<compile_context>
chip_gen: v6e
topology: v6e:2x2x1
jax: 0.10.0
libtpu: 0.0.40
codegen_flags: <defaults>
</compile_context>

<pallas_src>
import functools

import jax
import jax.numpy as jnp
from jax import lax
from jax.experimental import pallas as pl
from jax.experimental.pallas import tpu as pltpu


def _tensorcores_per_chip():
    """Best-effort TensorCores-per-device (v7x -> 2, v5e/v6e -> 1)."""
    try:
        dev = jax.devices()[0]
        if dev.platform != "tpu":
            return 1
        kind = str(getattr(dev, "device_kind", "")).lower()
        return 2 if ("v7" in kind or "7x" in kind) else 1
    except Exception:
        return 1


def convlstm_seq_kernel(xconv_ref, wh_ref, hc0_ref, out_ref, hp_scr, c_scr,
                        *, Bb, H, W, Ch):
    """One (batch-block, timestep) grid point of the fused ConvLSTM recurrence.

    xconv_ref : (1, Mb, 4*Ch) f32   x-part of the gate pre-activations (+bias), step t
    wh_ref    : (9, Ch, 4*Ch) bf16  hidden->gate conv taps, (ky, kx) major (resident)
    hc0_ref   : (Mb, 2*Ch)    f32   packed initial state [h0 | c0] (resident)
    out_ref   : (Mb, 2*Ch)    f32   packed final state   [hT | cT]
    hp_scr    : (Bb, H+2, W+2, Ch) f32  zero-padded hidden state (lives across steps)
    c_scr     : (Mb, Ch)      f32       cell state            (lives across steps)
    """
    t = pl.program_id(1)
    Mb = Bb * H * W

    # ---- load the initial state once per batch block (time step 0).
    @pl.when(t == 0)
    def _init_state():
        hp_scr[...] = jnp.zeros_like(hp_scr)          # zero halo stays zero forever
        hp_scr[:, 1:H + 1, 1:W + 1, :] = hc0_ref[:, :Ch].reshape(Bb, H, W, Ch)
        c_scr[...] = hc0_ref[:, Ch:]

    # ---- 3x3 "same" conv over the hidden state: 9 accumulating MXU matmuls on
    # (dy, dx) windows of the padded, VMEM-resident h.  Operands cast to bf16
    # for the MXU; accumulation stays f32 (starts from the streamed x-part).
    acc = xconv_ref[0]
    for tap in range(9):
        dy, dx = tap // 3, tap % 3
        h_tap = hp_scr[:, dy:dy + H, dx:dx + W, :].reshape(Mb, Ch)
        acc = acc + jnp.dot(h_tap.astype(jnp.bfloat16), wh_ref[tap],
                            preferred_element_type=jnp.float32)

    # ---- LSTM gates, lane-dense over the full 4*Ch block.
    # Gate order (i, f, o, g): i/f/o sigmoid, g tanh.  One tanh pass, with
    # sigmoid(x) = 0.5*(tanh(x/2)+1), selected by a (1, 4*Ch) row iota.
    is_sig = lax.broadcasted_iota(jnp.int32, (1, 4 * Ch), 1) < 3 * Ch
    th = jnp.tanh(jnp.where(is_sig, 0.5 * acc, acc))
    act = jnp.where(is_sig, 0.5 * (th + 1.0), th)

    i = act[:, 0 * Ch:1 * Ch]
    f = act[:, 1 * Ch:2 * Ch]
    o = act[:, 2 * Ch:3 * Ch]
    g = act[:, 3 * Ch:4 * Ch]

    c_next = f * c_scr[...] + i * g
    h_next = o * jnp.tanh(c_next)

    # ---- carry the state in VMEM (h back into the padded scratch interior).
    c_scr[...] = c_next
    hp_scr[:, 1:H + 1, 1:W + 1, :] = h_next.reshape(Bb, H, W, Ch)

    # ---- emit the final state once, with two direct slice stores (no lane concat).
    @pl.when(t == pl.num_programs(1) - 1)
    def _emit():
        out_ref[:, :Ch] = h_next.astype(out_ref.dtype)
        out_ref[:, Ch:] = c_next.astype(out_ref.dtype)


@functools.partial(jax.jit, static_argnames=("split_batch",))
def convlstm_encoder_forward_seq(x_seq_nchw, h0_nchw, c0_nchw, weight_oihw,
                                 bias, *, split_batch=None):
    """Apply the ConvLSTM cell over a (T, B, Cin, H, W) sequence in one fused
    pallas_call.  Returns the final (h, c), both NCHW — identical to calling
    ConvLSTMEncoder.forward T times."""
    T, B, Cin, H, W = x_seq_nchw.shape
    Ch = h0_nchw.shape[1]
    HW = H * W
    M = B * HW

    # ---- x-dependent half of the conv: no recurrence -> ONE XLA conv for all
    # timesteps (bias folded in), laid out as lane-dense (T, M, 4*Ch) rows that
    # the kernel streams one step at a time.
    wx = weight_oihw[:, :Cin]                                      # (4Ch, Cin, 3, 3)
    xconv = lax.conv_general_dilated(
        x_seq_nchw.reshape(T * B, Cin, H, W), wx, (1, 1), "SAME",
        dimension_numbers=("NCHW", "OIHW", "NCHW"))
    xconv = xconv + bias[None, :, None, None]
    xconv = jnp.transpose(xconv, (0, 2, 3, 1)).reshape(T, M, 4 * Ch)
    xconv = xconv.astype(jnp.float32)

    # ---- hidden->gate conv weights: (ky, kx) tap major, bf16 MXU operands.
    wh = jnp.transpose(weight_oihw[:, Cin:], (2, 3, 1, 0))          # (3,3,Ch,4Ch)
    wh = wh.reshape(9, Ch, 4 * Ch).astype(jnp.bfloat16)

    # ---- packed initial state (M, 2*Ch): NCHW -> flat NHWC rows, once per call.
    h0 = jnp.transpose(h0_nchw, (0, 2, 3, 1)).reshape(M, Ch)
    c0 = jnp.transpose(c0_nchw, (0, 2, 3, 1)).reshape(M, Ch)
    hc0 = jnp.concatenate([h0, c0], axis=-1).astype(jnp.float32)

    # ---- grid: (batch blocks) x (time).  Batch blocks are independent
    # recurrences ("parallel", feeds both v7x TensorCores); time is the
    # sequential recurrence ("arbitrary", innermost).  Single batch block on
    # 1-TC v5e/v6e to avoid paying extra grid-step overhead.
    if split_batch is None:
        split_batch = _tensorcores_per_chip() > 1 and B % 2 == 0
    nb = 2 if (split_batch and B % 2 == 0) else 1
    # TODO(synk): for B == 1 on multi-TensorCore chips, split H with a halo
    # exchange instead of the batch axis.
    Bb = B // nb
    Mb = Bb * HW

    kernel = functools.partial(convlstm_seq_kernel, Bb=Bb, H=H, W=W, Ch=Ch)

    packed = pl.pallas_call(
        kernel,
        out_shape=jax.ShapeDtypeStruct((M, 2 * Ch), jnp.float32),
        grid_spec=pltpu.PrefetchScalarGridSpec(
            num_scalar_prefetch=0,
            grid=(nb, T),
            in_specs=[
                pl.BlockSpec((1, Mb, 4 * Ch), lambda b, t: (t, b, 0)),   # streamed per step
                pl.BlockSpec((9, Ch, 4 * Ch), lambda b, t: (0, 0, 0)),   # resident weights
                pl.BlockSpec((Mb, 2 * Ch), lambda b, t: (b, 0)),         # resident init state
            ],
            out_specs=pl.BlockSpec((Mb, 2 * Ch), lambda b, t: (b, 0)),
            scratch_shapes=[
                pltpu.VMEM((Bb, H + 2, W + 2, Ch), jnp.float32),  # padded h, resident
                pltpu.VMEM((Mb, Ch), jnp.float32),                # c, resident
            ],
        ),
        compiler_params=pltpu.CompilerParams(
            dimension_semantics=("parallel", "arbitrary"),
            vmem_limit_bytes=32 * 1024 * 1024),
    )(xconv, wh, hc0)

    h = packed[:, :Ch].reshape(B, H, W, Ch)
    c = packed[:, Ch:].reshape(B, H, W, Ch)
    # Back to NCHW to match the PyTorch module.
    return (jnp.transpose(h, (0, 3, 1, 2)),
            jnp.transpose(c, (0, 3, 1, 2)))


def convlstm_encoder_forward(x_nchw, h_nchw, c_nchw, weight_oihw, bias,
                             *, split_batch=None):
    """ConvLSTMEncoder.forward(X, h, c) -> (h_next, c_next), all NCHW (T == 1)."""
    return convlstm_encoder_forward_seq(x_nchw[None], h_nchw, c_nchw,
                                        weight_oihw, bias,
                                        split_batch=split_batch)


def convlstm_cell_reference(x, h, c, weight_oihw, bias):
    """Pure-JAX NCHW reference mirroring the PyTorch ConvLSTMCell (f32)."""
    comb = jnp.concatenate([x, h], axis=1)
    out = lax.conv_general_dilated(
        comb, weight_oihw, window_strides=(1, 1), padding="SAME",
        dimension_numbers=("NCHW", "OIHW", "NCHW"))
    out = out + bias[None, :, None, None]
    cc_i, cc_f, cc_o, cc_g = jnp.split(out, 4, axis=1)
    i = jax.nn.sigmoid(cc_i)
    f = jax.nn.sigmoid(cc_f)
    o = jax.nn.sigmoid(cc_o)
    g = jnp.tanh(cc_g)
    c_next = f * c + i * g
    h_next = o * jnp.tanh(c_next)
    return h_next, c_next


if __name__ == "__main__":
    # Shapes implied by the module config:
    #   IMAGE_ENCODER.{H, W} = 16, INPUT_SIZE = 4, HIDDEN_SIZE = 32, BIAS = True
    B, Cin, H, W, Ch, T = 2, 4, 16, 16, 32, 8

    key = jax.random.PRNGKey(0)
    kx, kh, kc, kw, kb = jax.random.split(key, 5)

    x_seq = jax.random.normal(kx, (T, B, Cin, H, W), jnp.float32)
    h0 = jax.random.normal(kh, (B, Ch, H, W), jnp.float32)
    c0 = jax.random.normal(kc, (B, Ch, H, W), jnp.float32)

    # Synthetic Conv2d(Cin+Ch -> 4*Ch, 3x3, bias) parameters (Xavier-ish scale).
    weight = 0.05 * jax.random.normal(kw, (4 * Ch, Cin + Ch, 3, 3), jnp.float32)
    bias = 0.05 * jax.random.normal(kb, (4 * Ch,), jnp.float32)

    # --- single-step forward: exactly the module's forward(X, h, c) -> (h, c) ---
    h1, c1 = jax.block_until_ready(
        convlstm_encoder_forward(x_seq[0], h0, c0, weight, bias))
    h1_ref, c1_ref = convlstm_cell_reference(x_seq[0], h0, c0, weight, bias)
    assert h1.shape == (B, Ch, H, W) and c1.shape == (B, Ch, H, W)
    # bf16 conv operands (per perf review) -> ~1e-2-scale deviation vs the f32 reference.
    assert jnp.allclose(h1, h1_ref, atol=2e-2, rtol=2e-2)
    assert jnp.allclose(c1, c1_ref, atol=2e-2, rtol=2e-2)

    # --- fused recurrence over T steps: one pallas_call, h/c stay in VMEM ---
    hT, cT = jax.block_until_ready(
        convlstm_encoder_forward_seq(x_seq, h0, c0, weight, bias))
    h_ref, c_ref = h0, c0
    for t in range(T):
        h_ref, c_ref = convlstm_cell_reference(x_seq[t], h_ref, c_ref, weight, bias)
    # bf16 deviation accumulates over T recurrent steps.
    assert jnp.allclose(hT, h_ref, atol=5e-2, rtol=5e-2)
    assert jnp.allclose(cT, c_ref, atol=5e-2, rtol=5e-2)

    print("KERNEL_OK")
</pallas_src>

<mosaic_0001>
module attributes {stable_mosaic.version = 11 : i64} {
  func.func @convlstm_seq_kernel(%arg0: i32, %arg1: i32, %arg2: memref<1x512x128xf32, #tpu.memory_space<vmem>>, %arg3: memref<9x32x128xbf16, #tpu.memory_space<vmem>>, %arg4: memref<512x64xf32, #tpu.memory_space<vmem>>, %arg5: memref<512x64xf32, #tpu.memory_space<vmem>>, %arg6: memref<2x18x18x32xf32, #tpu.memory_space<vmem>>, %arg7: memref<512x32xf32, #tpu.memory_space<vmem>>) attributes {dimension_semantics = [#tpu.dimension_semantics<parallel>, #tpu.dimension_semantics<arbitrary>], iteration_bounds = array<i64: 1, 1>, scalar_prefetch = 0 : i64, scratch_operands = 2 : i64, tpu.core_type = #tpu.core_type<tc>, window_params = [{transform_indices = @transform_0, window_bounds = array<i64: 1, 512, 128>}, {pipeline_mode = #tpu.pipeline_mode<synchronous>, transform_indices = @transform_1, window_bounds = array<i64: 9, 32, 128>}, {transform_indices = @transform_2, window_bounds = array<i64: 512, 64>}, {transform_indices = @transform_3, window_bounds = array<i64: 512, 64>}]} {
    %c0_i32 = arith.constant 0 : i32
    %0 = arith.cmpi eq, %arg1, %c0_i32 : i32
    %1 = arith.extui %0 : i1 to i32
    %c0_i32_0 = arith.constant 0 : i32
    %2 = arith.cmpi ne, %1, %c0_i32_0 : i32
    scf.if %2 {
      %cst_79 = arith.constant 0.000000e+00 : f32
      %100 = vector.broadcast %cst_79 : f32 to vector<2x18x18x32xf32>
      %c0_80 = arith.constant 0 : index
      %c0_81 = arith.constant 0 : index
      %c0_82 = arith.constant 0 : index
      %c0_83 = arith.constant 0 : index
      %101 = vector.load %arg6[%c0_80, %c0_81, %c0_82, %c0_83] : memref<2x18x18x32xf32, #tpu.memory_space<vmem>>, vector<2x18x18x32xf32>
      tpu.vector_store %arg6[%c0_80, %c0_81, %c0_82, %c0_83], %100 {strides = array<i32>} : memref<2x18x18x32xf32, #tpu.memory_space<vmem>>, vector<2x18x18x32xf32>,
      %c0_84 = arith.constant 0 : index
      %c0_85 = arith.constant 0 : index
      %102 = vector.load %arg4[%c0_84, %c0_85] : memref<512x64xf32, #tpu.memory_space<vmem>>, vector<512x32xf32>
      %103 = vector.shape_cast %102 : vector<512x32xf32> to vector<2x16x16x32xf32>
      %c0_86 = arith.constant 0 : index
      %c1_87 = arith.constant 1 : index
      %c1_88 = arith.constant 1 : index
      %c0_89 = arith.constant 0 : index
      %104 = vector.load %arg6[%c0_86, %c1_87, %c1_88, %c0_89] : memref<2x18x18x32xf32, #tpu.memory_space<vmem>>, vector<2x16x16x32xf32>
      tpu.vector_store %arg6[%c0_86, %c1_87, %c1_88, %c0_89], %103 {strides = array<i32>} : memref<2x18x18x32xf32, #tpu.memory_space<vmem>>, vector<2x16x16x32xf32>,
      %c0_90 = arith.constant 0 : index
      %c32 = arith.constant 32 : index
      %105 = vector.load %arg4[%c0_90, %c32] : memref<512x64xf32, #tpu.memory_space<vmem>>, vector<512x32xf32>
      %c0_91 = arith.constant 0 : index
      %c0_92 = arith.constant 0 : index
      %106 = vector.load %arg7[%c0_91, %c0_92] : memref<512x32xf32, #tpu.memory_space<vmem>>, vector<512x32xf32>
      tpu.vector_store %arg7[%c0_91, %c0_92], %105 {strides = array<i32>} : memref<512x32xf32, #tpu.memory_space<vmem>>, vector<512x32xf32>,
    } else {
    }
    %c0 = arith.constant 0 : index
    %c0_1 = arith.constant 0 : index
    %c0_2 = arith.constant 0 : index
    %3 = vector.load %arg2[%c0, %c0_1, %c0_2] : memref<1x512x128xf32, #tpu.memory_space<vmem>>, vector<1x512x128xf32>
    %4 = vector.shape_cast %3 : vector<1x512x128xf32> to vector<512x128xf32>
    %c0_3 = arith.constant 0 : index
    %c0_4 = arith.constant 0 : index
    %c0_5 = arith.constant 0 : index
    %c0_6 = arith.constant 0 : index
    %5 = vector.load %arg6[%c0_3, %c0_4, %c0_5, %c0_6] : memref<2x18x18x32xf32, #tpu.memory_space<vmem>>, vector<2x16x16x32xf32>
    %6 = vector.shape_cast %5 : vector<2x16x16x32xf32> to vector<512x32xf32>
    %7 = arith.truncf %6 : vector<512x32xf32> to vector<512x32xbf16>
    %c0_7 = arith.constant 0 : index
    %c0_8 = arith.constant 0 : index
    %c0_9 = arith.constant 0 : index
    %8 = vector.load %arg3[%c0_7, %c0_8, %c0_9] : memref<9x32x128xbf16, #tpu.memory_space<vmem>>, vector<1x32x128xbf16>
    %9 = vector.shape_cast %8 : vector<1x32x128xbf16> to vector<32x128xbf16>
    %cst = arith.constant dense<0.000000e+00> : vector<512x128xf32>
    %10 = tpu.matmul %7, %9, %cst {dimension_numbers = #tpu.dot_dimension_numbers<[1], [0], [0], [1], [0, 0, 1, 1], [], []>} : vector<512x32xbf16>, vector<32x128xbf16>, vector<512x128xf32> -> vector<512x128xf32>
    %11 = arith.addf %4, %10 : vector<512x128xf32>
    %c0_10 = arith.constant 0 : index
    %c0_11 = arith.constant 0 : index
    %c1 = arith.constant 1 : index
    %c0_12 = arith.constant 0 : index
    %12 = vector.load %arg6[%c0_10, %c0_11, %c1, %c0_12] : memref<2x18x18x32xf32, #tpu.memory_space<vmem>>, vector<2x16x16x32xf32>
    %13 = vector.shape_cast %12 : vector<2x16x16x32xf32> to vector<512x32xf32>
    %14 = arith.truncf %13 : vector<512x32xf32> to vector<512x32xbf16>
    %c1_13 = arith.constant 1 : index
    %c0_14 = arith.constant 0 : index
    %c0_15 = arith.constant 0 : index
    %15 = vector.load %arg3[%c1_13, %c0_14, %c0_15] : memref<9x32x128xbf16, #tpu.memory_space<vmem>>, vector<1x32x128xbf16>
    %16 = vector.shape_cast %15 : vector<1x32x128xbf16> to vector<32x128xbf16>
    %cst_16 = arith.constant dense<0.000000e+00> : vector<512x128xf32>
    %17 = tpu.matmul %14, %16, %cst_16 {dimension_numbers = #tpu.dot_dimension_numbers<[1], [0], [0], [1], [0, 0, 1, 1], [], []>} : vector<512x32xbf16>, vector<32x128xbf16>, vector<512x128xf32> -> vector<512x128xf32>
    %18 = arith.addf %11, %17 : vector<512x128xf32>
    %c0_17 = arith.constant 0 : index
    %c0_18 = arith.constant 0 : index
    %c2 = arith.constant 2 : index
    %c0_19 = arith.constant 0 : index
    %19 = vector.load %arg6[%c0_17, %c0_18, %c2, %c0_19] : memref<2x18x18x32xf32, #tpu.memory_space<vmem>>, vector<2x16x16x32xf32>
    %20 = vector.shape_cast %19 : vector<2x16x16x32xf32> to vector<512x32xf32>
    %21 = arith.truncf %20 : vector<512x32xf32> to vector<512x32xbf16>
    %c2_20 = arith.constant 2 : index
    %c0_21 = arith.constant 0 : index
    %c0_22 = arith.constant 0 : index
    %22 = vector.load %arg3[%c2_20, %c0_21, %c0_22] : memref<9x32x128xbf16, #tpu.memory_space<vmem>>, vector<1x32x128xbf16>
    %23 = vector.shape_cast %22 : vector<1x32x128xbf16> to vector<32x128xbf16>
    %cst_23 = arith.constant dense<0.000000e+00> : vector<512x128xf32>
    %24 = tpu.matmul %21, %23, %cst_23 {dimension_numbers = #tpu.dot_dimension_numbers<[1], [0], [0], [1], [0, 0, 1, 1], [], []>} : vector<512x32xbf16>, vector<32x128xbf16>, vector<512x128xf32> -> vector<512x128xf32>
    %25 = arith.addf %18, %24 : vector<512x128xf32>
    %c0_24 = arith.constant 0 : index
    %c1_25 = arith.constant 1 : index
    %c0_26 = arith.constant 0 : index
    %c0_27 = arith.constant 0 : index
    %26 = vector.load %arg6[%c0_24, %c1_25, %c0_26, %c0_27] : memref<2x18x18x32xf32, #tpu.memory_space<vmem>>, vector<2x16x16x32xf32>
    %27 = vector.shape_cast %26 : vector<2x16x16x32xf32> to vector<512x32xf32>
    %28 = arith.truncf %27 : vector<512x32xf32> to vector<512x32xbf16>
    %c3 = arith.constant 3 : index
    %c0_28 = arith.constant 0 : index
    %c0_29 = arith.constant 0 : index
    %29 = vector.load %arg3[%c3, %c0_28, %c0_29] : memref<9x32x128xbf16, #tpu.memory_space<vmem>>, vector<1x32x128xbf16>
    %30 = vector.shape_cast %29 : vector<1x32x128xbf16> to vector<32x128xbf16>
    %cst_30 = arith.constant dense<0.000000e+00> : vector<512x128xf32>
    %31 = tpu.matmul %28, %30, %cst_30 {dimension_numbers = #tpu.dot_dimension_numbers<[1], [0], [0], [1], [0, 0, 1, 1], [], []>} : vector<512x32xbf16>, vector<32x128xbf16>, vector<512x128xf32> -> vector<512x128xf32>
    %32 = arith.addf %25, %31 : vector<512x128xf32>
    %c0_31 = arith.constant 0 : index
    %c1_32 = arith.constant 1 : index
    %c1_33 = arith.constant 1 : index
    %c0_34 = arith.constant 0 : index
    %33 = vector.load %arg6[%c0_31, %c1_32, %c1_33, %c0_34] : memref<2x18x18x32xf32, #tpu.memory_space<vmem>>, vector<2x16x16x32xf32>
    %34 = vector.shape_cast %33 : vector<2x16x16x32xf32> to vector<512x32xf32>
    %35 = arith.truncf %34 : vector<512x32xf32> to vector<512x32xbf16>
    %c4 = arith.constant 4 : index
    %c0_35 = arith.constant 0 : index
    %c0_36 = arith.constant 0 : index
    %36 = vector.load %arg3[%c4, %c0_35, %c0_36] : memref<9x32x128xbf16, #tpu.memory_space<vmem>>, vector<1x32x128xbf16>
    %37 = vector.shape_cast %36 : vector<1x32x128xbf16> to vector<32x128xbf16>
    %cst_37 = arith.constant dense<0.000000e+00> : vector<512x128xf32>
    %38 = tpu.matmul %35, %37, %cst_37 {dimension_numbers = #tpu.dot_dimension_numbers<[1], [0], [0], [1], [0, 0, 1, 1], [], []>} : vector<512x32xbf16>, vector<32x128xbf16>, vector<512x128xf32> -> vector<512x128xf32>
    %39 = arith.addf %32, %38 : vector<512x128xf32>
    %c0_38 = arith.constant 0 : index
    %c1_39 = arith.constant 1 : index
    %c2_40 = arith.constant 2 : index
    %c0_41 = arith.constant 0 : index
    %40 = vector.load %arg6[%c0_38, %c1_39, %c2_40, %c0_41] : memref<2x18x18x32xf32, #tpu.memory_space<vmem>>, vector<2x16x16x32xf32>
    %41 = vector.shape_cast %40 : vector<2x16x16x32xf32> to vector<512x32xf32>
    %42 = arith.truncf %41 : vector<512x32xf32> to vector<512x32xbf16>
    %c5 = arith.constant 5 : index
    %c0_42 = arith.constant 0 : index
    %c0_43 = arith.constant 0 : index
    %43 = vector.load %arg3[%c5, %c0_42, %c0_43] : memref<9x32x128xbf16, #tpu.memory_space<vmem>>, vector<1x32x128xbf16>
    %44 = vector.shape_cast %43 : vector<1x32x128xbf16> to vector<32x128xbf16>
    %cst_44 = arith.constant dense<0.000000e+00> : vector<512x128xf32>
    %45 = tpu.matmul %42, %44, %cst_44 {dimension_numbers = #tpu.dot_dimension_numbers<[1], [0], [0], [1], [0, 0, 1, 1], [], []>} : vector<512x32xbf16>, vector<32x128xbf16>, vector<512x128xf32> -> vector<512x128xf32>
    %46 = arith.addf %39, %45 : vector<512x128xf32>
    %c0_45 = arith.constant 0 : index
    %c2_46 = arith.constant 2 : index
    %c0_47 = arith.constant 0 : index
    %c0_48 = arith.constant 0 : index
    %47 = vector.load %arg6[%c0_45, %c2_46, %c0_47, %c0_48] : memref<2x18x18x32xf32, #tpu.memory_space<vmem>>, vector<2x16x16x32xf32>
    %48 = vector.shape_cast %47 : vector<2x16x16x32xf32> to vector<512x32xf32>
    %49 = arith.truncf %48 : vector<512x32xf32> to vector<512x32xbf16>
    %c6 = arith.constant 6 : index
    %c0_49 = arith.constant 0 : index
    %c0_50 = arith.constant 0 : index
    %50 = vector.load %arg3[%c6, %c0_49, %c0_50] : memref<9x32x128xbf16, #tpu.memory_space<vmem>>, vector<1x32x128xbf16>
    %51 = vector.shape_cast %50 : vector<1x32x128xbf16> to vector<32x128xbf16>
    %cst_51 = arith.constant dense<0.000000e+00> : vector<512x128xf32>
    %52 = tpu.matmul %49, %51, %cst_51 {dimension_numbers = #tpu.dot_dimension_numbers<[1], [0], [0], [1], [0, 0, 1, 1], [], []>} : vector<512x32xbf16>, vector<32x128xbf16>, vector<512x128xf32> -> vector<512x128xf32>
    %53 = arith.addf %46, %52 : vector<512x128xf32>
    %c0_52 = arith.constant 0 : index
    %c2_53 = arith.constant 2 : index
    %c1_54 = arith.constant 1 : index
    %c0_55 = arith.constant 0 : index
    %54 = vector.load %arg6[%c0_52, %c2_53, %c1_54, %c0_55] : memref<2x18x18x32xf32, #tpu.memory_space<vmem>>, vector<2x16x16x32xf32>
    %55 = vector.shape_cast %54 : vector<2x16x16x32xf32> to vector<512x32xf32>
    %56 = arith.truncf %55 : vector<512x32xf32> to vector<512x32xbf16>
    %c7 = arith.constant 7 : index
    %c0_56 = arith.constant 0 : index
    %c0_57 = arith.constant 0 : index
    %57 = vector.load %arg3[%c7, %c0_56, %c0_57] : memref<9x32x128xbf16, #tpu.memory_space<vmem>>, vector<1x32x128xbf16>
    %58 = vector.shape_cast %57 : vector<1x32x128xbf16> to vector<32x128xbf16>
    %cst_58 = arith.constant dense<0.000000e+00> : vector<512x128xf32>
    %59 = tpu.matmul %56, %58, %cst_58 {dimension_numbers = #tpu.dot_dimension_numbers<[1], [0], [0], [1], [0, 0, 1, 1], [], []>} : vector<512x32xbf16>, vector<32x128xbf16>, vector<512x128xf32> -> vector<512x128xf32>
    %60 = arith.addf %53, %59 : vector<512x128xf32>
    %c0_59 = arith.constant 0 : index
    %c2_60 = arith.constant 2 : index
    %c2_61 = arith.constant 2 : index
    %c0_62 = arith.constant 0 : index
    %61 = vector.load %arg6[%c0_59, %c2_60, %c2_61, %c0_62] : memref<2x18x18x32xf32, #tpu.memory_space<vmem>>, vector<2x16x16x32xf32>
    %62 = vector.shape_cast %61 : vector<2x16x16x32xf32> to vector<512x32xf32>
    %63 = arith.truncf %62 : vector<512x32xf32> to vector<512x32xbf16>
    %c8 = arith.constant 8 : index
    %c0_63 = arith.constant 0 : index
    %c0_64 = arith.constant 0 : index
    %64 = vector.load %arg3[%c8, %c0_63, %c0_64] : memref<9x32x128xbf16, #tpu.memory_space<vmem>>, vector<1x32x128xbf16>
    %65 = vector.shape_cast %64 : vector<1x32x128xbf16> to vector<32x128xbf16>
    %cst_65 = arith.constant dense<0.000000e+00> : vector<512x128xf32>
    %66 = tpu.matmul %63, %65, %cst_65 {dimension_numbers = #tpu.dot_dimension_numbers<[1], [0], [0], [1], [0, 0, 1, 1], [], []>} : vector<512x32xbf16>, vector<32x128xbf16>, vector<512x128xf32> -> vector<512x128xf32>
    %67 = arith.addf %60, %66 : vector<512x128xf32>
    %68 = tpu.iota {dimensions = array<i32: 1>} : vector<1x128xi32>
    %c96_i32 = arith.constant 96 : i32
    %69 = vector.broadcast %c96_i32 : i32 to vector<1x128xi32>
    %70 = arith.cmpi slt, %68, %69 : vector<1x128xi32>
    %cst_66 = arith.constant 5.000000e-01 : f32
    %71 = vector.broadcast %cst_66 : f32 to vector<512x128xf32>
    %72 = arith.mulf %71, %67 : vector<512x128xf32>
    %73 = vector.shape_cast %70 : vector<1x128xi1> to vector<1x128xi1>
    %74 = vector.broadcast %73 : vector<1x128xi1> to vector<512x128xi1>
    %75 = arith.select %74, %72, %67 : vector<512x128xi1>, vector<512x128xf32>
    %76 = math.tanh %75 : vector<512x128xf32>
    %cst_67 = arith.constant 1.000000e+00 : f32
    %77 = vector.broadcast %cst_67 : f32 to vector<512x128xf32>
    %78 = arith.addf %76, %77 : vector<512x128xf32>
    %cst_68 = arith.constant 5.000000e-01 : f32
    %79 = vector.broadcast %cst_68 : f32 to vector<512x128xf32>
    %80 = arith.mulf %79, %78 : vector<512x128xf32>
    %81 = vector.shape_cast %70 : vector<1x128xi1> to vector<1x128xi1>
    %82 = vector.broadcast %81 : vector<1x128xi1> to vector<512x128xi1>
    %83 = arith.select %82, %80, %76 : vector<512x128xi1>, vector<512x128xf32>
    %84 = vector.extract_strided_slice %83 {offsets = [0, 0], sizes = [512, 32], strides = [1, 1]} : vector<512x128xf32> to vector<512x32xf32>
    %85 = vector.extract_strided_slice %83 {offsets = [0, 32], sizes = [512, 32], strides = [1, 1]} : vector<512x128xf32> to vector<512x32xf32>
    %86 = vector.extract_strided_slice %83 {offsets = [0, 64], sizes = [512, 32], strides = [1, 1]} : vector<512x128xf32> to vector<512x32xf32>
    %87 = vector.extract_strided_slice %83 {offsets = [0, 96], sizes = [512, 32], strides = [1, 1]} : vector<512x128xf32> to vector<512x32xf32>
    %c0_69 = arith.constant 0 : index
    %c0_70 = arith.constant 0 : index
    %88 = vector.load %arg7[%c0_69, %c0_70] : memref<512x32xf32, #tpu.memory_space<vmem>>, vector<512x32xf32>
    %89 = arith.mulf %85, %88 : vector<512x32xf32>
    %90 = arith.mulf %84, %87 : vector<512x32xf32>
    %91 = arith.addf %89, %90 : vector<512x32xf32>
    %92 = math.tanh %91 : vector<512x32xf32>
    %93 = arith.mulf %86, %92 : vector<512x32xf32>
    %c0_71 = arith.constant 0 : index
    %c0_72 = arith.constant 0 : index
    %94 = vector.load %arg7[%c0_71, %c0_72] : memref<512x32xf32, #tpu.memory_space<vmem>>, vector<512x32xf32>
    tpu.vector_store %arg7[%c0_71, %c0_72], %91 {strides = array<i32>} : memref<512x32xf32, #tpu.memory_space<vmem>>, vector<512x32xf32>,
    %95 = vector.shape_cast %93 : vector<512x32xf32> to vector<2x16x16x32xf32>
    %c0_73 = arith.constant 0 : index
    %c1_74 = arith.constant 1 : index
    %c1_75 = arith.constant 1 : index
    %c0_76 = arith.constant 0 : index
    %96 = vector.load %arg6[%c0_73, %c1_74, %c1_75, %c0_76] : memref<2x18x18x32xf32, #tpu.memory_space<vmem>>, vector<2x16x16x32xf32>
    tpu.vector_store %arg6[%c0_73, %c1_74, %c1_75, %c0_76], %95 {strides = array<i32>} : memref<2x18x18x32xf32, #tpu.memory_space<vmem>>, vector<2x16x16x32xf32>,
    %c0_i32_77 = arith.constant 0 : i32
    %97 = arith.cmpi eq, %arg1, %c0_i32_77 : i32
    %98 = arith.extui %97 : i1 to i32
    %c0_i32_78 = arith.constant 0 : i32
    %99 = arith.cmpi ne, %98, %c0_i32_78 : i32
    scf.if %99 {
      %c0_79 = arith.constant 0 : index
      %c0_80 = arith.constant 0 : index
      %100 = vector.load %arg5[%c0_79, %c0_80] : memref<512x64xf32, #tpu.memory_space<vmem>>, vector<512x32xf32>
      tpu.vector_store %arg5[%c0_79, %c0_80], %93 {strides = array<i32>} : memref<512x64xf32, #tpu.memory_space<vmem>>, vector<512x32xf32>,
      %c0_81 = arith.constant 0 : index
      %c32 = arith.constant 32 : index
      %101 = vector.load %arg5[%c0_81, %c32] : memref<512x64xf32, #tpu.memory_space<vmem>>, vector<512x32xf32>
      tpu.vector_store %arg5[%c0_81, %c32], %91 {strides = array<i32>} : memref<512x64xf32, #tpu.memory_space<vmem>>, vector<512x32xf32>,
    } else {
    }
    return
  }
  func.func @transform_0(%arg0: i32, %arg1: i32) -> (i32, i32, i32) {
    %c0_i32 = arith.constant 0 : i32
    %c0_i32_0 = arith.constant 0 : i32
    return %arg1, %arg0, %c0_i32 : i32, i32, i32
  }
  func.func @transform_1(%arg0: i32, %arg1: i32) -> (i32, i32, i32) {
    %c0_i32 = arith.constant 0 : i32
    %c0_i32_0 = arith.constant 0 : i32
    %c0_i32_1 = arith.constant 0 : i32
    %c0_i32_2 = arith.constant 0 : i32
    return %c0_i32, %c0_i32_0, %c0_i32_1 : i32, i32, i32
  }
  func.func @transform_2(%arg0: i32, %arg1: i32) -> (i32, i32) {
    %c0_i32 = arith.constant 0 : i32
    %c0_i32_0 = arith.constant 0 : i32
    return %arg0, %c0_i32 : i32, i32
  }
  func.func @transform_3(%arg0: i32, %arg1: i32) -> (i32, i32) {
    %c0_i32 = arith.constant 0 : i32
    %c0_i32_0 = arith.constant 0 : i32
    return %arg0, %c0_i32 : i32, i32
  }
}

</mosaic_0001>

<bundles_post_ra>
// kernel: convlstm_encoder_forward_seq.1
= control target key start
LH: loop header
LB: loop body
LE: loop exit
PB: predicated region body
PF: predicated region fallthrough
CT: control target
= control target key end

     0   :  { %vm19_vm0 = vcmask 261120   ;;  %vm22_vm1 = vcmask 254976   ;;  %v9879_v1 = vmov 0.0   ;;  %s9880_s29 = smov 96   ;;  %vm8270_vm3 = vcmask 523520   ;;  %s14644_s1 = inlined_call_operand.vmem [shape: bf16[9,32,128], index: 1, kind: input, shape index: {}]   ;;  %s14645_s2 = inlined_call_operand.vmem [shape: f32[512,64], index: 2, kind: input, shape index: {}]   ;;  %s14646_s0 = inlined_call_operand.vmem [shape: f32[1,512,128], index: 0, kind: input, shape index: {}]   ;;  %s14647_s3 = inlined_call_operand.vmem [shape: f32[512,64], index: 3, kind: output, shape index: {}]  }
   0x1   :  { %v9906_v0 = vld [vmem:[%s14644_s1 + $0x8] sm:$0xff]   ;;  %20 = vst.msk [vmem:[#allocation2] sm:$0xff] %vm19_vm0, %v9879_v1  ;;  %21 = vst.msk [vmem:[#allocation2 + $0x8] sm:$0xff] %vm19_vm0, %v9879_v1  ;;  %v9604_v2 = vld [vmem:[%s14644_s1] sm:$0xff]  }
   0x2   :  { %24 = vst.msk [vmem:[#allocation2 + $0x18] sm:$0xff] %vm19_vm0, %v9879_v1  ;;  %25 = vst.msk [vmem:[#allocation2 + $0x20] sm:$0xff] %vm19_vm0, %v9879_v1  ;;  %8983 = vmatprep.subr.bf16.mxu0 %v9906_v0  ;;  %9595 = vmatprep.subr.bf16.mxu1 %v9906_v0  ;;  %v129_v3 = vld [vmem:[%s14645_s2] sm:$0xff]  ;;  %v130_v4 = vld [vmem:[%s14645_s2 + $0x8] sm:$0xff] }
   0x3   :  { %27 = vst.msk [vmem:[#allocation2 + $0x30] sm:$0xff] %vm19_vm0, %v9879_v1  ;;  %28 = vst.msk [vmem:[#allocation2 + $0x38] sm:$0xff] %vm19_vm0, %v9879_v1  ;;  %v161_v5 = vld [vmem:[%s14645_s2 + $0x100] sm:$0xff]  ;;  %8984 = vmatpush3.bf16.msra.mxu0 %v9906_v0  ;;  %9597 = vmatpush3.bf16.msra.mxu1 %v9906_v0  ;;  %v162_v6 = vld [vmem:[%s14645_s2 + $0x108] sm:$0xff] }
   0x4   :  { %30 = vst.msk [vmem:[#allocation2 + $0x48] sm:$0xff] %vm19_vm0, %v9879_v1  ;;  %31 = vst.msk [vmem:[#allocation2 + $0x50] sm:$0xff] %vm19_vm0, %v9879_v1  ;;  %8985 = vmatprep.subr.bf16.mxu0 %v9604_v2  ;;  %9596 = vmatprep.subr.bf16.mxu1 %v9604_v2  ;;  %v9605_v7 = vld [vmem:[%s14644_s1 + $0x18] sm:$0xff]   ;;  %v9606_v8 = vld [vmem:[%s14644_s1 + $0x28] sm:$0xff]  }
   0x5   :  { %33 = vst.msk [vmem:[#allocation2 + $0x60] sm:$0xff] %vm19_vm0, %v9879_v1  ;;  %34 = vst.msk [vmem:[#allocation2 + $0x68] sm:$0xff] %vm19_vm0, %v9879_v1  ;;  %v131_v9 = vld [vmem:[%s14645_s2 + $0x10] sm:$0xff]  ;;  %v132_v10 = vld [vmem:[%s14645_s2 + $0x18] sm:$0xff] }
   0x6   :  { %36 = vst.msk [vmem:[#allocation2 + $0x78] sm:$0xff] %vm19_vm0, %v9879_v1  ;;  %37 = vst.msk [vmem:[#allocation2 + $0x80] sm:$0xff] %vm19_vm0, %v9879_v1  ;;  %v163_v11 = vld [vmem:[%s14645_s2 + $0x110] sm:$0xff]  ;;  %v164_v12 = vld [vmem:[%s14645_s2 + $0x118] sm:$0xff] }
   0x7   :  { %39 = vst.msk [vmem:[#allocation2 + $0x90] sm:$0xff] %vm19_vm0, %v9879_v1  ;;  %40 = vst.msk [vmem:[#allocation2 + $0x98] sm:$0xff] %vm19_vm0, %v9879_v1  ;;  %v133_v13 = vld [vmem:[%s14645_s2 + $0x20] sm:$0xff]  ;;  %8986 = vmatpush3.bf16.msra.mxu0 %v9604_v2  ;;  %9598 = vmatpush3.bf16.msra.mxu1 %v9604_v2  ;;  %v134_v19 = vld [vmem:[%s14645_s2 + $0x28] sm:$0xff] }
   0x8   :  { %42 = vst.msk [vmem:[#allocation2 + $0xa8] sm:$0xff] %vm19_vm0, %v9879_v1  ;;  %43 = vst.msk [vmem:[#allocation2 + $0xb0] sm:$0xff] %vm19_vm0, %v9879_v1  ;;  %v706_v14 = vld [vmem:[#allocation2] sm:$0xff]  ;;  %v707_v15 = vld [vmem:[#allocation2 + $0x8] sm:$0xff]  ;;  %9051 = vmatprep.subr.bf16.mxu1 %v9605_v7  ;;  %9119 = vmatprep.subr.bf16.mxu0 %v9606_v8 }
   0x9   :  { %45 = vst.msk [vmem:[#allocation2 + $0xc0] sm:$0xff] %vm19_vm0, %v9879_v1  ;;  %46 = vst.msk [vmem:[#allocation2 + $0xc8] sm:$0xff] %vm19_vm0, %v9879_v1  ;;  %v770_v17 = vpack.c.bf16 %v707_v15, %v706_v14  ;;  %v165_v20 = vld [vmem:[%s14645_s2 + $0x120] sm:$0xff]  ;;  %v166_v22 = vld [vmem:[%s14645_s2 + $0x128] sm:$0xff] }
   0xa   :  { %48 = vst.msk [vmem:[#allocation2 + $0xd8] sm:$0xff] %vm19_vm0, %v9879_v1  ;;  %49 = vst.msk [vmem:[#allocation2 + $0xe0] sm:$0xff] %vm19_vm0, %v9879_v1  ;;  %v135_v23 = vld [vmem:[%s14645_s2 + $0x30] sm:$0xff]  ;;  %v136_v24 = vld [vmem:[%s14645_s2 + $0x38] sm:$0xff] }
   0xb   :  { %51 = vst.msk [vmem:[#allocation2 + $0xf0] sm:$0xff] %vm19_vm0, %v9879_v1  ;;  %52 = vst.msk [vmem:[#allocation2 + $0xf8] sm:$0xff] %vm19_vm0, %v9879_v1  ;;  %8987 = vmatprep.mubr.msk.bf16.mxu0 %vm19_vm0, %v770_v17  ;;  %v167_v30 = vld [vmem:[%s14645_s2 + $0x130] sm:$0xff]  ;;  %v168_v31 = vld [vmem:[%s14645_s2 + $0x138] sm:$0xff] }
   0xc   :  { %54 = vst.msk [vmem:[#allocation2 + $0x108] sm:$0xff] %vm19_vm0, %v9879_v1  ;;  %55 = vst.msk [vmem:[#allocation2 + $0x110] sm:$0xff] %vm19_vm0, %v9879_v1  ;;  %v137_v33 = vld [vmem:[%s14645_s2 + $0x40] sm:$0xff]  ;;  %v138_v34 = vld [vmem:[%s14645_s2 + $0x48] sm:$0xff] }
   0xd   :  { %57 = vst.msk [vmem:[#allocation2 + $0x120] sm:$0xff] %vm19_vm0, %v9879_v1  ;;  %58 = vst.msk [vmem:[#allocation2 + $0x128] sm:$0xff] %vm19_vm0, %v9879_v1  ;;  %v169_v35 = vld [vmem:[%s14645_s2 + $0x140] sm:$0xff]  ;;  %v170_v38 = vld [vmem:[%s14645_s2 + $0x148] sm:$0xff] }
   0xe   :  { %60 = vst.msk [vmem:[#allocation2 + $0x138] sm:$0xff] %vm19_vm0, %v9879_v1  ;;  %61 = vst.msk [vmem:[#allocation2 + $0x140] sm:$0xff] %vm19_vm0, %v9879_v1  ;;  %v139_v44 = vld [vmem:[%s14645_s2 + $0x50] sm:$0xff]  ;;  %v140_v45 = vld [vmem:[%s14645_s2 + $0x58] sm:$0xff] }
   0xf   :  { %63 = vst.msk [vmem:[#allocation2 + $0x150] sm:$0xff] %vm19_vm0, %v9879_v1  ;;  %64 = vst.msk [vmem:[#allocation2 + $0x158] sm:$0xff] %vm19_vm0, %v9879_v1  ;;  %v171_v46 = vld [vmem:[%s14645_s2 + $0x150] sm:$0xff]  ;;  %v172_v49 = vld [vmem:[%s14645_s2 + $0x158] sm:$0xff] }
  0x10   :  { %66 = vst.msk [vmem:[#allocation2 + $0x168] sm:$0xff] %vm19_vm0, %v9879_v1  ;;  %67 = vst.msk [vmem:[#allocation2 + $0x170] sm:$0xff] %vm19_vm0, %v9879_v1  ;;  %v141_v56 = vld [vmem:[%s14645_s2 + $0x60] sm:$0xff]  ;;  %v142_v57 = vld [vmem:[%s14645_s2 + $0x68] sm:$0xff] }
  0x11   :  { %69 = vst.msk [vmem:[#allocation2 + $0x180] sm:$0xff] %vm19_vm0, %v9879_v1  ;;  %70 = vst.msk [vmem:[#allocation2 + $0x188] sm:$0xff] %vm19_vm0, %v9879_v1  ;;  %v173_v58 = vld [vmem:[%s14645_s2 + $0x160] sm:$0xff]  ;;  %v174_v61 = vld [vmem:[%s14645_s2 + $0x168] sm:$0xff] }
  0x12   :  { %72 = vst.msk [vmem:[#allocation2 + $0x198] sm:$0xff] %vm19_vm0, %v9879_v1  ;;  %73 = vst.msk [vmem:[#allocation2 + $0x1a0] sm:$0xff] %vm19_vm0, %v9879_v1  ;;  %v178_v15 = vld [vmem:[%s14645_s2 + $0x188] sm:$0xff] }
  0x13   :  { %75 = vst.msk [vmem:[#allocation2 + $0x1b0] sm:$0xff] %vm19_vm0, %v9879_v1  ;;  %76 = vst.msk [vmem:[#allocation2 + $0x1b8] sm:$0xff] %vm19_vm0, %v9879_v1 }
  0x14   :  { %78 = vst.msk [vmem:[#allocation2 + $0x1c8] sm:$0xff] %vm19_vm0, %v9879_v1  ;;  %79 = vst.msk [vmem:[#allocation2 + $0x1d0] sm:$0xff] %vm19_vm0, %v9879_v1 }
  0x15   :  { %81 = vst.msk [vmem:[#allocation2 + $0x1e0] sm:$0xff] %vm19_vm0, %v9879_v1  ;;  %82 = vst.msk [vmem:[#allocation2 + $0x1e8] sm:$0xff] %vm19_vm0, %v9879_v1 }
  0x16   :  { %84 = vst.msk [vmem:[#allocation2 + $0x1f8] sm:$0xff] %vm19_vm0, %v9879_v1  ;;  %85 = vst.msk [vmem:[#allocation2 + $0x200] sm:$0xff] %vm19_vm0, %v9879_v1 }
  0x17   :  { %87 = vst.msk [vmem:[#allocation2 + $0x210] sm:$0xff] %vm19_vm0, %v9879_v1  ;;  %88 = vst.msk [vmem:[#allocation2 + $0x218] sm:$0xff] %vm19_vm0, %v9879_v1 }
  0x18   :  { %90 = vst.msk [vmem:[#allocation2 + $0x228] sm:$0xff] %vm19_vm0, %v9879_v1  ;;  %91 = vst.msk [vmem:[#allocation2 + $0x230] sm:$0xff] %vm19_vm0, %v9879_v1 }
  0x19   :  { %93 = vst.msk [vmem:[#allocation2 + $0x240] sm:$0xff] %vm19_vm0, %v9879_v1  ;;  %94 = vst.msk [vmem:[#allocation2 + $0x248] sm:$0xff] %vm19_vm0, %v9879_v1 }
  0x1a   :  { %96 = vst.msk [vmem:[#allocation2 + $0x258] sm:$0xff] %vm19_vm0, %v9879_v1  ;;  %97 = vst.msk [vmem:[#allocation2 + $0x260] sm:$0xff] %vm19_vm0, %v9879_v1  ;;  %v738_v16 = vld [vmem:[#allocation2 + $0x1b0] sm:$0xff]  ;;  %v739_v18 = vld [vmem:[#allocation2 + $0x1b8] sm:$0xff] }
  0x1b   :  { %99 = vst.msk [vmem:[#allocation2 + $0x270] sm:$0xff] %vm19_vm0, %v9879_v1  ;;  %100 = vst.msk [vmem:[#allocation2 + $0x278] sm:$0xff] %vm19_vm0, %v9879_v1  ;;  %v786_v21 = vpack.c.bf16 %v739_v18, %v738_v16 }
  0x1c   :  { %102 = vst.msk [vmem:[#allocation2 + $0x288] sm:$0xff] %vm19_vm0, %v9879_v1  ;;  %103 = vst.msk [vmem:[#allocation2 + $0x290] sm:$0xff] %vm19_vm0, %v9879_v1 }
  0x1d   :  { %105 = vst.msk [vmem:[#allocation2 + $0x2a0] sm:$0xff] %vm19_vm0, %v9879_v1  ;;  %106 = vst.msk [vmem:[#allocation2 + $0x2a8] sm:$0xff] %vm19_vm0, %v9879_v1  ;;  %9019 = vmatprep.mubr.msk.bf16.mxu1 %vm19_vm0, %v786_v21  ;;  %v9608_v21 = vld [vmem:[%s14644_s1 + $0x20] sm:$0xff]  }
  0x1e   :  { %108 = vst.msk [vmem:[#allocation2 + $0x2b8] sm:$0xff] %vm19_vm0, %v9879_v1  ;;  %109 = vst.msk [vmem:[#allocation2 + $0x2c0] sm:$0xff] %vm19_vm0, %v9879_v1 }
  0x1f   :  { %111 = vst.msk [vmem:[#allocation2 + $0x2d0] sm:$0xff] %vm19_vm0, %v9879_v1  ;;  %112 = vst.msk [vmem:[#allocation2 + $0x2d8] sm:$0xff] %vm19_vm0, %v9879_v1 }
  0x20   :  { %114 = vst.msk [vmem:[#allocation2 + $0x2e8] sm:$0xff] %vm19_vm0, %v9879_v1  ;;  %115 = vst.msk [vmem:[#allocation2 + $0x2f0] sm:$0xff] %vm19_vm0, %v9879_v1 }
  0x21   :  { %117 = vst.msk [vmem:[#allocation2 + $0x300] sm:$0xff] %vm19_vm0, %v9879_v1  ;;  %118 = vst.msk [vmem:[#allocation2 + $0x308] sm:$0xff] %vm19_vm0, %v9879_v1 }
  0x22   :  { %120 = vst.msk [vmem:[#allocation2 + $0x318] sm:$0xff] %vm19_vm0, %v9879_v1  ;;  %121 = vst.msk [vmem:[#allocation2 + $0x320] sm:$0xff] %vm19_vm0, %v9879_v1 }
  0x23   :  { %123 = vst.msk [vmem:[#allocation2 + $0x330] sm:$0xff] %vm19_vm0, %v9879_v1  ;;  %124 = vst.msk [vmem:[#allocation2 + $0x338] sm:$0xff] %vm19_vm0, %v9879_v1 }
  0x24   :  { %126 = vst.msk [vmem:[#allocation2 + $0x348] sm:$0xff] %vm19_vm0, %v9879_v1  ;;  %127 = vst.msk [vmem:[#allocation2 + $0x350] sm:$0xff] %vm19_vm0, %v9879_v1 }
  0x25   :  { %26 = vst.msk [vmem:[#allocation2 + $0x28] sm:$0x3] %vm22_vm1, %v9879_v1  ;;  %23 = vst.msk [vmem:[#allocation2 + $0x10] sm:$0x3] %vm22_vm1, %v9879_v1 }
  0x26   :  { %29 = vst.msk [vmem:[#allocation2 + $0x40] sm:$0x3] %vm22_vm1, %v9879_v1  ;;  %32 = vst.msk [vmem:[#allocation2 + $0x58] sm:$0x3] %vm22_vm1, %v9879_v1 }
  0x27   :  { %35 = vst.msk [vmem:[#allocation2 + $0x70] sm:$0x3] %vm22_vm1, %v9879_v1  ;;  %38 = vst.msk [vmem:[#allocation2 + $0x88] sm:$0x3] %vm22_vm1, %v9879_v1 }
  0x28   :  { %41 = vst.msk [vmem:[#allocation2 + $0xa0] sm:$0x3] %vm22_vm1, %v9879_v1  ;;  %44 = vst.msk [vmem:[#allocation2 + $0xb8] sm:$0x3] %vm22_vm1, %v9879_v1 }
  0x29   :  { %47 = vst.msk [vmem:[#allocation2 + $0xd0] sm:$0x3] %vm22_vm1, %v9879_v1  ;;  %50 = vst.msk [vmem:[#allocation2 + $0xe8] sm:$0x3] %vm22_vm1, %v9879_v1 }
  0x2a   :  { %53 = vst.msk [vmem:[#allocation2 + $0x100] sm:$0x3] %vm22_vm1, %v9879_v1  ;;  %56 = vst.msk [vmem:[#allocation2 + $0x118] sm:$0x3] %vm22_vm1, %v9879_v1 }
  0x2b   :  { %59 = vst.msk [vmem:[#allocation2 + $0x130] sm:$0x3] %vm22_vm1, %v9879_v1  ;;  %62 = vst.msk [vmem:[#allocation2 + $0x148] sm:$0x3] %vm22_vm1, %v9879_v1 }
  0x2c   :  { %65 = vst.msk [vmem:[#allocation2 + $0x160] sm:$0x3] %vm22_vm1, %v9879_v1  ;;  %68 = vst.msk [vmem:[#allocation2 + $0x178] sm:$0x3] %vm22_vm1, %v9879_v1 }
  0x2d   :  { %71 = vst.msk [vmem:[#allocation2 + $0x190] sm:$0x3] %vm22_vm1, %v9879_v1  ;;  %74 = vst.msk [vmem:[#allocation2 + $0x1a8] sm:$0x3] %vm22_vm1, %v9879_v1 }
  0x2e   :  { %77 = vst.msk [vmem:[#allocation2 + $0x1c0] sm:$0x3] %vm22_vm1, %v9879_v1  ;;  %80 = vst.msk [vmem:[#allocation2 + $0x1d8] sm:$0x3] %vm22_vm1, %v9879_v1 }
  0x2f   :  { %83 = vst.msk [vmem:[#allocation2 + $0x1f0] sm:$0x3] %vm22_vm1, %v9879_v1  ;;  %86 = vst.msk [vmem:[#allocation2 + $0x208] sm:$0x3] %vm22_vm1, %v9879_v1 }
  0x30   :  { %89 = vst.msk [vmem:[#allocation2 + $0x220] sm:$0x3] %vm22_vm1, %v9879_v1  ;;  %92 = vst.msk [vmem:[#allocation2 + $0x238] sm:$0x3] %vm22_vm1, %v9879_v1 }
  0x31   :  { %95 = vst.msk [vmem:[#allocation2 + $0x250] sm:$0x3] %vm22_vm1, %v9879_v1  ;;  %98 = vst.msk [vmem:[#allocation2 + $0x268] sm:$0x3] %vm22_vm1, %v9879_v1 }
  0x32   :  { %101 = vst.msk [vmem:[#allocation2 + $0x280] sm:$0x3] %vm22_vm1, %v9879_v1  ;;  %104 = vst.msk [vmem:[#allocation2 + $0x298] sm:$0x3] %vm22_vm1, %v9879_v1 }
  0x33   :  { %107 = vst.msk [vmem:[#allocation2 + $0x2b0] sm:$0x3] %vm22_vm1, %v9879_v1  ;;  %110 = vst.msk [vmem:[#allocation2 + $0x2c8] sm:$0x3] %vm22_vm1, %v9879_v1 }
  0x34   :  { %113 = vst.msk [vmem:[#allocation2 + $0x2e0] sm:$0x3] %vm22_vm1, %v9879_v1  ;;  %116 = vst.msk [vmem:[#allocation2 + $0x2f8] sm:$0x3] %vm22_vm1, %v9879_v1 }
  0x35   :  { %119 = vst.msk [vmem:[#allocation2 + $0x310] sm:$0x3] %vm22_vm1, %v9879_v1  ;;  %122 = vst.msk [vmem:[#allocation2 + $0x328] sm:$0x3] %vm22_vm1, %v9879_v1 }
  0x36   :  { %125 = vst.msk [vmem:[#allocation2 + $0x340] sm:$0x3] %vm22_vm1, %v9879_v1  ;;  %128 = vst.msk [vmem:[#allocation2 + $0x358] sm:$0x3] %vm22_vm1, %v9879_v1 }
  0x37   :  { %194 = vst.msk [vmem:[#allocation2 + $0x19] sm:$0xff] %vm19_vm0, %v129_v3  ;;  %195 = vst.msk [vmem:[#allocation2 + $0x21] sm:$0xff] %vm19_vm0, %v130_v4  ;;  %v143_v3 = vld [vmem:[%s14645_s2 + $0x70] sm:$0xff]  ;;  %v144_v4 = vld [vmem:[%s14645_s2 + $0x78] sm:$0xff] }
  0x38   :  { %226 = vst.msk [vmem:[#allocation2 + $0x1c9] sm:$0xff] %vm19_vm0, %v161_v5  ;;  %227 = vst.msk [vmem:[#allocation2 + $0x1d1] sm:$0xff] %vm19_vm0, %v162_v6  ;;  %v175_v5 = vld [vmem:[%s14645_s2 + $0x170] sm:$0xff]  ;;  %v176_v6 = vld [vmem:[%s14645_s2 + $0x178] sm:$0xff] }
  0x39   :  { %196 = vst.msk [vmem:[#allocation2 + $0x31] sm:$0xff] %vm19_vm0, %v131_v9  ;;  %197 = vst.msk [vmem:[#allocation2 + $0x39] sm:$0xff] %vm19_vm0, %v132_v10 }
  0x3a   :  { %228 = vst.msk [vmem:[#allocation2 + $0x1e1] sm:$0xff] %vm19_vm0, %v163_v11  ;;  %229 = vst.msk [vmem:[#allocation2 + $0x1e9] sm:$0xff] %vm19_vm0, %v164_v12  ;;  %v146_v12 = vld [vmem:[%s14645_s2 + $0x88] sm:$0xff] }
  0x3b   :  { %198 = vst.msk [vmem:[#allocation2 + $0x49] sm:$0xff] %vm19_vm0, %v133_v13  ;;  %199 = vst.msk [vmem:[#allocation2 + $0x51] sm:$0xff] %vm19_vm0, %v134_v19  ;;  %v177_v13 = vld [vmem:[%s14645_s2 + $0x180] sm:$0xff]  ;;  %v9607_v19 = vld [vmem:[%s14644_s1 + $0x10] sm:$0xff]  }
  0x3c   :  { %230 = vst.msk [vmem:[#allocation2 + $0x1f9] sm:$0xff] %vm19_vm0, %v165_v20  ;;  %231 = vst.msk [vmem:[#allocation2 + $0x201] sm:$0xff] %vm19_vm0, %v166_v22  ;;  %v147_v22 = vld [vmem:[%s14645_s2 + $0x90] sm:$0xff] }
  0x3d   :  { %200 = vst.msk [vmem:[#allocation2 + $0x61] sm:$0xff] %vm19_vm0, %v135_v23  ;;  %201 = vst.msk [vmem:[#allocation2 + $0x69] sm:$0xff] %vm19_vm0, %v136_v24 }
  0x3e   :  { %v708_v25 = vld [vmem:[#allocation2 + $0x18] sm:$0xff]  ;;  %v709_v26 = vld [vmem:[#allocation2 + $0x20] sm:$0xff]  ;;  %232 = vst.msk [vmem:[#allocation2 + $0x211] sm:$0xff] %vm19_vm0, %v167_v30  ;;  %233 = vst.msk [vmem:[#allocation2 + $0x219] sm:$0xff] %vm19_vm0, %v168_v31 }
  0x3f   :  { %v740_v27 = vld [vmem:[#allocation2 + $0x1c8] sm:$0xff]  ;;  %v771_v28 = vpack.c.bf16 %v709_v26, %v708_v25  ;;  %v741_v29 = vld [vmem:[#allocation2 + $0x1d0] sm:$0xff]  ;;  %202 = vst.msk [vmem:[#allocation2 + $0x79] sm:$0xff] %vm19_vm0, %v137_v33  ;;  %203 = vst.msk [vmem:[#allocation2 + $0x81] sm:$0xff] %vm19_vm0, %v138_v34 }
  0x40   :  { %v787_v32 = vpack.c.bf16 %v741_v29, %v740_v27  ;;  %v710_v36 = vld [vmem:[#allocation2 + $0x30] sm:$0xff]  ;;  %v711_v37 = vld [vmem:[#allocation2 + $0x38] sm:$0xff]  ;;  %234 = vst.msk [vmem:[#allocation2 + $0x229] sm:$0xff] %vm19_vm0, %v169_v35  ;;  %235 = vst.msk [vmem:[#allocation2 + $0x231] sm:$0xff] %vm19_vm0, %v170_v38 }
  0x41   :  { %8988 = vmatmul.mubr.msk.bf16.vlgmr.msra.gmra.mxu0 %vm19_vm0, %v771_v28  ;;  %v772_v39 = vpack.c.bf16 %v711_v37, %v710_v36  ;;  %v742_v40 = vld [vmem:[#allocation2 + $0x1e0] sm:$0xff]  ;;  %v743_v41 = vld [vmem:[#allocation2 + $0x1e8] sm:$0xff]  ;;  %204 = vst.msk [vmem:[#allocation2 + $0x91] sm:$0xff] %vm19_vm0, %v139_v44  ;;  %205 = vst.msk [vmem:[#allocation2 + $0x99] sm:$0xff] %vm19_vm0, %v140_v45 }
  0x42   :  { %9020 = vmatmul.mubr.msk.bf16.vlgmr.msra.gmra.mxu1 %vm19_vm0, %v787_v32  ;;  %9120 = vmatpush3.bf16.msra.mxu0 %v9606_v8  ;;  %v712_v42 = vld [vmem:[#allocation2 + $0x48] sm:$0xff]  ;;  %v788_v43 = vpack.c.bf16 %v743_v41, %v742_v40  ;;  %v713_v47 = vld [vmem:[#allocation2 + $0x50] sm:$0xff]  ;;  %236 = vst.msk [vmem:[#allocation2 + $0x241] sm:$0xff] %vm19_vm0, %v171_v46  ;;  %237 = vst.msk [vmem:[#allocation2 + $0x249] sm:$0xff] %vm19_vm0, %v172_v49 }
  0x43   :  { %9052 = vmatpush3.bf16.msra.mxu1 %v9605_v7  ;;  %8991 = vmatprep.mubr.msk.bf16.mxu0 %vm19_vm0, %v772_v39  ;;  %v744_v48 = vld [vmem:[#allocation2 + $0x1f8] sm:$0xff]  ;;  %v773_v50 = vpack.c.bf16 %v713_v47, %v712_v42  ;;  %v745_v51 = vld [vmem:[#allocation2 + $0x200] sm:$0xff]  ;;  %206 = vst.msk [vmem:[#allocation2 + $0xa9] sm:$0xff] %vm19_vm0, %v141_v56  ;;  %207 = vst.msk [vmem:[#allocation2 + $0xb1] sm:$0xff] %vm19_vm0, %v142_v57 }
  0x44   :  { %9023 = vmatprep.mubr.msk.bf16.mxu1 %vm19_vm0, %v788_v43  ;;  %v714_v52 = vld [vmem:[#allocation2 + $0x60] sm:$0xff]  ;;  %v715_v53 = vld [vmem:[#allocation2 + $0x68] sm:$0xff]  ;;  %v789_v54 = vpack.c.bf16 %v745_v51, %v744_v48  ;;  %238 = vst.msk [vmem:[#allocation2 + $0x259] sm:$0xff] %vm19_vm0, %v173_v58  ;;  %239 = vst.msk [vmem:[#allocation2 + $0x261] sm:$0xff] %vm19_vm0, %v174_v61  ;;  %9053 = vmatprep.subr.bf16.mxu1 %v9607_v19 }
  0x45   :  { %v774_v55 = vpack.c.bf16 %v715_v53, %v714_v52  ;;  %v746_v59 = vld [vmem:[#allocation2 + $0x210] sm:$0xff]  ;;  %v747_v60 = vld [vmem:[#allocation2 + $0x218] sm:$0xff]  ;;  %208 = vst.msk [vmem:[#allocation2 + $0xc1] sm:$0xff] %vm19_vm0, %v143_v3  ;;  %209 = vst.msk [vmem:[#allocation2 + $0xc9] sm:$0xff] %vm19_vm0, %v144_v4  ;;  %9121 = vmatprep.subr.bf16.mxu0 %v9608_v21 }
  0x46   :  { %v790_v62 = vpack.c.bf16 %v747_v60, %v746_v59  ;;  %v716_v63 = vld [vmem:[#allocation2 + $0x78] sm:$0xff]  ;;  %v717_v0 = vld [vmem:[#allocation2 + $0x80] sm:$0xff]  ;;  %240 = vst.msk [vmem:[#allocation2 + $0x271] sm:$0xff] %vm19_vm0, %v175_v5  ;;  %241 = vst.msk [vmem:[#allocation2 + $0x279] sm:$0xff] %vm19_vm0, %v176_v6  ;;  %9122 = vmatpush3.bf16.msra.mxu0 %v9608_v21 }
  0x47   :  { %v748_v1 = vld [vmem:[#allocation2 + $0x228] sm:$0xff]  ;;  %v749_v2 = vld [vmem:[#allocation2 + $0x230] sm:$0xff]  ;;  %v145_v7 = vld [vmem:[%s14645_s2 + $0x80] sm:$0xff]  ;;  %v775_v14 = vpack.c.bf16 %v717_v0, %v716_v63  ;;  %211 = vst.msk [vmem:[#allocation2 + $0xe1] sm:$0xff] %vm19_vm0, %v146_v12  ;;  %9054 = vmatpush3.bf16.msra.mxu1 %v9607_v19 }
  0x48   :  { %v718_v8 = vld [vmem:[#allocation2 + $0x90] sm:$0xff]  ;;  %v719_v9 = vld [vmem:[#allocation2 + $0x98] sm:$0xff]  ;;  %210 = vst.msk [vmem:[#allocation2 + $0xd9] sm:$0xff] %vm19_vm0, %v145_v7  ;;  %242 = vst.msk [vmem:[#allocation2 + $0x289] sm:$0xff] %vm19_vm0, %v177_v13  ;;  %v791_v16 = vpack.c.bf16 %v749_v2, %v748_v1 }
  0x49   :  { %8992 = vmatmul.mubr.msk.bf16.gmra.mxu0 %vm19_vm0, %v773_v50  ;;  %v750_v10 = vld [vmem:[#allocation2 + $0x240] sm:$0xff]  ;;  %v751_v11 = vld [vmem:[#allocation2 + $0x248] sm:$0xff]  ;;  %v776_v17 = vpack.c.bf16 %v719_v9, %v718_v8  ;;  %243 = vst.msk [vmem:[#allocation2 + $0x291] sm:$0xff] %vm19_vm0, %v178_v15  ;;  %v148_v25 = vld [vmem:[%s14645_s2 + $0x98] sm:$0xff] }
  0x4a   :  { %9024 = vmatmul.mubr.msk.bf16.gmra.mxu1 %vm19_vm0, %v789_v54  ;;  %8995 = vmatprep.mubr.msk.bf16.mxu0 %vm19_vm0, %v774_v55  ;;  %v792_v18 = vpack.c.bf16 %v751_v11, %v750_v10  ;;  %v720_v20 = vld [vmem:[#allocation2 + $0xa8] sm:$0xff]  ;;  %v721_v23 = vld [vmem:[#allocation2 + $0xb0] sm:$0xff]  ;;  %212 = vst.msk [vmem:[#allocation2 + $0xf1] sm:$0xff] %vm19_vm0, %v147_v22  ;;  %213 = vst.msk [vmem:[#allocation2 + $0xf9] sm:$0xff] %vm19_vm0, %v148_v25 }
  0x4b   :  { %9027 = vmatprep.mubr.msk.bf16.mxu1 %vm19_vm0, %v790_v62  ;;  %v752_v24 = vld [vmem:[#allocation2 + $0x258] sm:$0xff]  ;;  %v753_v26 = vld [vmem:[#allocation2 + $0x260] sm:$0xff]  ;;  %v179_v29 = vld [vmem:[%s14645_s2 + $0x190] sm:$0xff]  ;;  %v777_v35 = vpack.c.bf16 %v721_v23, %v720_v20 }
  0x4c   :  { %v722_v27 = vld [vmem:[#allocation2 + $0xc0] sm:$0xff]  ;;  %v723_v28 = vld [vmem:[#allocation2 + $0xc8] sm:$0xff]  ;;  %v180_v30 = vld [vmem:[%s14645_s2 + $0x198] sm:$0xff]  ;;  %244 = vst.msk [vmem:[#allocation2 + $0x2a1] sm:$0xff] %vm19_vm0, %v179_v29  ;;  %v793_v38 = vpack.c.bf16 %v753_v26, %v752_v24 }
  0x4d   :  { %v149_v31 = vld [vmem:[%s14645_s2 + $0xa0] sm:$0xff]  ;;  %v754_v32 = vld [vmem:[#allocation2 + $0x270] sm:$0xff]  ;;  %v755_v33 = vld [vmem:[#allocation2 + $0x278] sm:$0xff]  ;;  %245 = vst.msk [vmem:[#allocation2 + $0x2a9] sm:$0xff] %vm19_vm0, %v180_v30  ;;  %v778_v39 = vpack.c.bf16 %v723_v28, %v722_v27 }
  0x4e   :  { %v150_v34 = vld [vmem:[%s14645_s2 + $0xa8] sm:$0xff]  ;;  %214 = vst.msk [vmem:[#allocation2 + $0x109] sm:$0xff] %vm19_vm0, %v149_v31  ;;  %v181_v36 = vld [vmem:[%s14645_s2 + $0x1a0] sm:$0xff]  ;;  %v151_v40 = vld [vmem:[%s14645_s2 + $0xb0] sm:$0xff]  ;;  %v794_v43 = vpack.c.bf16 %v755_v33, %v754_v32 }
  0x4f   :  { %215 = vst.msk [vmem:[#allocation2 + $0x111] sm:$0xff] %vm19_vm0, %v150_v34  ;;  %v182_v37 = vld [vmem:[%s14645_s2 + $0x1a8] sm:$0xff]  ;;  %246 = vst.msk [vmem:[#allocation2 + $0x2b9] sm:$0xff] %vm19_vm0, %v181_v36  ;;  %v152_v41 = vld [vmem:[%s14645_s2 + $0xb8] sm:$0xff] }
  0x50   :  { %247 = vst.msk [vmem:[#allocation2 + $0x2c1] sm:$0xff] %vm19_vm0, %v182_v37  ;;  %v183_v42 = vld [vmem:[%s14645_s2 + $0x1b0] sm:$0xff]  ;;  %216 = vst.msk [vmem:[#allocation2 + $0x121] sm:$0xff] %vm19_vm0, %v151_v40  ;;  %v184_v44 = vld [vmem:[%s14645_s2 + $0x1b8] sm:$0xff] }
  0x51   :  { %8996 = vmatmul.mubr.msk.bf16.gmra.mxu0 %vm19_vm0, %v775_v14  ;;  %217 = vst.msk [vmem:[#allocation2 + $0x129] sm:$0xff] %vm19_vm0, %v152_v41  ;;  %248 = vst.msk [vmem:[#allocation2 + $0x2d1] sm:$0xff] %vm19_vm0, %v183_v42  ;;  %v153_v45 = vld [vmem:[%s14645_s2 + $0xc0] sm:$0xff]  ;;  %v154_v46 = vld [vmem:[%s14645_s2 + $0xc8] sm:$0xff] }
  0x52   :  { %9028 = vmatmul.mubr.msk.bf16.gmra.mxu1 %vm19_vm0, %v791_v16  ;;  %8999 = vmatprep.mubr.msk.bf16.mxu0 %vm19_vm0, %v776_v17  ;;  %v724_v47 = vld [vmem:[#allocation2 + $0xd8] sm:$0xff]  ;;  %v725_v48 = vld [vmem:[#allocation2 + $0xe0] sm:$0xff]  ;;  %249 = vst.msk [vmem:[#allocation2 + $0x2d9] sm:$0xff] %vm19_vm0, %v184_v44  ;;  %218 = vst.msk [vmem:[#allocation2 + $0x139] sm:$0xff] %vm19_vm0, %v153_v45 }
  0x53   :  { %9031 = vmatprep.mubr.msk.bf16.mxu1 %vm19_vm0, %v792_v18  ;;  %219 = vst.msk [vmem:[#allocation2 + $0x141] sm:$0xff] %vm19_vm0, %v154_v46  ;;  %v185_v49 = vld [vmem:[%s14645_s2 + $0x1c0] sm:$0xff]  ;;  %v186_v50 = vld [vmem:[%s14645_s2 + $0x1c8] sm:$0xff]  ;;  %v757_v52 = vld [vmem:[#allocation2 + $0x290] sm:$0xff]  ;;  %v779_v0 = vpack.c.bf16 %v725_v48, %v724_v47 }
  0x54   :  { %v756_v51 = vld [vmem:[#allocation2 + $0x288] sm:$0xff]  ;;  %250 = vst.msk [vmem:[#allocation2 + $0x2e9] sm:$0xff] %vm19_vm0, %v185_v49  ;;  %251 = vst.msk [vmem:[#allocation2 + $0x2f1] sm:$0xff] %vm19_vm0, %v186_v50  ;;  %v155_v53 = vld [vmem:[%s14645_s2 + $0xd0] sm:$0xff] }
  0x55   :  { %v156_v54 = vld [vmem:[%s14645_s2 + $0xd8] sm:$0xff]  ;;  %220 = vst.msk [vmem:[#allocation2 + $0x151] sm:$0xff] %vm19_vm0, %v155_v53  ;;  %v187_v55 = vld [vmem:[%s14645_s2 + $0x1d0] sm:$0xff]  ;;  %v157_v57 = vld [vmem:[%s14645_s2 + $0xe0] sm:$0xff]  ;;  %v795_v2 = vpack.c.bf16 %v757_v52, %v756_v51 }
  0x56   :  { %221 = vst.msk [vmem:[#allocation2 + $0x159] sm:$0xff] %vm19_vm0, %v156_v54  ;;  %v188_v56 = vld [vmem:[%s14645_s2 + $0x1d8] sm:$0xff]  ;;  %v726_v58 = vld [vmem:[#allocation2 + $0xf0] sm:$0xff]  ;;  %v758_v60 = vld [vmem:[#allocation2 + $0x2a0] sm:$0xff] }
  0x57   :  { %v727_v59 = vld [vmem:[#allocation2 + $0xf8] sm:$0xff]  ;;  %252 = vst.msk [vmem:[#allocation2 + $0x301] sm:$0xff] %vm19_vm0, %v187_v55  ;;  %253 = vst.msk [vmem:[#allocation2 + $0x309] sm:$0xff] %vm19_vm0, %v188_v56  ;;  %v759_v61 = vld [vmem:[#allocation2 + $0x2a8] sm:$0xff] }
  0x58   :  { %222 = vst.msk [vmem:[#allocation2 + $0x169] sm:$0xff] %vm19_vm0, %v157_v57  ;;  %v158_v62 = vld [vmem:[%s14645_s2 + $0xe8] sm:$0xff]  ;;  %v189_v63 = vld [vmem:[%s14645_s2 + $0x1e0] sm:$0xff]  ;;  %v780_v3 = vpack.c.bf16 %v727_v59, %v726_v58  ;;  %v796_v4 = vpack.c.bf16 %v759_v61, %v758_v60  ;;  %v729_v6 = vld [vmem:[#allocation2 + $0x110] sm:$0xff] }
  0x59   :  { %9000 = vmatmul.mubr.msk.bf16.gmra.mxu0 %vm19_vm0, %v777_v35  ;;  %223 = vst.msk [vmem:[#allocation2 + $0x171] sm:$0xff] %vm19_vm0, %v158_v62  ;;  %v190_v1 = vld [vmem:[%s14645_s2 + $0x1e8] sm:$0xff]  ;;  %254 = vst.msk [vmem:[#allocation2 + $0x319] sm:$0xff] %vm19_vm0, %v189_v63  ;;  %v760_v7 = vld [vmem:[#allocation2 + $0x2b8] sm:$0xff] }
  0x5a   :  { %9032 = vmatmul.mubr.msk.bf16.gmra.mxu1 %vm19_vm0, %v793_v38  ;;  %9003 = vmatprep.mubr.msk.bf16.mxu0 %vm19_vm0, %v778_v39  ;;  %255 = vst.msk [vmem:[#allocation2 + $0x321] sm:$0xff] %vm19_vm0, %v190_v1  ;;  %v728_v5 = vld [vmem:[#allocation2 + $0x108] sm:$0xff]  ;;  %v761_v8 = vld [vmem:[#allocation2 + $0x2c0] sm:$0xff]  ;;  %v762_v11 = vld [vmem:[#allocation2 + $0x2d0] sm:$0xff] }
  0x5b   :  { %9035 = vmatprep.mubr.msk.bf16.mxu1 %vm19_vm0, %v794_v43  ;;  %v730_v9 = vld [vmem:[#allocation2 + $0x120] sm:$0xff]  ;;  %v731_v10 = vld [vmem:[#allocation2 + $0x128] sm:$0xff]  ;;  %v763_v12 = vld [vmem:[#allocation2 + $0x2d8] sm:$0xff]  ;;  %v781_v13 = vpack.c.bf16 %v729_v6, %v728_v5  ;;  %v797_v14 = vpack.c.bf16 %v761_v8, %v760_v7 }
  0x5c   :  { %v782_v15 = vpack.c.bf16 %v731_v10, %v730_v9  ;;  %v9609_v16 = vld [vmem:[%s14644_s1 + $0x38] sm:$0xff]   ;;  %v798_v17 = vpack.c.bf16 %v763_v12, %v762_v11  ;;  %v9610_v18 = vld [vmem:[%s14644_s1 + $0x48] sm:$0xff]   ;;  %v733_v20 = vld [vmem:[#allocation2 + $0x140] sm:$0xff] }
  0x5d   :  { %9187 = vmatprep.subr.bf16.mxu1 %v9609_v16  ;;  %9255 = vmatprep.subr.bf16.mxu0 %v9610_v18  ;;  %v732_v19 = vld [vmem:[#allocation2 + $0x138] sm:$0xff]  ;;  %v764_v21 = vld [vmem:[#allocation2 + $0x2e8] sm:$0xff]  ;;  %v765_v22 = vld [vmem:[#allocation2 + $0x2f0] sm:$0xff] }
  0x5e   :  { %v734_v23 = vld [vmem:[#allocation2 + $0x150] sm:$0xff]  ;;  %v735_v24 = vld [vmem:[#allocation2 + $0x158] sm:$0xff]  ;;  %v766_v25 = vld [vmem:[#allocation2 + $0x300] sm:$0xff]  ;;  %v783_v27 = vpack.c.bf16 %v733_v20, %v732_v19  ;;  %v799_v28 = vpack.c.bf16 %v765_v22, %v764_v21 }
  0x5f   :  { %v767_v26 = vld [vmem:[#allocation2 + $0x308] sm:$0xff]  ;;  %v784_v29 = vpack.c.bf16 %v735_v24, %v734_v23  ;;  %v1832_v43 = vld [vmem:[#allocation2 + $0x1a] sm:$0xff]  ;;  %v1272_v47 = vld [vmem:[#allocation2 + $0x31] sm:$0xff] }
  0x60   :  { %v800_v30 = vpack.c.bf16 %v767_v26, %v766_v25  ;;  %v736_v31 = vld [vmem:[#allocation2 + $0x168] sm:$0xff]  ;;  %v737_v32 = vld [vmem:[#allocation2 + $0x170] sm:$0xff]  ;;  %v768_v34 = vld [vmem:[#allocation2 + $0x318] sm:$0xff] }
  0x61   :  { %9004 = vmatmul.mubr.msk.bf16.gmra.mxu0 %vm19_vm0, %v779_v0  ;;  %v1830_v33 = vld [vmem:[#allocation2 + $0x2] sm:$0xff]  ;;  %v1831_v36 = vld [vmem:[#allocation2 + $0xa] sm:$0xff]  ;;  %v785_v39 = vpack.c.bf16 %v737_v32, %v736_v31  ;;  %v1270_v45 = vld [vmem:[#allocation2 + $0x19] sm:$0xff] }
  0x62   :  { %9036 = vmatmul.mubr.msk.bf16.gmra.mxu1 %vm19_vm0, %v795_v2  ;;  %9007 = vmatprep.mubr.msk.bf16.mxu0 %vm19_vm0, %v780_v3  ;;  %v769_v35 = vld [vmem:[#allocation2 + $0x320] sm:$0xff]  ;;  %v1269_v38 = vld [vmem:[#allocation2 + $0x9] sm:$0xff]  ;;  %v1894_v41 = vpack.c.bf16 %v1831_v36, %v1830_v33  ;;  %v1834_v49 = vld [vmem:[#allocation2 + $0x32] sm:$0xff] }
  0x63   :  { %9039 = vmatprep.mubr.msk.bf16.mxu1 %vm19_vm0, %v796_v4  ;;  %v1268_v37 = vld [vmem:[#allocation2 + $0x1] sm:$0xff]  ;;  %v801_v40 = vpack.c.bf16 %v769_v35, %v768_v34  ;;  %v1273_v48 = vld [vmem:[#allocation2 + $0x39] sm:$0xff]  ;;  %v9611_v55 = vld [vmem:[%s14644_s1 + $0x30] sm:$0xff]  }
  0x64   :  { %v1332_v42 = vpack.c.bf16 %v1269_v38, %v1268_v37  ;;  %v1833_v44 = vld [vmem:[#allocation2 + $0x22] sm:$0xff]  ;;  %v1835_v51 = vld [vmem:[#allocation2 + $0x3a] sm:$0xff]  ;;  %v10425_v53 = vpack.c.bf16 %v1273_v48, %v1272_v47  ;;  %v1836_v58 = vld [vmem:[#allocation2 + $0x4a] sm:$0xff] }
  0x65   :  { %v1271_v46 = vld [vmem:[#allocation2 + $0x21] sm:$0xff]  ;;  %v1895_v50 = vpack.c.bf16 %v1833_v44, %v1832_v43  ;;  %v1896_v54 = vpack.c.bf16 %v1835_v51, %v1834_v49  ;;  %v1274_v57 = vld [vmem:[#allocation2 + $0x49] sm:$0xff]  ;;  %v1837_v59 = vld [vmem:[#allocation2 + $0x52] sm:$0xff] }
  0x66   :  { %v10423_v52 = vpack.c.bf16 %v1271_v46, %v1270_v45  ;;  %v9612_v56 = vld [vmem:[%s14644_s1 + $0x40] sm:$0xff]   ;;  %v1275_v60 = vld [vmem:[#allocation2 + $0x51] sm:$0xff]  ;;  %v1277_v0 = vld [vmem:[#allocation2 + $0x69] sm:$0xff]  ;;  %v1897_v1 = vpack.c.bf16 %v1837_v59, %v1836_v58 }
  0x67   :  { %v1838_v61 = vld [vmem:[#allocation2 + $0x62] sm:$0xff]  ;;  %v1839_v62 = vld [vmem:[#allocation2 + $0x6a] sm:$0xff]  ;;  %v10439_v2 = vpack.c.bf16 %v1275_v60, %v1274_v57  ;;  %v1278_v5 = vld [vmem:[#allocation2 + $0x79] sm:$0xff] }
  0x68   :  { %v1276_v63 = vld [vmem:[#allocation2 + $0x61] sm:$0xff]  ;;  %v1898_v3 = vpack.c.bf16 %v1839_v62, %v1838_v61  ;;  %v1842_v9 = vld [vmem:[#allocation2 + $0x92] sm:$0xff]  ;;  %v1844_v19 = vld [vmem:[#allocation2 + $0xaa] sm:$0xff] }
  0x69   :  { %9008 = vmatmul.mubr.msk.bf16.gmra.mxu0 %vm19_vm0, %v781_v13  ;;  %v10441_v4 = vpack.c.bf16 %v1277_v0, %v1276_v63  ;;  %v1840_v6 = vld [vmem:[#allocation2 + $0x7a] sm:$0xff]  ;;  %v1841_v7 = vld [vmem:[#allocation2 + $0x82] sm:$0xff]  ;;  %v1280_v11 = vld [vmem:[#allocation2 + $0x91] sm:$0xff] }
  0x6a   :  { %9040 = vmatmul.mubr.msk.bf16.gmra.mxu1 %vm19_vm0, %v797_v14  ;;  %9011 = vmatprep.mubr.msk.bf16.mxu0 %vm19_vm0, %v782_v15  ;;  %v1279_v8 = vld [vmem:[#allocation2 + $0x81] sm:$0xff]  ;;  %v1281_v12 = vld [vmem:[#allocation2 + $0x99] sm:$0xff]  ;;  %v1899_v13 = vpack.c.bf16 %v1841_v7, %v1840_v6  ;;  %v1285_v22 = vld [vmem:[#allocation2 + $0xc9] sm:$0xff] }
  0x6b   :  { %9043 = vmatprep.mubr.msk.bf16.mxu1 %vm19_vm0, %v798_v17  ;;  %v1843_v10 = vld [vmem:[#allocation2 + $0x9a] sm:$0xff]  ;;  %v10449_v14 = vpack.c.bf16 %v1279_v8, %v1278_v5  ;;  %v1282_v17 = vld [vmem:[#allocation2 + $0xa9] sm:$0xff]  ;;  %v1845_v20 = vld [vmem:[#allocation2 + $0xb2] sm:$0xff] }
  0x6c   :  { %v1900_v15 = vpack.c.bf16 %v1843_v10, %v1842_v9  ;;  %v1284_v21 = vld [vmem:[#allocation2 + $0xc1] sm:$0xff]  ;;  %v1847_v24 = vld [vmem:[#allocation2 + $0xca] sm:$0xff]  ;;  %v10462_v25 = vld [vmem:[%s14644_s1 + $0x58] sm:$0xff]   ;;  %v1901_v26 = vpack.c.bf16 %v1845_v20, %v1844_v19 }
  0x6d   :  { %v1846_v23 = vld [vmem:[#allocation2 + $0xc2] sm:$0xff]  ;;  %v1286_v31 = vld [vmem:[#allocation2 + $0xd9] sm:$0xff]  ;;  %v1288_v37 = vld [vmem:[#allocation2 + $0xf1] sm:$0xff] }
  0x6e   :  { %v1848_v32 = vld [vmem:[#allocation2 + $0xda] sm:$0xff]  ;;  %v1849_v33 = vld [vmem:[#allocation2 + $0xe2] sm:$0xff]  ;;  %v1850_v35 = vld [vmem:[#allocation2 + $0xf2] sm:$0xff] }
  0x6f   :  { %v1287_v34 = vld [vmem:[#allocation2 + $0xe1] sm:$0xff]  ;;  %v1289_v38 = vld [vmem:[#allocation2 + $0xf9] sm:$0xff]  ;;  %v1290_v43 = vld [vmem:[#allocation2 + $0x109] sm:$0xff] }
  0x70   :  { %v1851_v36 = vld [vmem:[#allocation2 + $0xfa] sm:$0xff]  ;;  %v1852_v44 = vld [vmem:[#allocation2 + $0x10a] sm:$0xff]  ;;  %v1853_v45 = vld [vmem:[#allocation2 + $0x112] sm:$0xff] }
  0x71   :  { %9012 = vmatmul.mubr.msk.bf16.gmra.mxu0 %vm19_vm0, %v783_v27  ;;  %v1291_v46 = vld [vmem:[#allocation2 + $0x111] sm:$0xff]  ;;  %v1854_v47 = vld [vmem:[#allocation2 + $0x122] sm:$0xff]  ;;  %v1905_v51 = vpack.c.bf16 %v1853_v45, %v1852_v44  ;;  %v1294_v57 = vld [vmem:[#allocation2 + $0x139] sm:$0xff] }
  0x72   :  { %9044 = vmatmul.mubr.msk.bf16.gmra.mxu1 %vm19_vm0, %v799_v28  ;;  %9015 = vmatprep.mubr.msk.bf16.mxu0 %vm19_vm0, %v784_v29  ;;  %v1902_v28 = vpack.c.bf16 %v1847_v24, %v1846_v23  ;;  %v10470_v29 = vld [vmem:[%s14644_s1 + $0x68] sm:$0xff]   ;;  %v1856_v59 = vld [vmem:[#allocation2 + $0x13a] sm:$0xff]  ;;  %v1296_v61 = vld [vmem:[#allocation2 + $0x151] sm:$0xff] }
  0x73   :  { %9047 = vmatprep.mubr.msk.bf16.mxu1 %vm19_vm0, %v800_v30  ;;  %v10472_v30 = vpack.c.bf16 %v1285_v22, %v1284_v21  ;;  %v1855_v48 = vld [vmem:[#allocation2 + $0x12a] sm:$0xff]  ;;  %v1292_v49 = vld [vmem:[#allocation2 + $0x121] sm:$0xff]  ;;  %v1858_v62 = vld [vmem:[#allocation2 + $0x152] sm:$0xff] }
  0x74   :  { %v1295_v58 = vld [vmem:[#allocation2 + $0x141] sm:$0xff]  ;;  %v1297_v0 = vld [vmem:[#allocation2 + $0x159] sm:$0xff]  ;;  %v159_v7 = vld [vmem:[%s14645_s2 + $0xf0] sm:$0xff] }
  0x75   :  { %v1857_v60 = vld [vmem:[#allocation2 + $0x142] sm:$0xff]  ;;  %v1859_v63 = vld [vmem:[#allocation2 + $0x15a] sm:$0xff]  ;;  %v10503_v6 = vpack.c.bf16 %v1297_v0, %v1296_v61  ;;  %224 = vst.msk [vmem:[#allocation2 + $0x181] sm:$0xff] %vm19_vm0, %v159_v7  ;;  %v1860_v10 = vld [vmem:[#allocation2 + $0x16a] sm:$0xff] }
  0x76   :  { %v1908_v5 = vpack.c.bf16 %v1859_v63, %v1858_v62  ;;  %v160_v8 = vld [vmem:[%s14645_s2 + $0xf8] sm:$0xff]  ;;  %v1298_v9 = vld [vmem:[#allocation2 + $0x169] sm:$0xff]  ;;  %v1307_v44 = vld [vmem:[#allocation2 + $0x201] sm:$0xff] }
  0x77   :  { %225 = vst.msk [vmem:[#allocation2 + $0x189] sm:$0xff] %vm19_vm0, %v160_v8  ;;  %v1302_v23 = vld [vmem:[#allocation2 + $0x1c9] sm:$0xff]  ;;  %v1870_v45 = vld [vmem:[#allocation2 + $0x212] sm:$0xff]  ;;  %v1312_v63 = vld [vmem:[#allocation2 + $0x241] sm:$0xff] }
  0x78   :  { %v1864_v24 = vld [vmem:[#allocation2 + $0x1ca] sm:$0xff]  ;;  %v1874_v61 = vld [vmem:[#allocation2 + $0x242] sm:$0xff] }
  0x79   :  { %9016 = vmatmul.mubr.msk.bf16.gmra.mxu0 %vm19_vm0, %v785_v39  ;;  %v1903_v39 = vpack.c.bf16 %v1849_v33, %v1848_v32  ;;  %v1867_v32 = vld [vmem:[#allocation2 + $0x1ea] sm:$0xff]  ;;  %v1304_v33 = vld [vmem:[#allocation2 + $0x1e1] sm:$0xff] }
  0x7a   :  { %9048 = vmatmul.mubr.msk.bf16.gmra.mxu1 %vm19_vm0, %v801_v40  ;;  %9123 = vmatprep.mubr.msk.bf16.mxu0 %vm19_vm0, %v1894_v41  ;;  %v10481_v40 = vpack.c.bf16 %v1287_v34, %v1286_v31  ;;  %v1904_v41 = vpack.c.bf16 %v1851_v36, %v1850_v35  ;;  %v1866_v31 = vld [vmem:[#allocation2 + $0x1e2] sm:$0xff]  ;;  %v1875_v62 = vld [vmem:[#allocation2 + $0x24a] sm:$0xff] }
  0x7b   :  { %9055 = vmatprep.mubr.msk.bf16.mxu1 %vm19_vm0, %v1332_v42  ;;  %v10483_v42 = vpack.c.bf16 %v1289_v38, %v1288_v37  ;;  %v1305_v34 = vld [vmem:[#allocation2 + $0x1e9] sm:$0xff]  ;;  %v1912_v37 = vpack.c.bf16 %v1867_v32, %v1866_v31  ;;  %v1916_v7 = vpack.c.bf16 %v1875_v62, %v1874_v61  ;;  %v1319_v31 = vld [vmem:[#allocation2 + $0x291] sm:$0xff] }
  0x7c   :  { %v10528_v38 = vpack.c.bf16 %v1305_v34, %v1304_v33  ;;  %v1313_v0 = vld [vmem:[#allocation2 + $0x249] sm:$0xff]  ;;  %v1320_v34 = vld [vmem:[#allocation2 + $0x2a1] sm:$0xff] }
  0x7d   :  { %v10548_v8 = vpack.c.bf16 %v1313_v0, %v1312_v63  ;;  %v1882_v32 = vld [vmem:[#allocation2 + $0x2a2] sm:$0xff]  ;;  %v1883_v33 = vld [vmem:[#allocation2 + $0x2aa] sm:$0xff]  ;;  %v1889_v0 = vld [vmem:[#allocation2 + $0x2f2] sm:$0xff] }
  0x7e   :  { %v1326_v62 = vld [vmem:[#allocation2 + $0x2e9] sm:$0xff] }
  0x7f   :  { %v1888_v63 = vld [vmem:[#allocation2 + $0x2ea] sm:$0xff] }
  0x81   :  { %9124 = vmatmul.mubr.msk.bf16.vlgmr.msra.gmra.mxu0 %vm19_vm0, %v1895_v50  ;;  %v1293_v50 = vld [vmem:[#allocation2 + $0x129] sm:$0xff] }
  0x82   :  { %9056 = vmatmul.mubr.msk.bf16.vlgmr.msra.gmra.mxu1 %vm19_vm0, %v10423_v52  ;;  %9256 = vmatpush3.bf16.msra.mxu0 %v9610_v18  ;;  %v1283_v18 = vld [vmem:[#allocation2 + $0xb1] sm:$0xff] }
  0x83   :  { %9188 = vmatpush3.bf16.msra.mxu1 %v9609_v16  ;;  %9059 = vmatprep.mubr.msk.bf16.mxu1 %vm19_vm0, %v10425_v53  ;;  %v10451_v16 = vpack.c.bf16 %v1281_v12, %v1280_v11  ;;  %v10464_v27 = vpack.c.bf16 %v1283_v18, %v1282_v17  ;;  %v1861_v11 = vld [vmem:[#allocation2 + $0x172] sm:$0xff] }
  0x84   :  { %9127 = vmatprep.mubr.msk.bf16.mxu0 %vm19_vm0, %v1896_v54  ;;  %9189 = vmatprep.subr.bf16.mxu1 %v9611_v55  ;;  %v10491_v54 = vpack.c.bf16 %v1291_v46, %v1290_v43  ;;  %v1299_v12 = vld [vmem:[#allocation2 + $0x171] sm:$0xff]  ;;  %v1301_v18 = vld [vmem:[#allocation2 + $0x1b9] sm:$0xff]  ;;  %v1909_v19 = vpack.c.bf16 %v1861_v11, %v1860_v10  ;;  %v1869_v43 = vld [vmem:[#allocation2 + $0x202] sm:$0xff] }
  0x85   :  { %9257 = vmatprep.subr.bf16.mxu0 %v9612_v56  ;;  %v1300_v17 = vld [vmem:[#allocation2 + $0x1b1] sm:$0xff]  ;;  %v10519_v20 = vpack.c.bf16 %v1299_v12, %v1298_v9  ;;  %v1871_v46 = vld [vmem:[#allocation2 + $0x21a] sm:$0xff]  ;;  %v1877_v11 = vld [vmem:[#allocation2 + $0x262] sm:$0xff] }
  0x86   :  { %9258 = vmatpush3.bf16.msra.mxu0 %v9612_v56  ;;  %v10493_v56 = vpack.c.bf16 %v1293_v50, %v1292_v49  ;;  %v1348_v22 = vpack.c.bf16 %v1301_v18, %v1300_v17  ;;  %v1314_v9 = vld [vmem:[#allocation2 + $0x259] sm:$0xff]  ;;  %v1315_v12 = vld [vmem:[#allocation2 + $0x261] sm:$0xff]  ;;  %v1316_v17 = vld [vmem:[#allocation2 + $0x271] sm:$0xff] }
  0x87   :  { %9190 = vmatpush3.bf16.msra.mxu1 %v9611_v55  ;;  %9391 = vmatprep.subr.bf16.mxu0 %v10470_v29  ;;  %v1906_v55 = vpack.c.bf16 %v1855_v48, %v1854_v47  ;;  %v1308_v47 = vld [vmem:[#allocation2 + $0x211] sm:$0xff]  ;;  %v1309_v48 = vld [vmem:[#allocation2 + $0x219] sm:$0xff] }
  0x88   :  { %9323 = vmatprep.subr.bf16.mxu1 %v10462_v25  ;;  %v1876_v10 = vld [vmem:[#allocation2 + $0x25a] sm:$0xff] }
  0x89   :  { %9128 = vmatmul.mubr.msk.bf16.gmra.mxu0 %vm19_vm0, %v1897_v1  ;;  %v1907_v1 = vpack.c.bf16 %v1857_v60, %v1856_v59  ;;  %v1873_v59 = vld [vmem:[#allocation2 + $0x232] sm:$0xff] }
  0x8a   :  { %9060 = vmatmul.mubr.msk.bf16.gmra.mxu1 %vm19_vm0, %v10439_v2  ;;  %9131 = vmatprep.mubr.msk.bf16.mxu0 %vm19_vm0, %v1898_v3  ;;  %v10501_v3 = vpack.c.bf16 %v1295_v58, %v1294_v57  ;;  %v1310_v57 = vld [vmem:[#allocation2 + $0x229] sm:$0xff]  ;;  %v1311_v60 = vld [vmem:[#allocation2 + $0x231] sm:$0xff]  ;;  %v1317_v18 = vld [vmem:[#allocation2 + $0x279] sm:$0xff] }
  0x8b   :  { %9063 = vmatprep.mubr.msk.bf16.mxu1 %vm19_vm0, %v10441_v4  ;;  %v1872_v58 = vld [vmem:[#allocation2 + $0x22a] sm:$0xff] }
  0x91   :  { %9132 = vmatmul.mubr.msk.bf16.gmra.mxu0 %vm19_vm0, %v1899_v13  ;;  %v1862_v13 = vld [vmem:[#allocation2 + $0x1b2] sm:$0xff] }
  0x92   :  { %9064 = vmatmul.mubr.msk.bf16.gmra.mxu1 %vm19_vm0, %v10449_v14  ;;  %9135 = vmatprep.mubr.msk.bf16.mxu0 %vm19_vm0, %v1900_v15  ;;  %v1863_v15 = vld [vmem:[#allocation2 + $0x1ba] sm:$0xff] }
  0x93   :  { %9067 = vmatprep.mubr.msk.bf16.mxu1 %vm19_vm0, %v10451_v16  ;;  %v1910_v21 = vpack.c.bf16 %v1863_v15, %v1862_v13  ;;  %v1878_v13 = vld [vmem:[#allocation2 + $0x272] sm:$0xff]  ;;  %v1879_v15 = vld [vmem:[#allocation2 + $0x27a] sm:$0xff] }
  0x99   :  { %9136 = vmatmul.mubr.msk.bf16.gmra.mxu0 %vm19_vm0, %v1901_v26  ;;  %v1865_v26 = vld [vmem:[#allocation2 + $0x1d2] sm:$0xff] }
  0x9a   :  { %9068 = vmatmul.mubr.msk.bf16.gmra.mxu1 %vm19_vm0, %v10464_v27  ;;  %9139 = vmatprep.mubr.msk.bf16.mxu0 %vm19_vm0, %v1902_v28  ;;  %v1303_v28 = vld [vmem:[#allocation2 + $0x1d1] sm:$0xff]  ;;  %v1911_v35 = vpack.c.bf16 %v1865_v26, %v1864_v24  ;;  %v1318_v24 = vld [vmem:[#allocation2 + $0x289] sm:$0xff] }
  0x9b   :  { %9071 = vmatprep.mubr.msk.bf16.mxu1 %vm19_vm0, %v10472_v30  ;;  %v10526_v36 = vpack.c.bf16 %v1303_v28, %v1302_v23  ;;  %v1356_v23 = vpack.c.bf16 %v1317_v18, %v1316_v17  ;;  %v1880_v26 = vld [vmem:[#allocation2 + $0x28a] sm:$0xff]  ;;  %v1881_v28 = vld [vmem:[#allocation2 + $0x292] sm:$0xff] }
  0x9c   :  { %v191_v18 = vld [vmem:[%s14645_s2 + $0x1f0] sm:$0xff] }
  0x9d   :  { %256 = vst.msk [vmem:[#allocation2 + $0x331] sm:$0xff] %vm19_vm0, %v191_v18  ;;  %v678_v18 = vld [vmem:[%s14646_s0 + $0x120] sm:$0xff] }
  0xa1   :  { %9140 = vmatmul.mubr.msk.bf16.gmra.mxu0 %vm19_vm0, %v1903_v39  ;;  %v1306_v39 = vld [vmem:[#allocation2 + $0x1f9] sm:$0xff] }
  0xa2   :  { %9072 = vmatmul.mubr.msk.bf16.gmra.mxu1 %vm19_vm0, %v10481_v40  ;;  %9143 = vmatprep.mubr.msk.bf16.mxu0 %vm19_vm0, %v1904_v41  ;;  %v1868_v41 = vld [vmem:[#allocation2 + $0x1fa] sm:$0xff]  ;;  %v10536_v50 = vpack.c.bf16 %v1307_v44, %v1306_v39  ;;  %v1357_v39 = vpack.c.bf16 %v1319_v31, %v1318_v24 }
  0xa3   :  { %9075 = vmatprep.mubr.msk.bf16.mxu1 %vm19_vm0, %v10483_v42  ;;  %v1913_v49 = vpack.c.bf16 %v1869_v43, %v1868_v41  ;;  %v1920_v41 = vpack.c.bf16 %v1883_v33, %v1882_v32  ;;  %v1322_v44 = vld [vmem:[#allocation2 + $0x2b9] sm:$0xff]  ;;  %v1331_v24 = vld [vmem:[#allocation2 + $0x321] sm:$0xff] }
  0xa9   :  { %9144 = vmatmul.mubr.msk.bf16.gmra.mxu0 %vm19_vm0, %v1905_v51  ;;  %v1914_v51 = vpack.c.bf16 %v1871_v46, %v1870_v45  ;;  %v1884_v45 = vld [vmem:[#allocation2 + $0x2ba] sm:$0xff]  ;;  %v1885_v46 = vld [vmem:[#allocation2 + $0x2c2] sm:$0xff] }
  0xaa   :  { %9076 = vmatmul.mubr.msk.bf16.gmra.mxu1 %vm19_vm0, %v10491_v54  ;;  %9147 = vmatprep.mubr.msk.bf16.mxu0 %vm19_vm0, %v1906_v55  ;;  %v10538_v55 = vpack.c.bf16 %v1309_v48, %v1308_v47  ;;  %v1323_v47 = vld [vmem:[#allocation2 + $0x2c1] sm:$0xff]  ;;  %v1886_v48 = vld [vmem:[#allocation2 + $0x2d2] sm:$0xff] }
  0xab   :  { %9079 = vmatprep.mubr.msk.bf16.mxu1 %vm19_vm0, %v10493_v56 }
  0xb1   :  { %9148 = vmatmul.mubr.msk.bf16.gmra.mxu0 %vm19_vm0, %v1907_v1  ;;  %v1915_v1 = vpack.c.bf16 %v1873_v59, %v1872_v58  ;;  %v1921_v58 = vpack.c.bf16 %v1885_v46, %v1884_v45  ;;  %v1359_v59 = vpack.c.bf16 %v1323_v47, %v1322_v44  ;;  %v676_v44 = vld [vmem:[%s14646_s0 + $0x110] sm:$0xff] }
  0xb2   :  { %9080 = vmatmul.mubr.msk.bf16.gmra.mxu1 %vm19_vm0, %v10501_v3  ;;  %9151 = vmatprep.mubr.msk.bf16.mxu0 %vm19_vm0, %v1908_v5  ;;  %v10546_v5 = vpack.c.bf16 %v1311_v60, %v1310_v57  ;;  %v1325_v57 = vld [vmem:[#allocation2 + $0x2d9] sm:$0xff]  ;;  %v9615_v45 = vld [vmem:[%s14644_s1 + $0x50] sm:$0xff]  }
  0xb3   :  { %9083 = vmatprep.mubr.msk.bf16.mxu1 %vm19_vm0, %v10503_v6 }
  0xb9   :  { %9152 = vmatmul.mubr.msk.bf16.gmra.mxu0 %vm19_vm0, %v1909_v19  ;;  %v1917_v19 = vpack.c.bf16 %v1877_v11, %v1876_v10  ;;  %v1328_v10 = vld [vmem:[#allocation2 + $0x301] sm:$0xff]  ;;  %v1329_v11 = vld [vmem:[#allocation2 + $0x309] sm:$0xff] }
  0xba   :  { %9084 = vmatmul.mubr.msk.bf16.gmra.mxu1 %vm19_vm0, %v10519_v20  ;;  %9155 = vmatprep.mubr.msk.bf16.mxu0 %vm19_vm0, %v1910_v21  ;;  %v1355_v21 = vpack.c.bf16 %v1315_v12, %v1314_v9  ;;  %v1891_v9 = vld [vmem:[#allocation2 + $0x30a] sm:$0xff]  ;;  %v1923_v12 = vpack.c.bf16 %v1889_v0, %v1888_v63  ;;  %v1362_v17 = vpack.c.bf16 %v1329_v11, %v1328_v10 }
  0xbb   :  { %9087 = vmatprep.mubr.msk.bf16.mxu1 %vm19_vm0, %v1348_v22  ;;  %v1918_v22 = vpack.c.bf16 %v1879_v15, %v1878_v13  ;;  %v675_v0 = vld [vmem:[%s14646_s0 + $0x108] sm:$0xff] }
  0xbc   :  { %v9618_v10 = vld [vmem:[%s14644_s1 + $0x88] sm:$0xff]  }
  0xc1   :  { %9156 = vmatmul.mubr.msk.bf16.gmra.mxu0 %vm19_vm0, %v1911_v35  ;;  %v1321_v35 = vld [vmem:[#allocation2 + $0x2a9] sm:$0xff] }
  0xc2   :  { %9088 = vmatmul.mubr.msk.bf16.gmra.mxu1 %vm19_vm0, %v10526_v36  ;;  %9159 = vmatprep.mubr.msk.bf16.mxu0 %vm19_vm0, %v1912_v37  ;;  %v1919_v37 = vpack.c.bf16 %v1881_v28, %v1880_v26  ;;  %v1358_v43 = vpack.c.bf16 %v1321_v35, %v1320_v34  ;;  %v2393_v26 = vld [vmem:[#allocation2 + $0x18] sm:$0xff]  ;;  %v2394_v28 = vld [vmem:[#allocation2 + $0x20] sm:$0xff]  ;;  %v2395_v34 = vld [vmem:[#allocation2 + $0x30] sm:$0xff] }
  0xc3   :  { %9091 = vmatprep.mubr.msk.bf16.mxu1 %vm19_vm0, %v10528_v38  ;;  %v2457_v33 = vpack.c.bf16 %v2394_v28, %v2393_v26  ;;  %v2396_v35 = vld [vmem:[#allocation2 + $0x38] sm:$0xff]  ;;  %v2405_v26 = vld [vmem:[#allocation2 + $0xa8] sm:$0xff]  ;;  %v2406_v28 = vld [vmem:[#allocation2 + $0xb0] sm:$0xff] }
  0xc9   :  { %9160 = vmatmul.mubr.msk.bf16.gmra.mxu0 %vm19_vm0, %v1913_v49  ;;  %v1887_v49 = vld [vmem:[#allocation2 + $0x2da] sm:$0xff] }
  0xca   :  { %9092 = vmatmul.mubr.msk.bf16.gmra.mxu1 %vm19_vm0, %v10536_v50  ;;  %9163 = vmatprep.mubr.msk.bf16.mxu0 %vm19_vm0, %v1914_v51  ;;  %v1324_v51 = vld [vmem:[#allocation2 + $0x2d1] sm:$0xff]  ;;  %v1922_v60 = vpack.c.bf16 %v1887_v49, %v1886_v48  ;;  %v674_v48 = vld [vmem:[%s14646_s0 + $0x100] sm:$0xff] }
  0xcb   :  { %9095 = vmatprep.mubr.msk.bf16.mxu1 %vm19_vm0, %v10538_v55  ;;  %v1360_v61 = vpack.c.bf16 %v1325_v57, %v1324_v51  ;;  %v2400_v57 = vld [vmem:[#allocation2 + $0x68] sm:$0xff] }
  0xd1   :  { %9164 = vmatmul.mubr.msk.bf16.gmra.mxu0 %vm19_vm0, %v1915_v1  ;;  %v1327_v1 = vld [vmem:[#allocation2 + $0x2f1] sm:$0xff] }
  0xd2   :  { %9096 = vmatmul.mubr.msk.bf16.gmra.mxu1 %vm19_vm0, %v10546_v5  ;;  %9167 = vmatprep.mubr.msk.bf16.mxu0 %vm19_vm0, %v1916_v7  ;;  %v1890_v7 = vld [vmem:[#allocation2 + $0x302] sm:$0xff]  ;;  %v1361_v13 = vpack.c.bf16 %v1327_v1, %v1326_v62  ;;  %v9617_v62 = vld [vmem:[%s14644_s1 + $0x78] sm:$0xff]  }
  0xd3   :  { %9099 = vmatprep.mubr.msk.bf16.mxu1 %vm19_vm0, %v10548_v8  ;;  %v1924_v15 = vpack.c.bf16 %v1891_v9, %v1890_v7 }
  0xd9   :  { %9168 = vmatmul.mubr.msk.bf16.gmra.mxu0 %vm19_vm0, %v1917_v19  ;;  %v192_v19 = vld [vmem:[%s14645_s2 + $0x1f8] sm:$0xff] }
  0xda   :  { %9100 = vmatmul.mubr.msk.bf16.gmra.mxu1 %vm19_vm0, %v1355_v21  ;;  %9171 = vmatprep.mubr.msk.bf16.mxu0 %vm19_vm0, %v1918_v22  ;;  %v1892_v21 = vld [vmem:[#allocation2 + $0x31a] sm:$0xff]  ;;  %v1893_v22 = vld [vmem:[#allocation2 + $0x322] sm:$0xff]  ;;  %257 = vst.msk [vmem:[#allocation2 + $0x339] sm:$0xff] %vm19_vm0, %v192_v19 }
  0xdb   :  { %9103 = vmatprep.mubr.msk.bf16.mxu1 %vm19_vm0, %v1356_v23  ;;  %v1330_v23 = vld [vmem:[#allocation2 + $0x319] sm:$0xff]  ;;  %v1925_v31 = vpack.c.bf16 %v1893_v22, %v1892_v21  ;;  %v2403_v22 = vld [vmem:[#allocation2 + $0x90] sm:$0xff] }
  0xdc   :  { %v1363_v32 = vpack.c.bf16 %v1331_v24, %v1330_v23  ;;  %v2404_v23 = vld [vmem:[#allocation2 + $0x98] sm:$0xff] }
  0xdd   :  { %v681_v24 = vld [vmem:[%s14646_s0 + $0x138] sm:$0xff] }
  0xe1   :  { %9172 = vmatmul.mubr.msk.bf16.gmra.mxu0 %vm19_vm0, %v1919_v37  ;;  %v2397_v37 = vld [vmem:[#allocation2 + $0x48] sm:$0xff] }
  0xe2   :  { %9104 = vmatmul.mubr.msk.bf16.gmra.mxu1 %vm19_vm0, %v1357_v39  ;;  %9175 = vmatprep.mubr.msk.bf16.mxu0 %vm19_vm0, %v1920_v41  ;;  %v2398_v39 = vld [vmem:[#allocation2 + $0x50] sm:$0xff]  ;;  %v2458_v41 = vpack.c.bf16 %v2396_v35, %v2395_v34  ;;  %v2462_v34 = vpack.c.bf16 %v2404_v23, %v2403_v22 }
  0xe3   :  { %9107 = vmatprep.mubr.msk.bf16.mxu1 %vm19_vm0, %v1358_v43  ;;  %v2459_v43 = vpack.c.bf16 %v2398_v39, %v2397_v37  ;;  %v2463_v39 = vpack.c.bf16 %v2406_v28, %v2405_v26  ;;  %v2411_v28 = vld [vmem:[#allocation2 + $0xf0] sm:$0xff] }
  0xe9   :  { %9176 = vmatmul.mubr.msk.bf16.gmra.mxu0 %vm19_vm0, %v1921_v58 }
  0xea   :  { %9108 = vmatmul.mubr.msk.bf16.gmra.mxu1 %vm19_vm0, %v1359_v59  ;;  %9179 = vmatprep.mubr.msk.bf16.mxu0 %vm19_vm0, %v1922_v60  ;;  %v677_v59 = vld [vmem:[%s14646_s0 + $0x118] sm:$0xff] }
  0xeb   :  { %9111 = vmatprep.mubr.msk.bf16.mxu1 %vm19_vm0, %v1360_v61  ;;  %v2401_v60 = vld [vmem:[#allocation2 + $0x78] sm:$0xff] }
  0xf1   :  { %9180 = vmatmul.mubr.msk.bf16.gmra.mxu0 %vm19_vm0, %v1923_v12  ;;  %v680_v12 = vld [vmem:[%s14646_s0 + $0x130] sm:$0xff] }
  0xf2   :  { %9112 = vmatmul.mubr.msk.bf16.gmra.mxu1 %vm19_vm0, %v1361_v13  ;;  %9183 = vmatprep.mubr.msk.bf16.mxu0 %vm19_vm0, %v1924_v15 }
  0xf3   :  { %9115 = vmatprep.mubr.msk.bf16.mxu1 %vm19_vm0, %v1362_v17 }
  0xf9   :  { %9184 = vmatmul.mubr.msk.bf16.gmra.mxu0 %vm19_vm0, %v1925_v31 }
  0xfa   :  { %9116 = vmatmul.mubr.msk.bf16.gmra.mxu1 %vm19_vm0, %v1363_v32  ;;  %9259 = vmatprep.mubr.msk.bf16.mxu0 %vm19_vm0, %v10423_v52  ;;  %v9616_v52 = vld [vmem:[%s14644_s1 + $0x60] sm:$0xff]  }
  0xfb   :  { %9191 = vmatprep.mubr.msk.bf16.mxu1 %vm19_vm0, %v2457_v33  ;;  %v679_v33 = vld [vmem:[%s14646_s0 + $0x128] sm:$0xff] }
 0x101   :  { %v10591_v46 = vpop.f32.mrf.mxu0  ;;  %9260 = vmatmul.mubr.msk.bf16.vlgmr.msra.gmra.mxu0 %vm19_vm0, %v10425_v53  ;;  %v2399_v53 = vld [vmem:[#allocation2 + $0x60] sm:$0xff] }
 0x102   :  { %v9021_v47 = vpop.f32.mrf.mxu1  ;;  %9192 = vmatmul.mubr.msk.bf16.vlgmr.msra.gmra.mxu1 %vm19_vm0, %v2458_v41  ;;  %9392 = vmatpush3.bf16.msra.mxu0 %v10470_v29  ;;  %v2402_v29 = vld [vmem:[#allocation2 + $0x80] sm:$0xff]  ;;  %v2460_v1 = vpack.c.bf16 %v2400_v57, %v2399_v53 }
 0x103   :  { %v10603_v49 = vadd.f32 %v9021_v47, %v676_v44  ;;  %9324 = vmatpush3.bf16.msra.mxu1 %v10462_v25  ;;  %v10606_v51 = vpop.f32.mrf.mxu0  ;;  %9195 = vmatprep.mubr.msk.bf16.mxu1 %vm19_vm0, %v2459_v43  ;;  %v2461_v9 = vpack.c.bf16 %v2402_v29, %v2401_v60  ;;  %v684_v43 = vld [vmem:[%s14646_s0 + $0x150] sm:$0xff]  ;;  %v682_v47 = vld [vmem:[%s14646_s0 + $0x140] sm:$0xff]  ;;  %v2409_v60 = vld [vmem:[#allocation2 + $0xd8] sm:$0xff] }
 0x104   :  { %v1077_v58 = vpop.f32.mrf.mxu1  ;;  %9263 = vmatprep.mubr.msk.bf16.mxu0 %vm19_vm0, %v10439_v2  ;;  %9325 = vmatprep.subr.bf16.mxu1 %v9615_v45  ;;  %v2407_v57 = vld [vmem:[#allocation2 + $0xc0] sm:$0xff] }
 0x105   :  { %v10614_v61 = vadd.f32 %v1077_v58, %v674_v48  ;;  %v10616_v25 = vpop.f32.mrf.mxu0  ;;  %9393 = vmatprep.subr.bf16.mxu0 %v9616_v52  ;;  %v2408_v58 = vld [vmem:[#allocation2 + $0xc8] sm:$0xff]  ;;  %v2410_v29 = vld [vmem:[#allocation2 + $0xe0] sm:$0xff] }
 0x106   :  { %v9022_v63 = vpop.f32.mrf.mxu1  ;;  %9394 = vmatpush3.bf16.msra.mxu0 %v9616_v52 }
 0x107   :  { %v10624_v2 = vadd.f32 %v9022_v63, %v677_v59  ;;  %v10626_v7 = vpop.f32.mrf.mxu0  ;;  %9326 = vmatpush3.bf16.msra.mxu1 %v9615_v45  ;;  %9527 = vmatprep.subr.bf16.mxu0 %v9618_v10 }
 0x108   :  { %v1080_v11 = vpop.f32.mrf.mxu1  ;;  %9459 = vmatprep.subr.bf16.mxu1 %v9617_v62 }
 0x109   :  { %v10634_v13 = vadd.f32 %v1080_v11, %v675_v0  ;;  %v10636_v15 = vpop.f32.mrf.mxu0  ;;  %9264 = vmatmul.mubr.msk.bf16.gmra.mxu0 %vm19_vm0, %v10441_v4  ;;  %v683_v0 = vld [vmem:[%s14646_s0 + $0x148] sm:$0xff]  ;;  %v2465_v11 = vpack.c.bf16 %v2410_v29, %v2409_v60  ;;  %v692_v60 = vld [vmem:[%s14646_s0 + $0x190] sm:$0xff] }
 0x10a   :  { %v9025_v17 = vpop.f32.mrf.mxu1  ;;  %9196 = vmatmul.mubr.msk.bf16.gmra.mxu1 %vm19_vm0, %v2460_v1  ;;  %9267 = vmatprep.mubr.msk.bf16.mxu0 %vm19_vm0, %v10449_v14  ;;  %v2464_v1 = vpack.c.bf16 %v2408_v58, %v2407_v57 }
 0x10b   :  { %v10646_v19 = vadd.f32 %v9025_v17, %v680_v12  ;;  %v10648_v21 = vpop.f32.mrf.mxu0  ;;  %9199 = vmatprep.mubr.msk.bf16.mxu1 %vm19_vm0, %v2461_v9  ;;  %v688_v17 = vld [vmem:[%s14646_s0 + $0x170] sm:$0xff] }
 0x10c   :  { %v1093_v4 = vpop.f32.mrf.mxu1 }
 0x10d   :  { %v10654_v31 = vadd.f32 %v1093_v4, %v678_v18  ;;  %v10656_v32 = vpop.f32.mrf.mxu0  ;;  %v686_v4 = vld [vmem:[%s14646_s0 + $0x160] sm:$0xff] }
 0x10e   :  { %v9026_v14 = vpop.f32.mrf.mxu1 }
 0x10f   :  { %v10661_v35 = vadd.f32 %v9026_v14, %v681_v24  ;;  %v10663_v37 = vpop.f32.mrf.mxu0  ;;  %v2412_v14 = vld [vmem:[#allocation2 + $0xf8] sm:$0xff] }
 0x110   :  { %v1096_v41 = vpop.f32.mrf.mxu1 }
 0x111   :  { %v10668_v44 = vadd.f32 %v1096_v41, %v679_v33  ;;  %v10670_v45 = vpop.f32.mrf.mxu0  ;;  %9268 = vmatmul.mubr.msk.bf16.gmra.mxu0 %vm19_vm0, %v10451_v16  ;;  %v685_v16 = vld [vmem:[%s14646_s0 + $0x158] sm:$0xff] }
 0x112   :  { %v9029_v52 = vpop.f32.mrf.mxu1  ;;  %9200 = vmatmul.mubr.msk.bf16.gmra.mxu1 %vm19_vm0, %v2462_v34  ;;  %9271 = vmatprep.mubr.msk.bf16.mxu0 %vm19_vm0, %v10464_v27  ;;  %v2413_v34 = vld [vmem:[#allocation2 + $0x108] sm:$0xff] }
 0x113   :  { %v10680_v48 = vadd.f32 %v9029_v52, %v684_v43  ;;  %v10682_v53 = vpop.f32.mrf.mxu0  ;;  %9203 = vmatprep.mubr.msk.bf16.mxu1 %vm19_vm0, %v2463_v39  ;;  %v2414_v39 = vld [vmem:[#allocation2 + $0x110] sm:$0xff]  ;;  %v687_v52 = vld [vmem:[%s14646_s0 + $0x168] sm:$0xff] }
 0x114   :  { %v1109_v59 = vpop.f32.mrf.mxu1 }
 0x115   :  { %14814 = vst [vmem:[#allocation4_spill] sm:$0xff] %v10680_v48  ;;  %v10688_v62 = vadd.f32 %v1109_v59, %v682_v47  ;;  %v10690_v63 = vpop.f32.mrf.mxu0  ;;  %v2466_v47 = vpack.c.bf16 %v2412_v14, %v2411_v28  ;;  %v2467_v59 = vpack.c.bf16 %v2414_v39, %v2413_v34  ;;  %v2417_v28 = vld [vmem:[#allocation2 + $0x138] sm:$0xff]  ;;  %v2418_v14 = vld [vmem:[#allocation2 + $0x140] sm:$0xff]  ;;  %v691_v34 = vld [vmem:[%s14646_s0 + $0x188] sm:$0xff] }
 0x116   :  { %v9030_v27 = vpop.f32.mrf.mxu1 }
 0x117   :  { %14815 = vst [vmem:[#allocation5_spill] sm:$0xff] %v10688_v62  ;;  %v10695_v9 = vadd.f32 %v9030_v27, %v685_v16  ;;  %v10697_v10 = vpop.f32.mrf.mxu0 }
 0x118   :  { %v1112_v12 = vpop.f32.mrf.mxu1 }
 0x119   :  { %14816 = vst [vmem:[#allocation6_spill] sm:$0xff] %v10695_v9  ;;  %v10702_v18 = vadd.f32 %v1112_v12, %v683_v0  ;;  %v10704_v22 = vpop.f32.mrf.mxu0  ;;  %9272 = vmatmul.mubr.msk.bf16.gmra.mxu0 %vm19_vm0, %v10472_v30  ;;  %v689_v30 = vld [vmem:[%s14646_s0 + $0x178] sm:$0xff] }
 0x11a   :  { %v9033_v23 = vpop.f32.mrf.mxu1  ;;  %9204 = vmatmul.mubr.msk.bf16.gmra.mxu1 %vm19_vm0, %v2464_v1  ;;  %9275 = vmatprep.mubr.msk.bf16.mxu0 %vm19_vm0, %v10481_v40  ;;  %v690_v1 = vld [vmem:[%s14646_s0 + $0x180] sm:$0xff] }
 0x11b   :  { %14817 = vst [vmem:[#allocation7_spill] sm:$0xff] %v10702_v18  ;;  %v10714_v24 = vadd.f32 %v9033_v23, %v688_v17  ;;  %v10716_v26 = vpop.f32.mrf.mxu0  ;;  %9207 = vmatprep.mubr.msk.bf16.mxu1 %vm19_vm0, %v2465_v11  ;;  %v2415_v17 = vld [vmem:[#allocation2 + $0x120] sm:$0xff]  ;;  %v2416_v23 = vld [vmem:[#allocation2 + $0x128] sm:$0xff] }
 0x11c   :  { %v1125_v33 = vpop.f32.mrf.mxu1  ;;  %v2468_v39 = vpack.c.bf16 %v2416_v23, %v2415_v17  ;;  %v694_v17 = vld [vmem:[%s14646_s0 + $0x1a0] sm:$0xff] }
 0x11d   :  { %14818 = vst [vmem:[#allocation8_spill] sm:$0xff] %v10714_v24  ;;  %v10722_v41 = vadd.f32 %v1125_v33, %v686_v4  ;;  %v10724_v43 = vpop.f32.mrf.mxu0 }
 0x11e   :  { %v9034_v40 = vpop.f32.mrf.mxu1 }
 0x11f   :  { %14819 = vst [vmem:[#allocation9_spill] sm:$0xff] %v10722_v41  ;;  %v10729_v57 = vadd.f32 %v9034_v40, %v689_v30  ;;  %v10731_v58 = vpop.f32.mrf.mxu0 }
 0x120   :  { %v1128_v16 = vpop.f32.mrf.mxu1 }
 0x121   :  { %14820 = vst [vmem:[#allocation10_spill] sm:$0xff] %v10729_v57  ;;  %v10736_v29 = vadd.f32 %v1128_v16, %v687_v52  ;;  %v10738_v27 = vpop.f32.mrf.mxu0  ;;  %9276 = vmatmul.mubr.msk.bf16.gmra.mxu0 %vm19_vm0, %v10483_v42  ;;  %v693_v42 = vld [vmem:[%s14646_s0 + $0x198] sm:$0xff]  ;;  %v696_v16 = vld [vmem:[%s14646_s0 + $0x1b0] sm:$0xff] }
 0x122   :  { %v9037_v0 = vpop.f32.mrf.mxu1  ;;  %9208 = vmatmul.mubr.msk.bf16.gmra.mxu1 %vm19_vm0, %v2466_v47  ;;  %9279 = vmatprep.mubr.msk.bf16.mxu0 %vm19_vm0, %v10491_v54  ;;  %v2469_v47 = vpack.c.bf16 %v2418_v14, %v2417_v28  ;;  %v2420_v28 = vld [vmem:[#allocation2 + $0x158] sm:$0xff] }
 0x123   :  { %14821 = vst [vmem:[#allocation11_spill] sm:$0xff] %v10736_v29  ;;  %v10748_v11 = vadd.f32 %v9037_v0, %v692_v60  ;;  %v10750_v12 = vpop.f32.mrf.mxu0  ;;  %9211 = vmatprep.mubr.msk.bf16.mxu1 %vm19_vm0, %v2467_v59 }
 0x124   :  { %v1141_v4 = vpop.f32.mrf.mxu1 }
 0x125   :  { %14822 = vst [vmem:[#allocation12_spill] sm:$0xff] %v10748_v11  ;;  %v10756_v33 = vadd.f32 %v1141_v4, %v690_v1  ;;  %v10758_v30 = vpop.f32.mrf.mxu0 }
 0x126   :  { %v9038_v54 = vpop.f32.mrf.mxu1 }
 0x127   :  { %14823 = vst [vmem:[#allocation13_spill] sm:$0xff] %v10756_v33  ;;  %v10763_v40 = vadd.f32 %v9038_v54, %v693_v42  ;;  %v10765_v52 = vpop.f32.mrf.mxu0  ;;  %v2419_v42 = vld [vmem:[#allocation2 + $0x150] sm:$0xff]  ;;  %v2421_v54 = vld [vmem:[#allocation2 + $0x168] sm:$0xff] }
 0x128   :  { %v1144_v59 = vpop.f32.mrf.mxu1  ;;  %v700_v33 = vld [vmem:[%s14646_s0 + $0x1d0] sm:$0xff] }
 0x129   :  { %14824 = vst [vmem:[#allocation14_spill] sm:$0xff] %v10763_v40  ;;  %v10770_v60 = vadd.f32 %v1144_v59, %v691_v34  ;;  %v10772_v0 = vpop.f32.mrf.mxu0  ;;  %9280 = vmatmul.mubr.msk.bf16.gmra.mxu0 %vm19_vm0, %v10493_v56  ;;  %v697_v56 = vld [vmem:[%s14646_s0 + $0x1b8] sm:$0xff]  ;;  %v2422_v34 = vld [vmem:[#allocation2 + $0x170] sm:$0xff] }
 0x12a   :  { %v9041_v1 = vpop.f32.mrf.mxu1  ;;  %9212 = vmatmul.mubr.msk.bf16.gmra.mxu1 %vm19_vm0, %v2468_v39  ;;  %9283 = vmatprep.mubr.msk.bf16.mxu0 %vm19_vm0, %v10501_v3 }
 0x12b   :  { %14825 = vst [vmem:[#allocation15_spill] sm:$0xff] %v10770_v60  ;;  %v10782_v23 = vadd.f32 %v9041_v1, %v696_v16  ;;  %v10784_v4 = vpop.f32.mrf.mxu0  ;;  %9215 = vmatprep.mubr.msk.bf16.mxu1 %vm19_vm0, %v2469_v47  ;;  %v695_v16 = vld [vmem:[%s14646_s0 + $0x1a8] sm:$0xff]  ;;  %v2470_v1 = vpack.c.bf16 %v2420_v28, %v2419_v42  ;;  %v2471_v60 = vpack.c.bf16 %v2422_v34, %v2421_v54  ;;  %v698_v42 = vld [vmem:[%s14646_s0 + $0x1c0] sm:$0xff] }
 0x12c   :  { %v1157_v14 = vpop.f32.mrf.mxu1  ;;  %v2985_v28 = vld [vmem:[#allocation2 + $0x181] sm:$0xff] }
 0x12d   :  { %14826 = vst [vmem:[#allocation16_spill] sm:$0xff] %v10782_v23  ;;  %v10790_v39 = vadd.f32 %v1157_v14, %v694_v17  ;;  %v10792_v59 = vpop.f32.mrf.mxu0  ;;  %v2423_v34 = vld [vmem:[#allocation2 + $0x180] sm:$0xff] }
 0x12e   :  { %v9042_v3 = vpop.f32.mrf.mxu1 }
 0x12f   :  { %14827 = vst [vmem:[#allocation17_spill] sm:$0xff] %v10790_v39  ;;  %v10797_v47 = vadd.f32 %v9042_v3, %v697_v56  ;;  %v10799_v23 = vpop.f32.mrf.mxu0  ;;  %v2986_v56 = vld [vmem:[#allocation2 + $0x189] sm:$0xff] }
 0x130   :  { %v1160_v40 = vpop.f32.mrf.mxu1  ;;  %v3034_v11 = vpack.c.bf16 %v2986_v56, %v2985_v28  ;;  %v670_v28 = vld [vmem:[%s14646_s0 + $0xe0] sm:$0xff] }
 0x131   :  { %14828 = vst [vmem:[#allocation18_spill] sm:$0xff] %v10797_v47  ;;  %v10804_v17 = vadd.f32 %v1160_v40, %v695_v16  ;;  %v10806_v14 = vpop.f32.mrf.mxu0  ;;  %9284 = vmatmul.mubr.msk.bf16.gmra.mxu0 %vm19_vm0, %v10503_v6  ;;  %v2424_v6 = vld [vmem:[#allocation2 + $0x188] sm:$0xff]  ;;  %v701_v16 = vld [vmem:[%s14646_s0 + $0x1d8] sm:$0xff] }
 0x132   :  { %v9045_v39 = vpop.f32.mrf.mxu1  ;;  %9216 = vmatmul.mubr.msk.bf16.gmra.mxu1 %vm19_vm0, %v2470_v1  ;;  %9287 = vmatprep.mubr.msk.bf16.mxu0 %vm19_vm0, %v10519_v20  ;;  %v2425_v1 = vld [vmem:[#allocation2 + $0x1c8] sm:$0xff] }
 0x133   :  { %14829 = vst [vmem:[#allocation19_spill] sm:$0xff] %v10804_v17  ;;  %v10816_v54 = vadd.f32 %v9045_v39, %v700_v33  ;;  %v10818_v40 = vpop.f32.mrf.mxu0  ;;  %9219 = vmatprep.mubr.msk.bf16.mxu1 %vm19_vm0, %v2471_v60  ;;  %v2426_v17 = vld [vmem:[#allocation2 + $0x1d0] sm:$0xff]  ;;  %v699_v39 = vld [vmem:[%s14646_s0 + $0x1c8] sm:$0xff]  ;;  %v2472_v60 = vpack.c.bf16 %v2424_v6, %v2423_v34  ;;  %v2427_v6 = vld [vmem:[#allocation2 + $0x1e0] sm:$0xff] }
 0x134   :  { %v1173_v3 = vpop.f32.mrf.mxu1  ;;  %v2473_v57 = vpack.c.bf16 %v2426_v17, %v2425_v1  ;;  %v702_v17 = vld [vmem:[%s14646_s0 + $0x1e0] sm:$0xff] }
 0x135   :  { %14830 = vst [vmem:[#allocation20_spill] sm:$0xff] %v10816_v54  ;;  %v10824_v47 = vadd.f32 %v1173_v3, %v698_v42  ;;  %v10826_v20 = vpop.f32.mrf.mxu0  ;;  %v704_v42 = vld [vmem:[%s14646_s0 + $0x1f0] sm:$0xff] }
 0x136   :  { %v9046_v33 = vpop.f32.mrf.mxu1 }
 0x137   :  { %14831 = vst [vmem:[#allocation21_spill] sm:$0xff] %v10824_v47  ;;  %v10831_v54 = vadd.f32 %v9046_v33, %v701_v16  ;;  %v10833_v29 = vpop.f32.mrf.mxu0  ;;  %v2428_v16 = vld [vmem:[#allocation2 + $0x1e8] sm:$0xff] }
 0x138   :  { %v1176_v41 = vpop.f32.mrf.mxu1 }
 0x139   :  { %14832 = vst [vmem:[#allocation22_spill] sm:$0xff] %v10831_v54  ;;  %v10838_v3 = vadd.f32 %v1176_v41, %v699_v39  ;;  %v10840_v47 = vpop.f32.mrf.mxu0  ;;  %9288 = vmatmul.mubr.msk.bf16.gmra.mxu0 %vm19_vm0, %v3034_v11  ;;  %v673_v11 = vld [vmem:[%s14646_s0 + $0xf8] sm:$0xff]  ;;  %v2474_v54 = vpack.c.bf16 %v2428_v16, %v2427_v6 }
 0x13a   :  { %v9049_v56 = vpop.f32.mrf.mxu1  ;;  %9220 = vmatmul.mubr.msk.bf16.gmra.mxu1 %vm19_vm0, %v2472_v60  ;;  %9291 = vmatprep.mubr.msk.bf16.mxu0 %vm19_vm0, %v10526_v36  ;;  %v705_v39 = vld [vmem:[%s14646_s0 + $0x1f8] sm:$0xff]  ;;  %v2430_v36 = vld [vmem:[#allocation2 + $0x200] sm:$0xff] }
 0x13b   :  { %14833 = vst [vmem:[#allocation23_spill] sm:$0xff] %v10838_v3  ;;  %v10852_v41 = vadd.f32 %v9049_v56, %v704_v42  ;;  %v1061_v34 = vpop.f32.mrf.mxu0  ;;  %9223 = vmatprep.mubr.msk.bf16.mxu1 %vm19_vm0, %v2473_v57  ;;  %v2429_v60 = vld [vmem:[#allocation2 + $0x1f8] sm:$0xff]  ;;  %v644_v57 = vld [vmem:[%s14646_s0 + $0x10] sm:$0xff]  ;;  %v703_v3 = vld [vmem:[%s14646_s0 + $0x1e8] sm:$0xff] }
 0x13c   :  { %v10858_v1 = vadd.f32 %v1061_v34, %v670_v28  ;;  %v1189_v33 = vpop.f32.mrf.mxu1  ;;  %v645_v6 = vld [vmem:[%s14646_s0 + $0x18] sm:$0xff] }
 0x13d   :  { %14834 = vst [vmem:[#allocation24_spill] sm:$0xff] %v10852_v41  ;;  %v10863_v42 = vadd.f32 %v1189_v33, %v702_v17  ;;  %v9018_v56 = vpop.f32.mrf.mxu0  ;;  %v671_v41 = vld [vmem:[%s14646_s0 + $0xe8] sm:$0xff]  ;;  %v10878_v33 = vpack.c.bf16 %v2430_v36, %v2429_v60 }
 0x13e   :  { %v10871_v28 = vadd.f32 %v9018_v56, %v673_v11  ;;  %v9050_v34 = vpop.f32.mrf.mxu1  ;;  %v1206_v11 = vadd.f32 %v10591_v46, %v644_v57  ;;  %v2433_v36 = vld [vmem:[#allocation2 + $0x228] sm:$0xff]  ;;  %v2434_v57 = vld [vmem:[#allocation2 + $0x230] sm:$0xff] }
 0x13f   :  { %14835 = vst [vmem:[#allocation25_spill] sm:$0xff] %v10863_v42  ;;  %v10876_v24 = vadd.f32 %v9050_v34, %v705_v39  ;;  %v1064_v17 = vpop.f32.mrf.mxu0  ;;  %14837 = vst [vmem:[#allocation27_spill] sm:$0xff] %v10878_v33  ;;  %v642_v42 = vld [vmem:[%s14646_s0] sm:$0xff]  ;;  %v2477_v48 = vpack.c.bf16 %v2434_v57, %v2433_v36 }
 0x140   :  { %v10883_v18 = vadd.f32 %v1064_v17, %v671_v41  ;;  %v1192_v9 = vpop.f32.mrf.mxu1  ;;  %v1204_v41 = vadd.f32 %v10606_v51, %v642_v42  ;;  %v648_v42 = vld [vmem:[%s14646_s0 + $0x30] sm:$0xff]  ;;  %v2999_v36 = vld [vmem:[#allocation2 + $0x259] sm:$0xff]  ;;  %v3000_v57 = vld [vmem:[#allocation2 + $0x261] sm:$0xff] }
 0x141   :  { %14836 = vst [vmem:[#allocation26_spill] sm:$0xff] %v10876_v24  ;;  %v10886_v56 = vadd.f32 %v1192_v9, %v703_v3  ;;  %v9125_v62 = vpop.f32.mrf.mxu0  ;;  %9292 = vmatmul.mubr.msk.bf16.gmra.mxu0 %vm19_vm0, %v10528_v38  ;;  %v2431_v9 = vld [vmem:[#allocation2 + $0x210] sm:$0xff]  ;;  %v2432_v3 = vld [vmem:[#allocation2 + $0x218] sm:$0xff]  ;;  %v643_v38 = vld [vmem:[%s14646_s0 + $0x8] sm:$0xff] }
 0x142   :  { %v9057_v16 = vpop.f32.mrf.mxu1  ;;  %9224 = vmatmul.mubr.msk.bf16.gmra.mxu1 %vm19_vm0, %v2474_v54  ;;  %9295 = vmatprep.mubr.msk.bf16.mxu0 %vm19_vm0, %v10536_v50  ;;  %v1207_v54 = vadd.f32 %v10616_v25, %v645_v6  ;;  %v646_v25 = vld [vmem:[%s14646_s0 + $0x20] sm:$0xff]  ;;  %v1210_v6 = vadd.f32 %v10636_v15, %v648_v42 }
 0x143   :  { %14838 = vst [vmem:[#allocation28_spill] sm:$0xff] %v10886_v56  ;;  %v1768_v39 = vadd.f32 %v9057_v16, %v1206_v11  ;;  %v2073_v46 = vpop.f32.mrf.mxu0  ;;  %9227 = vmatprep.mubr.msk.bf16.mxu1 %vm19_vm0, %v10878_v33  ;;  %v2476_v11 = vpack.c.bf16 %v2432_v3, %v2431_v9  ;;  %v1205_v16 = vadd.f32 %v10626_v7, %v643_v38  ;;  %v649_v7 = vld [vmem:[%s14646_s0 + $0x38] sm:$0xff]  ;;  %v2435_v9 = vld [vmem:[#allocation2 + $0x240] sm:$0xff] }
 0x144   :  { %v1511_v60 = vpop.f32.mrf.mxu1  ;;  %v1208_v15 = vadd.f32 %v10648_v21, %v646_v25  ;;  %v2438_v42 = vld [vmem:[#allocation2 + $0x260] sm:$0xff]  ;;  %v3041_v25 = vpack.c.bf16 %v3000_v57, %v2999_v36  ;;  %v3001_v36 = vld [vmem:[#allocation2 + $0x271] sm:$0xff] }
 0x145   :  { %v10903_v34 = vadd.f32 %v9125_v62, %v1768_v39  ;;  %v1766_v50 = vadd.f32 %v1511_v60, %v1204_v41  ;;  %v9126_v51 = vpop.f32.mrf.mxu0  ;;  %v3002_v57 = vld [vmem:[#allocation2 + $0x279] sm:$0xff] }
 0x146   :  { %v9058_v17 = vpop.f32.mrf.mxu1 }
 0x147   :  { %v10909_v33 = vadd.f32 %v2073_v46, %v1766_v50  ;;  %v1769_v56 = vadd.f32 %v9058_v17, %v1207_v54  ;;  %v2076_v24 = vpop.f32.mrf.mxu0  ;;  %v647_v54 = vld [vmem:[%s14646_s0 + $0x28] sm:$0xff] }
 0x148   :  { %v1514_v62 = vpop.f32.mrf.mxu1 }
 0x149   :  { %v10915_v41 = vadd.f32 %v9126_v51, %v1769_v56  ;;  %v1767_v39 = vadd.f32 %v1514_v62, %v1205_v16  ;;  %v9129_v60 = vpop.f32.mrf.mxu0  ;;  %9296 = vmatmul.mubr.msk.bf16.gmra.mxu0 %vm19_vm0, %v10538_v55  ;;  %v2436_v55 = vld [vmem:[#allocation2 + $0x248] sm:$0xff]  ;;  %v2437_v51 = vld [vmem:[#allocation2 + $0x258] sm:$0xff]  ;;  %v1209_v62 = vadd.f32 %v10663_v37, %v647_v54 }
 0x14a   :  { %v9061_v46 = vpop.f32.mrf.mxu1  ;;  %9228 = vmatmul.mubr.msk.bf16.gmra.mxu1 %vm19_vm0, %v2476_v11  ;;  %9299 = vmatprep.mubr.msk.bf16.mxu0 %vm19_vm0, %v10546_v5  ;;  %v1211_v5 = vadd.f32 %v10656_v32, %v649_v7  ;;  %v2478_v16 = vpack.c.bf16 %v2436_v55, %v2435_v9  ;;  %v650_v32 = vld [vmem:[%s14646_s0 + $0x40] sm:$0xff]  ;;  %v2439_v55 = vld [vmem:[#allocation2 + $0x270] sm:$0xff] }
 0x14b   :  { %v10926_v56 = vadd.f32 %v2076_v24, %v1767_v39  ;;  %v1772_v3 = vadd.f32 %v9061_v46, %v1210_v6  ;;  %v2089_v38 = vpop.f32.mrf.mxu0  ;;  %9231 = vmatprep.mubr.msk.bf16.mxu1 %vm19_vm0, %v2477_v48  ;;  %v652_v48 = vld [vmem:[%s14646_s0 + $0x50] sm:$0xff] }
 0x14c   :  { %v1527_v50 = vpop.f32.mrf.mxu1  ;;  %v1214_v7 = vadd.f32 %v10670_v45, %v652_v48  ;;  %v1212_v45 = vadd.f32 %v10682_v53, %v650_v32  ;;  %v2441_v48 = vld [vmem:[#allocation2 + $0x288] sm:$0xff] }
 0x14d   :  { %14839 = vst [vmem:[#allocation29_spill] sm:$0xff] %v10926_v56  ;;  %v10933_v17 = vadd.f32 %v9129_v60, %v1772_v3  ;;  %v1770_v21 = vadd.f32 %v1527_v50, %v1208_v15  ;;  %v9130_v24 = vpop.f32.mrf.mxu0  ;;  %v2479_v56 = vpack.c.bf16 %v2438_v42, %v2437_v51  ;;  %v653_v15 = vld [vmem:[%s14646_s0 + $0x58] sm:$0xff] }
 0x14e   :  { %v9062_v11 = vpop.f32.mrf.mxu1  ;;  %v2440_v42 = vld [vmem:[#allocation2 + $0x278] sm:$0xff] }
 0x14f   :  { %v10939_v6 = vadd.f32 %v2089_v38, %v1770_v21  ;;  %v1773_v39 = vadd.f32 %v9062_v11, %v1211_v5  ;;  %v2092_v46 = vpop.f32.mrf.mxu0  ;;  %v3003_v5 = vld [vmem:[#allocation2 + $0x289] sm:$0xff]  ;;  %v3004_v21 = vld [vmem:[#allocation2 + $0x291] sm:$0xff]  ;;  %v2480_v32 = vpack.c.bf16 %v2440_v42, %v2439_v55 }
 0x150   :  { %v1530_v60 = vpop.f32.mrf.mxu1  ;;  %v2442_v11 = vld [vmem:[#allocation2 + $0x290] sm:$0xff] }
 0x151   :  { %v10948_v9 = vadd.f32 %v9130_v24, %v1773_v39  ;;  %v1771_v3 = vadd.f32 %v1530_v60, %v1209_v62  ;;  %v9133_v37 = vpop.f32.mrf.mxu0  ;;  %9300 = vmatmul.mubr.msk.bf16.gmra.mxu0 %vm19_vm0, %v10548_v8  ;;  %v651_v8 = vld [vmem:[%s14646_s0 + $0x48] sm:$0xff]  ;;  %v3042_v39 = vpack.c.bf16 %v3002_v57, %v3001_v36  ;;  %v3043_v60 = vpack.c.bf16 %v3004_v21, %v3003_v5 }
 0x152   :  { %v9065_v38 = vpop.f32.mrf.mxu1  ;;  %9232 = vmatmul.mubr.msk.bf16.gmra.mxu1 %vm19_vm0, %v2478_v16  ;;  %9303 = vmatprep.mubr.msk.bf16.mxu0 %vm19_vm0, %v3041_v25  ;;  %v1215_v16 = vadd.f32 %v10690_v63, %v653_v15  ;;  %v258_v63 = vld [vmem:[%s14645_s2] sm:$0xff]  ;;  %v3006_v21 = vld [vmem:[#allocation2 + $0x2a9] sm:$0xff] }
 0x153   :  { %14840 = vst [vmem:[#allocation30_spill] sm:$0xff] %v10948_v9  ;;  %v10955_v54 = vadd.f32 %v2092_v46, %v1771_v3  ;;  %v1776_v50 = vadd.f32 %v9065_v38, %v1214_v7  ;;  %v2105_v51 = vpop.f32.mrf.mxu0  ;;  %9235 = vmatprep.mubr.msk.bf16.mxu1 %vm19_vm0, %v2479_v56  ;;  %v656_v56 = vld [vmem:[%s14646_s0 + $0x70] sm:$0xff]  ;;  %v1213_v7 = vadd.f32 %v10697_v10, %v651_v8  ;;  %v654_v15 = vld [vmem:[%s14646_s0 + $0x60] sm:$0xff]  ;;  %v657_v10 = vld [vmem:[%s14646_s0 + $0x78] sm:$0xff] }
 0x154   :  { %v1543_v24 = vpop.f32.mrf.mxu1  ;;  %v2481_v9 = vpack.c.bf16 %v2442_v11, %v2441_v48  ;;  %386 = vrot.lane.b32.xlu0 %v258_v63, %s9880_s29  ;;  %v1218_v55 = vadd.f32 %v10704_v22, %v656_v56  ;;  %v3005_v5 = vld [vmem:[#allocation2 + $0x2a1] sm:$0xff]  ;;  %v3007_v22 = vld [vmem:[#allocation2 + $0x2b9] sm:$0xff]  ;;  %v1216_v8 = vadd.f32 %v10716_v26, %v654_v15 }
 0x155   :  { %14841 = vst [vmem:[#allocation31_spill] sm:$0xff] %v10955_v54  ;;  %v10962_v25 = vadd.f32 %v9133_v37, %v1776_v50  ;;  %v1774_v53 = vadd.f32 %v1543_v24, %v1212_v45  ;;  %v9134_v62 = vpop.f32.mrf.mxu0  ;;  %v2443_v50 = vld [vmem:[#allocation2 + $0x2a0] sm:$0xff] }
 0x156   :  { %v9066_v46 = vpop.f32.mrf.mxu1  ;;  %v2446_v56 = vld [vmem:[#allocation2 + $0x2c0] sm:$0xff] }
 0x157   :  { %v10968_v3 = vadd.f32 %v2105_v51, %v1774_v53  ;;  %v1777_v38 = vadd.f32 %v9066_v46, %v1215_v16  ;;  %v2108_v54 = vpop.f32.mrf.mxu0  ;;  %v2444_v51 = vld [vmem:[#allocation2 + $0x2a8] sm:$0xff]  ;;  %v260_v53 = vld [vmem:[%s14645_s2 + $0x10] sm:$0xff] }
 0x158   :  { %v1546_v37 = vpop.f32.mrf.mxu1  ;;  %v3008_v16 = vld [vmem:[#allocation2 + $0x2c1] sm:$0xff]  ;;  %390 = vrot.lane.b32.xlu1 %v260_v53, %s9880_s29  ;;  %v2482_v15 = vpack.c.bf16 %v2444_v51, %v2443_v50  ;;  %v661_v51 = vld [vmem:[%s14646_s0 + $0x98] sm:$0xff] }
 0x159   :  { %v10981_v36 = vadd.f32 %v9134_v62, %v1777_v38  ;;  %v1775_v57 = vadd.f32 %v1546_v37, %v1213_v7  ;;  %v9137_v45 = vpop.f32.mrf.mxu0  ;;  %9304 = vmatmul.mubr.msk.bf16.gmra.mxu0 %vm19_vm0, %v3042_v39  ;;  %v259_v62 = vld [vmem:[%s14645_s2 + $0x8] sm:$0xff]  ;;  %v3044_v7 = vpack.c.bf16 %v3006_v21, %v3005_v5  ;;  %v660_v38 = vld [vmem:[%s14646_s0 + $0x90] sm:$0xff]  ;;  %v3045_v37 = vpack.c.bf16 %v3008_v16, %v3007_v22 }
 0x15a   :  { %v9069_v42 = vpop.f32.mrf.mxu1  ;;  %9236 = vmatmul.mubr.msk.bf16.gmra.mxu1 %vm19_vm0, %v2480_v32  ;;  %9307 = vmatprep.mubr.msk.bf16.mxu0 %vm19_vm0, %v3043_v60  ;;  %v655_v39 = vld [vmem:[%s14646_s0 + $0x68] sm:$0xff]  ;;  %v3009_v16 = vld [vmem:[#allocation2 + $0x2d1] sm:$0xff] }
 0x15b   :  { %v10987_v24 = vadd.f32 %v2108_v54, %v1775_v57  ;;  %v1780_v48 = vadd.f32 %v9069_v42, %v1218_v55  ;;  %v2121_v11 = vpop.f32.mrf.mxu0  ;;  %9239 = vmatprep.mubr.msk.bf16.mxu1 %vm19_vm0, %v2481_v9  ;;  %v2445_v54 = vld [vmem:[#allocation2 + $0x2b8] sm:$0xff]  ;;  %388 = vrot.lane.b32.xlu0 %v259_v62, %s9880_s29  ;;  %v1219_v9 = vadd.f32 %v10724_v43, %v657_v10  ;;  %v262_v10 = vld [vmem:[%s14645_s2 + $0x20] sm:$0xff] }
 0x15c   :  { %v1559_v26 = vpop.f32.mrf.mxu1  ;;  %v1217_v55 = vadd.f32 %v10731_v58, %v655_v39  ;;  %v2483_v62 = vpack.c.bf16 %v2446_v56, %v2445_v54  ;;  %v261_v43 = vld [vmem:[%s14645_s2 + $0x18] sm:$0xff]  ;;  %v1222_v58 = vadd.f32 %v10738_v27, %v660_v38  ;;  %v3011_v27 = vld [vmem:[#allocation2 + $0x2e9] sm:$0xff] }
 0x15d   :  { %v11002_v46 = vadd.f32 %v9137_v45, %v1780_v48  ;;  %v1778_v32 = vadd.f32 %v1559_v26, %v1216_v8  ;;  %v9138_v60 = vpop.f32.mrf.mxu0  ;;  %v658_v45 = vld [vmem:[%s14646_s0 + $0x80] sm:$0xff]  ;;  %392 = vrot.lane.b32.xlu1 %v261_v43, %s9880_s29  ;;  %v2447_v8 = vld [vmem:[#allocation2 + $0x2d0] sm:$0xff]  ;;  %v2448_v48 = vld [vmem:[#allocation2 + $0x2d8] sm:$0xff] }
 0x15e   :  { %v9070_v63 = vpop.f32.mrf.mxu1  ;;  %v3010_v39 = vld [vmem:[#allocation2 + $0x2d9] sm:$0xff]  ;;  %v1220_v26 = vadd.f32 %v10750_v12, %v658_v45  ;;  %v659_v38 = vld [vmem:[%s14646_s0 + $0x88] sm:$0xff]  ;;  %v664_v43 = vld [vmem:[%s14646_s0 + $0xb0] sm:$0xff]  ;;  %v2484_v45 = vpack.c.bf16 %v2448_v48, %v2447_v8 }
 0x15f   :  { %v11008_v57 = vadd.f32 %v2121_v11, %v1778_v32  ;;  %v1781_v42 = vadd.f32 %v9070_v63, %v1219_v9  ;;  %v2124_v53 = vpop.f32.mrf.mxu0  ;;  %394 = vrot.lane.b32.xlu0 %v262_v10, %s9880_s29  ;;  %v3012_v32 = vld [vmem:[#allocation2 + $0x2f1] sm:$0xff]  ;;  %v2449_v63 = vld [vmem:[#allocation2 + $0x2e8] sm:$0xff] }
 0x160   :  { %v1562_v50 = vpop.f32.mrf.mxu1  ;;  %v665_v48 = vld [vmem:[%s14646_s0 + $0xb8] sm:$0xff] }
 0x161   :  { %v11025_v5 = vadd.f32 %v9138_v60, %v1781_v42  ;;  %v1779_v21 = vadd.f32 %v1562_v50, %v1217_v55  ;;  %v9141_v22 = vpop.f32.mrf.mxu0  ;;  %9308 = vmatmul.mubr.msk.bf16.gmra.mxu0 %vm19_vm0, %v3044_v7  ;;  %v263_v60 = vld [vmem:[%s14645_s2 + $0x28] sm:$0xff]  ;;  %v264_v7 = vld [vmem:[%s14645_s2 + $0x30] sm:$0xff]  ;;  %v3047_v50 = vpack.c.bf16 %v3012_v32, %v3011_v27 }
 0x162   :  { %v9073_v11 = vpop.f32.mrf.mxu1  ;;  %9240 = vmatmul.mubr.msk.bf16.gmra.mxu1 %vm19_vm0, %v2482_v15  ;;  %9311 = vmatprep.mubr.msk.bf16.mxu0 %vm19_vm0, %v3045_v37  ;;  %v2450_v15 = vld [vmem:[#allocation2 + $0x2f0] sm:$0xff]  ;;  %v1223_v37 = vadd.f32 %v10758_v30, %v661_v51  ;;  %v265_v30 = vld [vmem:[%s14645_s2 + $0x38] sm:$0xff]  ;;  %v266_v51 = vld [vmem:[%s14645_s2 + $0x40] sm:$0xff] }
 0x163   :  { %v11031_v54 = vadd.f32 %v2124_v53, %v1779_v21  ;;  %v1784_v56 = vadd.f32 %v9073_v11, %v1222_v58  ;;  %v2137_v9 = vpop.f32.mrf.mxu0  ;;  %9243 = vmatprep.mubr.msk.bf16.mxu1 %vm19_vm0, %v2483_v62  ;;  %396 = vrot.lane.b32.xlu1 %v263_v60, %s9880_s29  ;;  %v3046_v62 = vpack.c.bf16 %v3010_v39, %v3009_v16  ;;  %v3013_v32 = vld [vmem:[#allocation2 + $0x301] sm:$0xff] }
 0x164   :  { %v1575_v12 = vpop.f32.mrf.mxu1  ;;  %398 = vrot.lane.b32.xlu0 %v264_v7, %s9880_s29  ;;  %v1221_v58 = vadd.f32 %v10765_v52, %v659_v38  ;;  %v2485_v7 = vpack.c.bf16 %v2450_v15, %v2449_v63  ;;  %v1226_v52 = vadd.f32 %v10772_v0, %v664_v43  ;;  %v3014_v38 = vld [vmem:[#allocation2 + $0x309] sm:$0xff]  ;;  %v3015_v0 = vld [vmem:[#allocation2 + $0x319] sm:$0xff] }
 0x165   :  { %v11046_v55 = vadd.f32 %v9141_v22, %v1784_v56  ;;  %v1782_v42 = vadd.f32 %v1575_v12, %v1220_v26  ;;  %v9142_v53 = vpop.f32.mrf.mxu0  ;;  %v662_v22 = vld [vmem:[%s14646_s0 + $0xa0] sm:$0xff]  ;;  %v2452_v56 = vld [vmem:[#allocation2 + $0x308] sm:$0xff] }
 0x166   :  { %v9074_v10 = vpop.f32.mrf.mxu1  ;;  %v2451_v26 = vld [vmem:[#allocation2 + $0x300] sm:$0xff]  ;;  %v1224_v12 = vadd.f32 %v10784_v4, %v662_v22  ;;  %v663_v43 = vld [vmem:[%s14646_s0 + $0xa8] sm:$0xff] }
 0x167   :  { %v11052_v21 = vadd.f32 %v2137_v9, %v1782_v42  ;;  %v1785_v11 = vadd.f32 %v9074_v10, %v1223_v37  ;;  %v2140_v60 = vpop.f32.mrf.mxu0  ;;  %400 = vrot.lane.b32.xlu1 %v265_v30, %s9880_s29  ;;  %v3016_v42 = vld [vmem:[#allocation2 + $0x321] sm:$0xff]  ;;  %v2453_v10 = vld [vmem:[#allocation2 + $0x318] sm:$0xff]  ;;  %v668_v30 = vld [vmem:[%s14646_s0 + $0xd0] sm:$0xff]  ;;  %v2486_v22 = vpack.c.bf16 %v2452_v56, %v2451_v26 }
 0x168   :  { %v1578_v8 = vpop.f32.mrf.mxu1  ;;  %402 = vrot.lane.b32.xlu0 %v266_v51, %s9880_s29  ;;  %v669_v56 = vld [vmem:[%s14646_s0 + $0xd8] sm:$0xff] }
 0x169   :  { %v11069_v16 = vadd.f32 %v9142_v53, %v1785_v11  ;;  %v1783_v39 = vadd.f32 %v1578_v8, %v1221_v58  ;;  %v9145_v27 = vpop.f32.mrf.mxu0  ;;  %9312 = vmatmul.mubr.msk.bf16.gmra.mxu0 %vm19_vm0, %v3046_v62  ;;  %v267_v53 = vld [vmem:[%s14645_s2 + $0x48] sm:$0xff]  ;;  %v268_v62 = vld [vmem:[%s14645_s2 + $0x50] sm:$0xff]  ;;  %v3049_v8 = vpack.c.bf16 %v3016_v42, %v3015_v0  ;;  %v2456_v42 = vld [vmem:[#allocation2 + $0x338] sm:$0xff] }
 0x16a   :  { %v9077_v9 = vpop.f32.mrf.mxu1  ;;  %9244 = vmatmul.mubr.msk.bf16.gmra.mxu1 %vm19_vm0, %v2484_v45  ;;  %9315 = vmatprep.mubr.msk.bf16.mxu0 %vm19_vm0, %v3047_v50  ;;  %v2454_v45 = vld [vmem:[#allocation2 + $0x320] sm:$0xff]  ;;  %v1227_v50 = vadd.f32 %v10792_v59, %v665_v48  ;;  %v269_v59 = vld [vmem:[%s14645_s2 + $0x58] sm:$0xff] }
 0x16b   :  { %v11075_v63 = vadd.f32 %v2140_v60, %v1783_v39  ;;  %v1788_v15 = vadd.f32 %v9077_v9, %v1226_v52  ;;  %v2153_v37 = vpop.f32.mrf.mxu0  ;;  %9247 = vmatprep.mubr.msk.bf16.mxu1 %vm19_vm0, %v2485_v7  ;;  %404 = vrot.lane.b32.xlu1 %v267_v53, %s9880_s29  ;;  %v3048_v7 = vpack.c.bf16 %v3014_v38, %v3013_v32  ;;  %v270_v48 = vld [vmem:[%s14645_s2 + $0x60] sm:$0xff] }
 0x16c   :  { %v1591_v4 = vpop.f32.mrf.mxu1  ;;  %406 = vrot.lane.b32.xlu0 %v268_v62, %s9880_s29  ;;  %v1225_v52 = vadd.f32 %v10799_v23, %v663_v43  ;;  %v2487_v62 = vpack.c.bf16 %v2454_v45, %v2453_v10  ;;  %v1230_v23 = vadd.f32 %v10806_v14, %v668_v30  ;;  %v3018_v43 = vld [vmem:[#allocation2 + $0x339] sm:$0xff]  ;;  %v4080_v14 = vld [vmem:[#allocation2 + $0x30] sm:$0xff]  ;;  %v667_v30 = vld [vmem:[%s14646_s0 + $0xc8] sm:$0xff] }
 0x16d   :  { %v11090_v58 = vadd.f32 %v9145_v27, %v1788_v15  ;;  %v1786_v11 = vadd.f32 %v1591_v4, %v1224_v12  ;;  %v9146_v60 = vpop.f32.mrf.mxu0  ;;  %v666_v27 = vld [vmem:[%s14646_s0 + $0xc0] sm:$0xff]  ;;  %v2455_v12 = vld [vmem:[#allocation2 + $0x330] sm:$0xff] }
 0x16e   :  { %v9078_v51 = vpop.f32.mrf.mxu1  ;;  %v3017_v15 = vld [vmem:[#allocation2 + $0x331] sm:$0xff]  ;;  %v1228_v4 = vadd.f32 %v10818_v40, %v666_v27  ;;  %v2488_v27 = vpack.c.bf16 %v2456_v42, %v2455_v12 }
 0x16f   :  { %v11096_v39 = vadd.f32 %v2153_v37, %v1786_v11  ;;  %v1789_v9 = vadd.f32 %v9078_v51, %v1227_v50  ;;  %v2156_v53 = vpop.f32.mrf.mxu0  ;;  %408 = vrot.lane.b32.xlu1 %v269_v59, %s9880_s29  ;;  %v4081_v11 = vld [vmem:[#allocation2 + $0x38] sm:$0xff]  ;;  %v672_v59 = vld [vmem:[%s14646_s0 + $0xf0] sm:$0xff] }
 0x170   :  { %v1594_v26 = vpop.f32.mrf.mxu1  ;;  %410 = vrot.lane.b32.xlu0 %v270_v48, %s9880_s29  ;;  %v3517_v51 = vld [vmem:[#allocation2 + $0x1a] sm:$0xff] }
 0x171   :  { %v11113_v32 = vadd.f32 %v9146_v60, %v1789_v9  ;;  %v1787_v38 = vadd.f32 %v1594_v26, %v1225_v52  ;;  %v9149_v0 = vpop.f32.mrf.mxu0  ;;  %9316 = vmatmul.mubr.msk.bf16.gmra.mxu0 %vm19_vm0, %v3048_v7  ;;  %v271_v60 = vld [vmem:[%s14645_s2 + $0x68] sm:$0xff]  ;;  %v272_v7 = vld [vmem:[%s14645_s2 + $0x70] sm:$0xff]  ;;  %v4144_v26 = vpack.c.bf16 %v4081_v11, %v4080_v14 }
 0x172   :  { %v9081_v37 = vpop.f32.mrf.mxu1  ;;  %9248 = vmatmul.mubr.msk.bf16.gmra.mxu1 %vm19_vm0, %v2486_v22  ;;  %9319 = vmatprep.mubr.msk.bf16.mxu0 %vm19_vm0, %v3049_v8  ;;  %v3518_v22 = vld [vmem:[#allocation2 + $0x22] sm:$0xff]  ;;  %v1231_v8 = vadd.f32 %v10826_v20, %v669_v56  ;;  %v273_v20 = vld [vmem:[%s14645_s2 + $0x78] sm:$0xff] }
 0x173   :  { %v11119_v10 = vadd.f32 %v2156_v53, %v1787_v38  ;;  %v1792_v45 = vadd.f32 %v9081_v37, %v1230_v23  ;;  %v2169_v50 = vpop.f32.mrf.mxu0  ;;  %9251 = vmatprep.mubr.msk.bf16.mxu1 %vm19_vm0, %v2487_v62  ;;  %412 = vrot.lane.b32.xlu1 %v271_v60, %s9880_s29  ;;  %v3050_v62 = vpack.c.bf16 %v3018_v43, %v3017_v15  ;;  %v274_v56 = vld [vmem:[%s14645_s2 + $0x80] sm:$0xff]  ;;  %v3519_v14 = vld [vmem:[#allocation2 + $0x32] sm:$0xff] }
 0x174   :  { %v1607_v40 = vpop.f32.mrf.mxu1  ;;  %414 = vrot.lane.b32.xlu0 %v272_v7, %s9880_s29  ;;  %v1229_v23 = vadd.f32 %v10833_v29, %v667_v30  ;;  %v3581_v7 = vpack.c.bf16 %v3518_v22, %v3517_v51  ;;  %v1234_v29 = vadd.f32 %v10840_v47, %v672_v59  ;;  %v3520_v47 = vld [vmem:[#allocation2 + $0x3a] sm:$0xff]  ;;  %v276_v51 = vld [vmem:[%s14645_s2 + $0x90] sm:$0xff] }
 0x175   :  { %v11134_v52 = vadd.f32 %v9149_v0, %v1792_v45  ;;  %v1790_v9 = vadd.f32 %v1607_v40, %v1228_v4  ;;  %v9150_v53 = vpop.f32.mrf.mxu0  ;;  %v4082_v4 = vld [vmem:[#allocation2 + $0x48] sm:$0xff]  ;;  %v4083_v45 = vld [vmem:[#allocation2 + $0x50] sm:$0xff] }
 0x176   :  { %v9082_v48 = vpop.f32.mrf.mxu1  ;;  %v275_v40 = vld [vmem:[%s14645_s2 + $0x88] sm:$0xff] }
 0x177   :  { %v11140_v38 = vadd.f32 %v2169_v50, %v1790_v9  ;;  %v1793_v37 = vadd.f32 %v9082_v48, %v1231_v8  ;;  %v2172_v60 = vpop.f32.mrf.mxu0  ;;  %416 = vrot.lane.b32.xlu1 %v273_v20, %s9880_s29  ;;  %v3521_v8 = vld [vmem:[#allocation2 + $0x4a] sm:$0xff]  ;;  %v3522_v9 = vld [vmem:[#allocation2 + $0x52] sm:$0xff]  ;;  %v4145_v48 = vpack.c.bf16 %v4083_v45, %v4082_v4  ;;  %v3523_v4 = vld [vmem:[#allocation2 + $0x62] sm:$0xff] }
 0x178   :  { %v1610_v0 = vpop.f32.mrf.mxu1  ;;  %418 = vrot.lane.b32.xlu0 %v274_v56, %s9880_s29  ;;  %v3583_v56 = vpack.c.bf16 %v3522_v9, %v3521_v8  ;;  %v3524_v45 = vld [vmem:[#allocation2 + $0x6a] sm:$0xff]  ;;  %v9878_v9 = vld [vmem:[%s14644_s1 + $0x78] sm:$0xff]  }
 0x179   :  { %v11151_v12 = vadd.f32 %v9150_v53, %v1793_v37  ;;  %v1791_v15 = vadd.f32 %v1610_v0, %v1229_v23  ;;  %v9153_v42 = vpop.f32.mrf.mxu0  ;;  %9320 = vmatmul.mubr.msk.bf16.gmra.mxu0 %vm19_vm0, %v3050_v62  ;;  %v3582_v37 = vpack.c.bf16 %v3520_v47, %v3519_v14  ;;  %v277_v0 = vld [vmem:[%s14645_s2 + $0x98] sm:$0xff]  ;;  %v9877_v47 = vld [vmem:[%s14644_s1 + $0x88] sm:$0xff]  }
 0x17a   :  { %v9085_v43 = vpop.f32.mrf.mxu1  ;;  %9252 = vmatmul.mubr.msk.bf16.gmra.mxu1 %vm19_vm0, %v2488_v27  ;;  %9395 = vmatprep.mubr.msk.bf16.mxu0 %vm19_vm0, %v4144_v26  ;;  %v4084_v27 = vld [vmem:[#allocation2 + $0x60] sm:$0xff]  ;;  %v4085_v26 = vld [vmem:[#allocation2 + $0x68] sm:$0xff] }
 0x17b   :  { %v11156_v50 = vadd.f32 %v2172_v60, %v1791_v15  ;;  %v1796_v11 = vadd.f32 %v9085_v43, %v1234_v29  ;;  %v2185_v30 = vpop.f32.mrf.mxu0  ;;  %9327 = vmatprep.mubr.msk.bf16.mxu1 %vm19_vm0, %v3581_v7  ;;  %420 = vrot.lane.b32.xlu1 %v275_v40, %s9880_s29  ;;  %v4146_v15 = vpack.c.bf16 %v4085_v26, %v4084_v27  ;;  %v4086_v40 = vld [vmem:[#allocation2 + $0x78] sm:$0xff]  ;;  %v280_v27 = vld [vmem:[%s14645_s2 + $0xb0] sm:$0xff] }
 0x17c   :  { %v1623_v22 = vpop.f32.mrf.mxu1  ;;  %422 = vrot.lane.b32.xlu0 %v276_v51, %s9880_s29  ;;  %v4087_v51 = vld [vmem:[#allocation2 + $0x80] sm:$0xff] }
 0x17d   :  { %v11167_v53 = vadd.f32 %v9153_v42, %v1796_v11  ;;  %v1794_v62 = vadd.f32 %v1623_v22, %v10858_v1  ;;  %v9154_v59 = vpop.f32.mrf.mxu0  ;;  %v278_v1 = vld [vmem:[%s14645_s2 + $0xa0] sm:$0xff]  ;;  %v9619_v42 = vld [vmem:[%s14644_s1 + $0x70] sm:$0xff]  }
 0x17e   :  { %v9086_v23 = vpop.f32.mrf.mxu1  ;;  %v9620_v11 = vld [vmem:[%s14644_s1 + $0x80] sm:$0xff]  }
 0x17f   :  { %v11170_v60 = vadd.f32 %v2185_v30, %v1794_v62  ;;  %v1797_v7 = vadd.f32 %v9086_v23, %v10871_v28  ;;  %v2188_v20 = vpop.f32.mrf.mxu0  ;;  %424 = vrot.lane.b32.xlu1 %v277_v0, %s9880_s29  ;;  %v3526_v23 = vld [vmem:[#allocation2 + $0x82] sm:$0xff] }
 0x180   :  { %v1626_v29 = vpop.f32.mrf.mxu1  ;;  %426 = vrot.lane.b32.xlu0 %v278_v1, %s9880_s29  ;;  %v3584_v1 = vpack.c.bf16 %v3524_v45, %v3523_v4  ;;  %v282_v4 = vld [vmem:[%s14645_s2 + $0xc0] sm:$0xff] }
 0x181   :  { %v11184_v28 = vadd.f32 %v9154_v59, %v1797_v7  ;;  %v1795_v43 = vadd.f32 %v1626_v29, %v10883_v18  ;;  %v9157_v14 = vpop.f32.mrf.mxu0  ;;  %9396 = vmatmul.mubr.msk.bf16.vlgmr.msra.gmra.mxu0 %vm19_vm0, %v4145_v48  ;;  %v4088_v18 = vld [vmem:[#allocation2 + $0x90] sm:$0xff]  ;;  %v4089_v59 = vld [vmem:[#allocation2 + $0x98] sm:$0xff]  ;;  %v279_v48 = vld [vmem:[%s14645_s2 + $0xa8] sm:$0xff] }
 0x182   :  { %v9089_v30 = vpop.f32.mrf.mxu1  ;;  %9328 = vmatmul.mubr.msk.bf16.vlgmr.msra.gmra.mxu1 %vm19_vm0, %v3582_v37  ;;  %9528 = vmatpush3.bf16.msra.mxu0 %v9877_v47  ;;  %v4148_v29 = vpack.c.bf16 %v4089_v59, %v4088_v18  ;;  %v4090_v18 = vld [vmem:[#allocation2 + $0xa8] sm:$0xff] }
 0x183   :  { %v11195_v22 = vadd.f32 %v2188_v20, %v1795_v43  ;;  %v1800_v8 = vadd.f32 %v9089_v30, %v10603_v49  ;;  %9460 = vmatpush3.bf16.msra.mxu1 %v9878_v9  ;;  %v2201_v62 = vpop.f32.mrf.mxu0  ;;  %9331 = vmatprep.mubr.msk.bf16.mxu1 %vm19_vm0, %v3583_v56  ;;  %v3525_v49 = vld [vmem:[#allocation2 + $0x7a] sm:$0xff]  ;;  %v4147_v56 = vpack.c.bf16 %v4087_v51, %v4086_v40 }
 0x184   :  { %v1639_v26 = vpop.f32.mrf.mxu1  ;;  %9399 = vmatprep.mubr.msk.bf16.mxu0 %vm19_vm0, %v4146_v15  ;;  %9461 = vmatprep.subr.bf16.mxu1 %v9619_v42  ;;  %v3528_v51 = vld [vmem:[#allocation2 + $0x9a] sm:$0xff] }
 0x185   :  { %v11209_v37 = vadd.f32 %v9157_v14, %v1800_v8  ;;  %v1798_v7 = vadd.f32 %v1639_v26, %v10614_v61  ;;  %v9158_v20 = vpop.f32.mrf.mxu0  ;;  %9529 = vmatprep.subr.bf16.mxu0 %v9620_v11  ;;  %428 = vrot.lane.b32.xlu1 %v279_v48, %s9880_s29  ;;  %v3585_v14 = vpack.c.bf16 %v3526_v23, %v3525_v49  ;;  %v281_v61 = vld [vmem:[%s14645_s2 + $0xb8] sm:$0xff]  ;;  %v4091_v8 = vld [vmem:[#allocation2 + $0xb0] sm:$0xff]  ;;  %v4093_v48 = vld [vmem:[#allocation2 + $0xc8] sm:$0xff] }
 0x186   :  { %v9090_v0 = vpop.f32.mrf.mxu1  ;;  %9530 = vmatpush3.bf16.msra.mxu0 %v9620_v11  ;;  %430 = vrot.lane.b32.xlu0 %v280_v27, %s9880_s29  ;;  %v283_v27 = vld [vmem:[%s14645_s2 + $0xc8] sm:$0xff]  ;;  %v3530_v23 = vld [vmem:[#allocation2 + $0xb2] sm:$0xff] }
 0x187   :  { %v11214_v43 = vadd.f32 %v2201_v62, %v1798_v7  ;;  %v1801_v15 = vadd.f32 %v9090_v0, %v10624_v2  ;;  %v2204_v30 = vpop.f32.mrf.mxu0  ;;  %9462 = vmatpush3.bf16.msra.mxu1 %v9619_v42  ;;  %v3527_v2 = vld [vmem:[#allocation2 + $0x92] sm:$0xff]  ;;  %v3529_v49 = vld [vmem:[#allocation2 + $0xaa] sm:$0xff]  ;;  %v4149_v0 = vpack.c.bf16 %v4091_v8, %v4090_v18 }
 0x188   :  { %v1642_v47 = vpop.f32.mrf.mxu1  ;;  %v284_v7 = vld [vmem:[%s14645_s2 + $0xd0] sm:$0xff]  ;;  %v4094_v8 = vld [vmem:[#allocation2 + $0xd8] sm:$0xff] }
 0x189   :  { %v11223_v45 = vadd.f32 %v9158_v20, %v1801_v15  ;;  %v1799_v11 = vadd.f32 %v1642_v47, %v10634_v13  ;;  %v9161_v40 = vpop.f32.mrf.mxu0  ;;  %9400 = vmatmul.mubr.msk.bf16.gmra.mxu0 %vm19_vm0, %v4147_v56  ;;  %432 = vrot.lane.b32.xlu1 %v281_v61, %s9880_s29  ;;  %v4092_v13 = vld [vmem:[#allocation2 + $0xc0] sm:$0xff]  ;;  %v3587_v47 = vpack.c.bf16 %v3530_v23, %v3529_v49  ;;  %v3532_v18 = vld [vmem:[#allocation2 + $0xca] sm:$0xff] }
 0x18a   :  { %v9093_v42 = vpop.f32.mrf.mxu1  ;;  %9332 = vmatmul.mubr.msk.bf16.gmra.mxu1 %vm19_vm0, %v3584_v1  ;;  %9403 = vmatprep.mubr.msk.bf16.mxu0 %vm19_vm0, %v4148_v29  ;;  %v3586_v29 = vpack.c.bf16 %v3528_v51, %v3527_v2  ;;  %v4150_v15 = vpack.c.bf16 %v4093_v48, %v4092_v13  ;;  %v14842_v13 = vld [vmem:[#allocation4_spill] sm:$0xff]  ;;  %v287_v49 = vld [vmem:[%s14645_s2 + $0xe8] sm:$0xff] }
 0x18b   :  { %v11230_v9 = vadd.f32 %v2204_v30, %v1799_v11  ;;  %v1804_v62 = vadd.f32 %v9093_v42, %v10646_v19  ;;  %v2217_v59 = vpop.f32.mrf.mxu0  ;;  %9335 = vmatprep.mubr.msk.bf16.mxu1 %vm19_vm0, %v3585_v14  ;;  %434 = vrot.lane.b32.xlu0 %v282_v4, %s9880_s29  ;;  %v285_v4 = vld [vmem:[%s14645_s2 + $0xd8] sm:$0xff]  ;;  %v286_v11 = vld [vmem:[%s14645_s2 + $0xe0] sm:$0xff] }
 0x18c   :  { %v1655_v26 = vpop.f32.mrf.mxu1 }
 0x18d   :  { %v11241_v20 = vadd.f32 %v9161_v40, %v1804_v62  ;;  %v1802_v19 = vadd.f32 %v1655_v26, %v10654_v31  ;;  %v9162_v56 = vpop.f32.mrf.mxu0  ;;  %436 = vrot.lane.b32.xlu1 %v283_v27, %s9880_s29  ;;  %v4095_v62 = vld [vmem:[#allocation2 + $0xe0] sm:$0xff]  ;;  %v4097_v26 = vld [vmem:[#allocation2 + $0xf8] sm:$0xff] }
 0x18e   :  { %v9094_v1 = vpop.f32.mrf.mxu1 }
 0x18f   :  { %v11245_v30 = vadd.f32 %v2217_v59, %v1802_v19  ;;  %v1805_v14 = vadd.f32 %v9094_v1, %v10661_v35  ;;  %v2220_v61 = vpop.f32.mrf.mxu0  ;;  %438 = vrot.lane.b32.xlu0 %v284_v7, %s9880_s29  ;;  %v3531_v35 = vld [vmem:[#allocation2 + $0xc2] sm:$0xff]  ;;  %v3533_v7 = vld [vmem:[#allocation2 + $0xda] sm:$0xff] }
 0x190   :  { %v1658_v31 = vpop.f32.mrf.mxu1  ;;  %v3534_v19 = vld [vmem:[#allocation2 + $0xe2] sm:$0xff] }
 0x191   :  { %v11255_v40 = vadd.f32 %v9162_v56, %v1805_v14  ;;  %v1803_v2 = vadd.f32 %v1658_v31, %v10668_v44  ;;  %v9165_v42 = vpop.f32.mrf.mxu0  ;;  %9404 = vmatmul.mubr.msk.bf16.gmra.mxu0 %vm19_vm0, %v4149_v0  ;;  %440 = vrot.lane.b32.xlu1 %v285_v4, %s9880_s29  ;;  %v4096_v44 = vld [vmem:[#allocation2 + $0xf0] sm:$0xff]  ;;  %v14844_v1 = vld [vmem:[#allocation5_spill] sm:$0xff]  ;;  %v4151_v14 = vpack.c.bf16 %v4095_v62, %v4094_v8  ;;  %v290_v8 = vld [vmem:[%s14645_s2 + $0x100] sm:$0xff] }
 0x192   :  { %v9097_v51 = vpop.f32.mrf.mxu1  ;;  %9336 = vmatmul.mubr.msk.bf16.gmra.mxu1 %vm19_vm0, %v3586_v29  ;;  %9407 = vmatprep.mubr.msk.bf16.mxu0 %vm19_vm0, %v4150_v15  ;;  %v288_v56 = vld [vmem:[%s14645_s2 + $0xf0] sm:$0xff]  ;;  %v4152_v4 = vpack.c.bf16 %v4097_v26, %v4096_v44 }
 0x193   :  { %v11262_v59 = vadd.f32 %v2220_v61, %v1803_v2  ;;  %v1808_v48 = vadd.f32 %v9097_v51, %v14842_v13  ;;  %v2233_v27 = vpop.f32.mrf.mxu0  ;;  %9339 = vmatprep.mubr.msk.bf16.mxu1 %vm19_vm0, %v3587_v47  ;;  %442 = vrot.lane.b32.xlu0 %v286_v11, %s9880_s29  ;;  %v3588_v47 = vpack.c.bf16 %v3532_v18, %v3531_v35  ;;  %v14846_v11 = vld [vmem:[#allocation6_spill] sm:$0xff]  ;;  %v14848_v35 = vld [vmem:[#allocation7_spill] sm:$0xff] }
 0x194   :  { %v1671_v23 = vpop.f32.mrf.mxu1  ;;  %v3589_v13 = vpack.c.bf16 %v3534_v19, %v3533_v7  ;;  %v3535_v44 = vld [vmem:[#allocation2 + $0xf2] sm:$0xff] }
 0x195   :  { %v11273_v0 = vadd.f32 %v9165_v42, %v1808_v48  ;;  %v1806_v29 = vadd.f32 %v1671_v23, %v14844_v1  ;;  %v9166_v15 = vpop.f32.mrf.mxu0  ;;  %444 = vrot.lane.b32.xlu1 %v287_v49, %s9880_s29  ;;  %v289_v42 = vld [vmem:[%s14645_s2 + $0xf8] sm:$0xff]  ;;  %v4098_v23 = vld [vmem:[#allocation2 + $0x108] sm:$0xff]  ;;  %v4099_v7 = vld [vmem:[#allocation2 + $0x110] sm:$0xff] }
 0x196   :  { %v9098_v61 = vpop.f32.mrf.mxu1  ;;  %v3536_v49 = vld [vmem:[#allocation2 + $0xfa] sm:$0xff] }
 0x197   :  { %14843 = vst [vmem:[#allocation4_spill] sm:$0xff] %v11273_v0  ;;  %v11277_v31 = vadd.f32 %v2233_v27, %v1806_v29  ;;  %v1809_v2 = vadd.f32 %v9098_v61, %v14846_v11  ;;  %v2236_v51 = vpop.f32.mrf.mxu0  ;;  %446 = vrot.lane.b32.xlu0 %v288_v56, %s9880_s29  ;;  %v14850_v56 = vld [vmem:[#allocation8_spill] sm:$0xff]  ;;  %v291_v61 = vld [vmem:[%s14645_s2 + $0x108] sm:$0xff]  ;;  %v3538_v11 = vld [vmem:[#allocation2 + $0x112] sm:$0xff] }
 0x198   :  { %v1674_v48 = vpop.f32.mrf.mxu1 }
 0x199   :  { %14845 = vst [vmem:[#allocation5_spill] sm:$0xff] %v11277_v31  ;;  %v11287_v62 = vadd.f32 %v9166_v15, %v1809_v2  ;;  %v1807_v18 = vadd.f32 %v1674_v48, %v14848_v35  ;;  %v9169_v27 = vpop.f32.mrf.mxu0  ;;  %9408 = vmatmul.mubr.msk.bf16.gmra.mxu0 %vm19_vm0, %v4151_v14  ;;  %448 = vrot.lane.b32.xlu1 %v289_v42, %s9880_s29  ;;  %v4100_v15 = vld [vmem:[#allocation2 + $0x120] sm:$0xff]  ;;  %v4101_v14 = vld [vmem:[#allocation2 + $0x128] sm:$0xff]  ;;  %v292_v2 = vld [vmem:[%s14645_s2 + $0x110] sm:$0xff] }
 0x19a   :  { %v9101_v26 = vpop.f32.mrf.mxu1  ;;  %9340 = vmatmul.mubr.msk.bf16.gmra.mxu1 %vm19_vm0, %v3588_v47  ;;  %9411 = vmatprep.mubr.msk.bf16.mxu0 %vm19_vm0, %v4152_v4  ;;  %v3537_v4 = vld [vmem:[#allocation2 + $0x10a] sm:$0xff]  ;;  %v4153_v35 = vpack.c.bf16 %v4099_v7, %v4098_v23  ;;  %v294_v23 = vld [vmem:[%s14645_s2 + $0x120] sm:$0xff] }
 0x19b   :  { %14847 = vst [vmem:[#allocation6_spill] sm:$0xff] %v11287_v62  ;;  %v11294_v19 = vadd.f32 %v2236_v51, %v1807_v18  ;;  %v1812_v1 = vadd.f32 %v9101_v26, %v14850_v56  ;;  %v2249_v29 = vpop.f32.mrf.mxu0  ;;  %9343 = vmatprep.mubr.msk.bf16.mxu1 %vm19_vm0, %v3589_v13  ;;  %450 = vrot.lane.b32.xlu0 %v290_v8, %s9880_s29  ;;  %v14852_v42 = vld [vmem:[#allocation9_spill] sm:$0xff] }
 0x19c   :  { %v1687_v47 = vpop.f32.mrf.mxu1  ;;  %v3590_v18 = vpack.c.bf16 %v3536_v49, %v3535_v44  ;;  %v4154_v26 = vpack.c.bf16 %v4101_v14, %v4100_v15  ;;  %v3591_v0 = vpack.c.bf16 %v3538_v11, %v3537_v4  ;;  %v14856_v44 = vld [vmem:[#allocation11_spill] sm:$0xff]  ;;  %v3540_v14 = vld [vmem:[#allocation2 + $0x12a] sm:$0xff] }
 0x19d   :  { %14849 = vst [vmem:[#allocation7_spill] sm:$0xff] %v11294_v19  ;;  %v11305_v51 = vadd.f32 %v9169_v27, %v1812_v1  ;;  %v1810_v48 = vadd.f32 %v1687_v47, %v14852_v42  ;;  %v9170_v13 = vpop.f32.mrf.mxu0  ;;  %452 = vrot.lane.b32.xlu1 %v291_v61, %s9880_s29  ;;  %v14854_v19 = vld [vmem:[#allocation10_spill] sm:$0xff]  ;;  %v293_v27 = vld [vmem:[%s14645_s2 + $0x118] sm:$0xff]  ;;  %v4103_v47 = vld [vmem:[#allocation2 + $0x140] sm:$0xff] }
 0x19e   :  { %v9102_v8 = vpop.f32.mrf.mxu1  ;;  %v4102_v61 = vld [vmem:[#allocation2 + $0x138] sm:$0xff]  ;;  %v4104_v42 = vld [vmem:[#allocation2 + $0x150] sm:$0xff] }
 0x19f   :  { %14851 = vst [vmem:[#allocation8_spill] sm:$0xff] %v11305_v51  ;;  %v11309_v56 = vadd.f32 %v2249_v29, %v1810_v48  ;;  %v1813_v62 = vadd.f32 %v9102_v8, %v14854_v19  ;;  %v2252_v31 = vpop.f32.mrf.mxu0  ;;  %454 = vrot.lane.b32.xlu0 %v292_v2, %s9880_s29  ;;  %v3539_v19 = vld [vmem:[#allocation2 + $0x122] sm:$0xff]  ;;  %v4105_v48 = vld [vmem:[#allocation2 + $0x158] sm:$0xff] }
 0x1a0   :  { %v1690_v1 = vpop.f32.mrf.mxu1  ;;  %v3541_v8 = vld [vmem:[#allocation2 + $0x13a] sm:$0xff] }
 0x1a1   :  { %14853 = vst [vmem:[#allocation9_spill] sm:$0xff] %v11309_v56  ;;  %v11319_v7 = vadd.f32 %v9170_v13, %v1813_v62  ;;  %v1811_v49 = vadd.f32 %v1690_v1, %v14856_v44  ;;  %v9173_v29 = vpop.f32.mrf.mxu0  ;;  %9412 = vmatmul.mubr.msk.bf16.gmra.mxu0 %vm19_vm0, %v4153_v35  ;;  %456 = vrot.lane.b32.xlu1 %v293_v27, %s9880_s29  ;;  %v14858_v62 = vld [vmem:[#allocation12_spill] sm:$0xff]  ;;  %v295_v13 = vld [vmem:[%s14645_s2 + $0x128] sm:$0xff] }
 0x1a2   :  { %v9105_v15 = vpop.f32.mrf.mxu1  ;;  %9344 = vmatmul.mubr.msk.bf16.gmra.mxu1 %vm19_vm0, %v3590_v18  ;;  %9415 = vmatprep.mubr.msk.bf16.mxu0 %vm19_vm0, %v4154_v26  ;;  %v3542_v18 = vld [vmem:[#allocation2 + $0x142] sm:$0xff]  ;;  %v4155_v44 = vpack.c.bf16 %v4103_v47, %v4102_v61 }
 0x1a3   :  { %14855 = vst [vmem:[#allocation10_spill] sm:$0xff] %v11319_v7  ;;  %v11326_v4 = vadd.f32 %v2252_v31, %v1811_v49  ;;  %v1816_v11 = vadd.f32 %v9105_v15, %v14858_v62  ;;  %v2265_v2 = vpop.f32.mrf.mxu0  ;;  %9347 = vmatprep.mubr.msk.bf16.mxu1 %vm19_vm0, %v3591_v0  ;;  %458 = vrot.lane.b32.xlu0 %v294_v23, %s9880_s29  ;;  %v296_v31 = vld [vmem:[%s14645_s2 + $0x130] sm:$0xff]  ;;  %v14860_v27 = vld [vmem:[#allocation13_spill] sm:$0xff]  ;;  %v298_v61 = vld [vmem:[%s14645_s2 + $0x140] sm:$0xff] }
 0x1a4   :  { %v1703_v35 = vpop.f32.mrf.mxu1  ;;  %v3592_v49 = vpack.c.bf16 %v3540_v14, %v3539_v19  ;;  %v4156_v15 = vpack.c.bf16 %v4105_v48, %v4104_v42  ;;  %v3593_v51 = vpack.c.bf16 %v3542_v18, %v3541_v8  ;;  %v14864_v19 = vld [vmem:[#allocation15_spill] sm:$0xff] }
 0x1a5   :  { %14857 = vst [vmem:[#allocation11_spill] sm:$0xff] %v11326_v4  ;;  %v11337_v26 = vadd.f32 %v9173_v29, %v1816_v11  ;;  %v1814_v1 = vadd.f32 %v1703_v35, %v14860_v27  ;;  %v9174_v0 = vpop.f32.mrf.mxu0  ;;  %460 = vrot.lane.b32.xlu1 %v295_v13, %s9880_s29  ;;  %v14862_v4 = vld [vmem:[#allocation14_spill] sm:$0xff]  ;;  %v297_v29 = vld [vmem:[%s14645_s2 + $0x138] sm:$0xff]  ;;  %v4106_v13 = vld [vmem:[#allocation2 + $0x168] sm:$0xff] }
 0x1a6   :  { %v9106_v23 = vpop.f32.mrf.mxu1  ;;  %v3544_v48 = vld [vmem:[#allocation2 + $0x15a] sm:$0xff]  ;;  %v4107_v35 = vld [vmem:[#allocation2 + $0x170] sm:$0xff] }
 0x1a7   :  { %14859 = vst [vmem:[#allocation12_spill] sm:$0xff] %v11337_v26  ;;  %v11341_v62 = vadd.f32 %v2265_v2, %v1814_v1  ;;  %v1817_v7 = vadd.f32 %v9106_v23, %v14862_v4  ;;  %v2268_v56 = vpop.f32.mrf.mxu0  ;;  %462 = vrot.lane.b32.xlu0 %v296_v31, %s9880_s29  ;;  %v3543_v4 = vld [vmem:[#allocation2 + $0x152] sm:$0xff]  ;;  %v4108_v27 = vld [vmem:[#allocation2 + $0x180] sm:$0xff]  ;;  %v4109_v1 = vld [vmem:[#allocation2 + $0x188] sm:$0xff] }
 0x1a8   :  { %v1706_v11 = vpop.f32.mrf.mxu1  ;;  %v3545_v23 = vld [vmem:[#allocation2 + $0x16a] sm:$0xff] }
 0x1a9   :  { %14861 = vst [vmem:[#allocation13_spill] sm:$0xff] %v11341_v62  ;;  %v11351_v47 = vadd.f32 %v9174_v0, %v1817_v7  ;;  %v1815_v14 = vadd.f32 %v1706_v11, %v14864_v19  ;;  %v9177_v2 = vpop.f32.mrf.mxu0  ;;  %9416 = vmatmul.mubr.msk.bf16.gmra.mxu0 %vm19_vm0, %v4155_v44  ;;  %464 = vrot.lane.b32.xlu1 %v297_v29, %s9880_s29  ;;  %v14866_v7 = vld [vmem:[#allocation16_spill] sm:$0xff]  ;;  %v299_v0 = vld [vmem:[%s14645_s2 + $0x148] sm:$0xff] }
 0x1aa   :  { %v9109_v42 = vpop.f32.mrf.mxu1  ;;  %9348 = vmatmul.mubr.msk.bf16.gmra.mxu1 %vm19_vm0, %v3592_v49  ;;  %9419 = vmatprep.mubr.msk.bf16.mxu0 %vm19_vm0, %v4156_v15  ;;  %v3546_v49 = vld [vmem:[#allocation2 + $0x172] sm:$0xff]  ;;  %v14868_v29 = vld [vmem:[#allocation17_spill] sm:$0xff]  ;;  %v4157_v19 = vpack.c.bf16 %v4107_v35, %v4106_v13  ;;  %v302_v13 = vld [vmem:[%s14645_s2 + $0x160] sm:$0xff] }
 0x1ab   :  { %14863 = vst [vmem:[#allocation14_spill] sm:$0xff] %v11351_v47  ;;  %v11358_v8 = vadd.f32 %v2268_v56, %v1815_v14  ;;  %v1820_v18 = vadd.f32 %v9109_v42, %v14866_v7  ;;  %v2281_v31 = vpop.f32.mrf.mxu0  ;;  %9351 = vmatprep.mubr.msk.bf16.mxu1 %vm19_vm0, %v3593_v51  ;;  %466 = vrot.lane.b32.xlu0 %v298_v61, %s9880_s29  ;;  %v300_v56 = vld [vmem:[%s14645_s2 + $0x150] sm:$0xff] }
 0x1ac   :  { %v1719_v44 = vpop.f32.mrf.mxu1  ;;  %v3594_v14 = vpack.c.bf16 %v3544_v48, %v3543_v4  ;;  %v4158_v42 = vpack.c.bf16 %v4109_v1, %v4108_v27  ;;  %v3595_v26 = vpack.c.bf16 %v3546_v49, %v3545_v23  ;;  %v14872_v4 = vld [vmem:[#allocation19_spill] sm:$0xff]  ;;  %v3548_v1 = vld [vmem:[#allocation2 + $0x18a] sm:$0xff] }
 0x1ad   :  { %14865 = vst [vmem:[#allocation15_spill] sm:$0xff] %v11358_v8  ;;  %v11369_v15 = vadd.f32 %v9177_v2, %v1820_v18  ;;  %v1818_v11 = vadd.f32 %v1719_v44, %v14868_v29  ;;  %v9178_v51 = vpop.f32.mrf.mxu0  ;;  %468 = vrot.lane.b32.xlu1 %v299_v0, %s9880_s29  ;;  %v14870_v8 = vld [vmem:[#allocation18_spill] sm:$0xff]  ;;  %v301_v2 = vld [vmem:[%s14645_s2 + $0x158] sm:$0xff]  ;;  %v4111_v44 = vld [vmem:[#allocation2 + $0x1a0] sm:$0xff] }
 0x1ae   :  { %v9110_v61 = vpop.f32.mrf.mxu1  ;;  %v4110_v0 = vld [vmem:[#allocation2 + $0x198] sm:$0xff]  ;;  %v4112_v29 = vld [vmem:[#allocation2 + $0x1e0] sm:$0xff] }
 0x1af   :  { %14867 = vst [vmem:[#allocation16_spill] sm:$0xff] %v11369_v15  ;;  %v11373_v7 = vadd.f32 %v2281_v31, %v1818_v11  ;;  %v1821_v47 = vadd.f32 %v9110_v61, %v14870_v8  ;;  %v2284_v62 = vpop.f32.mrf.mxu0  ;;  %470 = vrot.lane.b32.xlu0 %v300_v56, %s9880_s29  ;;  %v3547_v8 = vld [vmem:[#allocation2 + $0x182] sm:$0xff]  ;;  %v3549_v61 = vld [vmem:[#allocation2 + $0x1ca] sm:$0xff] }
 0x1b0   :  { %v1722_v18 = vpop.f32.mrf.mxu1  ;;  %v4113_v11 = vld [vmem:[#allocation2 + $0x1e8] sm:$0xff] }
 0x1b1   :  { %14869 = vst [vmem:[#allocation17_spill] sm:$0xff] %v11373_v7  ;;  %v11383_v35 = vadd.f32 %v9178_v51, %v1821_v47  ;;  %v1819_v48 = vadd.f32 %v1722_v18, %v14872_v4  ;;  %v9181_v31 = vpop.f32.mrf.mxu0  ;;  %9420 = vmatmul.mubr.msk.bf16.gmra.mxu0 %vm19_vm0, %v4157_v19  ;;  %472 = vrot.lane.b32.xlu1 %v301_v2, %s9880_s29  ;;  %v14874_v47 = vld [vmem:[#allocation20_spill] sm:$0xff]  ;;  %v303_v51 = vld [vmem:[%s14645_s2 + $0x168] sm:$0xff] }
 0x1b2   :  { %v9113_v27 = vpop.f32.mrf.mxu1  ;;  %9352 = vmatmul.mubr.msk.bf16.gmra.mxu1 %vm19_vm0, %v3594_v14  ;;  %9423 = vmatprep.mubr.msk.bf16.mxu0 %vm19_vm0, %v4158_v42  ;;  %v3550_v14 = vld [vmem:[#allocation2 + $0x1d2] sm:$0xff]  ;;  %v14875_v2 = vld [vmem:[#allocation21_spill] sm:$0xff]  ;;  %v4159_v4 = vpack.c.bf16 %v4111_v44, %v4110_v0  ;;  %v306_v0 = vld [vmem:[%s14645_s2 + $0x180] sm:$0xff] }
 0x1b3   :  { %14871 = vst [vmem:[#allocation18_spill] sm:$0xff] %v11383_v35  ;;  %v11390_v23 = vadd.f32 %v2284_v62, %v1819_v48  ;;  %v1824_v49 = vadd.f32 %v9113_v27, %v14874_v47  ;;  %v2297_v56 = vpop.f32.mrf.mxu0  ;;  %9355 = vmatprep.mubr.msk.bf16.mxu1 %vm19_vm0, %v3595_v26  ;;  %474 = vrot.lane.b32.xlu0 %v302_v13, %s9880_s29  ;;  %v304_v62 = vld [vmem:[%s14645_s2 + $0x170] sm:$0xff] }
 0x1b4   :  { %v1735_v19 = vpop.f32.mrf.mxu1  ;;  %v3596_v48 = vpack.c.bf16 %v3548_v1, %v3547_v8  ;;  %v4160_v27 = vpack.c.bf16 %v4113_v11, %v4112_v29  ;;  %v3597_v15 = vpack.c.bf16 %v3550_v14, %v3549_v61  ;;  %v14877_v8 = vld [vmem:[#allocation23_spill] sm:$0xff]  ;;  %v3551_v29 = vld [vmem:[#allocation2 + $0x1e2] sm:$0xff]  ;;  %v3552_v11 = vld [vmem:[#allocation2 + $0x1ea] sm:$0xff] }
 0x1b5   :  { %14873 = vst [vmem:[#allocation19_spill] sm:$0xff] %v11390_v23  ;;  %v11401_v42 = vadd.f32 %v9181_v31, %v1824_v49  ;;  %v1822_v18 = vadd.f32 %v1735_v19, %v14875_v2  ;;  %v9182_v26 = vpop.f32.mrf.mxu0  ;;  %476 = vrot.lane.b32.xlu1 %v303_v51, %s9880_s29  ;;  %v14876_v23 = vld [vmem:[#allocation22_spill] sm:$0xff]  ;;  %v305_v31 = vld [vmem:[%s14645_s2 + $0x178] sm:$0xff]  ;;  %v14879_v19 = vld [vmem:[#allocation24_spill] sm:$0xff] }
 0x1b6   :  { %v9114_v13 = vpop.f32.mrf.mxu1  ;;  %v4116_v14 = vld [vmem:[#allocation2 + $0x210] sm:$0xff]  ;;  %v307_v2 = vld [vmem:[%s14645_s2 + $0x188] sm:$0xff] }
 0x1b7   :  { %v11405_v47 = vadd.f32 %v2297_v56, %v1822_v18  ;;  %v1825_v35 = vadd.f32 %v9114_v13, %v14876_v23  ;;  %v2300_v7 = vpop.f32.mrf.mxu0  ;;  %478 = vrot.lane.b32.xlu0 %v304_v62, %s9880_s29  ;;  %v4117_v62 = vld [vmem:[#allocation2 + $0x218] sm:$0xff] }
 0x1b8   :  { %v1738_v49 = vpop.f32.mrf.mxu1 }
 0x1b9   :  { %v11415_v44 = vadd.f32 %v9182_v26, %v1825_v35  ;;  %v1823_v1 = vadd.f32 %v1738_v49, %v14877_v8  ;;  %v9185_v56 = vpop.f32.mrf.mxu0  ;;  %9424 = vmatmul.mubr.msk.bf16.gmra.mxu0 %vm19_vm0, %v4159_v4  ;;  %480 = vrot.lane.b32.xlu1 %v305_v31, %s9880_s29  ;;  %v3553_v26 = vld [vmem:[#allocation2 + $0x1fa] sm:$0xff]  ;;  %v3554_v4 = vld [vmem:[#allocation2 + $0x202] sm:$0xff]  ;;  %v3598_v49 = vpack.c.bf16 %v3552_v11, %v3551_v29 }
 0x1ba   :  { %v9117_v23 = vpop.f32.mrf.mxu1  ;;  %9356 = vmatmul.mubr.msk.bf16.gmra.mxu1 %vm19_vm0, %v3596_v48  ;;  %9427 = vmatprep.mubr.msk.bf16.mxu0 %vm19_vm0, %v4160_v27  ;;  %v14881_v48 = vld [vmem:[#allocation25_spill] sm:$0xff]  ;;  %v14885_v29 = vld [vmem:[#allocation28_spill] sm:$0xff] }
 0x1bb   :  { %v11422_v51 = vadd.f32 %v2300_v7, %v1823_v1  ;;  %v1828_v61 = vadd.f32 %v9117_v23, %v14879_v19  ;;  %v2313_v35 = vpop.f32.mrf.mxu0  ;;  %9359 = vmatprep.mubr.msk.bf16.mxu1 %vm19_vm0, %v3597_v15  ;;  %482 = vrot.lane.b32.xlu0 %v306_v0, %s9880_s29  ;;  %v308_v7 = vld [vmem:[%s14645_s2 + $0x190] sm:$0xff]  ;;  %v4162_v0 = vpack.c.bf16 %v4117_v62, %v4116_v14  ;;  %v14886_v14 = vld [vmem:[#allocation27_spill] sm:$0xff] }
 0x1bc   :  { %v1751_v18 = vpop.f32.mrf.mxu1  ;;  %v14883_v1 = vld [vmem:[#allocation26_spill] sm:$0xff] }
 0x1bd   :  { %14878 = vst [vmem:[#allocation20_spill] sm:$0xff] %v11422_v51  ;;  %v11433_v13 = vadd.f32 %v9185_v56, %v1828_v61  ;;  %v1826_v27 = vadd.f32 %v1751_v18, %v14881_v48  ;;  %v9186_v15 = vpop.f32.mrf.mxu0  ;;  %484 = vrot.lane.b32.xlu1 %v307_v2, %s9880_s29  ;;  %v3599_v51 = vpack.c.bf16 %v3554_v4, %v3553_v26  ;;  %v309_v56 = vld [vmem:[%s14645_s2 + $0x198] sm:$0xff]  ;;  %v310_v2 = vld [vmem:[%s14645_s2 + $0x1a0] sm:$0xff]  ;;  %v4119_v48 = vld [vmem:[#allocation2 + $0x230] sm:$0xff] }
 0x1be   :  { %v9118_v31 = vpop.f32.mrf.mxu1  ;;  %v3555_v62 = vld [vmem:[#allocation2 + $0x212] sm:$0xff]  ;;  %v3556_v4 = vld [vmem:[#allocation2 + $0x21a] sm:$0xff] }
 0x1bf   :  { %14880 = vst [vmem:[#allocation21_spill] sm:$0xff] %v11433_v13  ;;  %v11437_v8 = vadd.f32 %v2313_v35, %v1826_v27  ;;  %v1829_v23 = vadd.f32 %v9118_v31, %v14883_v1  ;;  %v2316_v19 = vpop.f32.mrf.mxu0  ;;  %486 = vrot.lane.b32.xlu0 %v308_v7, %s9880_s29  ;;  %v4118_v7 = vld [vmem:[#allocation2 + $0x228] sm:$0xff]  ;;  %v4120_v1 = vld [vmem:[#allocation2 + $0x240] sm:$0xff] }
 0x1c0   :  { %v1754_v61 = vpop.f32.mrf.mxu1 }
 0x1c1   :  { %14882 = vst [vmem:[#allocation22_spill] sm:$0xff] %v11437_v8  ;;  %v11447_v18 = vadd.f32 %v9186_v15, %v1829_v23  ;;  %v1827_v11 = vadd.f32 %v1754_v61, %v14885_v29  ;;  %v9261_v35 = vpop.f32.mrf.mxu0  ;;  %9428 = vmatmul.mubr.msk.bf16.gmra.mxu0 %vm19_vm0, %v14886_v14  ;;  %488 = vrot.lane.b32.xlu1 %v309_v56, %s9880_s29  ;;  %v4121_v23 = vld [vmem:[#allocation2 + $0x248] sm:$0xff]  ;;  %v3558_v61 = vld [vmem:[#allocation2 + $0x232] sm:$0xff] }
 0x1c2   :  { %v9193_v26 = vpop.f32.mrf.mxu1  ;;  %9360 = vmatmul.mubr.msk.bf16.gmra.mxu1 %vm19_vm0, %v3598_v49  ;;  %9431 = vmatprep.mubr.msk.bf16.mxu0 %vm19_vm0, %v4162_v0  ;;  %v311_v49 = vld [vmem:[%s14645_s2 + $0x1a8] sm:$0xff]  ;;  %v3600_v14 = vpack.c.bf16 %v3556_v4, %v3555_v62 }
 0x1c3   :  { %14884 = vst [vmem:[#allocation23_spill] sm:$0xff] %v11447_v18  ;;  %v11455_v27 = vadd.f32 %v2316_v19, %v1827_v11  ;;  %v2893_v15 = vadd.f32 %v9193_v26, %v10903_v34  ;;  %v3198_v31 = vpop.f32.mrf.mxu0  ;;  %9363 = vmatprep.mubr.msk.bf16.mxu1 %vm19_vm0, %v3599_v51  ;;  %490 = vrot.lane.b32.xlu0 %v310_v2, %s9880_s29  ;;  %v3557_v0 = vld [vmem:[#allocation2 + $0x22a] sm:$0xff] }
 0x1c4   :  { %v2636_v56 = vpop.f32.mrf.mxu1  ;;  %v312_v19 = vld [vmem:[%s14645_s2 + $0x1b0] sm:$0xff]  ;;  %v4163_v11 = vpack.c.bf16 %v4119_v48, %v4118_v7  ;;  %v4164_v26 = vpack.c.bf16 %v4121_v23, %v4120_v1  ;;  %v3601_v13 = vpack.c.bf16 %v3558_v61, %v3557_v0  ;;  %v314_v7 = vld [vmem:[%s14645_s2 + $0x1c0] sm:$0xff]  ;;  %v14890_v62 = vld [vmem:[#allocation29_spill] sm:$0xff] }
 0x1c5   :  { %14887 = vst [vmem:[#allocation24_spill] sm:$0xff] %v11455_v27  ;;  %v11466_v29 = vadd.f32 %v9261_v35, %v2893_v15  ;;  %v2891_v34 = vadd.f32 %v2636_v56, %v10909_v33  ;;  %v9262_v51 = vpop.f32.mrf.mxu0  ;;  %492 = vrot.lane.b32.xlu1 %v311_v49, %s9880_s29  ;;  %v313_v35 = vld [vmem:[%s14645_s2 + $0x1b8] sm:$0xff]  ;;  %v3560_v1 = vld [vmem:[#allocation2 + $0x24a] sm:$0xff]  ;;  %v4123_v49 = vld [vmem:[#allocation2 + $0x260] sm:$0xff] }
 0x1c6   :  { %v9194_v2 = vpop.f32.mrf.mxu1  ;;  %v4122_v23 = vld [vmem:[#allocation2 + $0x258] sm:$0xff]  ;;  %v387_v56 = vpop.permute.xlu0 %386 }
 0x1c7   :  { %v11470_v27 = vadd.f32 %v3198_v31, %v2891_v34  ;;  %v2894_v18 = vadd.f32 %v9194_v2, %v10915_v41  ;;  %v3201_v8 = vpop.f32.mrf.mxu0  ;;  %494 = vrot.lane.b32.xlu0 %v312_v19, %s9880_s29  ;;  %v3559_v41 = vld [vmem:[#allocation2 + $0x242] sm:$0xff]  ;;  %v4124_v19 = vld [vmem:[#allocation2 + $0x270] sm:$0xff]  ;;  %v4125_v34 = vld [vmem:[#allocation2 + $0x278] sm:$0xff]  ;;  %578 = vst.msk [vmem:[#allocation3] sm:$0xff] %vm19_vm0, %v387_v56 }
 0x1c8   :  { %v2639_v33 = vpop.f32.mrf.mxu1  ;;  %v3561_v2 = vld [vmem:[#allocation2 + $0x25a] sm:$0xff]  ;;  %v14892_v56 = vld [vmem:[#allocation30_spill] sm:$0xff] }
 0x1c9   :  { %14888 = vst [vmem:[#allocation25_spill] sm:$0xff] %v11470_v27  ;;  %v11480_v48 = vadd.f32 %v9262_v51, %v2894_v18  ;;  %v2892_v4 = vadd.f32 %v2639_v33, %v14890_v62  ;;  %v9265_v15 = vpop.f32.mrf.mxu0  ;;  %9432 = vmatmul.mubr.msk.bf16.gmra.mxu0 %vm19_vm0, %v4163_v11  ;;  %496 = vrot.lane.b32.xlu1 %v313_v35, %s9880_s29  ;;  %v315_v51 = vld [vmem:[%s14645_s2 + $0x1c8] sm:$0xff] }
 0x1ca   :  { %v9197_v31 = vpop.f32.mrf.mxu1  ;;  %9364 = vmatmul.mubr.msk.bf16.gmra.mxu1 %vm19_vm0, %v3600_v14  ;;  %9435 = vmatprep.mubr.msk.bf16.mxu0 %vm19_vm0, %v4164_v26  ;;  %v3562_v14 = vld [vmem:[#allocation2 + $0x262] sm:$0xff]  ;;  %v4165_v35 = vpack.c.bf16 %v4123_v49, %v4122_v23  ;;  %v4166_v62 = vpack.c.bf16 %v4125_v34, %v4124_v19  ;;  %v14893_v49 = vld [vmem:[#allocation31_spill] sm:$0xff] }
 0x1cb   :  { %14889 = vst [vmem:[#allocation26_spill] sm:$0xff] %v11480_v48  ;;  %v11487_v0 = vadd.f32 %v3201_v8, %v2892_v4  ;;  %v2897_v18 = vadd.f32 %v9197_v31, %v10933_v17  ;;  %v3214_v61 = vpop.f32.mrf.mxu0  ;;  %9367 = vmatprep.mubr.msk.bf16.mxu1 %vm19_vm0, %v3601_v13  ;;  %498 = vrot.lane.b32.xlu0 %v314_v7, %s9880_s29  ;;  %v316_v17 = vld [vmem:[%s14645_s2 + $0x1d0] sm:$0xff]  ;;  %v391_v4 = vpop.permute.xlu1 %390 }
 0x1cc   :  { %v2652_v11 = vpop.f32.mrf.mxu1  ;;  %v3602_v7 = vpack.c.bf16 %v3560_v1, %v3559_v41  ;;  %v3603_v27 = vpack.c.bf16 %v3562_v14, %v3561_v2  ;;  %580 = vst.msk [vmem:[#allocation3 + $0x10] sm:$0xff] %vm19_vm0, %v391_v4  ;;  %v318_v41 = vld [vmem:[%s14645_s2 + $0x1e0] sm:$0xff]  ;;  %v3563_v19 = vld [vmem:[#allocation2 + $0x272] sm:$0xff]  ;;  %v3565_v4 = vld [vmem:[#allocation2 + $0x28a] sm:$0xff] }
 0x1cd   :  { %14891 = vst [vmem:[#allocation28_spill] sm:$0xff] %v11487_v0  ;;  %v11499_v8 = vadd.f32 %v9265_v15, %v2897_v18  ;;  %v2895_v13 = vadd.f32 %v2652_v11, %v10939_v6  ;;  %v9266_v26 = vpop.f32.mrf.mxu0  ;;  %500 = vrot.lane.b32.xlu1 %v315_v51, %s9880_s29  ;;  %v389_v15 = vpop.permute.xlu0 %388  ;;  %v317_v6 = vld [vmem:[%s14645_s2 + $0x1d8] sm:$0xff]  ;;  %v4126_v11 = vld [vmem:[#allocation2 + $0x288] sm:$0xff]  ;;  %v4127_v2 = vld [vmem:[#allocation2 + $0x290] sm:$0xff] }
 0x1ce   :  { %v9198_v33 = vpop.f32.mrf.mxu1  ;;  %579 = vst.msk [vmem:[#allocation3 + $0x8] sm:$0xff] %vm19_vm0, %v389_v15  ;;  %v3564_v51 = vld [vmem:[#allocation2 + $0x27a] sm:$0xff] }
 0x1cf   :  { %v11503_v31 = vadd.f32 %v3214_v61, %v2895_v13  ;;  %v2898_v0 = vadd.f32 %v9198_v33, %v14892_v56  ;;  %v3217_v48 = vpop.f32.mrf.mxu0  ;;  %502 = vrot.lane.b32.xlu0 %v316_v17, %s9880_s29  ;;  %v393_v14 = vpop.permute.xlu1 %392 }
 0x1d0   :  { %v2655_v23 = vpop.f32.mrf.mxu1  ;;  %581 = vst.msk [vmem:[#allocation3 + $0x18] sm:$0xff] %vm19_vm0, %v393_v14 }
 0x1d1   :  { %v11515_v1 = vadd.f32 %v9266_v26, %v2898_v0  ;;  %v2896_v18 = vadd.f32 %v2655_v23, %v14893_v49  ;;  %v9269_v61 = vpop.f32.mrf.mxu0  ;;  %9436 = vmatmul.mubr.msk.bf16.gmra.mxu0 %vm19_vm0, %v4165_v35  ;;  %504 = vrot.lane.b32.xlu1 %v317_v6, %s9880_s29  ;;  %v4128_v26 = vld [vmem:[#allocation2 + $0x2a0] sm:$0xff]  ;;  %v4129_v35 = vld [vmem:[#allocation2 + $0x2a8] sm:$0xff]  ;;  %v395_v33 = vpop.permute.xlu0 %394  ;;  %v4167_v6 = vpack.c.bf16 %v4127_v2, %v4126_v11 }
 0x1d2   :  { %v9201_v34 = vpop.f32.mrf.mxu1  ;;  %9368 = vmatmul.mubr.msk.bf16.gmra.mxu1 %vm19_vm0, %v3602_v7  ;;  %9439 = vmatprep.mubr.msk.bf16.mxu0 %vm19_vm0, %v4166_v62  ;;  %v319_v7 = vld [vmem:[%s14645_s2 + $0x1e8] sm:$0xff]  ;;  %582 = vst.msk [vmem:[#allocation3 + $0x20] sm:$0xff] %vm19_vm0, %v395_v33  ;;  %v4168_v49 = vpack.c.bf16 %v4129_v35, %v4128_v26  ;;  %v4130_v35 = vld [vmem:[#allocation2 + $0x2b8] sm:$0xff] }
 0x1d3   :  { %v11522_v17 = vadd.f32 %v3217_v48, %v2896_v18  ;;  %v2901_v0 = vadd.f32 %v9201_v34, %v10962_v25  ;;  %v3230_v13 = vpop.f32.mrf.mxu0  ;;  %9371 = vmatprep.mubr.msk.bf16.mxu1 %vm19_vm0, %v3603_v27  ;;  %506 = vrot.lane.b32.xlu0 %v318_v41, %s9880_s29  ;;  %v3566_v48 = vld [vmem:[#allocation2 + $0x292] sm:$0xff]  ;;  %v3604_v41 = vpack.c.bf16 %v3564_v51, %v3563_v19  ;;  %v6155_v19 = vld [vmem:[#allocation3] sm:$0xff]  ;;  %v3568_v26 = vld [vmem:[#allocation2 + $0x2aa] sm:$0xff] }
 0x1d4   :  { %v2668_v62 = vpop.f32.mrf.mxu1  ;;  %v320_v25 = vld [vmem:[%s14645_s2 + $0x1f0] sm:$0xff] }
 0x1d5   :  { %14894 = vst [vmem:[#allocation27_spill] sm:$0xff] %v11522_v17  ;;  %v11535_v27 = vadd.f32 %v9269_v61, %v2901_v0  ;;  %v2899_v56 = vadd.f32 %v2668_v62, %v10968_v3  ;;  %v9270_v15 = vpop.f32.mrf.mxu0  ;;  %508 = vrot.lane.b32.xlu1 %v319_v7, %s9880_s29  ;;  %v397_v18 = vpop.permute.xlu1 %396  ;;  %v3605_v17 = vpack.c.bf16 %v3566_v48, %v3565_v4  ;;  %v321_v3 = vld [vmem:[%s14645_s2 + $0x1f8] sm:$0xff]  ;;  %v3567_v0 = vld [vmem:[#allocation2 + $0x2a2] sm:$0xff]  ;;  %s9881_s2 = smov 32  }
 0x1d6   :  { %v9202_v23 = vpop.f32.mrf.mxu1  ;;  %583 = vst.msk [vmem:[#allocation3 + $0x28] sm:$0xff] %vm19_vm0, %v397_v18  ;;  %v399_v61 = vpop.permute.xlu0 %398  ;;  %v4131_v7 = vld [vmem:[#allocation2 + $0x2c0] sm:$0xff]  ;;  %v6157_v18 = vld [vmem:[#allocation3 + $0x10] sm:$0xff] }
 0x1d7   :  { %v11539_v34 = vadd.f32 %v3230_v13, %v2899_v56  ;;  %v2902_v14 = vadd.f32 %v9202_v23, %v10981_v36  ;;  %v3233_v33 = vpop.f32.mrf.mxu0  ;;  %510 = vrot.lane.b32.xlu0 %v320_v25, %s9880_s29  ;;  %584 = vst.msk [vmem:[#allocation3 + $0x30] sm:$0xff] %vm19_vm0, %v399_v61  ;;  %v4132_v25 = vld [vmem:[#allocation2 + $0x2d0] sm:$0xff]  ;;  %v4133_v56 = vld [vmem:[#allocation2 + $0x2d8] sm:$0xff] }
 0x1d8   :  { %v2671_v11 = vpop.f32.mrf.mxu1 }
 0x1d9   :  { %v11548_v51 = vadd.f32 %v9270_v15, %v2902_v14  ;;  %v2900_v2 = vadd.f32 %v2671_v11, %v10987_v24  ;;  %v9273_v36 = vpop.f32.mrf.mxu0  ;;  %9440 = vmatmul.mubr.msk.bf16.gmra.mxu0 %vm19_vm0, %v4167_v6  ;;  %512 = vrot.lane.b32.xlu1 %v321_v3, %s9880_s29  ;;  %v401_v62 = vpop.permute.xlu1 %400  ;;  %v6156_v6 = vld [vmem:[#allocation3 + $0x8] sm:$0xff]  ;;  %v3606_v3 = vpack.c.bf16 %v3568_v26, %v3567_v0 }
 0x1da   :  { %v9205_v13 = vpop.f32.mrf.mxu1  ;;  %9372 = vmatmul.mubr.msk.bf16.gmra.mxu1 %vm19_vm0, %v3604_v41  ;;  %9443 = vmatprep.mubr.msk.bf16.mxu0 %vm19_vm0, %v4168_v49  ;;  %585 = vst.msk [vmem:[#allocation3 + $0x38] sm:$0xff] %vm19_vm0, %v401_v62  ;;  %v403_v15 = vpop.permute.xlu0 %402  ;;  %v3569_v41 = vld [vmem:[#allocation2 + $0x2ba] sm:$0xff]  ;;  %v3570_v49 = vld [vmem:[#allocation2 + $0x2c2] sm:$0xff]  ;;  %v4170_v11 = vpack.c.bf16 %v4133_v56, %v4132_v25  ;;  %v4135_v56 = vld [vmem:[#allocation2 + $0x2f0] sm:$0xff] }
 0x1db   :  { %v11555_v4 = vadd.f32 %v3233_v33, %v2900_v2  ;;  %v2905_v48 = vadd.f32 %v9205_v13, %v11002_v46  ;;  %v3246_v24 = vpop.f32.mrf.mxu0  ;;  %9375 = vmatprep.mubr.msk.bf16.mxu1 %vm19_vm0, %v3605_v17  ;;  %6283 = vrot.lane.b32.xlu0 %v6155_v19, %s9881_s2  ;;  %586 = vst.msk [vmem:[#allocation3 + $0x40] sm:$0xff] %vm19_vm0, %v403_v15  ;;  %v4134_v25 = vld [vmem:[#allocation2 + $0x2e8] sm:$0xff]  ;;  %v4136_v15 = vld [vmem:[#allocation2 + $0x300] sm:$0xff] }
 0x1dc   :  { %v2684_v23 = vpop.f32.mrf.mxu1  ;;  %v4169_v33 = vpack.c.bf16 %v4131_v7, %v4130_v35  ;;  %v3571_v7 = vld [vmem:[#allocation2 + $0x2d2] sm:$0xff] }
 0x1dd   :  { %14895 = vst [vmem:[#allocation29_spill] sm:$0xff] %v11555_v4  ;;  %v11562_v14 = vadd.f32 %v9273_v36, %v2905_v48  ;;  %v2903_v46 = vadd.f32 %v2684_v23, %v11008_v57  ;;  %v9274_v17 = vpop.f32.mrf.mxu0  ;;  %6285 = vrot.lane.b32.xlu1 %v6156_v6, %s9881_s2  ;;  %v405_v19 = vpop.permute.xlu1 %404  ;;  %v3607_v4 = vpack.c.bf16 %v3570_v49, %v3569_v41  ;;  %v6158_v57 = vld [vmem:[#allocation3 + $0x18] sm:$0xff]  ;;  %v4137_v49 = vld [vmem:[#allocation2 + $0x308] sm:$0xff] }
 0x1de   :  { %v9206_v61 = vpop.f32.mrf.mxu1  ;;  %587 = vst.msk [vmem:[#allocation3 + $0x48] sm:$0xff] %vm19_vm0, %v405_v19  ;;  %v407_v36 = vpop.permute.xlu0 %406 }
 0x1df   :  { %v11566_v2 = vadd.f32 %v3246_v24, %v2903_v46  ;;  %v2906_v13 = vadd.f32 %v9206_v61, %v11025_v5  ;;  %v3249_v62 = vpop.f32.mrf.mxu0  ;;  %6287 = vrot.lane.b32.xlu0 %v6157_v18, %s9881_s2  ;;  %588 = vst.msk [vmem:[#allocation3 + $0x50] sm:$0xff] %vm19_vm0, %v407_v36  ;;  %v3572_v5 = vld [vmem:[#allocation2 + $0x2da] sm:$0xff]  ;;  %v6160_v46 = vld [vmem:[#allocation3 + $0x28] sm:$0xff]  ;;  %v4172_v36 = vpack.c.bf16 %v4137_v49, %v4136_v15 }
 0x1e0   :  { %v2687_v48 = vpop.f32.mrf.mxu1  ;;  %v3573_v61 = vld [vmem:[#allocation2 + $0x2ea] sm:$0xff]  ;;  %v4139_v49 = vld [vmem:[#allocation2 + $0x320] sm:$0xff] }
 0x1e1   :  { %v11572_v35 = vadd.f32 %v9274_v17, %v2906_v13  ;;  %v2904_v0 = vadd.f32 %v2687_v48, %v11031_v54  ;;  %v9277_v26 = vpop.f32.mrf.mxu0  ;;  %9444 = vmatmul.mubr.msk.bf16.gmra.mxu0 %vm19_vm0, %v4169_v33  ;;  %6289 = vrot.lane.b32.xlu1 %v6158_v57, %s9881_s2  ;;  %v409_v6 = vpop.permute.xlu1 %408  ;;  %v6159_v17 = vld [vmem:[#allocation3 + $0x20] sm:$0xff]  ;;  %v4171_v13 = vpack.c.bf16 %v4135_v56, %v4134_v25  ;;  %v3576_v56 = vld [vmem:[#allocation2 + $0x30a] sm:$0xff] }
 0x1e2   :  { %v9209_v24 = vpop.f32.mrf.mxu1  ;;  %9376 = vmatmul.mubr.msk.bf16.gmra.mxu1 %vm19_vm0, %v3606_v3  ;;  %9447 = vmatprep.mubr.msk.bf16.mxu0 %vm19_vm0, %v4170_v11  ;;  %589 = vst.msk [vmem:[#allocation3 + $0x58] sm:$0xff] %vm19_vm0, %v409_v6  ;;  %v411_v18 = vpop.permute.xlu0 %410  ;;  %v3574_v3 = vld [vmem:[#allocation2 + $0x2f2] sm:$0xff] }
 0x1e3   :  { %v11579_v23 = vadd.f32 %v3249_v62, %v2904_v0  ;;  %v2909_v54 = vadd.f32 %v9209_v24, %v11046_v55  ;;  %v3262_v41 = vpop.f32.mrf.mxu0  ;;  %9379 = vmatprep.mubr.msk.bf16.mxu1 %vm19_vm0, %v3607_v4  ;;  %590 = vst.msk [vmem:[#allocation3 + $0x60] sm:$0xff] %vm19_vm0, %v411_v18  ;;  %6291 = vrot.lane.b32.xlu0 %v6159_v17, %s9881_s2  ;;  %v6161_v18 = vld [vmem:[#allocation3 + $0x30] sm:$0xff] }
 0x1e4   :  { %v2700_v33 = vpop.f32.mrf.mxu1  ;;  %v3608_v62 = vpack.c.bf16 %v3572_v5, %v3571_v7  ;;  %v3609_v6 = vpack.c.bf16 %v3574_v3, %v3573_v61  ;;  %v4141_v3 = vld [vmem:[#allocation2 + $0x338] sm:$0xff] }
 0x1e5   :  { %v11586_v11 = vadd.f32 %v9277_v26, %v2909_v54  ;;  %v2907_v55 = vadd.f32 %v2700_v33, %v11052_v21  ;;  %v9278_v19 = vpop.f32.mrf.mxu0  ;;  %6293 = vrot.lane.b32.xlu1 %v6160_v46, %s9881_s2  ;;  %v413_v57 = vpop.permute.xlu1 %412  ;;  %v6162_v54 = vld [vmem:[#allocation3 + $0x38] sm:$0xff]  ;;  %v4140_v46 = vld [vmem:[#allocation2 + $0x330] sm:$0xff] }
 0x1e6   :  { %v9210_v4 = vpop.f32.mrf.mxu1  ;;  %591 = vst.msk [vmem:[#allocation3 + $0x68] sm:$0xff] %vm19_vm0, %v413_v57  ;;  %v415_v26 = vpop.permute.xlu0 %414 }
 0x1e7   :  { %v11590_v48 = vadd.f32 %v3262_v41, %v2907_v55  ;;  %v2910_v0 = vadd.f32 %v9210_v4, %v11069_v16  ;;  %v3265_v24 = vpop.f32.mrf.mxu0  ;;  %592 = vst.msk [vmem:[#allocation3 + $0x70] sm:$0xff] %vm19_vm0, %v415_v26  ;;  %6295 = vrot.lane.b32.xlu0 %v6161_v18, %s9881_s2  ;;  %v3575_v16 = vld [vmem:[#allocation2 + $0x302] sm:$0xff]  ;;  %v4138_v41 = vld [vmem:[#allocation2 + $0x318] sm:$0xff] }
 0x1e8   :  { %v2703_v21 = vpop.f32.mrf.mxu1  ;;  %v3610_v26 = vpack.c.bf16 %v3576_v56, %v3575_v16 }
 0x1e9   :  { %v11596_v25 = vadd.f32 %v9278_v19, %v2910_v0  ;;  %v2908_v7 = vadd.f32 %v2703_v21, %v11075_v63  ;;  %v9281_v5 = vpop.f32.mrf.mxu0  ;;  %9448 = vmatmul.mubr.msk.bf16.gmra.mxu0 %vm19_vm0, %v4171_v13  ;;  %6297 = vrot.lane.b32.xlu1 %v6162_v54, %s9881_s2  ;;  %v417_v17 = vpop.permute.xlu1 %416  ;;  %v6164_v19 = vld [vmem:[#allocation3 + $0x48] sm:$0xff]  ;;  %v6163_v13 = vld [vmem:[#allocation3 + $0x40] sm:$0xff]  ;;  %v4174_v54 = vpack.c.bf16 %v4141_v3, %v4140_v46  ;;  %v4143_v3 = vld [vmem:[#allocation2 + $0x350] sm:$0xff] }
 0x1ea   :  { %v9213_v15 = vpop.f32.mrf.mxu1  ;;  %9380 = vmatmul.mubr.msk.bf16.gmra.mxu1 %vm19_vm0, %v3608_v62  ;;  %9451 = vmatprep.mubr.msk.bf16.mxu0 %vm19_vm0, %v4172_v36  ;;  %593 = vst.msk [vmem:[#allocation3 + $0x78] sm:$0xff] %vm19_vm0, %v417_v17  ;;  %v419_v55 = vpop.permute.xlu0 %418  ;;  %v3577_v62 = vld [vmem:[#allocation2 + $0x31a] sm:$0xff]  ;;  %v3578_v36 = vld [vmem:[#allocation2 + $0x322] sm:$0xff] }
 0x1eb   :  { %v11603_v33 = vadd.f32 %v3265_v24, %v2908_v7  ;;  %v2913_v63 = vadd.f32 %v9213_v15, %v11090_v58  ;;  %v3278_v61 = vpop.f32.mrf.mxu0  ;;  %9383 = vmatprep.mubr.msk.bf16.mxu1 %vm19_vm0, %v3609_v6  ;;  %594 = vst.msk [vmem:[#allocation3 + $0x80] sm:$0xff] %vm19_vm0, %v419_v55  ;;  %6299 = vrot.lane.b32.xlu0 %v6163_v13, %s9881_s2  ;;  %v6165_v55 = vld [vmem:[#allocation3 + $0x50] sm:$0xff] }
 0x1ec   :  { %v2716_v4 = vpop.f32.mrf.mxu1  ;;  %v4173_v24 = vpack.c.bf16 %v4139_v49, %v4138_v41  ;;  %v3611_v17 = vpack.c.bf16 %v3578_v36, %v3577_v62  ;;  %v3580_v49 = vld [vmem:[#allocation2 + $0x33a] sm:$0xff] }
 0x1ed   :  { %v11610_v57 = vadd.f32 %v9281_v5, %v2913_v63  ;;  %v2911_v58 = vadd.f32 %v2716_v4, %v11096_v39  ;;  %v9282_v0 = vpop.f32.mrf.mxu0  ;;  %6301 = vrot.lane.b32.xlu1 %v6164_v19, %s9881_s2  ;;  %v421_v18 = vpop.permute.xlu1 %420  ;;  %v6166_v63 = vld [vmem:[#allocation3 + $0x58] sm:$0xff] }
 0x1ee   :  { %v9214_v6 = vpop.f32.mrf.mxu1  ;;  %595 = vst.msk [vmem:[#allocation3 + $0x88] sm:$0xff] %vm19_vm0, %v421_v18  ;;  %v423_v5 = vpop.permute.xlu0 %422  ;;  %v5204_v19 = vld [vmem:[#allocation2 + $0x32] sm:$0xff]  ;;  %v5205_v36 = vld [vmem:[#allocation2 + $0x3a] sm:$0xff] }
 0x1ef   :  { %v11614_v21 = vadd.f32 %v3278_v61, %v2911_v58  ;;  %v2914_v7 = vadd.f32 %v9214_v6, %v11113_v32  ;;  %v3281_v15 = vpop.f32.mrf.mxu0  ;;  %596 = vst.msk [vmem:[#allocation3 + $0x90] sm:$0xff] %vm19_vm0, %v423_v5  ;;  %6303 = vrot.lane.b32.xlu0 %v6165_v55, %s9881_s2  ;;  %v3579_v32 = vld [vmem:[#allocation2 + $0x332] sm:$0xff]  ;;  %v4142_v61 = vld [vmem:[#allocation2 + $0x348] sm:$0xff] }
 0x1f0   :  { %v2719_v39 = vpop.f32.mrf.mxu1  ;;  %v3612_v5 = vpack.c.bf16 %v3580_v49, %v3579_v32 }
 0x1f1   :  { %v11620_v41 = vadd.f32 %v9282_v0, %v2914_v7  ;;  %v2912_v16 = vadd.f32 %v2719_v39, %v11119_v10  ;;  %v9285_v56 = vpop.f32.mrf.mxu0  ;;  %9452 = vmatmul.mubr.msk.bf16.gmra.mxu0 %vm19_vm0, %v4173_v24  ;;  %6305 = vrot.lane.b32.xlu1 %v6166_v63, %s9881_s2  ;;  %v425_v13 = vpop.permute.xlu1 %424  ;;  %v6168_v0 = vld [vmem:[#allocation3 + $0x68] sm:$0xff]  ;;  %v6167_v24 = vld [vmem:[#allocation3 + $0x60] sm:$0xff]  ;;  %v5268_v63 = vpack.c.bf16 %v5205_v36, %v5204_v19 }
 0x1f2   :  { %v9217_v46 = vpop.f32.mrf.mxu1  ;;  %9384 = vmatmul.mubr.msk.bf16.gmra.mxu1 %vm19_vm0, %v3610_v26  ;;  %9455 = vmatprep.mubr.msk.bf16.mxu0 %vm19_vm0, %v4174_v54  ;;  %597 = vst.msk [vmem:[#allocation3 + $0x98] sm:$0xff] %vm19_vm0, %v425_v13  ;;  %v427_v58 = vpop.permute.xlu0 %426  ;;  %v4642_v26 = vld [vmem:[#allocation2 + $0x31] sm:$0xff]  ;;  %v4643_v54 = vld [vmem:[#allocation2 + $0x39] sm:$0xff]  ;;  %v5208_v36 = vld [vmem:[#allocation2 + $0x62] sm:$0xff] }
 0x1f3   :  { %v11627_v4 = vadd.f32 %v3281_v15, %v2912_v16  ;;  %v2917_v10 = vadd.f32 %v9217_v46, %v11134_v52  ;;  %v3294_v62 = vpop.f32.mrf.mxu0  ;;  %9387 = vmatprep.mubr.msk.bf16.mxu1 %vm19_vm0, %v3611_v17  ;;  %598 = vst.msk [vmem:[#allocation3 + $0xa0] sm:$0xff] %vm19_vm0, %v427_v58  ;;  %6307 = vrot.lane.b32.xlu0 %v6167_v24, %s9881_s2  ;;  %v6170_v58 = vld [vmem:[#allocation3 + $0x78] sm:$0xff]  ;;  %v6169_v24 = vld [vmem:[#allocation3 + $0x70] sm:$0xff] }
 0x1f4   :  { %v2732_v6 = vpop.f32.mrf.mxu1  ;;  %v4175_v15 = vpack.c.bf16 %v4143_v3, %v4142_v61  ;;  %v4706_v46 = vpack.c.bf16 %v4643_v54, %v4642_v26  ;;  %v4644_v3 = vld [vmem:[#allocation2 + $0x49] sm:$0xff] }
 0x1f5   :  { %v11634_v18 = vadd.f32 %v9285_v56, %v2917_v10  ;;  %v2915_v52 = vadd.f32 %v2732_v6, %v11140_v38  ;;  %v9286_v7 = vpop.f32.mrf.mxu0  ;;  %6309 = vrot.lane.b32.xlu1 %v6168_v0, %s9881_s2  ;;  %v5206_v10 = vld [vmem:[#allocation2 + $0x4a] sm:$0xff] }
 0x1f6   :  { %v9218_v17 = vpop.f32.mrf.mxu1  ;;  %v5209_v26 = vld [vmem:[#allocation2 + $0x6a] sm:$0xff] }
 0x1f7   :  { %v11638_v55 = vadd.f32 %v3294_v62, %v2915_v52  ;;  %v2918_v39 = vadd.f32 %v9218_v17, %v11151_v12  ;;  %v3297_v16 = vpop.f32.mrf.mxu0  ;;  %v429_v13 = vpop.permute.xlu1 %428  ;;  %6311 = vrot.lane.b32.xlu0 %v6169_v24, %s9881_s2  ;;  %v4645_v12 = vld [vmem:[#allocation2 + $0x51] sm:$0xff]  ;;  %v6172_v52 = vld [vmem:[#allocation3 + $0x88] sm:$0xff]  ;;  %v5270_v24 = vpack.c.bf16 %v5209_v26, %v5208_v36  ;;  %v5210_v26 = vld [vmem:[#allocation2 + $0x7a] sm:$0xff] }
 0x1f8   :  { %v2735_v56 = vpop.f32.mrf.mxu1  ;;  %599 = vst.msk [vmem:[#allocation3 + $0xa8] sm:$0xff] %vm19_vm0, %v429_v13  ;;  %v431_v38 = vpop.permute.xlu0 %430  ;;  %v5207_v62 = vld [vmem:[#allocation2 + $0x52] sm:$0xff]  ;;  %v4646_v17 = vld [vmem:[#allocation2 + $0x61] sm:$0xff] }
 0x1f9   :  { %v11643_v61 = vadd.f32 %v9286_v7, %v2918_v39  ;;  %v2916_v32 = vadd.f32 %v2735_v56, %v11156_v50  ;;  %v9289_v49 = vpop.f32.mrf.mxu0  ;;  %9456 = vmatmul.mubr.msk.bf16.gmra.mxu0 %vm19_vm0, %v4175_v15  ;;  %600 = vst.msk [vmem:[#allocation3 + $0xb0] sm:$0xff] %vm19_vm0, %v431_v38  ;;  %6313 = vrot.lane.b32.xlu1 %v6170_v58, %s9881_s2  ;;  %v6171_v7 = vld [vmem:[#allocation3 + $0x80] sm:$0xff]  ;;  %v4647_v39 = vld [vmem:[#allocation2 + $0x69] sm:$0xff] }
 0x1fa   :  { %v9221_v19 = vpop.f32.mrf.mxu1  ;;  %9388 = vmatmul.mubr.msk.bf16.gmra.mxu1 %vm19_vm0, %v3612_v5  ;;  %9531 = vmatprep.mubr.msk.bf16.mxu0 %vm19_vm0, %v5268_v63  ;;  %v4707_v58 = vpack.c.bf16 %v4645_v12, %v4644_v3  ;;  %v4649_v36 = vld [vmem:[#allocation2 + $0x81] sm:$0xff] }
 0x1fb   :  { %v11651_v0 = vadd.f32 %v3297_v16, %v2916_v32  ;;  %v2921_v50 = vadd.f32 %v9221_v19, %v11167_v53  ;;  %v3310_v6 = vpop.f32.mrf.mxu0  ;;  %9463 = vmatprep.mubr.msk.bf16.mxu1 %vm19_vm0, %v4706_v46  ;;  %v433_v54 = vpop.permute.xlu1 %432  ;;  %6315 = vrot.lane.b32.xlu0 %v6171_v7, %s9881_s2  ;;  %v5269_v53 = vpack.c.bf16 %v5207_v62, %v5206_v10  ;;  %v4648_v62 = vld [vmem:[#allocation2 + $0x79] sm:$0xff] }
 0x1fc   :  { %v2748_v15 = vpop.f32.mrf.mxu1  ;;  %601 = vst.msk [vmem:[#allocation3 + $0xb8] sm:$0xff] %vm19_vm0, %v433_v54  ;;  %v4708_v19 = vpack.c.bf16 %v4647_v39, %v4646_v17  ;;  %v6173_v54 = vld [vmem:[#allocation3 + $0x90] sm:$0xff]  ;;  %v5213_v39 = vld [vmem:[#allocation2 + $0x9a] sm:$0xff] }
 0x1fd   :  { %v11657_v5 = vadd.f32 %v9289_v49, %v2921_v50  ;;  %v2919_v63 = vadd.f32 %v2748_v15, %v11170_v60  ;;  %v9290_v16 = vpop.f32.mrf.mxu0  ;;  %v435_v13 = vpop.permute.xlu0 %434  ;;  %6317 = vrot.lane.b32.xlu1 %v6172_v52, %s9881_s2  ;;  %v6174_v50 = vld [vmem:[#allocation3 + $0x98] sm:$0xff]  ;;  %v5211_v52 = vld [vmem:[#allocation2 + $0x82] sm:$0xff] }
 0x1fe   :  { %v9222_v46 = vpop.f32.mrf.mxu1  ;;  %602 = vst.msk [vmem:[#allocation3 + $0xc0] sm:$0xff] %vm19_vm0, %v435_v13  ;;  %v5212_v7 = vld [vmem:[#allocation2 + $0x92] sm:$0xff] }
 0x1ff   :  { %v11662_v56 = vadd.f32 %v3310_v6, %v2919_v63  ;;  %v2922_v38 = vadd.f32 %v9222_v46, %v11184_v28  ;;  %v3313_v32 = vpop.f32.mrf.mxu0  ;;  %v437_v49 = vpop.permute.xlu1 %436  ;;  %6319 = vrot.lane.b32.xlu0 %v6173_v54, %s9881_s2  ;;  %v4650_v46 = vld [vmem:[#allocation2 + $0x91] sm:$0xff]  ;;  %v5272_v54 = vpack.c.bf16 %v5213_v39, %v5212_v7 }
 0x200   :  { %v2751_v60 = vpop.f32.mrf.mxu1  ;;  %603 = vst.msk [vmem:[#allocation3 + $0xc8] sm:$0xff] %vm19_vm0, %v437_v49  ;;  %v4653_v7 = vld [vmem:[#allocation2 + $0xb1] sm:$0xff] }
 0x201   :  { %v11667_v10 = vadd.f32 %v9290_v16, %v2922_v38  ;;  %v2920_v3 = vadd.f32 %v2751_v60, %v11195_v22  ;;  %v9293_v12 = vpop.f32.mrf.mxu0  ;;  %9532 = vmatmul.mubr.msk.bf16.vlgmr.msra.gmra.mxu0 %vm19_vm0, %v5269_v53  ;;  %v439_v28 = vpop.permute.xlu0 %438  ;;  %6321 = vrot.lane.b32.xlu1 %v6174_v50, %s9881_s2  ;;  %v6176_v16 = vld [vmem:[#allocation3 + $0xa8] sm:$0xff]  ;;  %v6175_v53 = vld [vmem:[#allocation3 + $0xa0] sm:$0xff]  ;;  %v4709_v50 = vpack.c.bf16 %v4649_v36, %v4648_v62 }
 0x202   :  { %v9225_v6 = vpop.f32.mrf.mxu1  ;;  %9464 = vmatmul.mubr.msk.bf16.vlgmr.msra.gmra.mxu1 %vm19_vm0, %v4707_v58  ;;  %9535 = vmatprep.mubr.msk.bf16.mxu0 %vm19_vm0, %v5270_v24  ;;  %604 = vst.msk [vmem:[#allocation3 + $0xd0] sm:$0xff] %vm19_vm0, %v439_v28  ;;  %v4651_v58 = vld [vmem:[#allocation2 + $0x99] sm:$0xff]  ;;  %v5214_v39 = vld [vmem:[#allocation2 + $0xaa] sm:$0xff] }
 0x203   :  { %v11675_v15 = vadd.f32 %v3313_v32, %v2920_v3  ;;  %v2925_v22 = vadd.f32 %v9225_v6, %v11209_v37  ;;  %v3326_v17 = vpop.f32.mrf.mxu0  ;;  %9467 = vmatprep.mubr.msk.bf16.mxu1 %vm19_vm0, %v4708_v19  ;;  %v441_v63 = vpop.permute.xlu1 %440  ;;  %6323 = vrot.lane.b32.xlu0 %v6175_v53, %s9881_s2  ;;  %v5271_v37 = vpack.c.bf16 %v5211_v52, %v5210_v26  ;;  %v4652_v52 = vld [vmem:[#allocation2 + $0xa9] sm:$0xff] }
 0x204   :  { %v2764_v13 = vpop.f32.mrf.mxu1  ;;  %605 = vst.msk [vmem:[#allocation3 + $0xd8] sm:$0xff] %vm19_vm0, %v441_v63  ;;  %v4710_v6 = vpack.c.bf16 %v4651_v58, %v4650_v46  ;;  %v6177_v63 = vld [vmem:[#allocation3 + $0xb0] sm:$0xff]  ;;  %v5216_v53 = vld [vmem:[#allocation2 + $0xc2] sm:$0xff] }
 0x205   :  { %v11681_v24 = vadd.f32 %v9293_v12, %v2925_v22  ;;  %v2923_v38 = vadd.f32 %v2764_v13, %v11214_v43  ;;  %v9294_v32 = vpop.f32.mrf.mxu0  ;;  %v443_v49 = vpop.permute.xlu0 %442  ;;  %6325 = vrot.lane.b32.xlu1 %v6176_v16, %s9881_s2  ;;  %v6178_v22 = vld [vmem:[#allocation3 + $0xb8] sm:$0xff]  ;;  %v5217_v58 = vld [vmem:[#allocation2 + $0xca] sm:$0xff] }
 0x206   :  { %v9226_v19 = vpop.f32.mrf.mxu1  ;;  %606 = vst.msk [vmem:[#allocation3 + $0xe0] sm:$0xff] %vm19_vm0, %v443_v49  ;;  %v5215_v16 = vld [vmem:[#allocation2 + $0xb2] sm:$0xff] }
 0x207   :  { %v11686_v60 = vadd.f32 %v3326_v17, %v2923_v38  ;;  %v2926_v3 = vadd.f32 %v9226_v19, %v11223_v45  ;;  %v3329_v28 = vpop.f32.mrf.mxu0  ;;  %v445_v12 = vpop.permute.xlu1 %444  ;;  %6327 = vrot.lane.b32.xlu0 %v6177_v63, %s9881_s2  ;;  %v4654_v19 = vld [vmem:[#allocation2 + $0xc1] sm:$0xff]  ;;  %v5274_v63 = vpack.c.bf16 %v5217_v58, %v5216_v53 }
 0x208   :  { %v2767_v43 = vpop.f32.mrf.mxu1  ;;  %607 = vst.msk [vmem:[#allocation3 + $0xe8] sm:$0xff] %vm19_vm0, %v445_v12  ;;  %v4657_v53 = vld [vmem:[#allocation2 + $0xe1] sm:$0xff] }
 0x209   :  { %v11691_v26 = vadd.f32 %v9294_v32, %v2926_v3  ;;  %v2924_v62 = vadd.f32 %v2767_v43, %v11230_v9  ;;  %v9297_v36 = vpop.f32.mrf.mxu0  ;;  %9536 = vmatmul.mubr.msk.bf16.gmra.mxu0 %vm19_vm0, %v5271_v37  ;;  %v447_v45 = vpop.permute.xlu0 %446  ;;  %6329 = vrot.lane.b32.xlu1 %v6178_v22, %s9881_s2  ;;  %v6180_v32 = vld [vmem:[#allocation3 + $0xc8] sm:$0xff]  ;;  %v6179_v37 = vld [vmem:[#allocation3 + $0xc0] sm:$0xff]  ;;  %v4711_v22 = vpack.c.bf16 %v4653_v7, %v4652_v52 }
 0x20a   :  { %v9229_v17 = vpop.f32.mrf.mxu1  ;;  %9468 = vmatmul.mubr.msk.bf16.gmra.mxu1 %vm19_vm0, %v4709_v50  ;;  %9539 = vmatprep.mubr.msk.bf16.mxu0 %vm19_vm0, %v5272_v54  ;;  %608 = vst.msk [vmem:[#allocation3 + $0xf0] sm:$0xff] %vm19_vm0, %v447_v45  ;;  %v4655_v50 = vld [vmem:[#allocation2 + $0xc9] sm:$0xff]  ;;  %v5218_v58 = vld [vmem:[#allocation2 + $0xda] sm:$0xff] }
 0x20b   :  { %v11699_v13 = vadd.f32 %v3329_v28, %v2924_v62  ;;  %v2929_v9 = vadd.f32 %v9229_v17, %v11241_v20  ;;  %v3342_v46 = vpop.f32.mrf.mxu0  ;;  %9471 = vmatprep.mubr.msk.bf16.mxu1 %vm19_vm0, %v4710_v6  ;;  %v449_v38 = vpop.permute.xlu1 %448  ;;  %6331 = vrot.lane.b32.xlu0 %v6179_v37, %s9881_s2  ;;  %v5273_v20 = vpack.c.bf16 %v5215_v16, %v5214_v39  ;;  %v4656_v16 = vld [vmem:[#allocation2 + $0xd9] sm:$0xff] }
 0x20c   :  { %v2780_v49 = vpop.f32.mrf.mxu1  ;;  %609 = vst.msk [vmem:[#allocation3 + $0xf8] sm:$0xff] %vm19_vm0, %v449_v38  ;;  %v4712_v17 = vpack.c.bf16 %v4655_v50, %v4654_v19  ;;  %v6181_v38 = vld [vmem:[#allocation3 + $0xd0] sm:$0xff] }
 0x20d   :  { %v11705_v54 = vadd.f32 %v9297_v36, %v2929_v9  ;;  %v2927_v3 = vadd.f32 %v2780_v49, %v11245_v30  ;;  %v9298_v28 = vpop.f32.mrf.mxu0  ;;  %v451_v12 = vpop.permute.xlu0 %450  ;;  %6333 = vrot.lane.b32.xlu1 %v6180_v32, %s9881_s2  ;;  %v6182_v9 = vld [vmem:[#allocation3 + $0xd8] sm:$0xff]  ;;  %v5219_v32 = vld [vmem:[#allocation2 + $0xe2] sm:$0xff] }
 0x20e   :  { %v9230_v6 = vpop.f32.mrf.mxu1  ;;  %610 = vst.msk [vmem:[#allocation3 + $0x100] sm:$0xff] %vm19_vm0, %v451_v12  ;;  %v5220_v37 = vld [vmem:[#allocation2 + $0xf2] sm:$0xff]  ;;  %v6183_v12 = vld [vmem:[#allocation3 + $0xe0] sm:$0xff] }
 0x20f   :  { %v11710_v43 = vadd.f32 %v3342_v46, %v2927_v3  ;;  %v2930_v62 = vadd.f32 %v9230_v6, %v11255_v40  ;;  %v3345_v45 = vpop.f32.mrf.mxu0  ;;  %v453_v36 = vpop.permute.xlu1 %452  ;;  %6335 = vrot.lane.b32.xlu0 %v6181_v38, %s9881_s2  ;;  %v5221_v3 = vld [vmem:[#allocation2 + $0xfa] sm:$0xff]  ;;  %v5275_v38 = vpack.c.bf16 %v5219_v32, %v5218_v58 }
 0x210   :  { %v2783_v30 = vpop.f32.mrf.mxu1  ;;  %611 = vst.msk [vmem:[#allocation3 + $0x108] sm:$0xff] %vm19_vm0, %v453_v36 }
 0x211   :  { %v11715_v39 = vadd.f32 %v9298_v28, %v2930_v62  ;;  %v2928_v52 = vadd.f32 %v2783_v30, %v11262_v59  ;;  %v9301_v7 = vpop.f32.mrf.mxu0  ;;  %9540 = vmatmul.mubr.msk.bf16.gmra.mxu0 %vm19_vm0, %v5273_v20  ;;  %v455_v40 = vpop.permute.xlu0 %454  ;;  %6337 = vrot.lane.b32.xlu1 %v6182_v9, %s9881_s2  ;;  %v14897_v59 = vld [vmem:[#allocation4_spill] sm:$0xff]  ;;  %v6184_v20 = vld [vmem:[#allocation3 + $0xe8] sm:$0xff] }
 0x212   :  { %v9233_v46 = vpop.f32.mrf.mxu1  ;;  %9472 = vmatmul.mubr.msk.bf16.gmra.mxu1 %vm19_vm0, %v4711_v22  ;;  %9543 = vmatprep.mubr.msk.bf16.mxu0 %vm19_vm0, %v5274_v63  ;;  %612 = vst.msk [vmem:[#allocation3 + $0x110] sm:$0xff] %vm19_vm0, %v455_v40  ;;  %v4658_v22 = vld [vmem:[#allocation2 + $0xf1] sm:$0xff]  ;;  %v4659_v62 = vld [vmem:[#allocation2 + $0xf9] sm:$0xff]  ;;  %v5276_v40 = vpack.c.bf16 %v5221_v3, %v5220_v37  ;;  %v4660_v37 = vld [vmem:[#allocation2 + $0x109] sm:$0xff] }
 0x213   :  { %v11723_v49 = vadd.f32 %v3345_v45, %v2928_v52  ;;  %v2933_v19 = vadd.f32 %v9233_v46, %v14897_v59  ;;  %v3358_v50 = vpop.f32.mrf.mxu0  ;;  %9475 = vmatprep.mubr.msk.bf16.mxu1 %vm19_vm0, %v4712_v17  ;;  %v457_v28 = vpop.permute.xlu1 %456  ;;  %6339 = vrot.lane.b32.xlu0 %v6183_v12, %s9881_s2  ;;  %v14899_v45 = vld [vmem:[#allocation5_spill] sm:$0xff]  ;;  %v4713_v52 = vpack.c.bf16 %v4657_v53, %v4656_v16  ;;  %v14901_v59 = vld [vmem:[#allocation6_spill] sm:$0xff]  ;;  %v14903_v16 = vld [vmem:[#allocation7_spill] sm:$0xff] }
 0x214   :  { %v2796_v6 = vpop.f32.mrf.mxu1  ;;  %613 = vst.msk [vmem:[#allocation3 + $0x118] sm:$0xff] %vm19_vm0, %v457_v28  ;;  %v4714_v12 = vpack.c.bf16 %v4659_v62, %v4658_v22  ;;  %v5222_v22 = vld [vmem:[#allocation2 + $0x10a] sm:$0xff]  ;;  %v5223_v62 = vld [vmem:[#allocation2 + $0x112] sm:$0xff] }
 0x215   :  { %14896 = vst [vmem:[#allocation30_spill] sm:$0xff] %v11723_v49  ;;  %v11729_v63 = vadd.f32 %v9301_v7, %v2933_v19  ;;  %v2931_v36 = vadd.f32 %v2796_v6, %v14899_v45  ;;  %v9302_v9 = vpop.f32.mrf.mxu0  ;;  %v459_v30 = vpop.permute.xlu0 %458  ;;  %6341 = vrot.lane.b32.xlu1 %v6184_v20, %s9881_s2  ;;  %v6186_v19 = vld [vmem:[#allocation3 + $0xf8] sm:$0xff] }
 0x216   :  { %v9234_v17 = vpop.f32.mrf.mxu1  ;;  %614 = vst.msk [vmem:[#allocation3 + $0x120] sm:$0xff] %vm19_vm0, %v459_v30  ;;  %v5225_v30 = vld [vmem:[#allocation2 + $0x12a] sm:$0xff] }
 0x217   :  { %14898 = vst [vmem:[#allocation31_spill] sm:$0xff] %v11729_v63  ;;  %v11734_v46 = vadd.f32 %v3358_v50, %v2931_v36  ;;  %v2934_v28 = vadd.f32 %v9234_v17, %v14901_v59  ;;  %v3361_v49 = vpop.f32.mrf.mxu0  ;;  %v461_v7 = vpop.permute.xlu1 %460  ;;  %v6185_v63 = vld [vmem:[#allocation3 + $0xf0] sm:$0xff]  ;;  %v14905_v36 = vld [vmem:[#allocation8_spill] sm:$0xff]  ;;  %v6188_v59 = vld [vmem:[#allocation3 + $0x108] sm:$0xff] }
 0x218   :  { %v2799_v6 = vpop.f32.mrf.mxu1  ;;  %615 = vst.msk [vmem:[#allocation3 + $0x128] sm:$0xff] %vm19_vm0, %v461_v7  ;;  %6343 = vrot.lane.b32.xlu0 %v6185_v63, %s9881_s2  ;;  %v4661_v50 = vld [vmem:[#allocation2 + $0x111] sm:$0xff]  ;;  %v5224_v63 = vld [vmem:[#allocation2 + $0x122] sm:$0xff] }
 0x219   :  { %14900 = vst [vmem:[#allocation4_spill] sm:$0xff] %v11734_v46  ;;  %v11739_v58 = vadd.f32 %v9302_v9, %v2934_v28  ;;  %v2932_v53 = vadd.f32 %v2799_v6, %v14903_v16  ;;  %v9305_v32 = vpop.f32.mrf.mxu0  ;;  %9544 = vmatmul.mubr.msk.bf16.gmra.mxu0 %vm19_vm0, %v5275_v38  ;;  %v463_v3 = vpop.permute.xlu0 %462  ;;  %6345 = vrot.lane.b32.xlu1 %v6186_v19, %s9881_s2  ;;  %v6187_v28 = vld [vmem:[#allocation3 + $0x100] sm:$0xff]  ;;  %v4663_v19 = vld [vmem:[#allocation2 + $0x129] sm:$0xff] }
 0x21a   :  { %v9237_v20 = vpop.f32.mrf.mxu1  ;;  %9476 = vmatmul.mubr.msk.bf16.gmra.mxu1 %vm19_vm0, %v4713_v52  ;;  %9547 = vmatprep.mubr.msk.bf16.mxu0 %vm19_vm0, %v5276_v40  ;;  %616 = vst.msk [vmem:[#allocation3 + $0x130] sm:$0xff] %vm19_vm0, %v463_v3  ;;  %v4662_v52 = vld [vmem:[#allocation2 + $0x121] sm:$0xff] }
 0x21b   :  { %14902 = vst [vmem:[#allocation5_spill] sm:$0xff] %v11739_v58  ;;  %v11747_v45 = vadd.f32 %v3361_v49, %v2932_v53  ;;  %v2937_v9 = vadd.f32 %v9237_v20, %v14905_v36  ;;  %v3374_v38 = vpop.f32.mrf.mxu0  ;;  %9479 = vmatprep.mubr.msk.bf16.mxu1 %vm19_vm0, %v4714_v12  ;;  %v465_v17 = vpop.permute.xlu1 %464  ;;  %v14907_v49 = vld [vmem:[#allocation9_spill] sm:$0xff]  ;;  %v5277_v53 = vpack.c.bf16 %v5223_v62, %v5222_v22  ;;  %v14909_v58 = vld [vmem:[#allocation10_spill] sm:$0xff] }
 0x21c   :  { %v2812_v7 = vpop.f32.mrf.mxu1  ;;  %617 = vst.msk [vmem:[#allocation3 + $0x138] sm:$0xff] %vm19_vm0, %v465_v17  ;;  %6347 = vrot.lane.b32.xlu0 %v6187_v28, %s9881_s2  ;;  %v4715_v20 = vpack.c.bf16 %v4661_v50, %v4660_v37  ;;  %v5278_v36 = vpack.c.bf16 %v5225_v30, %v5224_v63  ;;  %v4716_v28 = vpack.c.bf16 %v4663_v19, %v4662_v52  ;;  %v14911_v37 = vld [vmem:[#allocation11_spill] sm:$0xff]  ;;  %v5227_v52 = vld [vmem:[#allocation2 + $0x142] sm:$0xff] }
 0x21d   :  { %14904 = vst [vmem:[#allocation6_spill] sm:$0xff] %v11747_v45  ;;  %v11753_v40 = vadd.f32 %v9305_v32, %v2937_v9  ;;  %v2935_v6 = vadd.f32 %v2812_v7, %v14907_v49  ;;  %v9306_v16 = vpop.f32.mrf.mxu0  ;;  %v467_v3 = vpop.permute.xlu0 %466  ;;  %6349 = vrot.lane.b32.xlu1 %v6188_v59, %s9881_s2  ;;  %v6190_v9 = vld [vmem:[#allocation3 + $0x118] sm:$0xff]  ;;  %v14913_v49 = vld [vmem:[#allocation12_spill] sm:$0xff] }
 0x21e   :  { %v9238_v12 = vpop.f32.mrf.mxu1  ;;  %618 = vst.msk [vmem:[#allocation3 + $0x140] sm:$0xff] %vm19_vm0, %v467_v3  ;;  %v4664_v63 = vld [vmem:[#allocation2 + $0x139] sm:$0xff] }
 0x21f   :  { %14906 = vst [vmem:[#allocation7_spill] sm:$0xff] %v11753_v40  ;;  %v11758_v45 = vadd.f32 %v3374_v38, %v2935_v6  ;;  %v2938_v17 = vadd.f32 %v9238_v12, %v14909_v58  ;;  %v3377_v46 = vpop.f32.mrf.mxu0  ;;  %v469_v32 = vpop.permute.xlu1 %468  ;;  %v6189_v40 = vld [vmem:[#allocation3 + $0x110] sm:$0xff]  ;;  %v4665_v38 = vld [vmem:[#allocation2 + $0x141] sm:$0xff] }
 0x220   :  { %v2815_v7 = vpop.f32.mrf.mxu1  ;;  %619 = vst.msk [vmem:[#allocation3 + $0x148] sm:$0xff] %vm19_vm0, %v469_v32  ;;  %6351 = vrot.lane.b32.xlu0 %v6189_v40, %s9881_s2  ;;  %v5226_v59 = vld [vmem:[#allocation2 + $0x13a] sm:$0xff]  ;;  %v5228_v19 = vld [vmem:[#allocation2 + $0x152] sm:$0xff]  ;;  %v6192_v12 = vld [vmem:[#allocation3 + $0x128] sm:$0xff] }
 0x221   :  { %14908 = vst [vmem:[#allocation8_spill] sm:$0xff] %v11758_v45  ;;  %v11763_v22 = vadd.f32 %v9306_v16, %v2938_v17  ;;  %v2936_v50 = vadd.f32 %v2815_v7, %v14911_v37  ;;  %v9309_v62 = vpop.f32.mrf.mxu0  ;;  %9548 = vmatmul.mubr.msk.bf16.gmra.mxu0 %vm19_vm0, %v5277_v53  ;;  %v471_v58 = vpop.permute.xlu0 %470  ;;  %6353 = vrot.lane.b32.xlu1 %v6190_v9, %s9881_s2  ;;  %v5229_v53 = vld [vmem:[#allocation2 + $0x15a] sm:$0xff] }
 0x222   :  { %v9241_v30 = vpop.f32.mrf.mxu1  ;;  %9480 = vmatmul.mubr.msk.bf16.gmra.mxu1 %vm19_vm0, %v4715_v20  ;;  %9551 = vmatprep.mubr.msk.bf16.mxu0 %vm19_vm0, %v5278_v36  ;;  %620 = vst.msk [vmem:[#allocation3 + $0x150] sm:$0xff] %vm19_vm0, %v471_v58  ;;  %v6191_v17 = vld [vmem:[#allocation3 + $0x120] sm:$0xff]  ;;  %v4666_v20 = vld [vmem:[#allocation2 + $0x151] sm:$0xff] }
 0x223   :  { %14910 = vst [vmem:[#allocation9_spill] sm:$0xff] %v11763_v22  ;;  %v11771_v40 = vadd.f32 %v3377_v46, %v2936_v50  ;;  %v2941_v6 = vadd.f32 %v9241_v30, %v14913_v49  ;;  %v3390_v16 = vpop.f32.mrf.mxu0  ;;  %9483 = vmatprep.mubr.msk.bf16.mxu1 %vm19_vm0, %v4716_v28  ;;  %v473_v3 = vpop.permute.xlu1 %472  ;;  %v4667_v9 = vld [vmem:[#allocation2 + $0x159] sm:$0xff]  ;;  %v14915_v46 = vld [vmem:[#allocation13_spill] sm:$0xff]  ;;  %v5279_v50 = vpack.c.bf16 %v5227_v52, %v5226_v59  ;;  %v14917_v22 = vld [vmem:[#allocation14_spill] sm:$0xff] }
 0x224   :  { %v2828_v32 = vpop.f32.mrf.mxu1  ;;  %621 = vst.msk [vmem:[#allocation3 + $0x158] sm:$0xff] %vm19_vm0, %v473_v3  ;;  %6355 = vrot.lane.b32.xlu0 %v6191_v17, %s9881_s2  ;;  %v4717_v30 = vpack.c.bf16 %v4665_v38, %v4664_v63  ;;  %v5280_v49 = vpack.c.bf16 %v5229_v53, %v5228_v19  ;;  %v4718_v17 = vpack.c.bf16 %v4667_v9, %v4666_v20  ;;  %v14919_v63 = vld [vmem:[#allocation15_spill] sm:$0xff]  ;;  %v4668_v19 = vld [vmem:[#allocation2 + $0x169] sm:$0xff] }
 0x225   :  { %14912 = vst [vmem:[#allocation10_spill] sm:$0xff] %v11771_v40  ;;  %v11777_v36 = vadd.f32 %v9309_v62, %v2941_v6  ;;  %v2939_v7 = vadd.f32 %v2828_v32, %v14915_v46  ;;  %v9310_v37 = vpop.f32.mrf.mxu0  ;;  %v475_v58 = vpop.permute.xlu0 %474  ;;  %6357 = vrot.lane.b32.xlu1 %v6192_v12, %s9881_s2  ;;  %v6194_v6 = vld [vmem:[#allocation3 + $0x138] sm:$0xff]  ;;  %v5230_v12 = vld [vmem:[#allocation2 + $0x16a] sm:$0xff]  ;;  %v5232_v9 = vld [vmem:[#allocation2 + $0x182] sm:$0xff] }
 0x226   :  { %v9242_v28 = vpop.f32.mrf.mxu1  ;;  %622 = vst.msk [vmem:[#allocation3 + $0x160] sm:$0xff] %vm19_vm0, %v475_v58  ;;  %v5231_v20 = vld [vmem:[#allocation2 + $0x172] sm:$0xff]  ;;  %v14921_v46 = vld [vmem:[#allocation16_spill] sm:$0xff] }
 0x227   :  { %14914 = vst [vmem:[#allocation11_spill] sm:$0xff] %v11777_v36  ;;  %v11782_v40 = vadd.f32 %v3390_v16, %v2939_v7  ;;  %v2942_v3 = vadd.f32 %v9242_v28, %v14917_v22  ;;  %v3393_v45 = vpop.f32.mrf.mxu0  ;;  %v477_v62 = vpop.permute.xlu1 %476  ;;  %v6193_v36 = vld [vmem:[#allocation3 + $0x130] sm:$0xff]  ;;  %v6196_v28 = vld [vmem:[#allocation3 + $0x148] sm:$0xff] }
 0x228   :  { %v2831_v32 = vpop.f32.mrf.mxu1  ;;  %623 = vst.msk [vmem:[#allocation3 + $0x168] sm:$0xff] %vm19_vm0, %v477_v62  ;;  %6359 = vrot.lane.b32.xlu0 %v6193_v36, %s9881_s2  ;;  %v4669_v16 = vld [vmem:[#allocation2 + $0x171] sm:$0xff] }
 0x229   :  { %14916 = vst [vmem:[#allocation12_spill] sm:$0xff] %v11782_v40  ;;  %v11787_v59 = vadd.f32 %v9310_v37, %v2942_v3  ;;  %v2940_v38 = vadd.f32 %v2831_v32, %v14919_v63  ;;  %v9313_v52 = vpop.f32.mrf.mxu0  ;;  %9552 = vmatmul.mubr.msk.bf16.gmra.mxu0 %vm19_vm0, %v5279_v50  ;;  %v479_v22 = vpop.permute.xlu0 %478  ;;  %6361 = vrot.lane.b32.xlu1 %v6194_v6, %s9881_s2  ;;  %v5233_v50 = vld [vmem:[#allocation2 + $0x18a] sm:$0xff]  ;;  %v6195_v3 = vld [vmem:[#allocation3 + $0x140] sm:$0xff] }
 0x22a   :  { %v9245_v53 = vpop.f32.mrf.mxu1  ;;  %9484 = vmatmul.mubr.msk.bf16.gmra.mxu1 %vm19_vm0, %v4717_v30  ;;  %9555 = vmatprep.mubr.msk.bf16.mxu0 %vm19_vm0, %v5280_v49  ;;  %624 = vst.msk [vmem:[#allocation3 + $0x170] sm:$0xff] %vm19_vm0, %v479_v22  ;;  %v4670_v30 = vld [vmem:[#allocation2 + $0x181] sm:$0xff]  ;;  %v4671_v6 = vld [vmem:[#allocation2 + $0x189] sm:$0xff] }
 0x22b   :  { %14918 = vst [vmem:[#allocation13_spill] sm:$0xff] %v11787_v59  ;;  %v11795_v36 = vadd.f32 %v3393_v45, %v2940_v38  ;;  %v2945_v7 = vadd.f32 %v9245_v53, %v14921_v46  ;;  %v3406_v37 = vpop.f32.mrf.mxu0  ;;  %9487 = vmatprep.mubr.msk.bf16.mxu1 %vm19_vm0, %v4718_v17  ;;  %v481_v58 = vpop.permute.xlu1 %480  ;;  %v14923_v45 = vld [vmem:[#allocation17_spill] sm:$0xff]  ;;  %v5281_v38 = vpack.c.bf16 %v5231_v20, %v5230_v12  ;;  %v14924_v59 = vld [vmem:[#allocation18_spill] sm:$0xff] }
 0x22c   :  { %v2844_v62 = vpop.f32.mrf.mxu1  ;;  %625 = vst.msk [vmem:[#allocation3 + $0x178] sm:$0xff] %vm19_vm0, %v481_v58  ;;  %6363 = vrot.lane.b32.xlu0 %v6195_v3, %s9881_s2  ;;  %v4719_v53 = vpack.c.bf16 %v4669_v16, %v4668_v19  ;;  %v5282_v46 = vpack.c.bf16 %v5233_v50, %v5232_v9  ;;  %v4720_v3 = vpack.c.bf16 %v4671_v6, %v4670_v30  ;;  %v14925_v19 = vld [vmem:[#allocation19_spill] sm:$0xff]  ;;  %v5235_v30 = vld [vmem:[#allocation2 + $0x1a2] sm:$0xff] }
 0x22d   :  { %14920 = vst [vmem:[#allocation14_spill] sm:$0xff] %v11795_v36  ;;  %v11801_v49 = vadd.f32 %v9313_v52, %v2945_v7  ;;  %v2943_v32 = vadd.f32 %v2844_v62, %v14923_v45  ;;  %v9314_v63 = vpop.f32.mrf.mxu0  ;;  %v483_v22 = vpop.permute.xlu0 %482  ;;  %6365 = vrot.lane.b32.xlu1 %v6196_v28, %s9881_s2  ;;  %v6198_v7 = vld [vmem:[#allocation3 + $0x158] sm:$0xff]  ;;  %v5236_v6 = vld [vmem:[#allocation2 + $0x1e2] sm:$0xff] }
 0x22e   :  { %v9246_v17 = vpop.f32.mrf.mxu1  ;;  %626 = vst.msk [vmem:[#allocation3 + $0x180] sm:$0xff] %vm19_vm0, %v483_v22  ;;  %v4672_v9 = vld [vmem:[#allocation2 + $0x199] sm:$0xff] }
 0x22f   :  { %14922 = vst [vmem:[#allocation15_spill] sm:$0xff] %v11801_v49  ;;  %v11806_v36 = vadd.f32 %v3406_v37, %v2943_v32  ;;  %v2946_v58 = vadd.f32 %v9246_v17, %v14924_v59  ;;  %v3409_v40 = vpop.f32.mrf.mxu0  ;;  %v485_v52 = vpop.permute.xlu1 %484  ;;  %v6197_v49 = vld [vmem:[#allocation3 + $0x150] sm:$0xff]  ;;  %v4673_v37 = vld [vmem:[#allocation2 + $0x1a1] sm:$0xff] }
 0x230   :  { %v2847_v62 = vpop.f32.mrf.mxu1  ;;  %627 = vst.msk [vmem:[#allocation3 + $0x188] sm:$0xff] %vm19_vm0, %v485_v52  ;;  %6367 = vrot.lane.b32.xlu0 %v6197_v49, %s9881_s2  ;;  %v5234_v28 = vld [vmem:[#allocation2 + $0x19a] sm:$0xff]  ;;  %v6200_v22 = vld [vmem:[#allocation3 + $0x168] sm:$0xff] }
 0x231   :  { %v11811_v12 = vadd.f32 %v9314_v63, %v2946_v58  ;;  %v2944_v16 = vadd.f32 %v2847_v62, %v14925_v19  ;;  %v9317_v20 = vpop.f32.mrf.mxu0  ;;  %9556 = vmatmul.mubr.msk.bf16.gmra.mxu0 %vm19_vm0, %v5281_v38  ;;  %v487_v59 = vpop.permute.xlu0 %486  ;;  %6369 = vrot.lane.b32.xlu1 %v6198_v7, %s9881_s2  ;;  %v5237_v63 = vld [vmem:[#allocation2 + $0x1ea] sm:$0xff]  ;;  %v6199_v17 = vld [vmem:[#allocation3 + $0x160] sm:$0xff]  ;;  %v4721_v19 = vpack.c.bf16 %v4673_v37, %v4672_v9 }
 0x232   :  { %v9249_v50 = vpop.f32.mrf.mxu1  ;;  %9488 = vmatmul.mubr.msk.bf16.gmra.mxu1 %vm19_vm0, %v4719_v53  ;;  %9559 = vmatprep.mubr.msk.bf16.mxu0 %vm19_vm0, %v5282_v46  ;;  %628 = vst.msk [vmem:[#allocation3 + $0x190] sm:$0xff] %vm19_vm0, %v487_v59  ;;  %v4674_v53 = vld [vmem:[#allocation2 + $0x1e1] sm:$0xff]  ;;  %v4675_v52 = vld [vmem:[#allocation2 + $0x1e9] sm:$0xff] }
 0x233   :  { %v11819_v49 = vadd.f32 %v3409_v40, %v2944_v16  ;;  %v2949_v45 = vadd.f32 %v9249_v50, %v11401_v42  ;;  %v3422_v32 = vpop.f32.mrf.mxu0  ;;  %9491 = vmatprep.mubr.msk.bf16.mxu1 %vm19_vm0, %v4720_v3  ;;  %v489_v38 = vpop.permute.xlu1 %488  ;;  %v5283_v42 = vpack.c.bf16 %v5235_v30, %v5234_v28  ;;  %v5284_v16 = vpack.c.bf16 %v5237_v63, %v5236_v6  ;;  %v14929_v9 = vld [vmem:[#allocation20_spill] sm:$0xff] }
 0x234   :  { %v2860_v58 = vpop.f32.mrf.mxu1  ;;  %629 = vst.msk [vmem:[#allocation3 + $0x198] sm:$0xff] %vm19_vm0, %v489_v38  ;;  %6371 = vrot.lane.b32.xlu0 %v6199_v17, %s9881_s2  ;;  %v4722_v17 = vpack.c.bf16 %v4675_v52, %v4674_v53  ;;  %v4676_v6 = vld [vmem:[#allocation2 + $0x1f9] sm:$0xff] }
 0x235   :  { %v11825_v46 = vadd.f32 %v9317_v20, %v2949_v45  ;;  %v2947_v40 = vadd.f32 %v2860_v58, %v11405_v47  ;;  %v9318_v7 = vpop.f32.mrf.mxu0  ;;  %v491_v62 = vpop.permute.xlu0 %490  ;;  %6373 = vrot.lane.b32.xlu1 %v6200_v22, %s9881_s2  ;;  %v6202_v45 = vld [vmem:[#allocation3 + $0x178] sm:$0xff]  ;;  %v5239_v58 = vld [vmem:[#allocation2 + $0x202] sm:$0xff] }
 0x236   :  { %v9250_v3 = vpop.f32.mrf.mxu1  ;;  %630 = vst.msk [vmem:[#allocation3 + $0x1a0] sm:$0xff] %vm19_vm0, %v491_v62  ;;  %v5238_v22 = vld [vmem:[#allocation2 + $0x1fa] sm:$0xff]  ;;  %v5240_v53 = vld [vmem:[#allocation2 + $0x212] sm:$0xff] }
 0x237   :  { %14926 = vst [vmem:[#allocation16_spill] sm:$0xff] %v11825_v46  ;;  %v11830_v59 = vadd.f32 %v3422_v32, %v2947_v40  ;;  %v2950_v50 = vadd.f32 %v9250_v3, %v11415_v44  ;;  %v3425_v38 = vpop.f32.mrf.mxu0  ;;  %v493_v20 = vpop.permute.xlu1 %492  ;;  %v6201_v46 = vld [vmem:[#allocation3 + $0x170] sm:$0xff]  ;;  %v4677_v32 = vld [vmem:[#allocation2 + $0x201] sm:$0xff] }
 0x238   :  { %v2863_v47 = vpop.f32.mrf.mxu1  ;;  %631 = vst.msk [vmem:[#allocation3 + $0x1a8] sm:$0xff] %vm19_vm0, %v493_v20  ;;  %6375 = vrot.lane.b32.xlu0 %v6201_v46, %s9881_s2  ;;  %v14931_v46 = vld [vmem:[#allocation21_spill] sm:$0xff] }
 0x239   :  { %14927 = vst [vmem:[#allocation17_spill] sm:$0xff] %v11830_v59  ;;  %v11835_v28 = vadd.f32 %v9318_v7, %v2950_v50  ;;  %v2948_v37 = vadd.f32 %v2863_v47, %v14929_v9  ;;  %v9321_v30 = vpop.f32.mrf.mxu0  ;;  %9560 = vmatmul.mubr.msk.bf16.gmra.mxu0 %vm19_vm0, %v5283_v42  ;;  %v495_v44 = vpop.permute.xlu0 %494  ;;  %6377 = vrot.lane.b32.xlu1 %v6202_v45, %s9881_s2  ;;  %v5241_v42 = vld [vmem:[#allocation2 + $0x21a] sm:$0xff]  ;;  %v6204_v3 = vld [vmem:[#allocation3 + $0x188] sm:$0xff] }
 0x23a   :  { %v9253_v63 = vpop.f32.mrf.mxu1  ;;  %9492 = vmatmul.mubr.msk.bf16.gmra.mxu1 %vm19_vm0, %v4721_v19  ;;  %9563 = vmatprep.mubr.msk.bf16.mxu0 %vm19_vm0, %v5284_v16  ;;  %632 = vst.msk [vmem:[#allocation3 + $0x1b0] sm:$0xff] %vm19_vm0, %v495_v44  ;;  %v6203_v50 = vld [vmem:[#allocation3 + $0x180] sm:$0xff]  ;;  %v4678_v19 = vld [vmem:[#allocation2 + $0x211] sm:$0xff] }
 0x23b   :  { %14928 = vst [vmem:[#allocation18_spill] sm:$0xff] %v11835_v28  ;;  %v11843_v52 = vadd.f32 %v3425_v38, %v2948_v37  ;;  %v2953_v40 = vadd.f32 %v9253_v63, %v14931_v46  ;;  %v3438_v7 = vpop.f32.mrf.mxu0  ;;  %9495 = vmatprep.mubr.msk.bf16.mxu1 %vm19_vm0, %v4722_v17  ;;  %v497_v62 = vpop.permute.xlu1 %496  ;;  %v4679_v45 = vld [vmem:[#allocation2 + $0x219] sm:$0xff]  ;;  %v14933_v38 = vld [vmem:[#allocation22_spill] sm:$0xff]  ;;  %v5285_v37 = vpack.c.bf16 %v5239_v58, %v5238_v22 }
 0x23c   :  { %v2876_v20 = vpop.f32.mrf.mxu1  ;;  %633 = vst.msk [vmem:[#allocation3 + $0x1b8] sm:$0xff] %vm19_vm0, %v497_v62  ;;  %6379 = vrot.lane.b32.xlu0 %v6203_v50, %s9881_s2  ;;  %v4723_v63 = vpack.c.bf16 %v4677_v32, %v4676_v6  ;;  %v5286_v46 = vpack.c.bf16 %v5241_v42, %v5240_v53  ;;  %v14934_v28 = vld [vmem:[#allocation23_spill] sm:$0xff]  ;;  %v4724_v50 = vpack.c.bf16 %v4679_v45, %v4678_v19  ;;  %v14936_v6 = vld [vmem:[#allocation24_spill] sm:$0xff]  ;;  %v4680_v53 = vld [vmem:[#allocation2 + $0x229] sm:$0xff] }
 0x23d   :  { %14930 = vst [vmem:[#allocation19_spill] sm:$0xff] %v11843_v52  ;;  %v11849_v16 = vadd.f32 %v9321_v30, %v2953_v40  ;;  %v2951_v47 = vadd.f32 %v2876_v20, %v14933_v38  ;;  %v9322_v9 = vpop.f32.mrf.mxu0  ;;  %v499_v44 = vpop.permute.xlu0 %498  ;;  %6381 = vrot.lane.b32.xlu1 %v6204_v3, %s9881_s2  ;;  %v6206_v40 = vld [vmem:[#allocation3 + $0x198] sm:$0xff]  ;;  %v5242_v3 = vld [vmem:[#allocation2 + $0x22a] sm:$0xff]  ;;  %v5244_v45 = vld [vmem:[#allocation2 + $0x242] sm:$0xff] }
 0x23e   :  { %v9254_v17 = vpop.f32.mrf.mxu1  ;;  %634 = vst.msk [vmem:[#allocation3 + $0x1c0] sm:$0xff] %vm19_vm0, %v499_v44  ;;  %v5243_v19 = vld [vmem:[#allocation2 + $0x232] sm:$0xff] }
 0x23f   :  { %14932 = vst [vmem:[#allocation20_spill] sm:$0xff] %v11849_v16  ;;  %v11854_v52 = vadd.f32 %v3438_v7, %v2951_v47  ;;  %v2954_v62 = vadd.f32 %v9254_v17, %v14934_v28  ;;  %v3441_v59 = vpop.f32.mrf.mxu0  ;;  %v501_v30 = vpop.permute.xlu1 %500  ;;  %v6205_v16 = vld [vmem:[#allocation3 + $0x190] sm:$0xff]  ;;  %v6208_v44 = vld [vmem:[#allocation3 + $0x1a8] sm:$0xff]  ;;  %v6207_v17 = vld [vmem:[#allocation3 + $0x1a0] sm:$0xff] }
 0x240   :  { %v2879_v20 = vpop.f32.mrf.mxu1  ;;  %635 = vst.msk [vmem:[#allocation3 + $0x1c8] sm:$0xff] %vm19_vm0, %v501_v30  ;;  %6383 = vrot.lane.b32.xlu0 %v6205_v16, %s9881_s2  ;;  %v4681_v7 = vld [vmem:[#allocation2 + $0x231] sm:$0xff]  ;;  %v4683_v30 = vld [vmem:[#allocation2 + $0x249] sm:$0xff] }
 0x241   :  { %v11859_v22 = vadd.f32 %v9322_v9, %v2954_v62  ;;  %v2952_v32 = vadd.f32 %v2879_v20, %v14936_v6  ;;  %v9397_v58 = vpop.f32.mrf.mxu0  ;;  %9564 = vmatmul.mubr.msk.bf16.gmra.mxu0 %vm19_vm0, %v5285_v37  ;;  %v503_v28 = vpop.permute.xlu0 %502  ;;  %6385 = vrot.lane.b32.xlu1 %v6206_v40, %s9881_s2  ;;  %v5245_v9 = vld [vmem:[#allocation2 + $0x24a] sm:$0xff] }
 0x242   :  { %v9329_v42 = vpop.f32.mrf.mxu1  ;;  %9496 = vmatmul.mubr.msk.bf16.gmra.mxu1 %vm19_vm0, %v4723_v63  ;;  %9567 = vmatprep.mubr.msk.bf16.mxu0 %vm19_vm0, %v5286_v46  ;;  %636 = vst.msk [vmem:[#allocation3 + $0x1d0] sm:$0xff] %vm19_vm0, %v503_v28  ;;  %v4682_v63 = vld [vmem:[#allocation2 + $0x241] sm:$0xff]  ;;  %v5288_v28 = vpack.c.bf16 %v5245_v9, %v5244_v45  ;;  %v4684_v45 = vld [vmem:[#allocation2 + $0x259] sm:$0xff] }
 0x243   :  { %14935 = vst [vmem:[#allocation21_spill] sm:$0xff] %v11859_v22  ;;  %v11867_v16 = vadd.f32 %v3441_v59, %v2952_v32  ;;  %v4017_v38 = vadd.f32 %v9329_v42, %v11466_v29  ;;  %v4323_v47 = vpop.f32.mrf.mxu0  ;;  %9499 = vmatprep.mubr.msk.bf16.mxu1 %vm19_vm0, %v4724_v50  ;;  %v505_v37 = vpop.permute.xlu1 %504  ;;  %v14939_v59 = vld [vmem:[#allocation25_spill] sm:$0xff]  ;;  %v5287_v29 = vpack.c.bf16 %v5243_v19, %v5242_v3 }
 0x244   :  { %v3760_v62 = vpop.f32.mrf.mxu1  ;;  %637 = vst.msk [vmem:[#allocation3 + $0x1d8] sm:$0xff] %vm19_vm0, %v505_v37  ;;  %6387 = vrot.lane.b32.xlu0 %v6207_v17, %s9881_s2  ;;  %v4725_v32 = vpack.c.bf16 %v4681_v7, %v4680_v53  ;;  %v4726_v17 = vpack.c.bf16 %v4683_v30, %v4682_v63  ;;  %v14942_v53 = vld [vmem:[#allocation28_spill] sm:$0xff]  ;;  %v5248_v30 = vld [vmem:[#allocation2 + $0x272] sm:$0xff] }
 0x245   :  { %14937 = vst [vmem:[#allocation22_spill] sm:$0xff] %v11867_v16  ;;  %v11873_v46 = vadd.f32 %v9397_v58, %v4017_v38  ;;  %v4015_v40 = vadd.f32 %v3760_v62, %v14939_v59  ;;  %v9398_v20 = vpop.f32.mrf.mxu0  ;;  %v507_v6 = vpop.permute.xlu0 %506  ;;  %6389 = vrot.lane.b32.xlu1 %v6208_v44, %s9881_s2  ;;  %v14940_v16 = vld [vmem:[#allocation26_spill] sm:$0xff]  ;;  %v6210_v38 = vld [vmem:[#allocation3 + $0x1b8] sm:$0xff]  ;;  %v5247_v63 = vld [vmem:[#allocation2 + $0x262] sm:$0xff] }
 0x246   :  { %v9330_v50 = vpop.f32.mrf.mxu1  ;;  %638 = vst.msk [vmem:[#allocation3 + $0x1e0] sm:$0xff] %vm19_vm0, %v507_v6  ;;  %v5246_v44 = vld [vmem:[#allocation2 + $0x25a] sm:$0xff] }
 0x247   :  { %14938 = vst [vmem:[#allocation23_spill] sm:$0xff] %v11873_v46  ;;  %v11878_v42 = vadd.f32 %v4323_v47, %v4015_v40  ;;  %v4018_v37 = vadd.f32 %v9330_v50, %v14940_v16  ;;  %v4326_v22 = vpop.f32.mrf.mxu0  ;;  %v509_v58 = vpop.permute.xlu1 %508  ;;  %v6209_v46 = vld [vmem:[#allocation3 + $0x1b0] sm:$0xff]  ;;  %v4685_v47 = vld [vmem:[#allocation2 + $0x261] sm:$0xff] }
 0x248   :  { %v3763_v62 = vpop.f32.mrf.mxu1  ;;  %639 = vst.msk [vmem:[#allocation3 + $0x1e8] sm:$0xff] %vm19_vm0, %v509_v58  ;;  %6391 = vrot.lane.b32.xlu0 %v6209_v46, %s9881_s2  ;;  %v6212_v6 = vld [vmem:[#allocation3 + $0x1c8] sm:$0xff]  ;;  %v6211_v50 = vld [vmem:[#allocation3 + $0x1c0] sm:$0xff] }
 0x249   :  { %v11883_v3 = vadd.f32 %v9398_v20, %v4018_v37  ;;  %v4016_v7 = vadd.f32 %v3763_v62, %v14942_v53  ;;  %v9401_v19 = vpop.f32.mrf.mxu0  ;;  %9568 = vmatmul.mubr.msk.bf16.gmra.mxu0 %vm19_vm0, %v5287_v29  ;;  %v511_v16 = vpop.permute.xlu0 %510  ;;  %6393 = vrot.lane.b32.xlu1 %v6210_v38, %s9881_s2  ;;  %v5249_v20 = vld [vmem:[#allocation2 + $0x27a] sm:$0xff]  ;;  %v4727_v62 = vpack.c.bf16 %v4685_v47, %v4684_v45  ;;  %v4688_v45 = vld [vmem:[#allocation2 + $0x289] sm:$0xff]  ;;  %v4689_v47 = vld [vmem:[#allocation2 + $0x291] sm:$0xff] }
 0x24a   :  { %v9333_v9 = vpop.f32.mrf.mxu1  ;;  %9500 = vmatmul.mubr.msk.bf16.gmra.mxu1 %vm19_vm0, %v4725_v32  ;;  %9571 = vmatprep.mubr.msk.bf16.mxu0 %vm19_vm0, %v5288_v28  ;;  %640 = vst.msk [vmem:[#allocation3 + $0x1f0] sm:$0xff] %vm19_vm0, %v511_v16  ;;  %v4686_v32 = vld [vmem:[#allocation2 + $0x271] sm:$0xff]  ;;  %v4687_v58 = vld [vmem:[#allocation2 + $0x279] sm:$0xff]  ;;  %v5290_v53 = vpack.c.bf16 %v5249_v20, %v5248_v30 }
 0x24b   :  { %14941 = vst [vmem:[#allocation24_spill] sm:$0xff] %v11883_v3  ;;  %v11891_v46 = vadd.f32 %v4326_v22, %v4016_v7  ;;  %v4021_v59 = vadd.f32 %v9333_v9, %v11499_v8  ;;  %v4339_v40 = vpop.f32.mrf.mxu0  ;;  %9503 = vmatprep.mubr.msk.bf16.mxu1 %vm19_vm0, %v4726_v17  ;;  %v513_v29 = vpop.permute.xlu1 %512  ;;  %v5289_v8 = vpack.c.bf16 %v5247_v63, %v5246_v44  ;;  %v6213_v3 = vld [vmem:[#allocation3 + $0x1d0] sm:$0xff] }
 0x24c   :  { %v3776_v37 = vpop.f32.mrf.mxu1  ;;  %641 = vst.msk [vmem:[#allocation3 + $0x1f8] sm:$0xff] %vm19_vm0, %v513_v29  ;;  %6395 = vrot.lane.b32.xlu0 %v6211_v50, %s9881_s2  ;;  %v6214_v29 = vld [vmem:[#allocation3 + $0x1d8] sm:$0xff] }
 0x24d   :  { %14943 = vst [vmem:[#allocation25_spill] sm:$0xff] %v11891_v46  ;;  %v11897_v28 = vadd.f32 %v9401_v19, %v4021_v59  ;;  %v4019_v22 = vadd.f32 %v3776_v37, %v11503_v31  ;;  %v9402_v38 = vpop.f32.mrf.mxu0  ;;  %6397 = vrot.lane.b32.xlu1 %v6212_v6, %s9881_s2  ;;  %v4728_v46 = vpack.c.bf16 %v4687_v58, %v4686_v32  ;;  %v14944_v31 = vld [vmem:[#allocation27_spill] sm:$0xff]  ;;  %v5253_v37 = vld [vmem:[#allocation2 + $0x2aa] sm:$0xff]  ;;  %v6215_v58 = vld [vmem:[#allocation3 + $0x1e0] sm:$0xff] }
 0x24e   :  { %v9334_v17 = vpop.f32.mrf.mxu1  ;;  %v5251_v59 = vld [vmem:[#allocation2 + $0x292] sm:$0xff] }
 0x24f   :  { %v11901_v7 = vadd.f32 %v4339_v40, %v4019_v22  ;;  %v4022_v16 = vadd.f32 %v9334_v17, %v11515_v1  ;;  %v4342_v9 = vpop.f32.mrf.mxu0  ;;  %v5250_v1 = vld [vmem:[#allocation2 + $0x28a] sm:$0xff]  ;;  %v5252_v40 = vld [vmem:[#allocation2 + $0x2a2] sm:$0xff] }
 0x250   :  { %v3779_v50 = vpop.f32.mrf.mxu1  ;;  %6399 = vrot.lane.b32.xlu0 %v6213_v3, %s9881_s2  ;;  %v6216_v32 = vld [vmem:[#allocation3 + $0x1e8] sm:$0xff] }
 0x251   :  { %v11905_v19 = vadd.f32 %v9402_v38, %v4022_v16  ;;  %v4020_v44 = vadd.f32 %v3779_v50, %v14944_v31  ;;  %v9405_v63 = vpop.f32.mrf.mxu0  ;;  %9572 = vmatmul.mubr.msk.bf16.gmra.mxu0 %vm19_vm0, %v5289_v8  ;;  %6401 = vrot.lane.b32.xlu1 %v6214_v29, %s9881_s2  ;;  %v4690_v38 = vld [vmem:[#allocation2 + $0x2a1] sm:$0xff]  ;;  %v4691_v8 = vld [vmem:[#allocation2 + $0x2a9] sm:$0xff]  ;;  %v5291_v16 = vpack.c.bf16 %v5251_v59, %v5250_v1 }
 0x252   :  { %v9337_v30 = vpop.f32.mrf.mxu1  ;;  %9504 = vmatmul.mubr.msk.bf16.gmra.mxu1 %vm19_vm0, %v4727_v62  ;;  %9575 = vmatprep.mubr.msk.bf16.mxu0 %vm19_vm0, %v5290_v53  ;;  %v5292_v29 = vpack.c.bf16 %v5253_v37, %v5252_v40  ;;  %v5255_v40 = vld [vmem:[#allocation2 + $0x2c2] sm:$0xff] }
 0x253   :  { %v11912_v3 = vadd.f32 %v4342_v9, %v4020_v44  ;;  %v4025_v20 = vadd.f32 %v9337_v30, %v11535_v27  ;;  %v4355_v6 = vpop.f32.mrf.mxu0  ;;  %9507 = vmatprep.mubr.msk.bf16.mxu1 %vm19_vm0, %v4728_v46  ;;  %v4729_v9 = vpack.c.bf16 %v4689_v47, %v4688_v45  ;;  %v4730_v44 = vpack.c.bf16 %v4691_v8, %v4690_v38  ;;  %v6218_v30 = vld [vmem:[#allocation3 + $0x1f8] sm:$0xff]  ;;  %v4693_v37 = vld [vmem:[#allocation2 + $0x2c1] sm:$0xff] }
 0x254   :  { %v3792_v22 = vpop.f32.mrf.mxu1  ;;  %6403 = vrot.lane.b32.xlu0 %v6215_v58, %s9881_s2  ;;  %v5254_v47 = vld [vmem:[#allocation2 + $0x2ba] sm:$0xff]  ;;  %v4694_v8 = vld [vmem:[#allocation2 + $0x2d1] sm:$0xff] }
 0x255   :  { %14945 = vst [vmem:[#allocation26_spill] sm:$0xff] %v11912_v3  ;;  %v11917_v17 = vadd.f32 %v9405_v63, %v4025_v20  ;;  %v4023_v62 = vadd.f32 %v3792_v22, %v11539_v34  ;;  %v9406_v53 = vpop.f32.mrf.mxu0  ;;  %6405 = vrot.lane.b32.xlu1 %v6216_v32, %s9881_s2  ;;  %v6217_v3 = vld [vmem:[#allocation3 + $0x1f0] sm:$0xff]  ;;  %v14946_v34 = vld [vmem:[#allocation29_spill] sm:$0xff]  ;;  %v5257_v22 = vld [vmem:[#allocation2 + $0x2da] sm:$0xff] }
 0x256   :  { %v9338_v27 = vpop.f32.mrf.mxu1  ;;  %v5256_v32 = vld [vmem:[#allocation2 + $0x2d2] sm:$0xff] }
 0x257   :  { %v11921_v46 = vadd.f32 %v4355_v6, %v4023_v62  ;;  %v4026_v50 = vadd.f32 %v9338_v27, %v11548_v51  ;;  %v4358_v31 = vpop.f32.mrf.mxu0  ;;  %v4692_v51 = vld [vmem:[#allocation2 + $0x2b9] sm:$0xff] }
 0x258   :  { %v3795_v58 = vpop.f32.mrf.mxu1  ;;  %6407 = vrot.lane.b32.xlu0 %v6217_v3, %s9881_s2  ;;  %v4695_v62 = vld [vmem:[#allocation2 + $0x2d9] sm:$0xff] }
 0x259   :  { %v11925_v63 = vadd.f32 %v9406_v53, %v4026_v50  ;;  %v4024_v1 = vadd.f32 %v3795_v58, %v14946_v34  ;;  %v9409_v59 = vpop.f32.mrf.mxu0  ;;  %9576 = vmatmul.mubr.msk.bf16.gmra.mxu0 %vm19_vm0, %v5291_v16  ;;  %6409 = vrot.lane.b32.xlu1 %v6218_v30, %s9881_s2  ;;  %v4731_v50 = vpack.c.bf16 %v4693_v37, %v4692_v51  ;;  %v4696_v51 = vld [vmem:[#allocation2 + $0x2e9] sm:$0xff]  ;;  %v4697_v37 = vld [vmem:[#allocation2 + $0x2f1] sm:$0xff] }
 0x25a   :  { %v9341_v45 = vpop.f32.mrf.mxu1  ;;  %9508 = vmatmul.mubr.msk.bf16.gmra.mxu1 %vm19_vm0, %v4729_v9  ;;  %9579 = vmatprep.mubr.msk.bf16.mxu0 %vm19_vm0, %v5292_v29  ;;  %v5293_v9 = vpack.c.bf16 %v5255_v40, %v5254_v47  ;;  %v4732_v58 = vpack.c.bf16 %v4695_v62, %v4694_v8  ;;  %v5258_v47 = vld [vmem:[#allocation2 + $0x2ea] sm:$0xff]  ;;  %v5259_v40 = vld [vmem:[#allocation2 + $0x2f2] sm:$0xff] }
 0x25b   :  { %v11932_v20 = vadd.f32 %v4358_v31, %v4024_v1  ;;  %v4029_v3 = vadd.f32 %v9341_v45, %v11562_v14  ;;  %v4371_v6 = vpop.f32.mrf.mxu0  ;;  %9511 = vmatprep.mubr.msk.bf16.mxu1 %vm19_vm0, %v4730_v44  ;;  %v5294_v31 = vpack.c.bf16 %v5257_v22, %v5256_v32  ;;  %v5261_v32 = vld [vmem:[#allocation2 + $0x30a] sm:$0xff] }
 0x25c   :  { %v3808_v38 = vpop.f32.mrf.mxu1  ;;  %v4699_v8 = vld [vmem:[#allocation2 + $0x309] sm:$0xff] }
 0x25d   :  { %v11936_v53 = vadd.f32 %v9409_v59, %v4029_v3  ;;  %v4027_v16 = vadd.f32 %v3808_v38, %v11566_v2  ;;  %v9410_v27 = vpop.f32.mrf.mxu0  ;;  %v4698_v38 = vld [vmem:[#allocation2 + $0x301] sm:$0xff] }
 0x25e   :  { %v9342_v29 = vpop.f32.mrf.mxu1 }
 0x25f   :  { %v11939_v30 = vadd.f32 %v4371_v6, %v4027_v16  ;;  %v4030_v14 = vadd.f32 %v9342_v29, %v11572_v35  ;;  %v4374_v44 = vpop.f32.mrf.mxu0 }
 0x260   :  { %v3811_v34 = vpop.f32.mrf.mxu1 }
 0x261   :  { %v11942_v1 = vadd.f32 %v9410_v27, %v4030_v14  ;;  %v4028_v45 = vadd.f32 %v3811_v34, %v11579_v23  ;;  %v9413_v59 = vpop.f32.mrf.mxu0  ;;  %9580 = vmatmul.mubr.msk.bf16.gmra.mxu0 %vm19_vm0, %v5293_v9  ;;  %v5260_v23 = vld [vmem:[#allocation2 + $0x302] sm:$0xff]  ;;  %v5295_v9 = vpack.c.bf16 %v5259_v40, %v5258_v47  ;;  %v5262_v47 = vld [vmem:[#allocation2 + $0x31a] sm:$0xff] }
 0x262   :  { %v9345_v2 = vpop.f32.mrf.mxu1  ;;  %9512 = vmatmul.mubr.msk.bf16.gmra.mxu1 %vm19_vm0, %v4731_v50  ;;  %9583 = vmatprep.mubr.msk.bf16.mxu0 %vm19_vm0, %v5294_v31  ;;  %v4733_v50 = vpack.c.bf16 %v4697_v37, %v4696_v51  ;;  %v5296_v31 = vpack.c.bf16 %v5261_v32, %v5260_v23  ;;  %v4700_v51 = vld [vmem:[#allocation2 + $0x319] sm:$0xff]  ;;  %v5263_v40 = vld [vmem:[#allocation2 + $0x322] sm:$0xff] }
 0x263   :  { %v11948_v3 = vadd.f32 %v4374_v44, %v4028_v45  ;;  %v4033_v35 = vadd.f32 %v9345_v2, %v11586_v11  ;;  %v4387_v6 = vpop.f32.mrf.mxu0  ;;  %9515 = vmatprep.mubr.msk.bf16.mxu1 %vm19_vm0, %v4732_v58  ;;  %v4734_v58 = vpack.c.bf16 %v4699_v8, %v4698_v38  ;;  %v4701_v37 = vld [vmem:[#allocation2 + $0x321] sm:$0xff]  ;;  %v4703_v38 = vld [vmem:[#allocation2 + $0x339] sm:$0xff] }
 0x264   :  { %v3824_v22 = vpop.f32.mrf.mxu1  ;;  %v5265_v23 = vld [vmem:[#allocation2 + $0x33a] sm:$0xff] }
 0x265   :  { %v11952_v62 = vadd.f32 %v9413_v59, %v4033_v35  ;;  %v4031_v16 = vadd.f32 %v3824_v22, %v11590_v48  ;;  %v9414_v27 = vpop.f32.mrf.mxu0  ;;  %v4702_v22 = vld [vmem:[#allocation2 + $0x331] sm:$0xff] }
 0x266   :  { %v9346_v29 = vpop.f32.mrf.mxu1 }
 0x267   :  { %v11955_v14 = vadd.f32 %v4387_v6, %v4031_v16  ;;  %v4034_v11 = vadd.f32 %v9346_v29, %v11596_v25  ;;  %v4390_v44 = vpop.f32.mrf.mxu0 }
 0x268   :  { %v3827_v34 = vpop.f32.mrf.mxu1 }
 0x269   :  { %v11958_v45 = vadd.f32 %v9414_v27, %v4034_v11  ;;  %v4032_v2 = vadd.f32 %v3827_v34, %v11603_v33  ;;  %v9417_v59 = vpop.f32.mrf.mxu0  ;;  %9584 = vmatmul.mubr.msk.bf16.gmra.mxu0 %vm19_vm0, %v5295_v9  ;;  %v5264_v33 = vld [vmem:[#allocation2 + $0x332] sm:$0xff]  ;;  %v5297_v9 = vpack.c.bf16 %v5263_v40, %v5262_v47 }
 0x26a   :  { %v9349_v48 = vpop.f32.mrf.mxu1  ;;  %9516 = vmatmul.mubr.msk.bf16.gmra.mxu1 %vm19_vm0, %v4733_v50  ;;  %9587 = vmatprep.mubr.msk.bf16.mxu0 %vm19_vm0, %v5296_v31  ;;  %v4735_v50 = vpack.c.bf16 %v4701_v37, %v4700_v51  ;;  %v5298_v31 = vpack.c.bf16 %v5265_v23, %v5264_v33  ;;  %v5266_v51 = vld [vmem:[#allocation2 + $0x34a] sm:$0xff]  ;;  %v5267_v47 = vld [vmem:[#allocation2 + $0x352] sm:$0xff] }
 0x26b   :  { %v11964_v35 = vadd.f32 %v4390_v44, %v4032_v2  ;;  %v4037_v25 = vadd.f32 %v9349_v48, %v11610_v57  ;;  %v4403_v6 = vpop.f32.mrf.mxu0  ;;  %9519 = vmatprep.mubr.msk.bf16.mxu1 %vm19_vm0, %v4734_v58  ;;  %v4736_v58 = vpack.c.bf16 %v4703_v38, %v4702_v22  ;;  %v4705_v37 = vld [vmem:[#allocation2 + $0x351] sm:$0xff]  ;;  %v5299_v22 = vpack.c.bf16 %v5267_v47, %v5266_v51 }
 0x26c   :  { %v3840_v32 = vpop.f32.mrf.mxu1 }
 0x26d   :  { %v11968_v8 = vadd.f32 %v9417_v59, %v4037_v25  ;;  %v4035_v16 = vadd.f32 %v3840_v32, %v11614_v21  ;;  %v9418_v27 = vpop.f32.mrf.mxu0 }
 0x26e   :  { %v9350_v29 = vpop.f32.mrf.mxu1 }
 0x26f   :  { %v11971_v11 = vadd.f32 %v4403_v6, %v4035_v16  ;;  %v4038_v57 = vadd.f32 %v9350_v29, %v11620_v41  ;;  %v4406_v44 = vpop.f32.mrf.mxu0  ;;  %v4704_v6 = vld [vmem:[#allocation2 + $0x349] sm:$0xff] }
 0x270   :  { %v3843_v34 = vpop.f32.mrf.mxu1  ;;  %v4737_v16 = vpack.c.bf16 %v4705_v37, %v4704_v6 }
 0x271   :  { %v11974_v2 = vadd.f32 %v9418_v27, %v4038_v57  ;;  %v4036_v48 = vadd.f32 %v3843_v34, %v11627_v4  ;;  %v9421_v59 = vpop.f32.mrf.mxu0  ;;  %9588 = vmatmul.mubr.msk.bf16.gmra.mxu0 %vm19_vm0, %v5297_v9 }
 0x272   :  { %v9353_v21 = vpop.f32.mrf.mxu1  ;;  %9520 = vmatmul.mubr.msk.bf16.gmra.mxu1 %vm19_vm0, %v4735_v50  ;;  %9591 = vmatprep.mubr.msk.bf16.mxu0 %vm19_vm0, %v5298_v31 }
 0x273   :  { %v11980_v40 = vadd.f32 %v4406_v44, %v4036_v48  ;;  %v4041_v41 = vadd.f32 %v9353_v21, %v11634_v18  ;;  %v4419_v25 = vpop.f32.mrf.mxu0  ;;  %9523 = vmatprep.mubr.msk.bf16.mxu1 %vm19_vm0, %v4736_v58 }
 0x274   :  { %v3856_v4 = vpop.f32.mrf.mxu1 }
 0x275   :  { %v11984_v33 = vadd.f32 %v9421_v59, %v4041_v41  ;;  %v4039_v23 = vadd.f32 %v3856_v4, %v11638_v55  ;;  %v9422_v32 = vpop.f32.mrf.mxu0 }
 0x276   :  { %v9354_v38 = vpop.f32.mrf.mxu1 }
 0x277   :  { %v11987_v27 = vadd.f32 %v4419_v25, %v4039_v23  ;;  %v4042_v9 = vadd.f32 %v9354_v38, %v11643_v61  ;;  %v4422_v29 = vpop.f32.mrf.mxu0 }
 0x278   :  { %v3859_v18 = vpop.f32.mrf.mxu1 }
 0x279   :  { %v11990_v50 = vadd.f32 %v9422_v32, %v4042_v9  ;;  %v4040_v31 = vadd.f32 %v3859_v18, %v11651_v0  ;;  %v9425_v57 = vpop.f32.mrf.mxu0  ;;  %9592 = vmatmul.mubr.msk.bf16.gmra.mxu0 %vm19_vm0, %v5299_v22 }
 0x27a   :  { %v9357_v44 = vpop.f32.mrf.mxu1  ;;  %9524 = vmatmul.mubr.msk.bf16.gmra.mxu1 %vm19_vm0, %v4737_v16 }
 0x27b   :  { %v11995_v55 = vadd.f32 %v4422_v29, %v4040_v31  ;;  %v4045_v58 = vadd.f32 %v9357_v44, %v11657_v5  ;;  %v4435_v34 = vpop.f32.mrf.mxu0 }
 0x27c   :  { %v3872_v48 = vpop.f32.mrf.mxu1 }
 0x27d   :  { %v11998_v59 = vadd.f32 %v9425_v57, %v4045_v58  ;;  %v4043_v61 = vadd.f32 %v3872_v48, %v11662_v56  ;;  %v9426_v21 = vpop.f32.mrf.mxu0 }
 0x27e   :  { %v9358_v51 = vpop.f32.mrf.mxu1 }
 0x27f   :  { %v12001_v47 = vadd.f32 %v4435_v34, %v4043_v61  ;;  %v4046_v0 = vadd.f32 %v9358_v51, %v11667_v10  ;;  %v4438_v41 = vpop.f32.mrf.mxu0 }
 0x280   :  { %v3875_v25 = vpop.f32.mrf.mxu1 }
 0x281   :  { %v12004_v6 = vadd.f32 %v9426_v21, %v4046_v0  ;;  %v4044_v37 = vadd.f32 %v3875_v25, %v11675_v15  ;;  %v9429_v4 = vpop.f32.mrf.mxu0 }
 0x282   :  { %v9361_v5 = vpop.f32.mrf.mxu1 }
 0x283   :  { %v12007_v23 = vadd.f32 %v4438_v41, %v4044_v37  ;;  %v4049_v32 = vadd.f32 %v9361_v5, %v11681_v24  ;;  %v4451_v22 = vpop.f32.mrf.mxu0 }
 0x284   :  { %v3888_v56 = vpop.f32.mrf.mxu1 }
 0x285   :  { %v12010_v38 = vadd.f32 %v9429_v4, %v4049_v32  ;;  %v4047_v16 = vadd.f32 %v3888_v56, %v11686_v60  ;;  %v9430_v9 = vpop.f32.mrf.mxu0  ;;  %v12028_v4 = vpop.permute.xlu0 %6283  ;;  %v14948_v32 = vld [vmem:[#allocation30_spill] sm:$0xff] }
 0x286   :  { %v9362_v10 = vpop.f32.mrf.mxu1  ;;  %14947 = vst [vmem:[#allocation28_spill] sm:$0xff] %v12028_v4 }
 0x287   :  { %v12013_v29 = vadd.f32 %v4451_v22, %v4047_v16  ;;  %v4050_v18 = vadd.f32 %v9362_v10, %v11691_v26  ;;  %v4454_v31 = vpop.f32.mrf.mxu0 }
 0x288   :  { %v3891_v15 = vpop.f32.mrf.mxu1 }
 0x289   :  { %v12016_v57 = vadd.f32 %v9430_v9, %v4050_v18  ;;  %v4048_v44 = vadd.f32 %v3891_v15, %v11699_v13  ;;  %v9433_v58 = vpop.f32.mrf.mxu0  ;;  %v14949_v9 = vld [vmem:[#allocation31_spill] sm:$0xff]  ;;  %v12036_v18 = vpop.permute.xlu1 %6285 }
 0x28a   :  { %v9365_v24 = vpop.f32.mrf.mxu1  ;;  %14950 = vst [vmem:[#allocation27_spill] sm:$0xff] %v12036_v18 }
 0x28b   :  { %v12019_v34 = vadd.f32 %v4454_v31, %v4048_v44  ;;  %v4053_v48 = vadd.f32 %v9365_v24, %v11705_v54  ;;  %v4467_v61 = vpop.f32.mrf.mxu0 }
 0x28c   :  { %v3904_v60 = vpop.f32.mrf.mxu1 }
 0x28d   :  { %v12022_v21 = vadd.f32 %v9433_v58, %v4053_v48  ;;  %v4051_v51 = vadd.f32 %v3904_v60, %v11710_v43  ;;  %v9434_v0 = vpop.f32.mrf.mxu0  ;;  %v12041_v48 = vpop.permute.xlu0 %6287  ;;  %v14953_v60 = vld [vmem:[#allocation5_spill] sm:$0xff] }
 0x28e   :  { %v9366_v26 = vpop.f32.mrf.mxu1  ;;  %14952 = vst [vmem:[#allocation29_spill] sm:$0xff] %v12041_v48 }
 0x28f   :  { %v12025_v41 = vadd.f32 %v4467_v61, %v4051_v51  ;;  %v4054_v25 = vadd.f32 %v9366_v26, %v11715_v39  ;;  %v4470_v37 = vpop.f32.mrf.mxu0  ;;  %v14951_v39 = vld [vmem:[#allocation4_spill] sm:$0xff] }
 0x290   :  { %v3907_v13 = vpop.f32.mrf.mxu1 }
 0x291   :  { %v12030_v5 = vadd.f32 %v9434_v0, %v4054_v25  ;;  %v4052_v54 = vadd.f32 %v3907_v13, %v14948_v32  ;;  %v9437_v22 = vpop.f32.mrf.mxu0 }
 0x292   :  { %v9369_v56 = vpop.f32.mrf.mxu1 }
 0x293   :  { %v12033_v16 = vadd.f32 %v4470_v37, %v4052_v54  ;;  %v4057_v43 = vadd.f32 %v9369_v56, %v14949_v9  ;;  %v4483_v10 = vpop.f32.mrf.mxu0  ;;  %v14954_v37 = vld [vmem:[#allocation6_spill] sm:$0xff]  ;;  %v12049_v54 = vpop.permute.xlu1 %6289 }
 0x294   :  { %v3920_v31 = vpop.f32.mrf.mxu1  ;;  %14955 = vst [vmem:[#allocation30_spill] sm:$0xff] %v12049_v54  ;;  %v12051_v56 = vpop.permute.xlu0 %6291 }
 0x295   :  { %v12038_v15 = vadd.f32 %v9437_v22, %v4057_v43  ;;  %v4055_v44 = vadd.f32 %v3920_v31, %v14951_v39  ;;  %v9438_v58 = vpop.f32.mrf.mxu0  ;;  %14956 = vst [vmem:[#allocation31_spill] sm:$0xff] %v12051_v56  ;;  %v14957_v43 = vld [vmem:[#allocation7_spill] sm:$0xff] }
 0x296   :  { %v9370_v24 = vpop.f32.mrf.mxu1 }
 0x297   :  { %v12043_v61 = vadd.f32 %v4483_v10, %v4055_v44  ;;  %v4058_v51 = vadd.f32 %v9370_v24, %v14953_v60  ;;  %v4486_v0 = vpop.f32.mrf.mxu0  ;;  %v14959_v24 = vld [vmem:[#allocation8_spill] sm:$0xff]  ;;  %v12062_v4 = vpop.permute.xlu1 %6293 }
 0x298   :  { %v3923_v26 = vpop.f32.mrf.mxu1  ;;  %14962 = vst [vmem:[#allocation6_spill] sm:$0xff] %v12062_v4 }
 0x299   :  { %v12046_v25 = vadd.f32 %v9438_v58, %v4058_v51  ;;  %v4056_v13 = vadd.f32 %v3923_v26, %v14954_v37  ;;  %v9441_v32 = vpop.f32.mrf.mxu0  ;;  %v14961_v26 = vld [vmem:[#allocation9_spill] sm:$0xff] }
 0x29a   :  { %v9373_v22 = vpop.f32.mrf.mxu1 }
 0x29b   :  { %v12053_v9 = vadd.f32 %v4486_v0, %v4056_v13  ;;  %v4061_v31 = vadd.f32 %v9373_v22, %v14957_v43  ;;  %v4499_v10 = vpop.f32.mrf.mxu0  ;;  %v12064_v0 = vpop.permute.xlu0 %6295  ;;  %v14965_v22 = vld [vmem:[#allocation10_spill] sm:$0xff] }
 0x29c   :  { %v3936_v39 = vpop.f32.mrf.mxu1  ;;  %14963 = vst [vmem:[#allocation7_spill] sm:$0xff] %v12064_v0 }
 0x29d   :  { %v12056_v44 = vadd.f32 %v9441_v32, %v4061_v31  ;;  %v4059_v60 = vadd.f32 %v3936_v39, %v14959_v24  ;;  %v9442_v58 = vpop.f32.mrf.mxu0  ;;  %v14967_v39 = vld [vmem:[#allocation11_spill] sm:$0xff] }
 0x29e   :  { %v9374_v51 = vpop.f32.mrf.mxu1 }
 0x29f   :  { %14958 = vst [vmem:[#allocation4_spill] sm:$0xff] %v12056_v44  ;;  %v12059_v18 = vadd.f32 %v4499_v10, %v4059_v60  ;;  %v4062_v37 = vadd.f32 %v9374_v51, %v14961_v26  ;;  %v4502_v54 = vpop.f32.mrf.mxu0  ;;  %v14969_v51 = vld [vmem:[#allocation12_spill] sm:$0xff]  ;;  %v12075_v44 = vpop.permute.xlu1 %6297 }
 0x2a0   :  { %v3939_v56 = vpop.f32.mrf.mxu1  ;;  %14970 = vst [vmem:[#allocation11_spill] sm:$0xff] %v12075_v44 }
 0x2a1   :  { %14960 = vst [vmem:[#allocation5_spill] sm:$0xff] %v12059_v18  ;;  %v12066_v13 = vadd.f32 %v9442_v58, %v4062_v37  ;;  %v4060_v43 = vadd.f32 %v3939_v56, %v14965_v22  ;;  %v9445_v32 = vpop.f32.mrf.mxu0  ;;  %v12077_v58 = vpop.permute.xlu0 %6299  ;;  %v14972_v56 = vld [vmem:[#allocation13_spill] sm:$0xff] }
 0x2a2   :  { %v9377_v31 = vpop.f32.mrf.mxu1  ;;  %14971 = vst [vmem:[#allocation12_spill] sm:$0xff] %v12077_v58 }
 0x2a3   :  { %14964 = vst [vmem:[#allocation8_spill] sm:$0xff] %v12066_v13  ;;  %v12069_v48 = vadd.f32 %v4502_v54, %v4060_v43  ;;  %v4065_v24 = vadd.f32 %v9377_v31, %v14967_v39  ;;  %v4515_v10 = vpop.f32.mrf.mxu0  ;;  %v14973_v31 = vld [vmem:[#allocation14_spill] sm:$0xff]  ;;  %v12088_v13 = vpop.permute.xlu1 %6301 }
 0x2a4   :  { %v3952_v60 = vpop.f32.mrf.mxu1  ;;  %14975 = vst [vmem:[#allocation13_spill] sm:$0xff] %v12088_v13 }
 0x2a5   :  { %14966 = vst [vmem:[#allocation9_spill] sm:$0xff] %v12069_v48  ;;  %v12072_v18 = vadd.f32 %v9445_v32, %v4065_v24  ;;  %v4063_v26 = vadd.f32 %v3952_v60, %v14969_v51  ;;  %v9446_v4 = vpop.f32.mrf.mxu0  ;;  %v14974_v60 = vld [vmem:[#allocation15_spill] sm:$0xff] }
 0x2a6   :  { %v9378_v0 = vpop.f32.mrf.mxu1 }
 0x2a7   :  { %14968 = vst [vmem:[#allocation10_spill] sm:$0xff] %v12072_v18  ;;  %v12079_v37 = vadd.f32 %v4515_v10, %v4063_v26  ;;  %v4066_v22 = vadd.f32 %v9378_v0, %v14972_v56  ;;  %v4518_v54 = vpop.f32.mrf.mxu0  ;;  %v12090_v10 = vpop.permute.xlu0 %6303 }
 0x2a8   :  { %v3955_v43 = vpop.f32.mrf.mxu1  ;;  %14976 = vst [vmem:[#allocation14_spill] sm:$0xff] %v12090_v10  ;;  %v12101_v13 = vpop.permute.xlu1 %6305 }
 0x2a9   :  { %v12082_v48 = vadd.f32 %v9446_v4, %v4066_v22  ;;  %v4064_v39 = vadd.f32 %v3955_v43, %v14973_v31  ;;  %v9449_v32 = vpop.f32.mrf.mxu0  ;;  %14980 = vst [vmem:[#allocation34_spill] sm:$0xff] %v12101_v13 }
 0x2aa   :  { %v9381_v24 = vpop.f32.mrf.mxu1 }
 0x2ab   :  { %v12085_v18 = vadd.f32 %v4518_v54, %v4064_v39  ;;  %v4069_v51 = vadd.f32 %v9381_v24, %v14974_v60  ;;  %v4531_v44 = vpop.f32.mrf.mxu0 }
 0x2ac   :  { %v3968_v58 = vpop.f32.mrf.mxu1 }
 0x2ad   :  { %v12092_v26 = vadd.f32 %v9449_v32, %v4069_v51  ;;  %v4067_v0 = vadd.f32 %v3968_v58, %v11806_v36  ;;  %v9450_v4 = vpop.f32.mrf.mxu0  ;;  %v12103_v32 = vpop.permute.xlu0 %6307  ;;  %v14983_v36 = vld [vmem:[#allocation16_spill] sm:$0xff] }
 0x2ae   :  { %v9382_v56 = vpop.f32.mrf.mxu1  ;;  %14981 = vst [vmem:[#allocation35_spill] sm:$0xff] %v12103_v32 }
 0x2af   :  { %14977 = vst [vmem:[#allocation15_spill] sm:$0xff] %v12092_v26  ;;  %v12095_v22 = vadd.f32 %v4531_v44, %v4067_v0  ;;  %v4070_v43 = vadd.f32 %v9382_v56, %v11811_v12  ;;  %v4534_v54 = vpop.f32.mrf.mxu0  ;;  %v14985_v12 = vld [vmem:[#allocation17_spill] sm:$0xff]  ;;  %v12114_v26 = vpop.permute.xlu1 %6309 }
 0x2b0   :  { %v3971_v31 = vpop.f32.mrf.mxu1 }
 0x2b1   :  { %14978 = vst [vmem:[#allocation32_spill] sm:$0xff] %v12095_v22  ;;  %v12098_v39 = vadd.f32 %v9450_v4, %v4070_v43  ;;  %v4068_v24 = vadd.f32 %v3971_v31, %v11819_v49  ;;  %v9453_v60 = vpop.f32.mrf.mxu0  ;;  %v14987_v49 = vld [vmem:[#allocation18_spill] sm:$0xff] }
 0x2b2   :  { %v9385_v10 = vpop.f32.mrf.mxu1  ;;  %14988 = vst [vmem:[#allocation18_spill] sm:$0xff] %v12114_v26 }
 0x2b3   :  { %14979 = vst [vmem:[#allocation33_spill] sm:$0xff] %v12098_v39  ;;  %v12105_v51 = vadd.f32 %v4534_v54, %v4068_v24  ;;  %v4073_v58 = vadd.f32 %v9385_v10, %v14983_v36  ;;  %v4547_v44 = vpop.f32.mrf.mxu0  ;;  %v12116_v54 = vpop.permute.xlu0 %6311  ;;  %v14991_v10 = vld [vmem:[#allocation19_spill] sm:$0xff] }
 0x2b4   :  { %v3984_v0 = vpop.f32.mrf.mxu1  ;;  %14989 = vst [vmem:[#allocation37_spill] sm:$0xff] %v12116_v54  ;;  %v12127_v26 = vpop.permute.xlu1 %6313 }
 0x2b5   :  { %14982 = vst [vmem:[#allocation36_spill] sm:$0xff] %v12105_v51  ;;  %v12108_v22 = vadd.f32 %v9453_v60, %v4073_v58  ;;  %v4071_v56 = vadd.f32 %v3984_v0, %v14985_v12  ;;  %v9454_v4 = vpop.f32.mrf.mxu0  ;;  %v14993_v0 = vld [vmem:[#allocation20_spill] sm:$0xff]  ;;  %14995 = vst [vmem:[#allocation39_spill] sm:$0xff] %v12127_v26  ;;  %v15002_v26 = vld [vmem:[#allocation23_spill] sm:$0xff] }
 0x2b6   :  { %v9386_v43 = vpop.f32.mrf.mxu1 }
 0x2b7   :  { %14984 = vst [vmem:[#allocation16_spill] sm:$0xff] %v12108_v22  ;;  %v12111_v39 = vadd.f32 %v4547_v44, %v4071_v56  ;;  %v4074_v31 = vadd.f32 %v9386_v43, %v14987_v49  ;;  %v4550_v13 = vpop.f32.mrf.mxu0 }
 0x2b8   :  { %v3987_v32 = vpop.f32.mrf.mxu1 }
 0x2b9   :  { %14986 = vst [vmem:[#allocation17_spill] sm:$0xff] %v12111_v39  ;;  %v12118_v24 = vadd.f32 %v9454_v4, %v4074_v31  ;;  %v4072_v36 = vadd.f32 %v3987_v32, %v14991_v10  ;;  %v9457_v60 = vpop.f32.mrf.mxu0  ;;  %v5766_v4 = vlaneseq  ;;  %v12129_v31 = vpop.permute.xlu0 %6315  ;;  %v14998_v10 = vld [vmem:[#allocation21_spill] sm:$0xff] }
 0x2ba   :  { %v9389_v58 = vpop.f32.mrf.mxu1  ;;  %14996 = vst [vmem:[#allocation40_spill] sm:$0xff] %v12129_v31  ;;  %v12142_v31 = vpop.permute.xlu1 %6317 }
 0x2bb   :  { %14990 = vst [vmem:[#allocation38_spill] sm:$0xff] %v12118_v24  ;;  %v12121_v22 = vadd.f32 %v4550_v13, %v4072_v36  ;;  %v4077_v12 = vadd.f32 %v9389_v58, %v14993_v0  ;;  %v4563_v44 = vpop.f32.mrf.mxu0  ;;  %v15000_v0 = vld [vmem:[#allocation22_spill] sm:$0xff]  ;;  %15003 = vst [vmem:[#allocation23_spill] sm:$0xff] %v12142_v31 }
 0x2bc   :  { %v4000_v56 = vpop.f32.mrf.mxu1 }
 0x2bd   :  { %14992 = vst [vmem:[#allocation19_spill] sm:$0xff] %v12121_v22  ;;  %v12124_v39 = vadd.f32 %v9457_v60, %v4077_v12  ;;  %v4075_v43 = vadd.f32 %v4000_v56, %v11854_v52  ;;  %v9458_v49 = vpop.f32.mrf.mxu0  ;;  %v12137_v52 = vand.u32 127, %v5766_v4 }
 0x2be   :  { %v9390_v54 = vpop.f32.mrf.mxu1 }
 0x2bf   :  { %14994 = vst [vmem:[#allocation20_spill] sm:$0xff] %v12124_v39  ;;  %v12131_v32 = vadd.f32 %v4563_v44, %v4075_v43  ;;  %v4078_v13 = vadd.f32 %v9390_v54, %v14998_v10  ;;  %v4566_v36 = vpop.f32.mrf.mxu0  ;;  %v12144_v43 = vpop.permute.xlu0 %6319  ;;  %vm5768_vm2 = vcmp.lt.s32.totalorder %v12137_v52, 96 }
 0x2c0   :  { %v4003_v22 = vpop.f32.mrf.mxu1  ;;  %15004 = vst [vmem:[#allocation42_spill] sm:$0xff] %v12144_v43 }
 0x2c1   :  { %14997 = vst [vmem:[#allocation41_spill] sm:$0xff] %v12131_v32  ;;  %v12134_v58 = vadd.f32 %v9458_v49, %v4078_v13  ;;  %v4076_v60 = vadd.f32 %v4003_v22, %v15000_v0  ;;  %v9533_v12 = vpop.f32.mrf.mxu0  ;;  %v15005_v0 = vld [vmem:[#allocation24_spill] sm:$0xff] }
 0x2c2   :  { %v9465_v39 = vpop.f32.mrf.mxu1 }
 0x2c3   :  { %14999 = vst [vmem:[#allocation21_spill] sm:$0xff] %v12134_v58  ;;  %v12139_v56 = vadd.f32 %v4566_v36, %v4076_v60  ;;  %v5142_v24 = vadd.f32 %v9465_v39, %v15002_v26  ;;  %v5447_v51 = vpop.f32.mrf.mxu0  ;;  %v15006_v58 = vld [vmem:[#allocation25_spill] sm:$0xff] }
 0x2c4   :  { %v4885_v44 = vpop.f32.mrf.mxu1 }
 0x2c5   :  { %15001 = vst [vmem:[#allocation22_spill] sm:$0xff] %v12139_v56  ;;  %v5704_v54 = vadd.f32 %v9533_v12, %v5142_v24  ;;  %v5140_v49 = vadd.f32 %v4885_v44, %v11878_v42  ;;  %v9534_v10 = vpop.f32.mrf.mxu0  ;;  %v12152_v12 = vpop.permute.xlu1 %6321 }
 0x2c6   :  { %v9466_v22 = vpop.f32.mrf.mxu1  ;;  %15007 = vst [vmem:[#allocation24_spill] sm:$0xff] %v12152_v12  ;;  %v12154_v44 = vpop.permute.xlu0 %6323 }
 0x2c7   :  { %v5771_v13 = vmul.f32 0.5, %v5704_v54  ;;  %v5702_v4 = vadd.f32 %v5447_v51, %v5140_v49  ;;  %v5143_v36 = vadd.f32 %v9466_v22, %v15005_v0  ;;  %v5450_v60 = vpop.f32.mrf.mxu0  ;;  %15008 = vst [vmem:[#allocation25_spill] sm:$0xff] %v12154_v44 }
 0x2c8   :  { %v4888_v56 = vpop.f32.mrf.mxu1 }
 0x2c9   :  { %v5837_v26 = vsel %vm5768_vm2, %v5771_v13, %v5704_v54  ;;  %v5769_v39 = vmul.f32 0.5, %v5702_v4  ;;  %v5705_v31 = vadd.f32 %v9534_v10, %v5143_v36  ;;  %v5141_v43 = vadd.f32 %v4888_v56, %v15006_v58  ;;  %v9537_v24 = vpop.f32.mrf.mxu0 }
 0x2ca   :  { %9621 = vtanh.f32 %v5837_v26  ;;  %v9469_v42 = vpop.f32.mrf.mxu1 }
 0x2cb   :  { %v5835_v51 = vsel %vm5768_vm2, %v5769_v39, %v5702_v4  ;;  %v5772_v49 = vmul.f32 0.5, %v5705_v31  ;;  %v5703_v22 = vadd.f32 %v5450_v60, %v5141_v43  ;;  %v5146_v0 = vadd.f32 %v9469_v42, %v11897_v28  ;;  %v5463_v32 = vpop.f32.mrf.mxu0  ;;  %v12165_v42 = vpop.permute.xlu1 %6325 }
 0x2cc   :  { %9623 = vtanh.f32 %v5835_v51  ;;  %v4901_v54 = vpop.f32.mrf.mxu1  ;;  %15009 = vst [vmem:[#allocation43_spill] sm:$0xff] %v12165_v42 }
 0x2cd   :  { %v5838_v58 = vsel %vm5768_vm2, %v5772_v49, %v5705_v31  ;;  %v5770_v56 = vmul.f32 0.5, %v5703_v22  ;;  %v5708_v10 = vadd.f32 %v9537_v24, %v5146_v0  ;;  %v5144_v13 = vadd.f32 %v4901_v54, %v11901_v7  ;;  %v9538_v36 = vpop.f32.mrf.mxu0  ;;  %v12167_v31 = vpop.permute.xlu0 %6327  ;;  %v15011_v0 = vld [vmem:[#allocation26_spill] sm:$0xff] }
 0x2ce   :  { %9625 = vtanh.f32 %v5838_v58  ;;  %v9470_v26 = vpop.f32.mrf.mxu1  ;;  %15010 = vst [vmem:[#allocation44_spill] sm:$0xff] %v12167_v31 }
 0x2cf   :  { %v5836_v4 = vsel %vm5768_vm2, %v5770_v56, %v5703_v22  ;;  %v5775_v39 = vmul.f32 0.5, %v5708_v10  ;;  %v5706_v43 = vadd.f32 %v5463_v32, %v5144_v13  ;;  %v5147_v28 = vadd.f32 %v9470_v26, %v11905_v19  ;;  %v5466_v60 = vpop.f32.mrf.mxu0 }
 0x2d0   :  { %9627 = vtanh.f32 %v5836_v4  ;;  %v4904_v51 = vpop.f32.mrf.mxu1 }
 0x2d1   :  { %v5841_v7 = vsel %vm5768_vm2, %v5775_v39, %v5708_v10  ;;  %v5773_v24 = vmul.f32 0.5, %v5706_v43  ;;  %v5709_v49 = vadd.f32 %v9538_v36, %v5147_v28  ;;  %v5145_v54 = vadd.f32 %v4904_v51, %v15011_v0  ;;  %v9541_v58 = vpop.f32.mrf.mxu0 }
 0x2d2   :  { %9629 = vtanh.f32 %v5841_v7  ;;  %v9473_v22 = vpop.f32.mrf.mxu1  ;;  %v12178_v7 = vpop.permute.xlu1 %6329 }
 0x2d3   :  { %v5839_v19 = vsel %vm5768_vm2, %v5773_v24, %v5706_v43  ;;  %v5776_v32 = vmul.f32 0.5, %v5709_v49  ;;  %v5707_v56 = vadd.f32 %v5466_v60, %v5145_v54  ;;  %v5150_v13 = vadd.f32 %v9473_v22, %v11917_v17  ;;  %v5479_v26 = vpop.f32.mrf.mxu0  ;;  %15012 = vst [vmem:[#allocation26_spill] sm:$0xff] %v12178_v7  ;;  %v12180_v43 = vpop.permute.xlu0 %6331 }
 0x2d4   :  { %9631 = vtanh.f32 %v5839_v19  ;;  %v4917_v4 = vpop.f32.mrf.mxu1  ;;  %15013 = vst [vmem:[#allocation45_spill] sm:$0xff] %v12180_v43 }
 0x2d5   :  { %v5842_v10 = vsel %vm5768_vm2, %v5776_v32, %v5709_v49  ;;  %v5774_v39 = vmul.f32 0.5, %v5707_v56  ;;  %v5712_v36 = vadd.f32 %v9541_v58, %v5150_v13  ;;  %v5148_v28 = vadd.f32 %v4917_v4, %v11921_v46  ;;  %v9542_v51 = vpop.f32.mrf.mxu0 }
 0x2d6   :  { %9633 = vtanh.f32 %v5842_v10  ;;  %v9474_v0 = vpop.f32.mrf.mxu1  ;;  %v12191_v44 = vpop.permute.xlu1 %6333 }
 0x2d7   :  { %v9622_v60 = vpop.eup %9621  ;;  %v5840_v17 = vsel %vm5768_vm2, %v5774_v39, %v5707_v56  ;;  %v5779_v24 = vmul.f32 0.5, %v5712_v36  ;;  %v5710_v54 = vadd.f32 %v5479_v26, %v5148_v28  ;;  %v5151_v22 = vadd.f32 %v9474_v0, %v11925_v63  ;;  %v5482_v49 = vpop.f32.mrf.mxu0  ;;  %15014 = vst [vmem:[#allocation46_spill] sm:$0xff] %v12191_v44 }
 0x2d8   :  { %v5965_v19 = vadd.f32 1.0, %v9622_v60  ;;  %9635 = vtanh.f32 %v5840_v17  ;;  %v4920_v58 = vpop.f32.mrf.mxu1 }
 0x2d9   :  { %v9624_v46 = vpop.eup %9623  ;;  %v5845_v32 = vsel %vm5768_vm2, %v5779_v24, %v5712_v36  ;;  %v5777_v13 = vmul.f32 0.5, %v5710_v54  ;;  %v5713_v4 = vadd.f32 %v9542_v51, %v5151_v22  ;;  %v5149_v10 = vadd.f32 %v4920_v58, %v11932_v20  ;;  %v9545_v43 = vpop.f32.mrf.mxu0 }
 0x2da   :  { %v5963_v42 = vadd.f32 1.0, %v9624_v46  ;;  %v6029_v7 = vmul.f32 0.5, %v5965_v19  ;;  %9637 = vtanh.f32 %v5845_v32  ;;  %v9477_v56 = vpop.f32.mrf.mxu1  ;;  %v12197_v24 = vpop.permute.xlu0 %6335 }
 0x2db   :  { %v9626_v26 = vpop.eup %9625  ;;  %v5843_v63 = vsel %vm5768_vm2, %v5777_v13, %v5710_v54  ;;  %v5780_v39 = vmul.f32 0.5, %v5713_v4  ;;  %v5711_v28 = vadd.f32 %v5482_v49, %v5149_v10  ;;  %v5154_v0 = vadd.f32 %v9477_v56, %v11936_v53  ;;  %v5495_v17 = vpop.f32.mrf.mxu0  ;;  %15016 = vst [vmem:[#allocation48_spill] sm:$0xff] %v12197_v24 }
 0x2dc   :  { %v12195_v36 = vsel %vm5768_vm2, %v6029_v7, %v9622_v60  ;;  %v5966_v20 = vadd.f32 1.0, %v9626_v26  ;;  %9639 = vtanh.f32 %v5843_v63  ;;  %v4933_v51 = vpop.f32.mrf.mxu1  ;;  %v6027_v19 = vmul.f32 0.5, %v5963_v42 }
 0x2dd   :  { %15015 = vst [vmem:[#allocation47_spill] sm:$0xff] %v12195_v36  ;;  %v9628_v22 = vpop.eup %9627  ;;  %v5846_v54 = vsel %vm5768_vm2, %v5780_v39, %v5713_v4  ;;  %v5778_v49 = vmul.f32 0.5, %v5711_v28  ;;  %v5716_v58 = vadd.f32 %v9545_v43, %v5154_v0  ;;  %6607 = vrot.lane.b32.xlu0 %v12195_v36, %s9881_s2  ;;  %v9546_v53 = vpop.f32.mrf.mxu0  ;;  %v5152_v42 = vadd.f32 %v4933_v51, %v11939_v30 }
 0x2de   :  { %v5964_v32 = vadd.f32 1.0, %v9628_v22  ;;  %v6030_v13 = vmul.f32 0.5, %v5966_v20  ;;  %9641 = vtanh.f32 %v5846_v54  ;;  %v9478_v7 = vpop.f32.mrf.mxu1  ;;  %v12212_v20 = vsel %vm5768_vm2, %v6027_v19, %v9624_v46  ;;  %v12223_v19 = vpop.permute.xlu0 %6339 }
 0x2df   :  { %v9630_v60 = vpop.eup %9629  ;;  %v5844_v10 = vsel %vm5768_vm2, %v5778_v49, %v5711_v28  ;;  %v5783_v56 = vmul.f32 0.5, %v5716_v58  ;;  %v5498_v63 = vpop.f32.mrf.mxu0  ;;  %15018 = vst [vmem:[#allocation50_spill] sm:$0xff] %v12212_v20  ;;  %v5714_v54 = vadd.f32 %v5495_v17, %v5152_v42  ;;  %v5155_v30 = vadd.f32 %v9478_v7, %v11942_v1  ;;  %15020 = vst [vmem:[#allocation52_spill] sm:$0xff] %v12223_v19 }
 0x2e0   :  { %v6028_v44 = vmul.f32 0.5, %v5964_v32  ;;  %v12208_v43 = vsel %vm5768_vm2, %v6030_v13, %v9626_v26  ;;  %9643 = vtanh.f32 %v5844_v10  ;;  %v5969_v4 = vadd.f32 1.0, %v9630_v60  ;;  %v4936_v39 = vpop.f32.mrf.mxu1  ;;  %v12219_v26 = vpop.permute.xlu1 %6337 }
 0x2e1   :  { %15017 = vst [vmem:[#allocation49_spill] sm:$0xff] %v12208_v43  ;;  %v9632_v0 = vpop.eup %9631  ;;  %v5849_v28 = vsel %vm5768_vm2, %v5783_v56, %v5716_v58  ;;  %6609 = vrot.lane.b32.xlu1 %v12208_v43, %s9881_s2  ;;  %v9549_v51 = vpop.f32.mrf.mxu0  ;;  %15019 = vst [vmem:[#allocation51_spill] sm:$0xff] %v12219_v26  ;;  %6603 = vrot.lane.b32.xlu0 %v12212_v20, %s9881_s2  ;;  %v5781_v58 = vmul.f32 0.5, %v5714_v54  ;;  %v5717_v17 = vadd.f32 %v9546_v53, %v5155_v30 }
 0x2e2   :  { %v5967_v49 = vadd.f32 1.0, %v9632_v0  ;;  %9645 = vtanh.f32 %v5849_v28  ;;  %v6033_v32 = vmul.f32 0.5, %v5969_v4  ;;  %v9481_v46 = vpop.f32.mrf.mxu1  ;;  %v5153_v1 = vadd.f32 %v4936_v39, %v11948_v3  ;;  %v12249_v24 = vpop.permute.xlu0 %6343 }
 0x2e3   :  { %v9634_v13 = vpop.eup %9633  ;;  %v5511_v7 = vpop.f32.mrf.mxu0  ;;  %v12228_v10 = vsel %vm5768_vm2, %v6028_v44, %v9628_v22  ;;  %v5158_v4 = vadd.f32 %v9481_v46, %v11952_v62  ;;  %v5847_v53 = vsel %vm5768_vm2, %v5781_v58, %v5714_v54  ;;  %v5784_v30 = vmul.f32 0.5, %v5717_v17  ;;  %15025 = vst [vmem:[#allocation57_spill] sm:$0xff] %v12249_v24 }
 0x2e4   :  { %15021 = vst [vmem:[#allocation53_spill] sm:$0xff] %v12228_v10  ;;  %v5970_v56 = vadd.f32 1.0, %v9634_v13  ;;  %v12232_v42 = vsel %vm5768_vm2, %v6033_v32, %v9630_v60  ;;  %v4949_v28 = vpop.f32.mrf.mxu1  ;;  %v6031_v19 = vmul.f32 0.5, %v5967_v49  ;;  %v5715_v3 = vadd.f32 %v5498_v63, %v5153_v1  ;;  %v12243_v58 = vpop.permute.xlu1 %6341 }
 0x2e5   :  { %15022 = vst [vmem:[#allocation54_spill] sm:$0xff] %v12232_v42  ;;  %v9636_v26 = vpop.eup %9635  ;;  %6605 = vrot.lane.b32.xlu1 %v12228_v10, %s9881_s2  ;;  %v9550_v44 = vpop.f32.mrf.mxu0  ;;  %9647 = vtanh.f32 %v5847_v53  ;;  %6615 = vrot.lane.b32.xlu0 %v12232_v42, %s9881_s2  ;;  %v5850_v49 = vsel %vm5768_vm2, %v5784_v30, %v5717_v17  ;;  %v5720_v46 = vadd.f32 %v9549_v51, %v5158_v4  ;;  %15023 = vst [vmem:[#allocation55_spill] sm:$0xff] %v12243_v58 }
 0x2e6   :  { %v5968_v22 = vadd.f32 1.0, %v9636_v26  ;;  %v6034_v39 = vmul.f32 0.5, %v5970_v56  ;;  %v9482_v60 = vpop.f32.mrf.mxu1  ;;  %v5782_v32 = vmul.f32 0.5, %v5715_v3  ;;  %9649 = vtanh.f32 %v5850_v49 }
 0x2e7   :  { %v9638_v62 = vpop.eup %9637  ;;  %v5514_v54 = vpop.f32.mrf.mxu0  ;;  %v12253_v12 = vsel %vm5768_vm2, %v6031_v19, %v9632_v0  ;;  %v5787_v17 = vmul.f32 0.5, %v5720_v46  ;;  %v5156_v4 = vadd.f32 %v4949_v28, %v11955_v14 }
 0x2e8   :  { %v6032_v63 = vmul.f32 0.5, %v5968_v22  ;;  %v12247_v1 = vsel %vm5768_vm2, %v6034_v39, %v9634_v13  ;;  %v5973_v56 = vadd.f32 1.0, %v9638_v62  ;;  %v4952_v53 = vpop.f32.mrf.mxu1  ;;  %15026 = vst [vmem:[#allocation58_spill] sm:$0xff] %v12253_v12  ;;  %v5848_v51 = vsel %vm5768_vm2, %v5782_v32, %v5715_v3 }
 0x2e9   :  { %15024 = vst [vmem:[#allocation56_spill] sm:$0xff] %v12247_v1  ;;  %v9640_v31 = vpop.eup %9639  ;;  %6617 = vrot.lane.b32.xlu1 %v12247_v1, %s9881_s2  ;;  %v9553_v13 = vpop.f32.mrf.mxu0  ;;  %9651 = vtanh.f32 %v5848_v51  ;;  %6611 = vrot.lane.b32.xlu0 %v12253_v12, %s9881_s2  ;;  %v5853_v0 = vsel %vm5768_vm2, %v5787_v17, %v5720_v46  ;;  %v5718_v19 = vadd.f32 %v5511_v7, %v5156_v4 }
 0x2ea   :  { %v5971_v30 = vadd.f32 1.0, %v9640_v31  ;;  %v6037_v22 = vmul.f32 0.5, %v5973_v56  ;;  %v9485_v39 = vpop.f32.mrf.mxu1  ;;  %v5159_v3 = vadd.f32 %v9482_v60, %v11958_v45  ;;  %v12267_v14 = vsel %vm5768_vm2, %v6032_v63, %v9636_v26  ;;  %v12276_v60 = vpop.permute.xlu1 %6345 }
 0x2eb   :  { %v9642_v49 = vpop.eup %9641  ;;  %v5527_v32 = vpop.f32.mrf.mxu0  ;;  %15027 = vst [vmem:[#allocation59_spill] sm:$0xff] %v12267_v14  ;;  %9653 = vtanh.f32 %v5853_v0  ;;  %v5785_v1 = vmul.f32 0.5, %v5718_v19  ;;  %v5157_v7 = vadd.f32 %v4952_v53, %v11964_v35  ;;  %15029 = vst [vmem:[#allocation61_spill] sm:$0xff] %v12276_v60  ;;  %v5162_v63 = vadd.f32 %v9485_v39, %v11968_v8 }
 0x2ec   :  { %v5974_v28 = vadd.f32 1.0, %v9642_v49  ;;  %v12271_v56 = vsel %vm5768_vm2, %v6037_v22, %v9638_v62  ;;  %v4965_v51 = vpop.f32.mrf.mxu1  ;;  %v6035_v24 = vmul.f32 0.5, %v5971_v30  ;;  %v5721_v12 = vadd.f32 %v9550_v44, %v5159_v3  ;;  %v12281_v17 = vpop.permute.xlu0 %6347 }
 0x2ed   :  { %15028 = vst [vmem:[#allocation60_spill] sm:$0xff] %v12271_v56  ;;  %v9644_v58 = vpop.eup %9643  ;;  %6613 = vrot.lane.b32.xlu1 %v12267_v14, %s9881_s2  ;;  %v9554_v45 = vpop.f32.mrf.mxu0  ;;  %6623 = vrot.lane.b32.xlu0 %v12271_v56, %s9881_s2  ;;  %15030 = vst [vmem:[#allocation62_spill] sm:$0xff] %v12281_v17  ;;  %v5851_v35 = vsel %vm5768_vm2, %v5785_v1, %v5718_v19  ;;  %v5719_v53 = vadd.f32 %v5514_v54, %v5157_v7 }
 0x2ee   :  { %v5972_v26 = vadd.f32 1.0, %v9644_v58  ;;  %v6038_v46 = vmul.f32 0.5, %v5974_v28  ;;  %v9486_v62 = vpop.f32.mrf.mxu1  ;;  %v5788_v44 = vmul.f32 0.5, %v5721_v12  ;;  %9655 = vtanh.f32 %v5851_v35 }
 0x2ef   :  { %v9646_v4 = vpop.eup %9645  ;;  %v5530_v30 = vpop.f32.mrf.mxu0  ;;  %v5724_v8 = vadd.f32 %v9553_v13, %v5162_v63  ;;  %v12291_v3 = vsel %vm5768_vm2, %v6035_v24, %v9640_v31  ;;  %v5786_v17 = vmul.f32 0.5, %v5719_v53 }
 0x2f0   :  { %v6036_v22 = vmul.f32 0.5, %v5972_v26  ;;  %v12287_v0 = vsel %vm5768_vm2, %v6038_v46, %v9642_v49  ;;  %v4968_v39 = vpop.f32.mrf.mxu1  ;;  %15032 = vst [vmem:[#allocation64_spill] sm:$0xff] %v12291_v3  ;;  %v5854_v28 = vsel %vm5768_vm2, %v5788_v44, %v5721_v12  ;;  %v5977_v1 = vadd.f32 1.0, %v9646_v4  ;;  %v12307_v63 = vpop.permute.xlu1 %6349 }
 0x2f1   :  { %15031 = vst [vmem:[#allocation63_spill] sm:$0xff] %v12287_v0  ;;  %6625 = vrot.lane.b32.xlu1 %v12287_v0, %s9881_s2  ;;  %v9557_v54 = vpop.f32.mrf.mxu0  ;;  %9657 = vtanh.f32 %v5854_v28  ;;  %v5791_v19 = vmul.f32 0.5, %v5724_v8  ;;  %v5160_v49 = vadd.f32 %v4965_v51, %v11971_v11  ;;  %6619 = vrot.lane.b32.xlu0 %v12291_v3, %s9881_s2  ;;  %v5852_v12 = vsel %vm5768_vm2, %v5786_v17, %v5719_v53  ;;  %v12311_v28 = vpop.permute.xlu0 %6351 }
 0x2f2   :  { %v9489_v13 = vpop.f32.mrf.mxu1  ;;  %v9648_v7 = vpop.eup %9647  ;;  %v12302_v31 = vsel %vm5768_vm2, %v6036_v22, %v9644_v58  ;;  %v6041_v24 = vmul.f32 0.5, %v5977_v1  ;;  %v5163_v26 = vadd.f32 %v9486_v62, %v11974_v2  ;;  %15034 = vst [vmem:[#allocation66_spill] sm:$0xff] %v12307_v63  ;;  %9659 = vtanh.f32 %v5852_v12  ;;  %15035 = vst [vmem:[#allocation67_spill] sm:$0xff] %v12311_v28 }
 0x2f3   :  { %15033 = vst [vmem:[#allocation65_spill] sm:$0xff] %v12302_v31  ;;  %v5543_v46 = vpop.f32.mrf.mxu0  ;;  %v5975_v35 = vadd.f32 1.0, %v9648_v7  ;;  %v5857_v11 = vsel %vm5768_vm2, %v5791_v19, %v5724_v8  ;;  %v5722_v51 = vadd.f32 %v5527_v32, %v5160_v49  ;;  %v9650_v58 = vpop.eup %9649  ;;  %v5161_v2 = vadd.f32 %v4968_v39, %v11980_v40 }
 0x2f4   :  { %v4981_v44 = vpop.f32.mrf.mxu1  ;;  %9661 = vtanh.f32 %v5857_v11  ;;  %v12315_v17 = vsel %vm5768_vm2, %v6041_v24, %v9646_v4  ;;  %v5725_v53 = vadd.f32 %v9554_v45, %v5163_v26  ;;  %v5978_v1 = vadd.f32 1.0, %v9650_v58 }
 0x2f5   :  { %15036 = vst [vmem:[#allocation68_spill] sm:$0xff] %v12315_v17  ;;  %6621 = vrot.lane.b32.xlu1 %v12302_v31, %s9881_s2  ;;  %v9558_v62 = vpop.f32.mrf.mxu0  ;;  %v6039_v22 = vmul.f32 0.5, %v5975_v35  ;;  %v5789_v8 = vmul.f32 0.5, %v5722_v51  ;;  %6631 = vrot.lane.b32.xlu0 %v12315_v17, %s9881_s2  ;;  %v5723_v12 = vadd.f32 %v5530_v30, %v5161_v2  ;;  %v5166_v4 = vadd.f32 %v9489_v13, %v11984_v33  ;;  %v12332_v13 = vpop.permute.xlu1 %6353 }
 0x2f6   :  { %v9490_v32 = vpop.f32.mrf.mxu1  ;;  %v9652_v19 = vpop.eup %9651  ;;  %v5792_v49 = vmul.f32 0.5, %v5725_v53  ;;  %v5164_v45 = vadd.f32 %v4981_v44, %v11987_v27  ;;  %v6042_v39 = vmul.f32 0.5, %v5978_v1  ;;  %15038 = vst [vmem:[#allocation70_spill] sm:$0xff] %v12332_v13 }
 0x2f7   :  { %v5546_v24 = vpop.f32.mrf.mxu0  ;;  %v5976_v40 = vadd.f32 1.0, %v9652_v19  ;;  %v5855_v26 = vsel %vm5768_vm2, %v5789_v8, %v5722_v51  ;;  %v12328_v63 = vsel %vm5768_vm2, %v6039_v22, %v9648_v7  ;;  %v5790_v2 = vmul.f32 0.5, %v5723_v12  ;;  %v12340_v22 = vpop.permute.xlu0 %6355 }
 0x2f8   :  { %v4984_v35 = vpop.f32.mrf.mxu1  ;;  %v9654_v11 = vpop.eup %9653  ;;  %15037 = vst [vmem:[#allocation69_spill] sm:$0xff] %v12328_v63  ;;  %9663 = vtanh.f32 %v5855_v26  ;;  %v5858_v30 = vsel %vm5768_vm2, %v5792_v49, %v5725_v53  ;;  %v12336_v44 = vsel %vm5768_vm2, %v6042_v39, %v9650_v58  ;;  %v5728_v51 = vadd.f32 %v9557_v54, %v5166_v4  ;;  %15040 = vst [vmem:[#allocation72_spill] sm:$0xff] %v12340_v22 }
 0x2f9   :  { %v9561_v33 = vpop.f32.mrf.mxu0  ;;  %v6040_v27 = vmul.f32 0.5, %v5976_v40  ;;  %15039 = vst [vmem:[#allocation71_spill] sm:$0xff] %v12336_v44  ;;  %9665 = vtanh.f32 %v5858_v30  ;;  %6627 = vrot.lane.b32.xlu0 %v12328_v63, %s9881_s2  ;;  %v5856_v53 = vsel %vm5768_vm2, %v5790_v2, %v5723_v12  ;;  %v5981_v1 = vadd.f32 1.0, %v9654_v11  ;;  %6633 = vrot.lane.b32.xlu1 %v12336_v44, %s9881_s2 }
 0x2fa   :  { %v9493_v7 = vpop.f32.mrf.mxu1  ;;  %v5726_v8 = vadd.f32 %v5543_v46, %v5164_v45  ;;  %9667 = vtanh.f32 %v5856_v53  ;;  %v5795_v58 = vmul.f32 0.5, %v5728_v51  ;;  %v5167_v40 = vadd.f32 %v9490_v32, %v11990_v50 }
 0x2fb   :  { %v5559_v49 = vpop.f32.mrf.mxu0  ;;  %v9656_v4 = vpop.eup %9655  ;;  %v12349_v39 = vsel %vm5768_vm2, %v6040_v27, %v9652_v19  ;;  %v6045_v26 = vmul.f32 0.5, %v5981_v1  ;;  %v5165_v12 = vadd.f32 %v4984_v35, %v11995_v55  ;;  %v5170_v53 = vadd.f32 %v9493_v7, %v11998_v59 }
 0x2fc   :  { %v4997_v54 = vpop.f32.mrf.mxu1  ;;  %15041 = vst [vmem:[#allocation73_spill] sm:$0xff] %v12349_v39  ;;  %v5793_v30 = vmul.f32 0.5, %v5726_v8  ;;  %v5979_v46 = vadd.f32 1.0, %v9656_v4  ;;  %v5861_v45 = vsel %vm5768_vm2, %v5795_v58, %v5728_v51  ;;  %v5729_v22 = vadd.f32 %v9558_v62, %v5167_v40  ;;  %v12363_v35 = vpop.permute.xlu1 %6357 }
 0x2fd   :  { %v9562_v2 = vpop.f32.mrf.mxu0  ;;  %9669 = vtanh.f32 %v5861_v45  ;;  %v12357_v32 = vsel %vm5768_vm2, %v6045_v26, %v9654_v11  ;;  %v5727_v27 = vadd.f32 %v5546_v24, %v5165_v12  ;;  %6629 = vrot.lane.b32.xlu1 %v12349_v39, %s9881_s2  ;;  %15043 = vst [vmem:[#allocation75_spill] sm:$0xff] %v12363_v35  ;;  %v12367_v7 = vpop.permute.xlu0 %6359  ;;  %v5168_v24 = vadd.f32 %v4997_v54, %v12001_v47 }
 0x2fe   :  { %v9494_v13 = vpop.f32.mrf.mxu1  ;;  %v9658_v50 = vpop.eup %9657  ;;  %15042 = vst [vmem:[#allocation74_spill] sm:$0xff] %v12357_v32  ;;  %v5859_v19 = vsel %vm5768_vm2, %v5793_v30, %v5726_v8  ;;  %v6043_v62 = vmul.f32 0.5, %v5979_v46  ;;  %6639 = vrot.lane.b32.xlu0 %v12357_v32, %s9881_s2  ;;  %15044 = vst [vmem:[#allocation76_spill] sm:$0xff] %v12367_v7  ;;  %v5796_v1 = vmul.f32 0.5, %v5729_v22  ;;  %v5732_v8 = vadd.f32 %v9561_v33, %v5170_v53 }
 0x2ff   :  { %v5562_v55 = vpop.f32.mrf.mxu0  ;;  %v5982_v51 = vadd.f32 1.0, %v9658_v50  ;;  %9671 = vtanh.f32 %v5859_v19  ;;  %v9660_v11 = vpop.eup %9659  ;;  %v5794_v58 = vmul.f32 0.5, %v5727_v27  ;;  %v5171_v46 = vadd.f32 %v9494_v13, %v12004_v6 }
 0x300   :  { %v5000_v59 = vpop.f32.mrf.mxu1  ;;  %v5980_v30 = vadd.f32 1.0, %v9660_v11  ;;  %v12373_v19 = vsel %vm5768_vm2, %v6043_v62, %v9656_v4  ;;  %v5862_v35 = vsel %vm5768_vm2, %v5796_v1, %v5729_v22  ;;  %v5799_v33 = vmul.f32 0.5, %v5732_v8  ;;  %v12393_v62 = vpop.permute.xlu1 %6361 }
 0x301   :  { %v9565_v40 = vpop.f32.mrf.mxu0  ;;  %v9662_v26 = vpop.eup %9661  ;;  %v6046_v12 = vmul.f32 0.5, %v5982_v51  ;;  %15045 = vst [vmem:[#allocation77_spill] sm:$0xff] %v12373_v19  ;;  %v5860_v7 = vsel %vm5768_vm2, %v5794_v58, %v5727_v27  ;;  %9673 = vtanh.f32 %v5862_v35  ;;  %v5730_v4 = vadd.f32 %v5559_v49, %v5168_v24  ;;  %15047 = vst [vmem:[#allocation79_spill] sm:$0xff] %v12393_v62 }
 0x302   :  { %v9497_v45 = vpop.f32.mrf.mxu1  ;;  %v6044_v47 = vmul.f32 0.5, %v5980_v30  ;;  %v5985_v6 = vadd.f32 1.0, %v9662_v26  ;;  %6635 = vrot.lane.b32.xlu0 %v12373_v19, %s9881_s2  ;;  %9675 = vtanh.f32 %v5860_v7  ;;  %v5865_v22 = vsel %vm5768_vm2, %v5799_v33, %v5732_v8  ;;  %v12395_v58 = vpop.permute.xlu0 %6363 }
 0x303   :  { %v12379_v53 = vpop.f32.mrf.mxu0  ;;  %v12383_v54 = vsel %vm5768_vm2, %v6046_v12, %v9658_v50  ;;  %9677 = vtanh.f32 %v5865_v22  ;;  %v5733_v51 = vadd.f32 %v9562_v2, %v5171_v46  ;;  %15048 = vst [vmem:[#allocation80_spill] sm:$0xff] %v12395_v58  ;;  %v5797_v8 = vmul.f32 0.5, %v5730_v4 }
 0x304   :  { %15046 = vst [vmem:[#allocation78_spill] sm:$0xff] %v12383_v54  ;;  %v5013_v13 = vpop.f32.mrf.mxu1  ;;  %6641 = vrot.lane.b32.xlu1 %v12383_v54, %s9881_s2  ;;  %v6049_v35 = vmul.f32 0.5, %v5985_v6  ;;  %v12399_v7 = vsel %vm5768_vm2, %v6044_v47, %v9660_v11  ;;  %v5169_v24 = vadd.f32 %v5000_v59, %v12007_v23  ;;  %v5174_v46 = vadd.f32 %v9497_v45, %v12010_v38 }
 0x305   :  { %v12391_v27 = vpop.f32.mrf.mxu0  ;;  %v9664_v50 = vpop.eup %9663  ;;  %15049 = vst [vmem:[#allocation81_spill] sm:$0xff] %v12399_v7  ;;  %v5800_v2 = vmul.f32 0.5, %v5733_v51  ;;  %v5863_v11 = vsel %vm5768_vm2, %v5797_v8, %v5730_v4 }
 0x306   :  { %v9498_v1 = vpop.f32.mrf.mxu1  ;;  %v9666_v30 = vpop.eup %9665  ;;  %v5983_v49 = vadd.f32 1.0, %v9664_v50  ;;  %v12406_v22 = vsel %vm5768_vm2, %v6049_v35, %v9662_v26  ;;  %v5731_v47 = vadd.f32 %v5562_v55, %v5169_v24  ;;  %9679 = vtanh.f32 %v5863_v11 }
 0x307   :  { %v12402_v12 = vpop.f32.mrf.mxu0  ;;  %v5986_v33 = vadd.f32 1.0, %v9666_v30  ;;  %15050 = vst [vmem:[#allocation82_spill] sm:$0xff] %v12406_v22  ;;  %v9668_v58 = vpop.eup %9667  ;;  %6647 = vrot.lane.b32.xlu0 %v12406_v22, %s9881_s2  ;;  %v5866_v38 = vsel %vm5768_vm2, %v5800_v2, %v5733_v51  ;;  %v5172_v11 = vadd.f32 %v5013_v13, %v12013_v29 }
 0x308   :  { %v5016_v6 = vpop.f32.mrf.mxu1  ;;  %v6047_v62 = vmul.f32 0.5, %v5983_v49  ;;  %6637 = vrot.lane.b32.xlu1 %v12399_v7, %s9881_s2  ;;  %v5984_v59 = vadd.f32 1.0, %v9668_v58  ;;  %9681 = vtanh.f32 %v5866_v38  ;;  %v5798_v35 = vmul.f32 0.5, %v5731_v47  ;;  %v12417_v4 = vpop.permute.xlu1 %6365 }
 0x309   :  { %v9569_v23 = vpop.f32.mrf.mxu0  ;;  %v6050_v26 = vmul.f32 0.5, %v5986_v33  ;;  %v5736_v49 = vadd.f32 %v9565_v40, %v5174_v46  ;;  %15051 = vst [vmem:[#allocation83_spill] sm:$0xff] %v12417_v4  ;;  %v12428_v2 = vpop.permute.xlu0 %6367  ;;  %v5734_v29 = vadd.f32 %v12379_v53, %v5172_v11 }
 0x30a   :  { %v9501_v45 = vpop.f32.mrf.mxu1  ;;  %v9670_v55 = vpop.eup %9669  ;;  %v6048_v8 = vmul.f32 0.5, %v5984_v59  ;;  %v12421_v24 = vsel %vm5768_vm2, %v6047_v62, %v9664_v50  ;;  %15054 = vst [vmem:[#allocation86_spill] sm:$0xff] %v12428_v2  ;;  %v5864_v40 = vsel %vm5768_vm2, %v5798_v35, %v5731_v47 }
 0x30b   :  { %v5591_v28 = vpop.f32.mrf.mxu0  ;;  %15052 = vst [vmem:[#allocation84_spill] sm:$0xff] %v12421_v24  ;;  %v12425_v33 = vsel %vm5768_vm2, %v6050_v26, %v9666_v30  ;;  %v5803_v46 = vmul.f32 0.5, %v5736_v49  ;;  %v5989_v4 = vadd.f32 1.0, %v9670_v55  ;;  %6643 = vrot.lane.b32.xlu0 %v12421_v24, %s9881_s2  ;;  %9683 = vtanh.f32 %v5864_v40 }
 0x30c   :  { %15053 = vst [vmem:[#allocation85_spill] sm:$0xff] %v12425_v33  ;;  %v5029_v51 = vpop.f32.mrf.mxu1  ;;  %v9672_v38 = vpop.eup %9671  ;;  %6649 = vrot.lane.b32.xlu1 %v12425_v33, %s9881_s2  ;;  %v12441_v30 = vsel %vm5768_vm2, %v6048_v8, %v9668_v58  ;;  %v5175_v26 = vadd.f32 %v9498_v1, %v12016_v57  ;;  %v5801_v60 = vmul.f32 0.5, %v5734_v29  ;;  %v5173_v40 = vadd.f32 %v5016_v6, %v12019_v34 }
 0x30d   :  { %v12436_v62 = vpop.f32.mrf.mxu0  ;;  %v5987_v50 = vadd.f32 1.0, %v9672_v38  ;;  %15055 = vst [vmem:[#allocation87_spill] sm:$0xff] %v12441_v30  ;;  %v5869_v47 = vsel %vm5768_vm2, %v5803_v46, %v5736_v49  ;;  %v6053_v59 = vmul.f32 0.5, %v5989_v4  ;;  %v5178_v49 = vadd.f32 %v9501_v45, %v12022_v21  ;;  %v12462_v4 = vpop.permute.xlu1 %6369 }
 0x30e   :  { %v9502_v13 = vpop.f32.mrf.mxu1  ;;  %9685 = vtanh.f32 %v5869_v47  ;;  %v9674_v53 = vpop.eup %9673  ;;  %v5737_v8 = vadd.f32 %v12391_v27, %v5175_v26  ;;  %v5176_v57 = vadd.f32 %v5029_v51, %v12025_v41  ;;  %15057 = vst [vmem:[#allocation89_spill] sm:$0xff] %v12462_v4  ;;  %v5867_v11 = vsel %vm5768_vm2, %v5801_v60, %v5734_v29 }
 0x30f   :  { %v12446_v35 = vpop.f32.mrf.mxu0  ;;  %v6051_v2 = vmul.f32 0.5, %v5987_v50  ;;  %v12453_v58 = vsel %vm5768_vm2, %v6053_v59, %v9670_v55  ;;  %v9676_v34 = vpop.eup %9675  ;;  %v5990_v6 = vadd.f32 1.0, %v9674_v53  ;;  %9687 = vtanh.f32 %v5867_v11 }
 0x310   :  { %v12449_v33 = vpop.f32.mrf.mxu1  ;;  %15056 = vst [vmem:[#allocation88_spill] sm:$0xff] %v12453_v58  ;;  %6645 = vrot.lane.b32.xlu1 %v12441_v30, %s9881_s2  ;;  %6655 = vrot.lane.b32.xlu0 %v12453_v58, %s9881_s2  ;;  %v12468_v55 = vpop.permute.xlu0 %6371  ;;  %v5988_v41 = vadd.f32 1.0, %v9676_v34  ;;  %v5804_v51 = vmul.f32 0.5, %v5737_v8  ;;  %v5735_v47 = vadd.f32 %v12402_v12, %v5173_v40  ;;  %v5740_v60 = vadd.f32 %v9569_v23, %v5178_v49 }
 0x311   :  { %v12460_v1 = vpop.f32.mrf.mxu0  ;;  %15058 = vst [vmem:[#allocation90_spill] sm:$0xff] %v12468_v55  ;;  %v9678_v21 = vpop.eup %9677  ;;  %v12472_v45 = vsel %vm5768_vm2, %v6051_v2, %v9672_v38  ;;  %v6054_v50 = vmul.f32 0.5, %v5990_v6  ;;  %v5738_v4 = vadd.f32 %v5591_v28, %v5176_v57  ;;  %v5179_v30 = vadd.f32 %v9502_v13, %v12030_v5 }
 0x312   :  { %v9505_v27 = vpop.f32.mrf.mxu1  ;;  %15059 = vst [vmem:[#allocation91_spill] sm:$0xff] %v12472_v45  ;;  %v5993_v29 = vadd.f32 1.0, %v9678_v21  ;;  %v6052_v26 = vmul.f32 0.5, %v5988_v41  ;;  %v5870_v55 = vsel %vm5768_vm2, %v5804_v51, %v5737_v8  ;;  %v5802_v38 = vmul.f32 0.5, %v5735_v47  ;;  %v12492_v28 = vpop.permute.xlu1 %6373 }
 0x313   :  { %v12474_v46 = vpop.f32.mrf.mxu0  ;;  %v12484_v2 = vsel %vm5768_vm2, %v6054_v50, %v9674_v53  ;;  %9689 = vtanh.f32 %v5870_v55  ;;  %v5807_v6 = vmul.f32 0.5, %v5740_v60  ;;  %v9680_v23 = vpop.eup %9679  ;;  %v5805_v49 = vmul.f32 0.5, %v5738_v4  ;;  %15061 = vst [vmem:[#allocation93_spill] sm:$0xff] %v12492_v28 }
 0x314   :  { %v5045_v59 = vpop.f32.mrf.mxu1  ;;  %15060 = vst [vmem:[#allocation92_spill] sm:$0xff] %v12484_v2  ;;  %6651 = vrot.lane.b32.xlu0 %v12472_v45, %s9881_s2  ;;  %v6057_v40 = vmul.f32 0.5, %v5993_v29  ;;  %6657 = vrot.lane.b32.xlu1 %v12484_v2, %s9881_s2  ;;  %v5991_v53 = vadd.f32 1.0, %v9680_v23  ;;  %v5868_v8 = vsel %vm5768_vm2, %v5802_v38, %v5735_v47  ;;  %v12498_v55 = vpop.permute.xlu0 %6375  ;;  %v12510_v47 = vsel %vm5768_vm2, %v6052_v26, %v9676_v34 }
 0x315   :  { %v12480_v58 = vpop.f32.mrf.mxu0  ;;  %v9682_v13 = vpop.eup %9681  ;;  %v5873_v57 = vsel %vm5768_vm2, %v5807_v6, %v5740_v60  ;;  %15062 = vst [vmem:[#allocation94_spill] sm:$0xff] %v12498_v55  ;;  %9691 = vtanh.f32 %v5868_v8  ;;  %v5871_v50 = vsel %vm5768_vm2, %v5805_v49, %v5738_v4  ;;  %15064 = vst [vmem:[#allocation96_spill] sm:$0xff] %v12510_v47  ;;  %v5741_v60 = vadd.f32 %v12436_v62, %v5179_v30 }
 0x316   :  { %v9506_v12 = vpop.f32.mrf.mxu1  ;;  %v5994_v41 = vadd.f32 1.0, %v9682_v13  ;;  %v12502_v51 = vsel %vm5768_vm2, %v6057_v40, %v9678_v21  ;;  %v6055_v38 = vmul.f32 0.5, %v5991_v53  ;;  %9693 = vtanh.f32 %v5873_v57 }
 0x317   :  { %v12490_v5 = vpop.f32.mrf.mxu0  ;;  %15063 = vst [vmem:[#allocation95_spill] sm:$0xff] %v12502_v51  ;;  %9695 = vtanh.f32 %v5871_v50  ;;  %v5177_v4 = vadd.f32 %v12449_v33, %v12033_v16  ;;  %v5182_v40 = vadd.f32 %v9505_v27, %v12038_v15  ;;  %v5808_v49 = vmul.f32 0.5, %v5741_v60 }
 0x318   :  { %v5048_v11 = vpop.f32.mrf.mxu1  ;;  %6663 = vrot.lane.b32.xlu0 %v12502_v51, %s9881_s2  ;;  %v9684_v8 = vpop.eup %9683  ;;  %v6058_v21 = vmul.f32 0.5, %v5994_v41  ;;  %6653 = vrot.lane.b32.xlu1 %v12510_v47, %s9881_s2  ;;  %v5180_v62 = vadd.f32 %v5045_v59, %v12043_v61  ;;  %v12525_v57 = vsel %vm5768_vm2, %v6055_v38, %v9680_v23 }
 0x319   :  { %v12506_v29 = vpop.f32.mrf.mxu0  ;;  %v5992_v26 = vadd.f32 1.0, %v9684_v8  ;;  %15065 = vst [vmem:[#allocation97_spill] sm:$0xff] %v12525_v57  ;;  %v5739_v15 = vadd.f32 %v12446_v35, %v5177_v4  ;;  %v5744_v33 = vadd.f32 %v12460_v1, %v5182_v40  ;;  %v12535_v41 = vpop.permute.xlu1 %6377  ;;  %v5874_v61 = vsel %vm5768_vm2, %v5808_v49, %v5741_v60 }
 0x31a   :  { %v9509_v6 = vpop.f32.mrf.mxu1  ;;  %v12529_v16 = vsel %vm5768_vm2, %v6058_v21, %v9682_v13  ;;  %15067 = vst [vmem:[#allocation99_spill] sm:$0xff] %v12535_v41  ;;  %v12543_v13 = vpop.permute.xlu0 %6379  ;;  %9697 = vtanh.f32 %v5874_v61  ;;  %v5742_v1 = vadd.f32 %v12474_v46, %v5180_v62  ;;  %v5183_v40 = vadd.f32 %v9506_v12, %v12046_v25 }
 0x31b   :  { %v12520_v34 = vpop.f32.mrf.mxu0  ;;  %v9686_v53 = vpop.eup %9685  ;;  %15066 = vst [vmem:[#allocation98_spill] sm:$0xff] %v12529_v16  ;;  %v6056_v50 = vmul.f32 0.5, %v5992_v26  ;;  %15068 = vst [vmem:[#allocation100_spill] sm:$0xff] %v12543_v13  ;;  %v5806_v35 = vmul.f32 0.5, %v5739_v15  ;;  %v5811_v38 = vmul.f32 0.5, %v5744_v33  ;;  %v5181_v26 = vadd.f32 %v5048_v11, %v12053_v9 }
 0x31c   :  { %v5061_v30 = vpop.f32.mrf.mxu1  ;;  %v5997_v59 = vadd.f32 1.0, %v9686_v53  ;;  %6659 = vrot.lane.b32.xlu0 %v12525_v57, %s9881_s2  ;;  %6665 = vrot.lane.b32.xlu1 %v12529_v16, %s9881_s2  ;;  %v9688_v4 = vpop.eup %9687  ;;  %v5809_v9 = vmul.f32 0.5, %v5742_v1  ;;  %v5745_v12 = vadd.f32 %v12480_v58, %v5183_v40 }
 0x31d   :  { %v12533_v27 = vpop.f32.mrf.mxu0  ;;  %v12554_v13 = vsel %vm5768_vm2, %v6056_v50, %v9684_v8  ;;  %v5995_v61 = vadd.f32 1.0, %v9688_v4  ;;  %v5872_v46 = vsel %vm5768_vm2, %v5806_v35, %v5739_v15  ;;  %v5877_v62 = vsel %vm5768_vm2, %v5811_v38, %v5744_v33  ;;  %v15072_v38 = vld [vmem:[#allocation4_spill] sm:$0xff] }
 0x31e   :  { %v12541_v23 = vpop.f32.mrf.mxu1  ;;  %v6061_v60 = vmul.f32 0.5, %v5997_v59  ;;  %15069 = vst [vmem:[#allocation101_spill] sm:$0xff] %v12554_v13  ;;  %9699 = vtanh.f32 %v5872_v46  ;;  %v5743_v15 = vadd.f32 %v12490_v5, %v5181_v26  ;;  %v5875_v58 = vsel %vm5768_vm2, %v5809_v9, %v5742_v1  ;;  %v15074_v26 = vld [vmem:[#allocation5_spill] sm:$0xff] }
 0x31f   :  { %v12548_v21 = vpop.f32.mrf.mxu0  ;;  %v6059_v50 = vmul.f32 0.5, %v5995_v61  ;;  %9701 = vtanh.f32 %v5877_v62  ;;  %v5812_v35 = vmul.f32 0.5, %v5745_v12  ;;  %v12581_v61 = vpop.permute.xlu0 %6383  ;;  %v5184_v46 = vadd.f32 %v5061_v30, %v15074_v26 }
 0x320   :  { %v5064_v49 = vpop.f32.mrf.mxu1  ;;  %v12564_v25 = vsel %vm5768_vm2, %v6061_v60, %v9686_v53  ;;  %v9690_v8 = vpop.eup %9689  ;;  %6661 = vrot.lane.b32.xlu1 %v12554_v13, %s9881_s2  ;;  %v5186_v60 = vadd.f32 %v9509_v6, %v15072_v38  ;;  %15073 = vst [vmem:[#allocation4_spill] sm:$0xff] %v12581_v61  ;;  %9703 = vtanh.f32 %v5875_v58  ;;  %v5810_v5 = vmul.f32 0.5, %v5743_v15 }
 0x321   :  { %v12560_v28 = vpop.f32.mrf.mxu0  ;;  %15070 = vst [vmem:[#allocation102_spill] sm:$0xff] %v12564_v25  ;;  %6671 = vrot.lane.b32.xlu0 %v12564_v25, %s9881_s2  ;;  %v12576_v53 = vpop.permute.xlu1 %6381  ;;  %v5998_v59 = vadd.f32 1.0, %v9690_v8  ;;  %v5878_v1 = vsel %vm5768_vm2, %v5812_v35, %v5745_v12  ;;  %v5746_v58 = vadd.f32 %v12520_v34, %v5184_v46 }
 0x322   :  { %v12567_v11 = vpop.f32.mrf.mxu1  ;;  %15071 = vst [vmem:[#allocation103_spill] sm:$0xff] %v12576_v53  ;;  %v9692_v41 = vpop.eup %9691  ;;  %v12588_v53 = vsel %vm5768_vm2, %v6059_v50, %v9688_v4  ;;  %v5748_v6 = vadd.f32 %v12506_v29, %v5186_v60  ;;  %9705 = vtanh.f32 %v5878_v1  ;;  %v5876_v30 = vsel %vm5768_vm2, %v5810_v5, %v5743_v15 }
 0x323   :  { %v12574_v33 = vpop.f32.mrf.mxu0  ;;  %15075 = vst [vmem:[#allocation5_spill] sm:$0xff] %v12588_v53  ;;  %v6062_v55 = vmul.f32 0.5, %v5998_v59  ;;  %v9694_v38 = vpop.eup %9693  ;;  %v5996_v61 = vadd.f32 1.0, %v9692_v41  ;;  %9707 = vtanh.f32 %v5876_v30  ;;  %v5813_v1 = vmul.f32 0.5, %v5746_v58  ;;  %v15079_v30 = vld [vmem:[#allocation9_spill] sm:$0xff] }
 0x324   :  { %v5077_v40 = vpop.f32.mrf.mxu1  ;;  %v9696_v50 = vpop.eup %9695  ;;  %v5815_v29 = vmul.f32 0.5, %v5748_v6  ;;  %v6001_v59 = vadd.f32 1.0, %v9694_v38 }
 0x325   :  { %v12584_v62 = vpop.f32.mrf.mxu0  ;;  %6667 = vrot.lane.b32.xlu0 %v12588_v53, %s9881_s2  ;;  %v12602_v12 = vsel %vm5768_vm2, %v6062_v55, %v9690_v8  ;;  %v6060_v60 = vmul.f32 0.5, %v5996_v61  ;;  %v5999_v26 = vadd.f32 1.0, %v9696_v50  ;;  %v12608_v15 = vpop.permute.xlu1 %6385  ;;  %v15078_v55 = vld [vmem:[#allocation8_spill] sm:$0xff]  ;;  %v5185_v53 = vadd.f32 %v5064_v49, %v15079_v30 }
 0x326   :  { %v9514_v9 = vpop.f32.mrf.mxu1  ;;  %15076 = vst [vmem:[#allocation104_spill] sm:$0xff] %v12602_v12  ;;  %6673 = vrot.lane.b32.xlu1 %v12602_v12, %s9881_s2  ;;  %15077 = vst [vmem:[#allocation105_spill] sm:$0xff] %v12608_v15  ;;  %v5881_v5 = vsel %vm5768_vm2, %v5815_v29, %v5748_v6  ;;  %v6065_v46 = vmul.f32 0.5, %v6001_v59  ;;  %v5187_v8 = vadd.f32 %v12541_v23, %v15078_v55  ;;  %v12615_v61 = vpop.permute.xlu0 %6387 }
 0x327   :  { %v12598_v4 = vpop.f32.mrf.mxu0  ;;  %15080 = vst [vmem:[#allocation8_spill] sm:$0xff] %v12615_v61  ;;  %v6063_v25 = vmul.f32 0.5, %v5999_v26  ;;  %9709 = vtanh.f32 %v5881_v5  ;;  %v5879_v12 = vsel %vm5768_vm2, %v5813_v1, %v5746_v58  ;;  %v9698_v15 = vpop.eup %9697  ;;  %v12623_v6 = vsel %vm5768_vm2, %v6060_v60, %v9692_v41 }
 0x328   :  { %v5080_v35 = vpop.f32.mrf.mxu1  ;;  %15081 = vst [vmem:[#allocation9_spill] sm:$0xff] %v12623_v6  ;;  %v12627_v23 = vsel %vm5768_vm2, %v6065_v46, %v9694_v38  ;;  %9711 = vtanh.f32 %v5879_v12  ;;  %v5749_v49 = vadd.f32 %v12533_v27, %v5187_v8  ;;  %v6002_v59 = vadd.f32 1.0, %v9698_v15  ;;  %v15083_v12 = vld [vmem:[#allocation10_spill] sm:$0xff] }
 0x329   :  { %v12606_v34 = vpop.f32.mrf.mxu0  ;;  %v5747_v26 = vadd.f32 %v12548_v21, %v5185_v53  ;;  %6679 = vrot.lane.b32.xlu0 %v12627_v23, %s9881_s2  ;;  %v12641_v38 = vsel %vm5768_vm2, %v6063_v25, %v9696_v50  ;;  %v5190_v27 = vadd.f32 %v12567_v11, %v15083_v12  ;;  %v5188_v60 = vadd.f32 %v5077_v40, %v12079_v37  ;;  %v12652_v30 = vpop.permute.xlu1 %6389 }
 0x32a   :  { %v9517_v13 = vpop.f32.mrf.mxu1  ;;  %6669 = vrot.lane.b32.xlu1 %v12623_v6, %s9881_s2  ;;  %15082 = vst [vmem:[#allocation106_spill] sm:$0xff] %v12641_v38  ;;  %v5816_v58 = vmul.f32 0.5, %v5749_v49  ;;  %v6066_v53 = vmul.f32 0.5, %v6002_v59  ;;  %v5191_v46 = vadd.f32 %v9514_v9, %v12082_v48  ;;  %v5189_v55 = vadd.f32 %v5080_v35, %v12085_v18  ;;  %15084 = vst [vmem:[#allocation10_spill] sm:$0xff] %v12652_v30  ;;  %v12660_v59 = vpop.permute.xlu0 %6391 }
 0x32b   :  { %v12619_v16 = vpop.f32.mrf.mxu0  ;;  %v9700_v21 = vpop.eup %9699  ;;  %v5814_v5 = vmul.f32 0.5, %v5747_v26  ;;  %v5752_v37 = vadd.f32 %v12560_v28, %v5190_v27  ;;  %v5750_v40 = vadd.f32 %v12574_v33, %v5188_v60  ;;  %15085 = vst [vmem:[#allocation107_spill] sm:$0xff] %v12660_v59  ;;  %v15088_v59 = vld [vmem:[#allocation15_spill] sm:$0xff] }
 0x32c   :  { %v12630_v29 = vpop.f32.mrf.mxu1  ;;  %v9702_v25 = vpop.eup %9701  ;;  %v6000_v50 = vadd.f32 1.0, %v9700_v21  ;;  %v5882_v11 = vsel %vm5768_vm2, %v5816_v58, %v5749_v49  ;;  %v12664_v18 = vsel %vm5768_vm2, %v6066_v53, %v9698_v15  ;;  %v5753_v60 = vadd.f32 %v12584_v62, %v5191_v46 }
 0x32d   :  { %v12637_v41 = vpop.f32.mrf.mxu0  ;;  %15086 = vst [vmem:[#allocation108_spill] sm:$0xff] %v12664_v18  ;;  %9713 = vtanh.f32 %v5882_v11  ;;  %v5880_v48 = vsel %vm5768_vm2, %v5814_v5, %v5747_v26  ;;  %v6005_v9 = vadd.f32 1.0, %v9702_v25  ;;  %6675 = vrot.lane.b32.xlu0 %v12641_v38, %s9881_s2  ;;  %v9704_v35 = vpop.eup %9703  ;;  %v5819_v33 = vmul.f32 0.5, %v5752_v37 }
 0x32e   :  { %v12646_v1 = vpop.f32.mrf.mxu1  ;;  %v6064_v28 = vmul.f32 0.5, %v6000_v50  ;;  %9715 = vtanh.f32 %v5880_v48  ;;  %6681 = vrot.lane.b32.xlu1 %v12664_v18, %s9881_s2  ;;  %v6003_v58 = vadd.f32 1.0, %v9704_v35  ;;  %v5817_v15 = vmul.f32 0.5, %v5750_v40 }
 0x32f   :  { %v12650_v8 = vpop.f32.mrf.mxu0  ;;  %v6069_v27 = vmul.f32 0.5, %v6005_v9  ;;  %v9706_v26 = vpop.eup %9705  ;;  %v5885_v50 = vsel %vm5768_vm2, %v5819_v33, %v5752_v37  ;;  %v5751_v11 = vadd.f32 %v12598_v4, %v5189_v55  ;;  %v5194_v18 = vadd.f32 %v9517_v13, %v15088_v59 }
 0x330   :  { %v12658_v12 = vpop.f32.mrf.mxu1  ;;  %v12677_v5 = vsel %vm5768_vm2, %v6064_v28, %v9700_v21  ;;  %v9708_v30 = vpop.eup %9707  ;;  %v6067_v61 = vmul.f32 0.5, %v6003_v58  ;;  %9717 = vtanh.f32 %v5885_v50  ;;  %v6006_v9 = vadd.f32 1.0, %v9706_v26 }
 0x331   :  { %v12673_v53 = vpop.f32.mrf.mxu0  ;;  %15087 = vst [vmem:[#allocation109_spill] sm:$0xff] %v12677_v5  ;;  %v6004_v62 = vadd.f32 1.0, %v9708_v30  ;;  %v12685_v46 = vsel %vm5768_vm2, %v6069_v27, %v9702_v25  ;;  %v5883_v21 = vsel %vm5768_vm2, %v5817_v15, %v5750_v40  ;;  %v5820_v28 = vmul.f32 0.5, %v5753_v60  ;;  %v12691_v4 = vpop.permute.xlu1 %6393 }
 0x332   :  { %v9521_v49 = vpop.f32.mrf.mxu1  ;;  %15089 = vst [vmem:[#allocation15_spill] sm:$0xff] %v12685_v46  ;;  %6677 = vrot.lane.b32.xlu1 %v12677_v5, %s9881_s2  ;;  %15090 = vst [vmem:[#allocation110_spill] sm:$0xff] %v12691_v4  ;;  %v12693_v55 = vpop.permute.xlu0 %6395  ;;  %v6070_v37 = vmul.f32 0.5, %v6006_v9  ;;  %9719 = vtanh.f32 %v5883_v21  ;;  %6687 = vrot.lane.b32.xlu0 %v12685_v46, %s9881_s2  ;;  %v5818_v58 = vmul.f32 0.5, %v5751_v11  ;;  %v5756_v50 = vadd.f32 %v12606_v34, %v5194_v18 }
 0x333   :  { %15091 = vst [vmem:[#allocation111_spill] sm:$0xff] %v12693_v55  ;;  %v5671_v13 = vpop.f32.mrf.mxu0  ;;  %v6068_v33 = vmul.f32 0.5, %v6004_v62  ;;  %v5886_v40 = vsel %vm5768_vm2, %v5820_v28, %v5753_v60  ;;  %v12706_v21 = vsel %vm5768_vm2, %v6067_v61, %v9704_v35  ;;  %v15095_v35 = vld [vmem:[#allocation32_spill] sm:$0xff] }
 0x334   :  { %v5109_v48 = vpop.f32.mrf.mxu1  ;;  %v9710_v25 = vpop.eup %9709  ;;  %v12701_v15 = vsel %vm5768_vm2, %v6070_v37, %v9706_v26  ;;  %9721 = vtanh.f32 %v5886_v40  ;;  %15093 = vst [vmem:[#allocation113_spill] sm:$0xff] %v12706_v21  ;;  %v5884_v62 = vsel %vm5768_vm2, %v5818_v58, %v5751_v11  ;;  %v5823_v26 = vmul.f32 0.5, %v5756_v50  ;;  %v15096_v11 = vld [vmem:[#allocation33_spill] sm:$0xff]  ;;  %v15097_v58 = vld [vmem:[#allocation36_spill] sm:$0xff] }
 0x335   :  { %v9712_v27 = vpop.eup %9711  ;;  %15092 = vst [vmem:[#allocation112_spill] sm:$0xff] %v12701_v15  ;;  %v6009_v9 = vadd.f32 1.0, %v9710_v25  ;;  %v12714_v60 = vsel %vm5768_vm2, %v6068_v33, %v9708_v30  ;;  %9723 = vtanh.f32 %v5884_v62  ;;  %v9590_v34 = vpop.f32.mrf.mxu0  ;;  %v5192_v37 = vadd.f32 %v12630_v29, %v15095_v35  ;;  %v15100_v62 = vld [vmem:[#allocation16_spill] sm:$0xff] }
 0x336   :  { %v9522_v59 = vpop.f32.mrf.mxu1  ;;  %v6007_v55 = vadd.f32 1.0, %v9712_v27  ;;  %6689 = vrot.lane.b32.xlu1 %v12701_v15, %s9881_s2  ;;  %15094 = vst [vmem:[#allocation114_spill] sm:$0xff] %v12714_v60  ;;  %6683 = vrot.lane.b32.xlu0 %v12706_v21, %s9881_s2  ;;  %v5195_v40 = vadd.f32 %v12646_v1, %v15096_v11  ;;  %v5193_v4 = vadd.f32 %v12658_v12, %v15097_v58  ;;  %v12724_v30 = vpop.permute.xlu1 %6397  ;;  %v15101_v15 = vld [vmem:[#allocation17_spill] sm:$0xff] }
 0x337   :  { %v6073_v28 = vmul.f32 0.5, %v6009_v9  ;;  %15098 = vst [vmem:[#allocation32_spill] sm:$0xff] %v12724_v30  ;;  %v5889_v33 = vsel %vm5768_vm2, %v5823_v26, %v5756_v50  ;;  %v5196_v21 = vadd.f32 %v5109_v48, %v15101_v15  ;;  %v12734_v29 = vpop.permute.xlu0 %6399  ;;  %v5754_v1 = vadd.f32 %v12619_v16, %v5192_v37  ;;  %v5674_v48 = vpop.f32.mrf.mxu0 }
 0x338   :  { %v5112_v61 = vpop.f32.mrf.mxu1  ;;  %v6071_v18 = vmul.f32 0.5, %v6007_v55  ;;  %v5198_v55 = vadd.f32 %v9521_v49, %v15100_v62  ;;  %15102 = vst [vmem:[#allocation36_spill] sm:$0xff] %v12734_v29  ;;  %9725 = vtanh.f32 %v5889_v33  ;;  %v5757_v26 = vadd.f32 %v12637_v41, %v5195_v40 }
 0x339   :  { %v12730_v9 = vsel %vm5768_vm2, %v6073_v28, %v9710_v25  ;;  %v5755_v49 = vadd.f32 %v12650_v8, %v5193_v4  ;;  %v5821_v16 = vmul.f32 0.5, %v5754_v1  ;;  %v5758_v11 = vadd.f32 %v5671_v13, %v5196_v21  ;;  %v9593_v30 = vpop.f32.mrf.mxu0 }
 0x33a   :  { %15099 = vst [vmem:[#allocation33_spill] sm:$0xff] %v12730_v9  ;;  %v9714_v35 = vpop.eup %9713  ;;  %6685 = vrot.lane.b32.xlu1 %v12714_v60, %s9881_s2  ;;  %v12741_v50 = vsel %vm5768_vm2, %v6071_v18, %v9712_v27  ;;  %6695 = vrot.lane.b32.xlu0 %v12730_v9, %s9881_s2  ;;  %v9525_v15 = vpop.f32.mrf.mxu1  ;;  %v5760_v37 = vadd.f32 %v12673_v53, %v5198_v55  ;;  %v5824_v33 = vmul.f32 0.5, %v5757_v26  ;;  %v15103_v27 = vld [vmem:[#allocation38_spill] sm:$0xff] }
 0x33b   :  { %v9716_v12 = vpop.eup %9715  ;;  %v6010_v25 = vadd.f32 1.0, %v9714_v35  ;;  %v5822_v62 = vmul.f32 0.5, %v5755_v49  ;;  %v5199_v18 = vadd.f32 %v9522_v59, %v15103_v27  ;;  %v5887_v8 = vsel %vm5768_vm2, %v5821_v16, %v5754_v1  ;;  %v12751_v60 = vpop.permute.xlu1 %6401 }
 0x33c   :  { %v6008_v28 = vadd.f32 1.0, %v9716_v12  ;;  %v5827_v4 = vmul.f32 0.5, %v5760_v37  ;;  %v5825_v40 = vmul.f32 0.5, %v5758_v11  ;;  %15104 = vst [vmem:[#allocation16_spill] sm:$0xff] %v12751_v60  ;;  %9727 = vtanh.f32 %v5887_v8  ;;  %v5125_v59 = vpop.f32.mrf.mxu1  ;;  %v12763_v21 = vpop.permute.xlu0 %6403  ;;  %v15108_v60 = vld [vmem:[#allocation20_spill] sm:$0xff] }
 0x33d   :  { %v6074_v58 = vmul.f32 0.5, %v6010_v25  ;;  %v9718_v29 = vpop.eup %9717  ;;  %v5890_v53 = vsel %vm5768_vm2, %v5824_v33, %v5757_v26  ;;  %v5888_v13 = vsel %vm5768_vm2, %v5822_v62, %v5755_v49  ;;  %15105 = vst [vmem:[#allocation17_spill] sm:$0xff] %v12763_v21  ;;  %v5687_v26 = vpop.f32.mrf.mxu0  ;;  %v5761_v16 = vadd.f32 %v9590_v34, %v5199_v18  ;;  %v15111_v18 = vld [vmem:[#allocation41_spill] sm:$0xff] }
 0x33e   :  { %v6072_v41 = vmul.f32 0.5, %v6008_v28  ;;  %6691 = vrot.lane.b32.xlu0 %v12741_v50, %s9881_s2  ;;  %9729 = vtanh.f32 %v5890_v53  ;;  %v5893_v1 = vsel %vm5768_vm2, %v5827_v4, %v5760_v37  ;;  %v6013_v25 = vadd.f32 1.0, %v9718_v29  ;;  %v9526_v8 = vpop.f32.mrf.mxu1 }
 0x33f   :  { %v12755_v9 = vsel %vm5768_vm2, %v6074_v58, %v9714_v35  ;;  %v9720_v55 = vpop.eup %9719  ;;  %9731 = vtanh.f32 %v5888_v13  ;;  %v5891_v49 = vsel %vm5768_vm2, %v5825_v40, %v5758_v11  ;;  %v15106_v58 = vld [vmem:[#allocation19_spill] sm:$0xff]  ;;  %v5828_v13 = vmul.f32 0.5, %v5761_v16  ;;  %v12779_v34 = vpop.permute.xlu1 %6405 }
 0x340   :  { %6697 = vrot.lane.b32.xlu1 %v12755_v9, %s9881_s2  ;;  %v6011_v35 = vadd.f32 1.0, %v9720_v55  ;;  %9733 = vtanh.f32 %v5893_v1  ;;  %v5197_v33 = vadd.f32 %v5112_v61, %v15106_v58  ;;  %v12774_v62 = vsel %vm5768_vm2, %v6072_v41, %v9716_v12  ;;  %15109 = vst [vmem:[#allocation19_spill] sm:$0xff] %v12779_v34  ;;  %v9594_v40 = vpop.f32.mrf.mxu0  ;;  %v5128_v58 = vpop.f32.mrf.mxu1 }
 0x341   :  { %v9722_v28 = vpop.eup %9721  ;;  %15107 = vst [vmem:[#allocation38_spill] sm:$0xff] %v12774_v62  ;;  %v6077_v27 = vmul.f32 0.5, %v6013_v25  ;;  %9735 = vtanh.f32 %v5891_v49  ;;  %v5202_v1 = vadd.f32 %v9525_v15, %v15108_v60  ;;  %v5200_v41 = vadd.f32 %v5125_v59, %v15111_v18  ;;  %v12786_v25 = vpop.permute.xlu0 %6407 }
 0x342   :  { %v6014_v37 = vadd.f32 1.0, %v9722_v28  ;;  %v9724_v4 = vpop.eup %9723  ;;  %v6075_v53 = vmul.f32 0.5, %v6011_v35  ;;  %v5759_v21 = vadd.f32 %v5674_v48, %v5197_v33  ;;  %15112 = vst [vmem:[#allocation41_spill] sm:$0xff] %v12786_v25  ;;  %v5894_v48 = vsel %vm5768_vm2, %v5828_v13, %v5761_v16 }
 0x343   :  { %v6012_v61 = vadd.f32 1.0, %v9724_v4  ;;  %v12783_v12 = vsel %vm5768_vm2, %v6077_v27, %v9718_v29  ;;  %9737 = vtanh.f32 %v5894_v48  ;;  %v5764_v29 = vadd.f32 %v9593_v30, %v5202_v1  ;;  %v15116_v30 = vld [vmem:[#allocation22_spill] sm:$0xff] }
 0x344   :  { %6693 = vrot.lane.b32.xlu1 %v12774_v62, %s9881_s2  ;;  %v6078_v11 = vmul.f32 0.5, %v6014_v37  ;;  %15110 = vst [vmem:[#allocation20_spill] sm:$0xff] %v12783_v12  ;;  %v5826_v60 = vmul.f32 0.5, %v5759_v21  ;;  %6703 = vrot.lane.b32.xlu0 %v12783_v12, %s9881_s2  ;;  %v15114_v37 = vld [vmem:[#allocation21_spill] sm:$0xff]  ;;  %v12803_v16 = vsel %vm5768_vm2, %v6075_v53, %v9720_v55  ;;  %v5201_v1 = vadd.f32 %v5128_v58, %v15116_v30  ;;  %v12814_v53 = vpop.permute.xlu1 %6409 }
 0x345   :  { %v9726_v15 = vpop.eup %9725  ;;  %v6076_v35 = vmul.f32 0.5, %v6012_v61  ;;  %v5203_v27 = vadd.f32 %v9526_v8, %v15114_v37  ;;  %15115 = vst [vmem:[#allocation21_spill] sm:$0xff] %v12803_v16  ;;  %v5831_v13 = vmul.f32 0.5, %v5764_v29  ;;  %v5690_v61 = vpop.f32.mrf.mxu0  ;;  %15118 = vst [vmem:[#allocation116_spill] sm:$0xff] %v12814_v53 }
 0x346   :  { %v12794_v49 = vsel %vm5768_vm2, %v6078_v11, %v9722_v28  ;;  %v5892_v59 = vsel %vm5768_vm2, %v5826_v60, %v5759_v21  ;;  %v6017_v33 = vadd.f32 1.0, %v9726_v15  ;;  %v5762_v28 = vadd.f32 %v5687_v26, %v5200_v41 }
 0x347   :  { %15113 = vst [vmem:[#allocation115_spill] sm:$0xff] %v12794_v49  ;;  %9739 = vtanh.f32 %v5892_v59  ;;  %v5765_v18 = vadd.f32 %v9594_v40, %v5203_v27  ;;  %v12810_v21 = vsel %vm5768_vm2, %v6076_v35, %v9724_v4  ;;  %v5897_v8 = vsel %vm5768_vm2, %v5831_v13, %v5764_v29 }
 0x348   :  { %6705 = vrot.lane.b32.xlu1 %v12794_v49, %s9881_s2  ;;  %v6081_v11 = vmul.f32 0.5, %v6017_v33  ;;  %6699 = vrot.lane.b32.xlu0 %v12803_v16, %s9881_s2  ;;  %15117 = vst [vmem:[#allocation22_spill] sm:$0xff] %v12810_v21  ;;  %v5829_v55 = vmul.f32 0.5, %v5762_v28  ;;  %v5763_v60 = vadd.f32 %v5690_v61, %v5201_v1  ;;  %9741 = vtanh.f32 %v5897_v8 }
 0x349   :  { %v9728_v26 = vpop.eup %9727  ;;  %v5832_v40 = vmul.f32 0.5, %v5765_v18 }
 0x34a   :  { %v12818_v41 = vsel %vm5768_vm2, %v6081_v11, %v9726_v15  ;;  %v6015_v4 = vadd.f32 1.0, %v9728_v26  ;;  %v5895_v29 = vsel %vm5768_vm2, %v5829_v55, %v5762_v28  ;;  %v5830_v13 = vmul.f32 0.5, %v5763_v60 }
 0x34b   :  { %15119 = vst [vmem:[#allocation117_spill] sm:$0xff] %v12818_v41  ;;  %v9730_v58 = vpop.eup %9729  ;;  %v5898_v27 = vsel %vm5768_vm2, %v5832_v40, %v5765_v18  ;;  %9743 = vtanh.f32 %v5895_v29 }
 0x34c   :  { %6701 = vrot.lane.b32.xlu1 %v12810_v21, %s9881_s2  ;;  %v9732_v35 = vpop.eup %9731  ;;  %v6018_v59 = vadd.f32 1.0, %v9730_v58  ;;  %6711 = vrot.lane.b32.xlu0 %v12818_v41, %s9881_s2  ;;  %v6079_v15 = vmul.f32 0.5, %v6015_v4  ;;  %9745 = vtanh.f32 %v5898_v27  ;;  %v5896_v18 = vsel %vm5768_vm2, %v5830_v13, %v5763_v60 }
 0x34d   :  { %v9734_v33 = vpop.eup %9733  ;;  %v6016_v37 = vadd.f32 1.0, %v9732_v35  ;;  %9747 = vtanh.f32 %v5896_v18 }
 0x34e   :  { %v9736_v11 = vpop.eup %9735  ;;  %v6082_v30 = vmul.f32 0.5, %v6018_v59  ;;  %v6021_v1 = vadd.f32 1.0, %v9734_v33  ;;  %v12830_v34 = vsel %vm5768_vm2, %v6079_v15, %v9728_v26 }
 0x34f   :  { %v6608_v48 = vpop.permute.xlu0 %6607  ;;  %15120 = vst [vmem:[#allocation118_spill] sm:$0xff] %v12830_v34  ;;  %v6019_v28 = vadd.f32 1.0, %v9736_v11  ;;  %v6080_v55 = vmul.f32 0.5, %v6016_v37 }
 0x350   :  { %v12834_v53 = vsel %vm5768_vm2, %v6082_v30, %v9730_v58  ;;  %v6085_v4 = vmul.f32 0.5, %v6021_v1  ;;  %6707 = vrot.lane.b32.xlu0 %v12830_v34, %s9881_s2  ;;  %v9738_v40 = vpop.eup %9737  ;;  %v6797_v18 = vmul.f32 %v6608_v48, %v12195_v36 }
 0x351   :  { %15121 = vst [vmem:[#allocation119_spill] sm:$0xff] %v12834_v53  ;;  %6713 = vrot.lane.b32.xlu1 %v12834_v53, %s9881_s2  ;;  %v6083_v58 = vmul.f32 0.5, %v6019_v28  ;;  %v6022_v37 = vadd.f32 1.0, %v9738_v40  ;;  %v12848_v27 = vsel %vm5768_vm2, %v6080_v55, %v9732_v35 }
 0x352   :  { %v12844_v59 = vsel %vm5768_vm2, %v6085_v4, %v9734_v33  ;;  %15123 = vst [vmem:[#allocation121_spill] sm:$0xff] %v12848_v27 }
 0x353   :  { %v6610_v61 = vpop.permute.xlu1 %6609  ;;  %v6604_v8 = vpop.permute.xlu0 %6603  ;;  %15122 = vst [vmem:[#allocation120_spill] sm:$0xff] %v12844_v59  ;;  %v6086_v13 = vmul.f32 0.5, %v6022_v37  ;;  %v12856_v1 = vsel %vm5768_vm2, %v6083_v58, %v9736_v11 }
 0x354   :  { %v9740_v15 = vpop.eup %9739  ;;  %6719 = vrot.lane.b32.xlu0 %v12844_v59, %s9881_s2  ;;  %15124 = vst [vmem:[#allocation122_spill] sm:$0xff] %v12856_v1  ;;  %v6798_v48 = vmul.f32 %v6610_v61, %v12208_v43 }
 0x355   :  { %v6020_v60 = vadd.f32 1.0, %v9740_v15  ;;  %6709 = vrot.lane.b32.xlu1 %v12848_v27, %s9881_s2  ;;  %v12860_v28 = vsel %vm5768_vm2, %v6086_v13, %v9738_v40  ;;  %v9742_v35 = vpop.eup %9741 }
 0x356   :  { %15125 = vst [vmem:[#allocation123_spill] sm:$0xff] %v12860_v28  ;;  %v6025_v25 = vadd.f32 1.0, %v9742_v35 }
 0x357   :  { %v6606_v26 = vpop.permute.xlu1 %6605  ;;  %v6616_v29 = vpop.permute.xlu0 %6615  ;;  %v6084_v55 = vmul.f32 0.5, %v6020_v60  ;;  %v6795_v60 = vmul.f32 %v6604_v8, %v12212_v20 }
 0x358   :  { %6715 = vrot.lane.b32.xlu0 %v12856_v1, %s9881_s2  ;;  %v9744_v27 = vpop.eup %9743  ;;  %v6089_v1 = vmul.f32 0.5, %v6025_v25  ;;  %v6796_v8 = vmul.f32 %v6606_v26, %v12228_v10 }
 0x359   :  { %6721 = vrot.lane.b32.xlu1 %v12860_v28, %s9881_s2  ;;  %v12869_v11 = vsel %vm5768_vm2, %v6084_v55, %v9740_v15  ;;  %v9746_v40 = vpop.eup %9745  ;;  %v6023_v28 = vadd.f32 1.0, %v9744_v27 }
 0x35a   :  { %15126 = vst [vmem:[#allocation124_spill] sm:$0xff] %v12869_v11  ;;  %v6026_v36 = vadd.f32 1.0, %v9746_v40  ;;  %v9748_v59 = vpop.eup %9747 }
 0x35b   :  { %v6618_v30 = vpop.permute.xlu1 %6617  ;;  %v6612_v33 = vpop.permute.xlu0 %6611  ;;  %v6024_v20 = vadd.f32 1.0, %v9748_v59 }
 0x35c   :  { %6927 = vrot.lane.b32.xlu0 %v6797_v18, %s9881_s2  ;;  %v6087_v18 = vmul.f32 0.5, %v6023_v28  ;;  %v6090_v53 = vmul.f32 0.5, %v6026_v36  ;;  %v6801_v36 = vmul.f32 %v6616_v29, %v12232_v42 }
 0x35d   :  { %6717 = vrot.lane.b32.xlu1 %v12869_v11, %s9881_s2  ;;  %v12880_v11 = vsel %vm5768_vm2, %v6089_v1, %v9742_v35  ;;  %v6088_v28 = vmul.f32 0.5, %v6024_v20 }
 0x35e   :  { %15127 = vst [vmem:[#allocation125_spill] sm:$0xff] %v12880_v11  ;;  %v12888_v61 = vsel %vm5768_vm2, %v6087_v18, %v9744_v27  ;;  %v12892_v1 = vsel %vm5768_vm2, %v6090_v53, %v9746_v40  ;;  %v15129_v53 = vld [vmem:[#allocation58_spill] sm:$0xff]  ;;  %v15130_v40 = vld [vmem:[#allocation56_spill] sm:$0xff] }
 0x35f   :  { %v6614_v4 = vpop.permute.xlu1 %6613  ;;  %v6624_v37 = vpop.permute.xlu0 %6623  ;;  %v12901_v35 = vsel %vm5768_vm2, %v6088_v28, %v9748_v59  ;;  %v6799_v27 = vmul.f32 %v6612_v33, %v15129_v53 }
 0x360   :  { %6923 = vrot.lane.b32.xlu0 %v6795_v60, %s9881_s2  ;;  %15128 = vst [vmem:[#allocation126_spill] sm:$0xff] %v12901_v35  ;;  %v6805_v52 = vmul.f32 %v6624_v37, %v12271_v56  ;;  %v6800_v59 = vmul.f32 %v6614_v4, %v12267_v14 }
 0x361   :  { %6929 = vrot.lane.b32.xlu1 %v6798_v48, %s9881_s2  ;;  %v6802_v48 = vmul.f32 %v6618_v30, %v15130_v40 }
 0x363   :  { %v6626_v58 = vpop.permute.xlu1 %6625  ;;  %v6620_v13 = vpop.permute.xlu0 %6619 }
 0x364   :  { %6727 = vrot.lane.b32.xlu0 %v12880_v11, %s9881_s2  ;;  %v6803_v33 = vmul.f32 %v6620_v13, %v12291_v3  ;;  %v6806_v30 = vmul.f32 %v6626_v58, %v12287_v0 }
 0x365   :  { %6925 = vrot.lane.b32.xlu1 %v6796_v8, %s9881_s2 }
 0x367   :  { %v6622_v15 = vpop.permute.xlu1 %6621  ;;  %v6632_v55 = vpop.permute.xlu0 %6631 }
 0x368   :  { %6723 = vrot.lane.b32.xlu0 %v12888_v61, %s9881_s2  ;;  %v6809_v37 = vmul.f32 %v6632_v55, %v12315_v17  ;;  %v6804_v4 = vmul.f32 %v6622_v15, %v12302_v31 }
 0x369   :  { %6729 = vrot.lane.b32.xlu1 %v12892_v1, %s9881_s2 }
 0x36b   :  { %v6628_v25 = vpop.permute.xlu0 %6627  ;;  %v6634_v60 = vpop.permute.xlu1 %6633 }
 0x36c   :  { %6935 = vrot.lane.b32.xlu0 %v6801_v36, %s9881_s2  ;;  %v6810_v58 = vmul.f32 %v6634_v60, %v12336_v44 }
 0x36d   :  { %6725 = vrot.lane.b32.xlu1 %v12901_v35, %s9881_s2 }
 0x36f   :  { %v6630_v26 = vpop.permute.xlu1 %6629 }
 0x370   :  { %v6640_v20 = vpop.permute.xlu0 %6639  ;;  %6931 = vrot.lane.b32.xlu0 %v6799_v27, %s9881_s2  ;;  %v6808_v55 = vmul.f32 %v6630_v26, %v12349_v39 }
 0x371   :  { %6937 = vrot.lane.b32.xlu1 %v6802_v48, %s9881_s2 }
 0x374   :  { %v6636_v18 = vpop.permute.xlu0 %6635  ;;  %6943 = vrot.lane.b32.xlu0 %v6805_v52, %s9881_s2  ;;  %v6807_v52 = vmul.f32 %v6628_v25, %v12328_v63 }
 0x375   :  { %6933 = vrot.lane.b32.xlu1 %v6800_v59, %s9881_s2  ;;  %v6813_v59 = vmul.f32 %v6640_v20, %v12357_v32 }
 0x376   :  { %v6642_v29 = vpop.permute.xlu1 %6641 }
 0x378   :  { %6939 = vrot.lane.b32.xlu0 %v6803_v33, %s9881_s2 }
 0x379   :  { %v6648_v28 = vpop.permute.xlu0 %6647  ;;  %6945 = vrot.lane.b32.xlu1 %v6806_v30, %s9881_s2  ;;  %v6811_v30 = vmul.f32 %v6636_v18, %v12373_v19 }
 0x37a   :  { %v6638_v8 = vpop.permute.xlu1 %6637  ;;  %v6817_v20 = vmul.f32 %v6648_v28, %v12406_v22 }
 0x37b   :  { %v6812_v26 = vmul.f32 %v6638_v8, %v12399_v7 }
 0x37c   :  { %6951 = vrot.lane.b32.xlu0 %v6809_v37, %s9881_s2  ;;  %v6814_v37 = vmul.f32 %v6642_v29, %v12383_v54 }
 0x37d   :  { %v6644_v27 = vpop.permute.xlu0 %6643  ;;  %6941 = vrot.lane.b32.xlu1 %v6804_v4, %s9881_s2 }
 0x37e   :  { %v6650_v36 = vpop.permute.xlu1 %6649  ;;  %v6815_v18 = vmul.f32 %v6644_v27, %v12421_v24 }
 0x380   :  { %6947 = vrot.lane.b32.xlu0 %v6807_v52, %s9881_s2 }
 0x381   :  { %6953 = vrot.lane.b32.xlu1 %v6810_v58, %s9881_s2  ;;  %v15131_v58 = vld [vmem:[#allocation85_spill] sm:$0xff] }
 0x382   :  { %v6646_v48 = vpop.permute.xlu1 %6645  ;;  %v6656_v13 = vpop.permute.xlu0 %6655 }
 0x384   :  { %6959 = vrot.lane.b32.xlu0 %v6813_v59, %s9881_s2  ;;  %v6818_v59 = vmul.f32 %v6650_v36, %v15131_v58 }
 0x385   :  { %6949 = vrot.lane.b32.xlu1 %v6808_v55, %s9881_s2 }
 0x386   :  { %v6652_v33 = vpop.permute.xlu0 %6651  ;;  %v6658_v15 = vpop.permute.xlu1 %6657 }
 0x387   :  { %v6819_v27 = vmul.f32 %v6652_v33, %v12472_v45  ;;  %v6822_v36 = vmul.f32 %v6658_v15, %v12484_v2 }
 0x388   :  { %6955 = vrot.lane.b32.xlu0 %v6811_v30, %s9881_s2  ;;  %v15132_v30 = vld [vmem:[#allocation88_spill] sm:$0xff] }
 0x389   :  { %6961 = vrot.lane.b32.xlu1 %v6814_v37, %s9881_s2  ;;  %v6821_v28 = vmul.f32 %v6656_v13, %v15132_v30  ;;  %v15133_v37 = vld [vmem:[#allocation87_spill] sm:$0xff] }
 0x38a   :  { %v6664_v25 = vpop.permute.xlu0 %6663  ;;  %v6654_v60 = vpop.permute.xlu1 %6653  ;;  %v6816_v22 = vmul.f32 %v6646_v48, %v15133_v37 }
 0x38b   :  { %v6825_v13 = vmul.f32 %v6664_v25, %v12502_v51  ;;  %v6820_v48 = vmul.f32 %v6654_v60, %v12510_v47  ;;  %v15136_v25 = vld [vmem:[#allocation101_spill] sm:$0xff] }
 0x38c   :  { %6967 = vrot.lane.b32.xlu0 %v6817_v20, %s9881_s2 }
 0x38d   :  { %6957 = vrot.lane.b32.xlu1 %v6812_v26, %s9881_s2 }
 0x38e   :  { %v6660_v4 = vpop.permute.xlu0 %6659  ;;  %v6666_v52 = vpop.permute.xlu1 %6665 }
 0x390   :  { %6963 = vrot.lane.b32.xlu0 %v6815_v18, %s9881_s2 }
 0x391   :  { %6969 = vrot.lane.b32.xlu1 %v6818_v59, %s9881_s2  ;;  %v6823_v59 = vmul.f32 %v6660_v4, %v12525_v57  ;;  %v15138_v57 = vld [vmem:[#allocation104_spill] sm:$0xff] }
 0x392   :  { %v6662_v29 = vpop.permute.xlu1 %6661 }
 0x393   :  { %v6672_v55 = vpop.permute.xlu0 %6671  ;;  %v6824_v51 = vmul.f32 %v6662_v29, %v15136_v25 }
 0x394   :  { %6975 = vrot.lane.b32.xlu0 %v6821_v28, %s9881_s2  ;;  %v15134_v28 = vld [vmem:[#allocation98_spill] sm:$0xff] }
 0x395   :  { %6965 = vrot.lane.b32.xlu1 %v6816_v22, %s9881_s2  ;;  %v6826_v15 = vmul.f32 %v6666_v52, %v15134_v28 }
 0x397   :  { %v6668_v8 = vpop.permute.xlu0 %6667 }
 0x398   :  { %v6674_v20 = vpop.permute.xlu1 %6673  ;;  %6971 = vrot.lane.b32.xlu0 %v6819_v27, %s9881_s2  ;;  %v15135_v27 = vld [vmem:[#allocation102_spill] sm:$0xff] }
 0x399   :  { %6977 = vrot.lane.b32.xlu1 %v6822_v36, %s9881_s2  ;;  %v6829_v36 = vmul.f32 %v6672_v55, %v15135_v27  ;;  %v6830_v47 = vmul.f32 %v6674_v20, %v15138_v57 }
 0x39b   :  { %v6680_v18 = vpop.permute.xlu0 %6679 }
 0x39c   :  { %v6670_v26 = vpop.permute.xlu1 %6669  ;;  %6983 = vrot.lane.b32.xlu0 %v6825_v13, %s9881_s2  ;;  %v15137_v13 = vld [vmem:[#allocation5_spill] sm:$0xff]  ;;  %v6833_v55 = vmul.f32 %v6680_v18, %v12627_v23 }
 0x39d   :  { %6973 = vrot.lane.b32.xlu1 %v6820_v48, %s9881_s2  ;;  %v6827_v48 = vmul.f32 %v6668_v8, %v15137_v13  ;;  %v6828_v29 = vmul.f32 %v6670_v26, %v12623_v6  ;;  %v15139_v8 = vld [vmem:[#allocation108_spill] sm:$0xff] }
 0x39f   :  { %v6676_v22 = vpop.permute.xlu0 %6675 }
 0x3a0   :  { %v6682_v33 = vpop.permute.xlu1 %6681  ;;  %6979 = vrot.lane.b32.xlu0 %v6823_v59, %s9881_s2 }
 0x3a1   :  { %6985 = vrot.lane.b32.xlu1 %v6826_v15, %s9881_s2 }
 0x3a4   :  { %v6678_v2 = vpop.permute.xlu1 %6677  ;;  %v6688_v60 = vpop.permute.xlu0 %6687  ;;  %6991 = vrot.lane.b32.xlu0 %v6829_v36, %s9881_s2  ;;  %v6834_v36 = vmul.f32 %v6682_v33, %v15139_v8 }
 0x3a5   :  { %6981 = vrot.lane.b32.xlu1 %v6824_v51, %s9881_s2  ;;  %v6831_v51 = vmul.f32 %v6676_v22, %v12641_v38  ;;  %v6832_v18 = vmul.f32 %v6678_v2, %v12677_v5  ;;  %v15141_v38 = vld [vmem:[#allocation112_spill] sm:$0xff] }
 0x3a8   :  { %v6690_v4 = vpop.permute.xlu1 %6689  ;;  %v6684_v52 = vpop.permute.xlu0 %6683  ;;  %6987 = vrot.lane.b32.xlu0 %v6827_v48, %s9881_s2 }
 0x3a9   :  { %6993 = vrot.lane.b32.xlu1 %v6830_v47, %s9881_s2  ;;  %v6837_v47 = vmul.f32 %v6688_v60, %v12685_v46  ;;  %v6838_v33 = vmul.f32 %v6690_v4, %v15141_v38  ;;  %v15143_v46 = vld [vmem:[#allocation114_spill] sm:$0xff] }
 0x3ac   :  { %v6686_v59 = vpop.permute.xlu1 %6685  ;;  %v6696_v15 = vpop.permute.xlu0 %6695  ;;  %6999 = vrot.lane.b32.xlu0 %v6833_v55, %s9881_s2  ;;  %v15140_v55 = vld [vmem:[#allocation113_spill] sm:$0xff] }
 0x3ad   :  { %6989 = vrot.lane.b32.xlu1 %v6828_v29, %s9881_s2  ;;  %v6835_v29 = vmul.f32 %v6684_v52, %v15140_v55  ;;  %v6836_v2 = vmul.f32 %v6686_v59, %v15143_v46 }
 0x3b0   :  { %6995 = vrot.lane.b32.xlu0 %v6831_v51, %s9881_s2  ;;  %v6692_v48 = vpop.permute.xlu0 %6691 }
 0x3b1   :  { %7001 = vrot.lane.b32.xlu1 %v6834_v36, %s9881_s2  ;;  %v15142_v36 = vld [vmem:[#allocation33_spill] sm:$0xff]  ;;  %v6839_v52 = vmul.f32 %v6692_v48, %v12741_v50 }
 0x3b2   :  { %v6698_v20 = vpop.permute.xlu1 %6697  ;;  %v6841_v8 = vmul.f32 %v6696_v15, %v15142_v36 }
 0x3b3   :  { %v6842_v4 = vmul.f32 %v6698_v20, %v12755_v9 }
 0x3b4   :  { %7007 = vrot.lane.b32.xlu0 %v6837_v47, %s9881_s2 }
 0x3b5   :  { %6997 = vrot.lane.b32.xlu1 %v6832_v18, %s9881_s2 }
 0x3b6   :  { %v6694_v26 = vpop.permute.xlu1 %6693  ;;  %v6704_v22 = vpop.permute.xlu0 %6703 }
 0x3b8   :  { %7003 = vrot.lane.b32.xlu0 %v6835_v29, %s9881_s2  ;;  %v6845_v29 = vmul.f32 %v6704_v22, %v12783_v12 }
 0x3b9   :  { %7009 = vrot.lane.b32.xlu1 %v6838_v33, %s9881_s2  ;;  %v6840_v33 = vmul.f32 %v6694_v26, %v12774_v62 }
 0x3ba   :  { %v6706_v51 = vpop.permute.xlu1 %6705  ;;  %v6700_v60 = vpop.permute.xlu0 %6699 }
 0x3bc   :  { %7015 = vrot.lane.b32.xlu0 %v6841_v8, %s9881_s2  ;;  %v6843_v8 = vmul.f32 %v6700_v60, %v12803_v16  ;;  %v15149_v16 = vld [vmem:[#allocation47_spill] sm:$0xff] }
 0x3bd   :  { %7005 = vrot.lane.b32.xlu1 %v6836_v2, %s9881_s2  ;;  %v6846_v2 = vmul.f32 %v6706_v51, %v12794_v49 }
 0x3be   :  { %v6702_v47 = vpop.permute.xlu1 %6701  ;;  %v6712_v18 = vpop.permute.xlu0 %6711 }
 0x3bf   :  { %v6849_v22 = vmul.f32 %v6712_v18, %v12818_v41  ;;  %v6844_v26 = vmul.f32 %v6702_v47, %v12810_v21  ;;  %v15146_v41 = vld [vmem:[#allocation121_spill] sm:$0xff] }
 0x3c0   :  { %7011 = vrot.lane.b32.xlu0 %v6839_v52, %s9881_s2 }
 0x3c1   :  { %7017 = vrot.lane.b32.xlu1 %v6842_v4, %s9881_s2 }
 0x3c2   :  { %v6708_v15 = vpop.permute.xlu0 %6707 }
 0x3c3   :  { %v6714_v59 = vpop.permute.xlu1 %6713  ;;  %v6847_v60 = vmul.f32 %v6708_v15, %v12830_v34  ;;  %v15148_v34 = vld [vmem:[#allocation123_spill] sm:$0xff] }
 0x3c4   :  { %7023 = vrot.lane.b32.xlu0 %v6845_v29, %s9881_s2 }
 0x3c5   :  { %7013 = vrot.lane.b32.xlu1 %v6840_v33, %s9881_s2  ;;  %v15144_v33 = vld [vmem:[#allocation119_spill] sm:$0xff] }
 0x3c6   :  { %v6720_v48 = vpop.permute.xlu0 %6719  ;;  %v6850_v51 = vmul.f32 %v6714_v59, %v15144_v33 }
 0x3c7   :  { %v6710_v20 = vpop.permute.xlu1 %6709 }
 0x3c8   :  { %7019 = vrot.lane.b32.xlu0 %v6843_v8, %s9881_s2  ;;  %v15145_v8 = vld [vmem:[#allocation120_spill] sm:$0xff]  ;;  %v6848_v47 = vmul.f32 %v6710_v20, %v15146_v41 }
 0x3c9   :  { %7025 = vrot.lane.b32.xlu1 %v6846_v2, %s9881_s2  ;;  %v6853_v18 = vmul.f32 %v6720_v48, %v15145_v8  ;;  %v15154_v41 = vld [vmem:[#allocation28_spill] sm:$0xff] }
 0x3ca   :  { %v6716_v52 = vpop.permute.xlu0 %6715 }
 0x3cb   :  { %v6722_v4 = vpop.permute.xlu1 %6721 }
 0x3cc   :  { %7031 = vrot.lane.b32.xlu0 %v6849_v22, %s9881_s2  ;;  %v15147_v22 = vld [vmem:[#allocation122_spill] sm:$0xff]  ;;  %v6854_v59 = vmul.f32 %v6722_v4, %v15148_v34 }
 0x3cd   :  { %7021 = vrot.lane.b32.xlu1 %v6844_v26, %s9881_s2  ;;  %v6851_v15 = vmul.f32 %v6716_v52, %v15147_v22  ;;  %v15155_v4 = vld [vmem:[#allocation30_spill] sm:$0xff] }
 0x3ce   :  { %v6928_v29 = vpop.permute.xlu0 %6927  ;;  %v6478_v34 = vmul.f32 %v15155_v4, %v12208_v43 }
 0x3cf   :  { %v6718_v49 = vpop.permute.xlu1 %6717 }
 0x3d0   :  { %7027 = vrot.lane.b32.xlu0 %v6847_v60, %s9881_s2  ;;  %v15150_v60 = vld [vmem:[#allocation29_spill] sm:$0xff] }
 0x3d1   :  { %7033 = vrot.lane.b32.xlu1 %v6850_v51, %s9881_s2  ;;  %v6477_v12 = vmul.f32 %v15150_v60, %v15149_v16  ;;  %v15152_v51 = vld [vmem:[#allocation124_spill] sm:$0xff] }
 0x3d2   :  { %v6924_v2 = vpop.permute.xlu0 %6923  ;;  %v15215_v16 = vld [vmem:[#allocation52_spill] sm:$0xff] }
 0x3d3   :  { %v6930_v21 = vpop.permute.xlu1 %6929  ;;  %v13016_v48 = vadd.f32 %v6928_v29, %v6477_v12 }
 0x3d4   :  { %7039 = vrot.lane.b32.xlu0 %v6853_v18, %s9881_s2  ;;  %v6852_v18 = vmul.f32 %v6718_v49, %v15152_v51  ;;  %v13028_v12 = vadd.f32 %v6930_v21, %v6478_v34  ;;  %v15158_v49 = vld [vmem:[#allocation27_spill] sm:$0xff] }
 0x3d5   :  { %7029 = vrot.lane.b32.xlu1 %v6848_v47, %s9881_s2  ;;  %15151 = vst [vmem:[#allocation98_spill] sm:$0xff] %v13016_v48  ;;  %v15153_v47 = vld [vmem:[#allocation50_spill] sm:$0xff]  ;;  %9749 = vtanh.f32 %v13016_v48 }
 0x3d6   :  { %v6728_v26 = vpop.permute.xlu0 %6727  ;;  %v6475_v52 = vmul.f32 %v15154_v41, %v15153_v47  ;;  %15157 = vst [vmem:[#allocation101_spill] sm:$0xff] %v13028_v12  ;;  %v6476_v41 = vmul.f32 %v15158_v49, %v12228_v10  ;;  %v15160_v49 = vld [vmem:[#allocation7_spill] sm:$0xff]  ;;  %v15214_v47 = vld [vmem:[#allocation97_spill] sm:$0xff] }
 0x3d7   :  { %v6926_v33 = vpop.permute.xlu1 %6925  ;;  %v6857_v60 = vmul.f32 %v6728_v26, %v12880_v11  ;;  %v6481_v26 = vmul.f32 %v15160_v49, %v12232_v42 }
 0x3d8   :  { %7035 = vrot.lane.b32.xlu0 %v6851_v15, %s9881_s2  ;;  %v13026_v15 = vadd.f32 %v6924_v2, %v6475_v52  ;;  %v13037_v43 = vadd.f32 %v6926_v33, %v6476_v41 }
 0x3d9   :  { %7041 = vrot.lane.b32.xlu1 %v6854_v59, %s9881_s2 }
 0x3da   :  { %v6724_v20 = vpop.permute.xlu0 %6723  ;;  %15156 = vst [vmem:[#allocation102_spill] sm:$0xff] %v13026_v15  ;;  %15159 = vst [vmem:[#allocation5_spill] sm:$0xff] %v13037_v43  ;;  %9751 = vtanh.f32 %v13026_v15 }
 0x3db   :  { %v6730_v8 = vpop.permute.xlu1 %6729  ;;  %v6855_v34 = vmul.f32 %v6724_v20, %v12888_v61  ;;  %9753 = vtanh.f32 %v13028_v12 }
 0x3dc   :  { %7631 = vrot.lane.b32.xlu0 %v13016_v48, %s9880_s29  ;;  %9755 = vtanh.f32 %v13037_v43 }
 0x3dd   :  { %7037 = vrot.lane.b32.xlu1 %v6852_v18, %s9881_s2  ;;  %v6858_v18 = vmul.f32 %v6730_v8, %v12892_v1  ;;  %v15162_v8 = vld [vmem:[#allocation31_spill] sm:$0xff] }
 0x3de   :  { %v6936_v59 = vpop.permute.xlu0 %6935  ;;  %v6479_v48 = vmul.f32 %v15162_v8, %v15129_v53  ;;  %v15166_v8 = vld [vmem:[#allocation6_spill] sm:$0xff] }
 0x3df   :  { %v6726_v29 = vpop.permute.xlu1 %6725  ;;  %v13050_v33 = vadd.f32 %v6936_v59, %v6481_v26 }
 0x3e0   :  { %7627 = vrot.lane.b32.xlu0 %v13026_v15, %s9880_s29  ;;  %v6856_v20 = vmul.f32 %v6726_v29, %v12901_v35  ;;  %v6503_v35 = vmul.f32 %v15215_v16, %v15214_v47  ;;  %v15219_v16 = vld [vmem:[#allocation55_spill] sm:$0xff] }
 0x3e1   :  { %7633 = vrot.lane.b32.xlu1 %v13028_v12, %s9880_s29  ;;  %15161 = vst [vmem:[#allocation104_spill] sm:$0xff] %v13050_v33  ;;  %v6480_v12 = vmul.f32 %v15166_v8, %v12267_v14  ;;  %9757 = vtanh.f32 %v13050_v33 }
 0x3e2   :  { %v6932_v4 = vpop.permute.xlu0 %6931  ;;  %v9750_v15 = vpop.eup %9749 }
 0x3e3   :  { %v6938_v2 = vpop.permute.xlu1 %6937 }
 0x3e4   :  { %7047 = vrot.lane.b32.xlu0 %v6857_v60, %s9881_s2 }
 0x3e5   :  { %7629 = vrot.lane.b32.xlu1 %v13037_v43, %s9880_s29  ;;  %v15168_v43 = vld [vmem:[#allocation14_spill] sm:$0xff] }
 0x3e6   :  { %v6944_v21 = vpop.permute.xlu0 %6943  ;;  %v6485_v14 = vmul.f32 %v15168_v43, %v12271_v56  ;;  %v15171_v43 = vld [vmem:[#allocation34_spill] sm:$0xff] }
 0x3e7   :  { %v6934_v52 = vpop.permute.xlu1 %6933 }
 0x3e8   :  { %7043 = vrot.lane.b32.xlu0 %v6855_v34, %s9881_s2  ;;  %v15163_v34 = vld [vmem:[#allocation11_spill] sm:$0xff] }
 0x3e9   :  { %7049 = vrot.lane.b32.xlu1 %v6858_v18, %s9881_s2  ;;  %v6482_v49 = vmul.f32 %v15163_v34, %v15130_v40  ;;  %v13061_v18 = vadd.f32 %v6932_v4, %v6479_v48  ;;  %v15170_v40 = vld [vmem:[#allocation12_spill] sm:$0xff] }
 0x3ea   :  { %v6940_v41 = vpop.permute.xlu0 %6939  ;;  %v6483_v53 = vmul.f32 %v15170_v40, %v12291_v3  ;;  %v15174_v40 = vld [vmem:[#allocation13_spill] sm:$0xff]  ;;  %v15178_v3 = vld [vmem:[#allocation35_spill] sm:$0xff] }
 0x3eb   :  { %v6946_v60 = vpop.permute.xlu1 %6945  ;;  %15164 = vst [vmem:[#allocation113_spill] sm:$0xff] %v13061_v18  ;;  %v13064_v26 = vadd.f32 %v6938_v2, %v6482_v49  ;;  %v9752_v2 = vpop.eup %9751  ;;  %9759 = vtanh.f32 %v13061_v18  ;;  %v6487_v56 = vmul.f32 %v15178_v3, %v12328_v63  ;;  %v15182_v3 = vld [vmem:[#allocation18_spill] sm:$0xff]  ;;  %v15186_v63 = vld [vmem:[#allocation40_spill] sm:$0xff] }
 0x3ec   :  { %7639 = vrot.lane.b32.xlu0 %v13050_v33, %s9880_s29  ;;  %v9754_v8 = vpop.eup %9753 }
 0x3ed   :  { %7045 = vrot.lane.b32.xlu1 %v6856_v20, %s9881_s2  ;;  %15165 = vst [vmem:[#allocation112_spill] sm:$0xff] %v13064_v26  ;;  %v13072_v20 = vadd.f32 %v6934_v52, %v6480_v12  ;;  %9761 = vtanh.f32 %v13064_v26  ;;  %v9756_v33 = vpop.eup %9755 }
 0x3ee   :  { %v6952_v59 = vpop.permute.xlu0 %6951 }
 0x3ef   :  { %v6942_v29 = vpop.permute.xlu1 %6941  ;;  %15167 = vst [vmem:[#allocation33_spill] sm:$0xff] %v13072_v20  ;;  %9763 = vtanh.f32 %v13072_v20 }
 0x3f0   :  { %7635 = vrot.lane.b32.xlu0 %v13061_v18, %s9880_s29  ;;  %v6484_v18 = vmul.f32 %v15174_v40, %v12302_v31  ;;  %v15176_v31 = vld [vmem:[#allocation37_spill] sm:$0xff] }
 0x3f1   :  { %7641 = vrot.lane.b32.xlu1 %v13064_v26, %s9880_s29 }
 0x3f2   :  { %v6948_v34 = vpop.permute.xlu0 %6947 }
 0x3f3   :  { %v6954_v48 = vpop.permute.xlu1 %6953 }
 0x3f4   :  { %7311 = vrot.lane.b32.xlu0 %v9750_v15, %s9881_s2  ;;  %v13085_v15 = vadd.f32 %v6944_v21, %v6485_v14  ;;  %v13099_v14 = vadd.f32 %v6940_v41, %v6483_v53  ;;  %v9758_v53 = vpop.eup %9757  ;;  %v13116_v41 = vadd.f32 %v6942_v29, %v6484_v18 }
 0x3f5   :  { %7637 = vrot.lane.b32.xlu1 %v13072_v20, %s9880_s29 }
 0x3f6   :  { %v13078_v4 = vpop.permute.xlu0 %6959  ;;  %15169 = vst [vmem:[#allocation114_spill] sm:$0xff] %v13085_v15  ;;  %15172 = vst [vmem:[#allocation122_spill] sm:$0xff] %v13099_v14  ;;  %9765 = vtanh.f32 %v13085_v15 }
 0x3f7   :  { %v6950_v49 = vpop.permute.xlu1 %6949  ;;  %15175 = vst [vmem:[#allocation124_spill] sm:$0xff] %v13116_v41  ;;  %9767 = vtanh.f32 %v13099_v14 }
 0x3f8   :  { %7307 = vrot.lane.b32.xlu0 %v9752_v2, %s9881_s2  ;;  %v6486_v2 = vmul.f32 %v15171_v43, %v12287_v0  ;;  %v6489_v0 = vmul.f32 %v15176_v31, %v12315_v17  ;;  %v15179_v31 = vld [vmem:[#allocation39_spill] sm:$0xff]  ;;  %v6491_v17 = vmul.f32 %v15186_v63, %v12373_v19 }
 0x3f9   :  { %7313 = vrot.lane.b32.xlu1 %v9754_v8, %s9881_s2  ;;  %v15190_v63 = vld [vmem:[#allocation23_spill] sm:$0xff] }
 0x3fa   :  { %v13087_v12 = vpop.permute.xlu0 %6955  ;;  %v13104_v8 = vadd.f32 %v6946_v60, %v6486_v2  ;;  %v9760_v2 = vpop.eup %9759  ;;  %v13133_v18 = vadd.f32 %v6952_v59, %v6489_v0  ;;  %v13147_v0 = vadd.f32 %v6948_v34, %v6487_v56 }
 0x3fb   :  { %v13090_v52 = vpop.permute.xlu1 %6961  ;;  %v9762_v20 = vpop.eup %9761 }
 0x3fc   :  { %7647 = vrot.lane.b32.xlu0 %v13085_v15, %s9880_s29  ;;  %15173 = vst [vmem:[#allocation29_spill] sm:$0xff] %v13104_v8  ;;  %15177 = vst [vmem:[#allocation28_spill] sm:$0xff] %v13133_v18  ;;  %9769 = vtanh.f32 %v13104_v8  ;;  %v9764_v15 = vpop.eup %9763 }
 0x3fd   :  { %7309 = vrot.lane.b32.xlu1 %v9756_v33, %s9881_s2  ;;  %15180 = vst [vmem:[#allocation30_spill] sm:$0xff] %v13147_v0  ;;  %9771 = vtanh.f32 %v13116_v41 }
 0x3fe   :  { %v13101_v21 = vpop.permute.xlu0 %6967  ;;  %9773 = vtanh.f32 %v13133_v18 }
 0x3ff   :  { %v13106_v26 = vpop.permute.xlu1 %6957  ;;  %9775 = vtanh.f32 %v13147_v0 }
 0x400   :  { %7643 = vrot.lane.b32.xlu0 %v13099_v14, %s9880_s29  ;;  %v6488_v14 = vmul.f32 %v15182_v3, %v12349_v39  ;;  %v15184_v39 = vld [vmem:[#allocation42_spill] sm:$0xff] }
 0x401   :  { %7649 = vrot.lane.b32.xlu1 %v13104_v8, %s9880_s29 }
 0x402   :  { %v13114_v33 = vpop.permute.xlu0 %6963  ;;  %v13164_v34 = vadd.f32 %v6950_v49, %v6488_v14 }
 0x403   :  { %v13118_v43 = vpop.permute.xlu1 %6969  ;;  %v9766_v56 = vpop.eup %9765 }
 0x404   :  { %7319 = vrot.lane.b32.xlu0 %v9758_v53, %s9881_s2  ;;  %15183 = vst [vmem:[#allocation7_spill] sm:$0xff] %v13164_v34 }
 0x405   :  { %7645 = vrot.lane.b32.xlu1 %v13116_v41, %s9880_s29 }
 0x406   :  { %v13124_v60 = vpop.permute.xlu0 %6975 }
 0x407   :  { %v13126_v40 = vpop.permute.xlu1 %6965 }
 0x408   :  { %7315 = vrot.lane.b32.xlu0 %v9760_v2, %s9881_s2 }
 0x409   :  { %7321 = vrot.lane.b32.xlu1 %v9762_v20, %s9881_s2  ;;  %v6490_v20 = vmul.f32 %v15179_v31, %v12336_v44  ;;  %v6493_v44 = vmul.f32 %v15184_v39, %v12357_v32  ;;  %v15187_v39 = vld [vmem:[#allocation24_spill] sm:$0xff]  ;;  %v15195_v32 = vld [vmem:[#allocation25_spill] sm:$0xff] }
 0x40a   :  { %v13135_v29 = vpop.permute.xlu0 %6971  ;;  %v6495_v42 = vmul.f32 %v15195_v32, %v12421_v24  ;;  %v15199_v32 = vld [vmem:[#allocation43_spill] sm:$0xff]  ;;  %v15203_v24 = vld [vmem:[#allocation45_spill] sm:$0xff] }
 0x40b   :  { %v13138_v53 = vpop.permute.xlu1 %6977  ;;  %v13152_v2 = vadd.f32 %v6954_v48, %v6490_v20  ;;  %v9768_v20 = vpop.eup %9767  ;;  %v13182_v49 = vadd.f32 %v13078_v4, %v6493_v44  ;;  %v13197_v44 = vadd.f32 %v13087_v12, %v6491_v17 }
 0x40c   :  { %7655 = vrot.lane.b32.xlu0 %v13133_v18, %s9880_s29  ;;  %v9770_v41 = vpop.eup %9769 }
 0x40d   :  { %7317 = vrot.lane.b32.xlu1 %v9764_v15, %s9881_s2  ;;  %15181 = vst [vmem:[#allocation27_spill] sm:$0xff] %v13152_v2  ;;  %15185 = vst [vmem:[#allocation31_spill] sm:$0xff] %v13182_v49  ;;  %9777 = vtanh.f32 %v13152_v2  ;;  %v9772_v18 = vpop.eup %9771 }
 0x40e   :  { %v13149_v59 = vpop.permute.xlu0 %6983  ;;  %15188 = vst [vmem:[#allocation11_spill] sm:$0xff] %v13197_v44  ;;  %9779 = vtanh.f32 %v13164_v34  ;;  %v9774_v12 = vpop.eup %9773 }
 0x40f   :  { %v13154_v8 = vpop.permute.xlu1 %6973  ;;  %9781 = vtanh.f32 %v13182_v49 }
 0x410   :  { %7651 = vrot.lane.b32.xlu0 %v13147_v0, %s9880_s29  ;;  %9783 = vtanh.f32 %v13197_v44 }
 0x411   :  { %7657 = vrot.lane.b32.xlu1 %v13152_v2, %s9880_s29 }
 0x412   :  { %v13162_v15 = vpop.permute.xlu0 %6979 }
 0x413   :  { %v13166_v31 = vpop.permute.xlu1 %6985 }
 0x414   :  { %7327 = vrot.lane.b32.xlu0 %v9766_v56, %s9881_s2 }
 0x415   :  { %7653 = vrot.lane.b32.xlu1 %v13164_v34, %s9880_s29 }
 0x416   :  { %v13172_v48 = vpop.permute.xlu0 %6991 }
 0x417   :  { %v13174_v3 = vpop.permute.xlu1 %6981 }
 0x418   :  { %7323 = vrot.lane.b32.xlu0 %v9768_v20, %s9881_s2 }
 0x419   :  { %7329 = vrot.lane.b32.xlu1 %v9770_v41, %s9881_s2  ;;  %v6494_v41 = vmul.f32 %v15187_v39, %v12383_v54  ;;  %v6492_v39 = vmul.f32 %v15190_v63, %v12399_v7  ;;  %v15192_v7 = vld [vmem:[#allocation82_spill] sm:$0xff]  ;;  %v15193_v54 = vld [vmem:[#allocation44_spill] sm:$0xff] }
 0x41a   :  { %v13184_v14 = vpop.permute.xlu0 %6987  ;;  %v6497_v19 = vmul.f32 %v15193_v54, %v15192_v7  ;;  %v15196_v54 = vld [vmem:[#allocation26_spill] sm:$0xff]  ;;  %v6499_v7 = vmul.f32 %v15203_v24, %v12472_v45  ;;  %v15208_v24 = vld [vmem:[#allocation96_spill] sm:$0xff] }
 0x41b   :  { %v13187_v56 = vpop.permute.xlu1 %6993  ;;  %v13203_v20 = vadd.f32 %v13090_v52, %v6494_v41  ;;  %v9776_v41 = vpop.eup %9775  ;;  %v15209_v45 = vld [vmem:[#allocation46_spill] sm:$0xff] }
 0x41c   :  { %7663 = vrot.lane.b32.xlu0 %v13182_v49, %s9880_s29  ;;  %v9778_v0 = vpop.eup %9777 }
 0x41d   :  { %7325 = vrot.lane.b32.xlu1 %v9772_v18, %s9881_s2  ;;  %15189 = vst [vmem:[#allocation6_spill] sm:$0xff] %v13203_v20  ;;  %v13216_v18 = vadd.f32 %v13106_v26, %v6492_v39  ;;  %v13234_v26 = vadd.f32 %v13101_v21, %v6497_v19  ;;  %9785 = vtanh.f32 %v13203_v20  ;;  %v9780_v49 = vpop.eup %9779  ;;  %v13249_v19 = vadd.f32 %v13114_v33, %v6495_v42 }
 0x41e   :  { %v13199_v4 = vpop.permute.xlu0 %6999  ;;  %v9782_v33 = vpop.eup %9781 }
 0x41f   :  { %v13205_v2 = vpop.permute.xlu1 %6989  ;;  %15191 = vst [vmem:[#allocation14_spill] sm:$0xff] %v13216_v18  ;;  %15194 = vst [vmem:[#allocation12_spill] sm:$0xff] %v13234_v26  ;;  %9787 = vtanh.f32 %v13216_v18 }
 0x420   :  { %7659 = vrot.lane.b32.xlu0 %v13197_v44, %s9880_s29  ;;  %15197 = vst [vmem:[#allocation34_spill] sm:$0xff] %v13249_v19  ;;  %9789 = vtanh.f32 %v13234_v26 }
 0x421   :  { %7665 = vrot.lane.b32.xlu1 %v13203_v20, %s9880_s29  ;;  %9791 = vtanh.f32 %v13249_v19 }
 0x422   :  { %v13213_v17 = vpop.permute.xlu0 %6995 }
 0x423   :  { %v13218_v34 = vpop.permute.xlu1 %7001 }
 0x424   :  { %7335 = vrot.lane.b32.xlu0 %v9774_v12, %s9881_s2 }
 0x425   :  { %7661 = vrot.lane.b32.xlu1 %v13216_v18, %s9880_s29 }
 0x426   :  { %v13224_v52 = vpop.permute.xlu0 %7007 }
 0x427   :  { %v13226_v63 = vpop.permute.xlu1 %6997 }
 0x428   :  { %7331 = vrot.lane.b32.xlu0 %v9776_v41, %s9881_s2 }
 0x429   :  { %7337 = vrot.lane.b32.xlu1 %v9778_v0, %s9881_s2  ;;  %v6498_v0 = vmul.f32 %v15196_v54, %v15131_v58  ;;  %v6496_v54 = vmul.f32 %v15199_v32, %v15133_v37  ;;  %v15201_v37 = vld [vmem:[#allocation48_spill] sm:$0xff] }
 0x42a   :  { %v13236_v39 = vpop.permute.xlu0 %7003  ;;  %v6501_v58 = vmul.f32 %v15201_v37, %v15132_v30  ;;  %v15204_v37 = vld [vmem:[#allocation92_spill] sm:$0xff]  ;;  %v15212_v30 = vld [vmem:[#allocation57_spill] sm:$0xff] }
 0x42b   :  { %v13239_v12 = vpop.permute.xlu1 %7009  ;;  %v13255_v41 = vadd.f32 %v13118_v43, %v6498_v0  ;;  %v9784_v0 = vpop.eup %9783 }
 0x42c   :  { %7671 = vrot.lane.b32.xlu0 %v13234_v26, %s9880_s29  ;;  %v9786_v44 = vpop.eup %9785 }
 0x42d   :  { %7333 = vrot.lane.b32.xlu1 %v9780_v49, %s9881_s2  ;;  %15198 = vst [vmem:[#allocation13_spill] sm:$0xff] %v13255_v41  ;;  %v13268_v49 = vadd.f32 %v13126_v40, %v6496_v54  ;;  %v13286_v40 = vadd.f32 %v13124_v60, %v6501_v58  ;;  %9793 = vtanh.f32 %v13255_v41  ;;  %v9788_v26 = vpop.eup %9787  ;;  %v13301_v58 = vadd.f32 %v13135_v29, %v6499_v7 }
 0x42e   :  { %v13251_v21 = vpop.permute.xlu0 %7015  ;;  %v9790_v29 = vpop.eup %9789 }
 0x42f   :  { %v13257_v20 = vpop.permute.xlu1 %7005  ;;  %15200 = vst [vmem:[#allocation37_spill] sm:$0xff] %v13268_v49  ;;  %15202 = vst [vmem:[#allocation35_spill] sm:$0xff] %v13286_v40  ;;  %9795 = vtanh.f32 %v13268_v49 }
 0x430   :  { %7667 = vrot.lane.b32.xlu0 %v13249_v19, %s9880_s29  ;;  %15206 = vst [vmem:[#allocation39_spill] sm:$0xff] %v13301_v58  ;;  %9797 = vtanh.f32 %v13286_v40 }
 0x431   :  { %7673 = vrot.lane.b32.xlu1 %v13255_v41, %s9880_s29  ;;  %9799 = vtanh.f32 %v13301_v58 }
 0x432   :  { %v13265_v42 = vpop.permute.xlu0 %7011 }
 0x433   :  { %v13270_v18 = vpop.permute.xlu1 %7017 }
 0x434   :  { %7343 = vrot.lane.b32.xlu0 %v9782_v33, %s9881_s2 }
 0x435   :  { %7669 = vrot.lane.b32.xlu1 %v13268_v49, %s9880_s29 }
 0x436   :  { %v13276_v43 = vpop.permute.xlu0 %7023 }
 0x437   :  { %v13278_v32 = vpop.permute.xlu1 %7013 }
 0x438   :  { %7339 = vrot.lane.b32.xlu0 %v9784_v0, %s9881_s2 }
 0x439   :  { %7345 = vrot.lane.b32.xlu1 %v9786_v44, %s9881_s2  ;;  %v15205_v44 = vld [vmem:[#allocation51_spill] sm:$0xff] }
 0x43a   :  { %v13288_v54 = vpop.permute.xlu0 %7019  ;;  %v6502_v0 = vmul.f32 %v15205_v44, %v15204_v37  ;;  %v6500_v44 = vmul.f32 %v15209_v45, %v15208_v24  ;;  %v9792_v45 = vpop.eup %9791  ;;  %v15211_v37 = vld [vmem:[#allocation95_spill] sm:$0xff] }
 0x43b   :  { %v13291_v33 = vpop.permute.xlu1 %7025  ;;  %v9794_v24 = vpop.eup %9793  ;;  %v6505_v10 = vmul.f32 %v15212_v30, %v15211_v37  ;;  %v15216_v30 = vld [vmem:[#allocation61_spill] sm:$0xff] }
 0x43c   :  { %7679 = vrot.lane.b32.xlu0 %v13286_v40, %s9880_s29  ;;  %v13307_v41 = vadd.f32 %v13138_v53, %v6502_v0  ;;  %v9796_v40 = vpop.eup %9795 }
 0x43d   :  { %7341 = vrot.lane.b32.xlu1 %v9788_v26, %s9881_s2  ;;  %v13320_v26 = vadd.f32 %v13154_v8, %v6500_v44  ;;  %v13338_v8 = vadd.f32 %v13149_v59, %v6505_v10  ;;  %v13353_v10 = vadd.f32 %v13162_v15, %v6503_v35  ;;  %v9798_v15 = vpop.eup %9797 }
 0x43e   :  { %v13303_v60 = vpop.permute.xlu0 %7031  ;;  %15207 = vst [vmem:[#allocation18_spill] sm:$0xff] %v13307_v41  ;;  %9801 = vtanh.f32 %v13307_v41 }
 0x43f   :  { %v13309_v19 = vpop.permute.xlu1 %7021  ;;  %15210 = vst [vmem:[#allocation42_spill] sm:$0xff] %v13320_v26  ;;  %15213 = vst [vmem:[#allocation40_spill] sm:$0xff] %v13338_v8  ;;  %9803 = vtanh.f32 %v13320_v26 }
 0x440   :  { %7675 = vrot.lane.b32.xlu0 %v13301_v58, %s9880_s29  ;;  %15217 = vst [vmem:[#allocation24_spill] sm:$0xff] %v13353_v10  ;;  %9805 = vtanh.f32 %v13338_v8 }
 0x441   :  { %7681 = vrot.lane.b32.xlu1 %v13307_v41, %s9880_s29  ;;  %9807 = vtanh.f32 %v13353_v10 }
 0x442   :  { %v13317_v7 = vpop.permute.xlu0 %7027 }
 0x443   :  { %v13322_v49 = vpop.permute.xlu1 %7033 }
 0x444   :  { %7351 = vrot.lane.b32.xlu0 %v9790_v29, %s9881_s2 }
 0x445   :  { %7677 = vrot.lane.b32.xlu1 %v13320_v26, %s9880_s29 }
 0x446   :  { %v13328_v53 = vpop.permute.xlu0 %7039 }
 0x447   :  { %v13330_v0 = vpop.permute.xlu1 %7029 }
 0x448   :  { %7347 = vrot.lane.b32.xlu0 %v9792_v45, %s9881_s2 }
 0x449   :  { %7353 = vrot.lane.b32.xlu1 %v9794_v24, %s9881_s2  ;;  %v6506_v24 = vmul.f32 %v15216_v30, %v15134_v28  ;;  %v6504_v30 = vmul.f32 %v15219_v16, %v15136_v25 }
 0x44a   :  { %v13340_v44 = vpop.permute.xlu0 %7035 }
 0x44b   :  { %v13343_v29 = vpop.permute.xlu1 %7041  ;;  %v13357_v45 = vadd.f32 %v13166_v31, %v6506_v24 }
 0x44c   :  { %7687 = vrot.lane.b32.xlu0 %v13338_v8, %s9880_s29 }
 0x44d   :  { %7349 = vrot.lane.b32.xlu1 %v9796_v40, %s9881_s2  ;;  %15218 = vst [vmem:[#allocation23_spill] sm:$0xff] %v13357_v45  ;;  %v13369_v40 = vadd.f32 %v13174_v3, %v6504_v30  ;;  %v15221_v3 = vld [vmem:[#allocation67_spill] sm:$0xff]  ;;  %9809 = vtanh.f32 %v13357_v45 }
 0x44e   :  { %v7632_v59 = vpop.permute.xlu0 %7631  ;;  %v6509_v30 = vmul.f32 %v15221_v3, %v15135_v27  ;;  %v15223_v3 = vld [vmem:[#allocation62_spill] sm:$0xff] }
 0x44f   :  { %v13359_v41 = vpop.permute.xlu1 %7037  ;;  %7821 = vst.msk [vmem:[#allocation3 + $0x10] sm:$0xff] %vm19_vm0, %v7632_v59  ;;  %15220 = vst [vmem:[#allocation44_spill] sm:$0xff] %v13369_v40  ;;  %v9800_v59 = vpop.eup %9799  ;;  %v6507_v58 = vmul.f32 %v15223_v3, %v15137_v13  ;;  %9811 = vtanh.f32 %v13369_v40  ;;  %v15227_v3 = vld [vmem:[#allocation66_spill] sm:$0xff] }
 0x450   :  { %7683 = vrot.lane.b32.xlu0 %v13353_v10, %s9880_s29  ;;  %v9802_v26 = vpop.eup %9801  ;;  %v15231_v10 = vld [vmem:[#allocation106_spill] sm:$0xff] }
 0x451   :  { %7689 = vrot.lane.b32.xlu1 %v13357_v45, %s9880_s29  ;;  %v9804_v8 = vpop.eup %9803 }
 0x452   :  { %v7628_v35 = vpop.permute.xlu0 %7627 }
 0x453   :  { %v7634_v31 = vpop.permute.xlu1 %7633  ;;  %7819 = vst.msk [vmem:[#allocation3] sm:$0xff] %vm19_vm0, %v7628_v35  ;;  %v13386_v35 = vadd.f32 %v13172_v48, %v6509_v30  ;;  %v13401_v48 = vadd.f32 %v13184_v14, %v6507_v58  ;;  %v9806_v58 = vpop.eup %9805 }
 0x454   :  { %7822 = vst.msk [vmem:[#allocation3 + $0x18] sm:$0xff] %vm19_vm0, %v7634_v31  ;;  %7359 = vrot.lane.b32.xlu0 %v9798_v15, %s9881_s2 }
 0x455   :  { %7685 = vrot.lane.b32.xlu1 %v13369_v40, %s9880_s29  ;;  %15222 = vst [vmem:[#allocation25_spill] sm:$0xff] %v13386_v35  ;;  %15225 = vst [vmem:[#allocation26_spill] sm:$0xff] %v13401_v48  ;;  %9813 = vtanh.f32 %v13386_v35 }
 0x456   :  { %v13377_v24 = vpop.permute.xlu0 %7047  ;;  %9815 = vtanh.f32 %v13401_v48 }
 0x457   :  { %v7630_v16 = vpop.permute.xlu1 %7629 }
 0x458   :  { %7820 = vst.msk [vmem:[#allocation3 + $0x8] sm:$0xff] %vm19_vm0, %v7630_v16  ;;  %7355 = vrot.lane.b32.xlu0 %v9800_v59, %s9881_s2 }
 0x459   :  { %7361 = vrot.lane.b32.xlu1 %v9802_v26, %s9881_s2  ;;  %v15224_v26 = vld [vmem:[#allocation70_spill] sm:$0xff] }
 0x45a   :  { %v13388_v15 = vpop.permute.xlu0 %7043  ;;  %v6510_v59 = vmul.f32 %v15224_v26, %v15138_v57  ;;  %v6508_v26 = vmul.f32 %v15227_v3, %v12623_v6 }
 0x45b   :  { %v13391_v31 = vpop.permute.xlu1 %7049 }
 0x45c   :  { %7695 = vrot.lane.b32.xlu0 %v13386_v35, %s9880_s29  ;;  %v13405_v30 = vadd.f32 %v13187_v56, %v6510_v59 }
 0x45d   :  { %7357 = vrot.lane.b32.xlu1 %v9804_v8, %s9881_s2  ;;  %v13417_v8 = vadd.f32 %v13205_v2, %v6508_v26  ;;  %v15229_v2 = vld [vmem:[#allocation76_spill] sm:$0xff] }
 0x45e   :  { %v7640_v16 = vpop.permute.xlu0 %7639  ;;  %15226 = vst [vmem:[#allocation43_spill] sm:$0xff] %v13405_v30  ;;  %v6513_v26 = vmul.f32 %v15229_v2, %v12627_v23  ;;  %9817 = vtanh.f32 %v13405_v30  ;;  %v15232_v2 = vld [vmem:[#allocation72_spill] sm:$0xff] }
 0x45f   :  { %v13407_v45 = vpop.permute.xlu1 %7045  ;;  %7825 = vst.msk [vmem:[#allocation3 + $0x30] sm:$0xff] %vm19_vm0, %v7640_v16  ;;  %15228 = vst [vmem:[#allocation48_spill] sm:$0xff] %v13417_v8  ;;  %v9808_v16 = vpop.eup %9807  ;;  %v6511_v6 = vmul.f32 %v15232_v2, %v15231_v10  ;;  %9819 = vtanh.f32 %v13417_v8  ;;  %v15237_v2 = vld [vmem:[#allocation75_spill] sm:$0xff] }
 0x460   :  { %7691 = vrot.lane.b32.xlu0 %v13401_v48, %s9880_s29  ;;  %v9810_v40 = vpop.eup %9809 }
 0x461   :  { %7697 = vrot.lane.b32.xlu1 %v13405_v30, %s9880_s29  ;;  %v9812_v35 = vpop.eup %9811 }
 0x462   :  { %v7636_v14 = vpop.permute.xlu0 %7635 }
 0x463   :  { %v7642_v56 = vpop.permute.xlu1 %7641  ;;  %7823 = vst.msk [vmem:[#allocation3 + $0x20] sm:$0xff] %vm19_vm0, %v7636_v14  ;;  %v13434_v14 = vadd.f32 %v13199_v4, %v6513_v26  ;;  %v13449_v4 = vadd.f32 %v13213_v17, %v6511_v6  ;;  %v9814_v17 = vpop.eup %9813 }
 0x464   :  { %7826 = vst.msk [vmem:[#allocation3 + $0x38] sm:$0xff] %vm19_vm0, %v7642_v56  ;;  %7367 = vrot.lane.b32.xlu0 %v9806_v58, %s9881_s2 }
 0x465   :  { %7693 = vrot.lane.b32.xlu1 %v13417_v8, %s9880_s29  ;;  %15230 = vst [vmem:[#allocation45_spill] sm:$0xff] %v13434_v14  ;;  %15235 = vst [vmem:[#allocation51_spill] sm:$0xff] %v13449_v4  ;;  %9821 = vtanh.f32 %v13434_v14 }
 0x466   :  { %v13425_v59 = vpop.permute.xlu0 %7311  ;;  %9823 = vtanh.f32 %v13449_v4 }
 0x467   :  { %v7638_v3 = vpop.permute.xlu1 %7637 }
 0x468   :  { %7824 = vst.msk [vmem:[#allocation3 + $0x28] sm:$0xff] %vm19_vm0, %v7638_v3  ;;  %7363 = vrot.lane.b32.xlu0 %v9808_v16, %s9881_s2  ;;  %v15233_v16 = vld [vmem:[#allocation108_spill] sm:$0xff] }
 0x469   :  { %7369 = vrot.lane.b32.xlu1 %v9810_v40, %s9881_s2  ;;  %v15234_v40 = vld [vmem:[#allocation79_spill] sm:$0xff] }
 0x46a   :  { %v13436_v58 = vpop.permute.xlu0 %7307  ;;  %v6514_v3 = vmul.f32 %v15234_v40, %v15233_v16  ;;  %v6512_v40 = vmul.f32 %v15237_v2, %v12677_v5  ;;  %v15239_v5 = vld [vmem:[#allocation15_spill] sm:$0xff] }
 0x46b   :  { %v13439_v56 = vpop.permute.xlu1 %7313 }
 0x46c   :  { %7703 = vrot.lane.b32.xlu0 %v13434_v14, %s9880_s29  ;;  %v13453_v30 = vadd.f32 %v13218_v34, %v6514_v3 }
 0x46d   :  { %7365 = vrot.lane.b32.xlu1 %v9812_v35, %s9881_s2  ;;  %v13465_v35 = vadd.f32 %v13226_v63, %v6512_v40  ;;  %v15240_v63 = vld [vmem:[#allocation86_spill] sm:$0xff] }
 0x46e   :  { %v7648_v26 = vpop.permute.xlu0 %7647  ;;  %15236 = vst [vmem:[#allocation46_spill] sm:$0xff] %v13453_v30  ;;  %v6517_v40 = vmul.f32 %v15240_v63, %v15239_v5  ;;  %9825 = vtanh.f32 %v13453_v30  ;;  %v15242_v63 = vld [vmem:[#allocation80_spill] sm:$0xff] }
 0x46f   :  { %v13455_v48 = vpop.permute.xlu1 %7309  ;;  %7829 = vst.msk [vmem:[#allocation3 + $0x50] sm:$0xff] %vm19_vm0, %v7648_v26  ;;  %15238 = vst [vmem:[#allocation95_spill] sm:$0xff] %v13465_v35  ;;  %v9816_v26 = vpop.eup %9815  ;;  %v6515_v5 = vmul.f32 %v15242_v63, %v15140_v55  ;;  %9827 = vtanh.f32 %v13465_v35  ;;  %v15246_v63 = vld [vmem:[#allocation83_spill] sm:$0xff] }
 0x470   :  { %7699 = vrot.lane.b32.xlu0 %v13449_v4, %s9880_s29  ;;  %v9818_v8 = vpop.eup %9817 }
 0x471   :  { %7705 = vrot.lane.b32.xlu1 %v13453_v30, %s9880_s29  ;;  %v9820_v14 = vpop.eup %9819 }
 0x472   :  { %v7644_v6 = vpop.permute.xlu0 %7643 }
 0x473   :  { %v7650_v34 = vpop.permute.xlu1 %7649  ;;  %7827 = vst.msk [vmem:[#allocation3 + $0x40] sm:$0xff] %vm19_vm0, %v7644_v6  ;;  %v13482_v6 = vadd.f32 %v13224_v52, %v6517_v40  ;;  %v13497_v52 = vadd.f32 %v13236_v39, %v6515_v5  ;;  %v9822_v39 = vpop.eup %9821 }
 0x474   :  { %7830 = vst.msk [vmem:[#allocation3 + $0x58] sm:$0xff] %vm19_vm0, %v7650_v34  ;;  %7375 = vrot.lane.b32.xlu0 %v9814_v17, %s9881_s2 }
 0x475   :  { %7701 = vrot.lane.b32.xlu1 %v13465_v35, %s9880_s29  ;;  %15241 = vst [vmem:[#allocation57_spill] sm:$0xff] %v13482_v6  ;;  %15244 = vst [vmem:[#allocation97_spill] sm:$0xff] %v13497_v52  ;;  %9829 = vtanh.f32 %v13482_v6 }
 0x476   :  { %v13473_v3 = vpop.permute.xlu0 %7319  ;;  %9831 = vtanh.f32 %v13497_v52 }
 0x477   :  { %v7646_v2 = vpop.permute.xlu1 %7645 }
 0x478   :  { %7828 = vst.msk [vmem:[#allocation3 + $0x48] sm:$0xff] %vm19_vm0, %v7646_v2  ;;  %7371 = vrot.lane.b32.xlu0 %v9816_v26, %s9881_s2 }
 0x479   :  { %7377 = vrot.lane.b32.xlu1 %v9818_v8, %s9881_s2  ;;  %v15243_v8 = vld [vmem:[#allocation89_spill] sm:$0xff] }
 0x47a   :  { %v13484_v17 = vpop.permute.xlu0 %7315  ;;  %v6518_v26 = vmul.f32 %v15243_v8, %v15141_v38  ;;  %v6516_v8 = vmul.f32 %v15246_v63, %v15143_v46 }
 0x47b   :  { %v13487_v34 = vpop.permute.xlu1 %7321 }
 0x47c   :  { %7711 = vrot.lane.b32.xlu0 %v13482_v6, %s9880_s29  ;;  %v13501_v40 = vadd.f32 %v13239_v12, %v6518_v26 }
 0x47d   :  { %7373 = vrot.lane.b32.xlu1 %v9820_v14, %s9881_s2  ;;  %v13513_v14 = vadd.f32 %v13257_v20, %v6516_v8  ;;  %v15248_v20 = vld [vmem:[#allocation94_spill] sm:$0xff] }
 0x47e   :  { %v7656_v2 = vpop.permute.xlu0 %7655  ;;  %15245 = vst [vmem:[#allocation52_spill] sm:$0xff] %v13501_v40  ;;  %v6521_v8 = vmul.f32 %v15248_v20, %v15142_v36  ;;  %9833 = vtanh.f32 %v13501_v40  ;;  %v15250_v20 = vld [vmem:[#allocation90_spill] sm:$0xff] }
 0x47f   :  { %v13503_v30 = vpop.permute.xlu1 %7317  ;;  %7833 = vst.msk [vmem:[#allocation3 + $0x70] sm:$0xff] %vm19_vm0, %v7656_v2  ;;  %15247 = vst [vmem:[#allocation61_spill] sm:$0xff] %v13513_v14  ;;  %v9824_v2 = vpop.eup %9823  ;;  %v6519_v4 = vmul.f32 %v15250_v20, %v12741_v50  ;;  %9835 = vtanh.f32 %v13513_v14  ;;  %v15254_v20 = vld [vmem:[#allocation93_spill] sm:$0xff] }
 0x480   :  { %7707 = vrot.lane.b32.xlu0 %v13497_v52, %s9880_s29  ;;  %v9826_v35 = vpop.eup %9825  ;;  %v15256_v52 = vld [vmem:[#allocation20_spill] sm:$0xff] }
 0x481   :  { %7713 = vrot.lane.b32.xlu1 %v13501_v40, %s9880_s29  ;;  %v9828_v6 = vpop.eup %9827 }
 0x482   :  { %v7652_v5 = vpop.permute.xlu0 %7651 }
 0x483   :  { %v7658_v12 = vpop.permute.xlu1 %7657  ;;  %7831 = vst.msk [vmem:[#allocation3 + $0x60] sm:$0xff] %vm19_vm0, %v7652_v5  ;;  %v13530_v5 = vadd.f32 %v13251_v21, %v6521_v8  ;;  %v13545_v21 = vadd.f32 %v13265_v42, %v6519_v4  ;;  %v9830_v4 = vpop.eup %9829 }
 0x484   :  { %7834 = vst.msk [vmem:[#allocation3 + $0x78] sm:$0xff] %vm19_vm0, %v7658_v12  ;;  %7383 = vrot.lane.b32.xlu0 %v9822_v39, %s9881_s2 }
 0x485   :  { %7709 = vrot.lane.b32.xlu1 %v13513_v14, %s9880_s29  ;;  %15249 = vst [vmem:[#allocation55_spill] sm:$0xff] %v13530_v5  ;;  %15252 = vst [vmem:[#allocation67_spill] sm:$0xff] %v13545_v21  ;;  %9837 = vtanh.f32 %v13530_v5 }
 0x486   :  { %v13521_v26 = vpop.permute.xlu0 %7327  ;;  %9839 = vtanh.f32 %v13545_v21 }
 0x487   :  { %v7654_v63 = vpop.permute.xlu1 %7653 }
 0x488   :  { %7832 = vst.msk [vmem:[#allocation3 + $0x68] sm:$0xff] %vm19_vm0, %v7654_v63  ;;  %7379 = vrot.lane.b32.xlu0 %v9824_v2, %s9881_s2 }
 0x489   :  { %7385 = vrot.lane.b32.xlu1 %v9826_v35, %s9881_s2  ;;  %v15251_v35 = vld [vmem:[#allocation99_spill] sm:$0xff] }
 0x48a   :  { %v13532_v39 = vpop.permute.xlu0 %7323  ;;  %v6522_v2 = vmul.f32 %v15251_v35, %v12755_v9  ;;  %v6520_v35 = vmul.f32 %v15254_v20, %v12774_v62  ;;  %v15259_v62 = vld [vmem:[#allocation21_spill] sm:$0xff] }
 0x48b   :  { %v13535_v12 = vpop.permute.xlu1 %7329 }
 0x48c   :  { %7719 = vrot.lane.b32.xlu0 %v13530_v5, %s9880_s29  ;;  %v13549_v8 = vadd.f32 %v13270_v18, %v6522_v2 }
 0x48d   :  { %7381 = vrot.lane.b32.xlu1 %v9828_v6, %s9881_s2  ;;  %v13561_v6 = vadd.f32 %v13278_v32, %v6520_v35  ;;  %v15257_v32 = vld [vmem:[#allocation4_spill] sm:$0xff] }
 0x48e   :  { %v7664_v63 = vpop.permute.xlu0 %7663  ;;  %15253 = vst [vmem:[#allocation62_spill] sm:$0xff] %v13549_v8  ;;  %v6525_v35 = vmul.f32 %v15257_v32, %v15256_v52  ;;  %9841 = vtanh.f32 %v13549_v8  ;;  %v15260_v32 = vld [vmem:[#allocation100_spill] sm:$0xff] }
 0x48f   :  { %v13551_v40 = vpop.permute.xlu1 %7325  ;;  %7837 = vst.msk [vmem:[#allocation3 + $0x90] sm:$0xff] %vm19_vm0, %v7664_v63  ;;  %15255 = vst [vmem:[#allocation70_spill] sm:$0xff] %v13561_v6  ;;  %v9832_v63 = vpop.eup %9831  ;;  %v6523_v52 = vmul.f32 %v15260_v32, %v15259_v62  ;;  %9843 = vtanh.f32 %v13561_v6  ;;  %v15265_v32 = vld [vmem:[#allocation22_spill] sm:$0xff] }
 0x490   :  { %7715 = vrot.lane.b32.xlu0 %v13545_v21, %s9880_s29  ;;  %v9834_v14 = vpop.eup %9833  ;;  %v15271_v62 = vld [vmem:[#allocation118_spill] sm:$0xff] }
 0x491   :  { %7721 = vrot.lane.b32.xlu1 %v13549_v8, %s9880_s29  ;;  %v9836_v5 = vpop.eup %9835 }
 0x492   :  { %v7660_v42 = vpop.permute.xlu0 %7659 }
 0x493   :  { %v7666_v18 = vpop.permute.xlu1 %7665  ;;  %7835 = vst.msk [vmem:[#allocation3 + $0x80] sm:$0xff] %vm19_vm0, %v7660_v42  ;;  %v13578_v42 = vadd.f32 %v13276_v43, %v6525_v35  ;;  %v13593_v43 = vadd.f32 %v13288_v54, %v6523_v52  ;;  %v9838_v52 = vpop.eup %9837 }
 0x494   :  { %7838 = vst.msk [vmem:[#allocation3 + $0x98] sm:$0xff] %vm19_vm0, %v7666_v18  ;;  %7391 = vrot.lane.b32.xlu0 %v9830_v4, %s9881_s2 }
 0x495   :  { %7717 = vrot.lane.b32.xlu1 %v13561_v6, %s9880_s29  ;;  %15258 = vst [vmem:[#allocation66_spill] sm:$0xff] %v13578_v42  ;;  %15263 = vst [vmem:[#allocation76_spill] sm:$0xff] %v13593_v43  ;;  %9845 = vtanh.f32 %v13578_v42 }
 0x496   :  { %v13569_v2 = vpop.permute.xlu0 %7335  ;;  %9847 = vtanh.f32 %v13593_v43 }
 0x497   :  { %v7662_v20 = vpop.permute.xlu1 %7661 }
 0x498   :  { %7836 = vst.msk [vmem:[#allocation3 + $0x88] sm:$0xff] %vm19_vm0, %v7662_v20  ;;  %7387 = vrot.lane.b32.xlu0 %v9832_v63, %s9881_s2  ;;  %v15261_v63 = vld [vmem:[#allocation115_spill] sm:$0xff] }
 0x499   :  { %7393 = vrot.lane.b32.xlu1 %v9834_v14, %s9881_s2  ;;  %v15262_v14 = vld [vmem:[#allocation105_spill] sm:$0xff] }
 0x49a   :  { %v13580_v4 = vpop.permute.xlu0 %7331  ;;  %v6526_v20 = vmul.f32 %v15262_v14, %v15261_v63  ;;  %v15266_v14 = vld [vmem:[#allocation103_spill] sm:$0xff] }
 0x49b   :  { %v13583_v18 = vpop.permute.xlu1 %7337  ;;  %v6524_v63 = vmul.f32 %v15266_v14, %v15265_v32  ;;  %v15268_v32 = vld [vmem:[#allocation117_spill] sm:$0xff] }
 0x49c   :  { %7727 = vrot.lane.b32.xlu0 %v13578_v42, %s9880_s29  ;;  %v13597_v8 = vadd.f32 %v13291_v33, %v6526_v20 }
 0x49d   :  { %7389 = vrot.lane.b32.xlu1 %v9836_v5, %s9881_s2  ;;  %v13609_v5 = vadd.f32 %v13309_v19, %v6524_v63  ;;  %v15269_v19 = vld [vmem:[#allocation107_spill] sm:$0xff] }
 0x49e   :  { %v7672_v35 = vpop.permute.xlu0 %7671  ;;  %15264 = vst [vmem:[#allocation106_spill] sm:$0xff] %v13597_v8  ;;  %v6529_v63 = vmul.f32 %v15269_v19, %v15268_v32  ;;  %9849 = vtanh.f32 %v13597_v8  ;;  %v15272_v19 = vld [vmem:[#allocation8_spill] sm:$0xff] }
 0x49f   :  { %v13599_v21 = vpop.permute.xlu1 %7333  ;;  %7841 = vst.msk [vmem:[#allocation3 + $0xb0] sm:$0xff] %vm19_vm0, %v7672_v35  ;;  %15267 = vst [vmem:[#allocation72_spill] sm:$0xff] %v13609_v5  ;;  %v9840_v35 = vpop.eup %9839  ;;  %v6527_v32 = vmul.f32 %v15272_v19, %v15271_v62  ;;  %9851 = vtanh.f32 %v13609_v5  ;;  %v15277_v19 = vld [vmem:[#allocation121_spill] sm:$0xff] }
 0x4a0   :  { %7723 = vrot.lane.b32.xlu0 %v13593_v43, %s9880_s29  ;;  %v9842_v6 = vpop.eup %9841 }
 0x4a1   :  { %7729 = vrot.lane.b32.xlu1 %v13597_v8, %s9880_s29  ;;  %v9844_v42 = vpop.eup %9843 }
 0x4a2   :  { %v7668_v54 = vpop.permute.xlu0 %7667 }
 0x4a3   :  { %v7674_v33 = vpop.permute.xlu1 %7673  ;;  %7839 = vst.msk [vmem:[#allocation3 + $0xa0] sm:$0xff] %vm19_vm0, %v7668_v54  ;;  %v13626_v54 = vadd.f32 %v13303_v60, %v6529_v63  ;;  %v13641_v60 = vadd.f32 %v13317_v7, %v6527_v32 }
 0x4a4   :  { %7842 = vst.msk [vmem:[#allocation3 + $0xb8] sm:$0xff] %vm19_vm0, %v7674_v33  ;;  %7399 = vrot.lane.b32.xlu0 %v9838_v52, %s9881_s2 }
 0x4a5   :  { %7725 = vrot.lane.b32.xlu1 %v13609_v5, %s9880_s29  ;;  %15270 = vst [vmem:[#allocation108_spill] sm:$0xff] %v13626_v54  ;;  %15275 = vst [vmem:[#allocation79_spill] sm:$0xff] %v13641_v60  ;;  %9853 = vtanh.f32 %v13626_v54 }
 0x4a6   :  { %v13617_v20 = vpop.permute.xlu0 %7343  ;;  %9855 = vtanh.f32 %v13641_v60 }
 0x4a7   :  { %v7670_v14 = vpop.permute.xlu1 %7669 }
 0x4a8   :  { %7840 = vst.msk [vmem:[#allocation3 + $0xa8] sm:$0xff] %vm19_vm0, %v7670_v14  ;;  %7395 = vrot.lane.b32.xlu0 %v9840_v35, %s9881_s2  ;;  %v15273_v35 = vld [vmem:[#allocation119_spill] sm:$0xff] }
 0x4a9   :  { %7401 = vrot.lane.b32.xlu1 %v9842_v6, %s9881_s2  ;;  %v15274_v6 = vld [vmem:[#allocation110_spill] sm:$0xff] }
 0x4aa   :  { %v13628_v52 = vpop.permute.xlu0 %7339  ;;  %v6530_v14 = vmul.f32 %v15274_v6, %v15273_v35  ;;  %v15278_v6 = vld [vmem:[#allocation10_spill] sm:$0xff] }
 0x4ab   :  { %v13631_v33 = vpop.permute.xlu1 %7345  ;;  %v6528_v35 = vmul.f32 %v15278_v6, %v15277_v19  ;;  %v15280_v19 = vld [vmem:[#allocation120_spill] sm:$0xff] }
 0x4ac   :  { %7735 = vrot.lane.b32.xlu0 %v13626_v54, %s9880_s29  ;;  %v13645_v8 = vadd.f32 %v13322_v49, %v6530_v14 }
 0x4ad   :  { %7397 = vrot.lane.b32.xlu1 %v9844_v42, %s9881_s2  ;;  %v9846_v42 = vpop.eup %9845  ;;  %v13657_v32 = vadd.f32 %v13330_v0, %v6528_v35  ;;  %v15281_v0 = vld [vmem:[#allocation36_spill] sm:$0xff] }
 0x4ae   :  { %v7680_v63 = vpop.permute.xlu0 %7679  ;;  %15276 = vst [vmem:[#allocation75_spill] sm:$0xff] %v13645_v8  ;;  %v6533_v35 = vmul.f32 %v15281_v0, %v15280_v19  ;;  %9857 = vtanh.f32 %v13645_v8  ;;  %v15283_v0 = vld [vmem:[#allocation111_spill] sm:$0xff] }
 0x4af   :  { %v13647_v43 = vpop.permute.xlu1 %7341  ;;  %7845 = vst.msk [vmem:[#allocation3 + $0xd0] sm:$0xff] %vm19_vm0, %v7680_v63  ;;  %15279 = vst [vmem:[#allocation86_spill] sm:$0xff] %v13657_v32  ;;  %v9848_v63 = vpop.eup %9847  ;;  %v6531_v19 = vmul.f32 %v15283_v0, %v15147_v22  ;;  %9859 = vtanh.f32 %v13657_v32  ;;  %v15288_v0 = vld [vmem:[#allocation32_spill] sm:$0xff] }
 0x4b0   :  { %7731 = vrot.lane.b32.xlu0 %v13641_v60, %s9880_s29  ;;  %v9850_v5 = vpop.eup %9849 }
 0x4b1   :  { %7737 = vrot.lane.b32.xlu1 %v13645_v8, %s9880_s29  ;;  %v9852_v54 = vpop.eup %9851 }
 0x4b2   :  { %v7676_v7 = vpop.permute.xlu0 %7675 }
 0x4b3   :  { %v7682_v49 = vpop.permute.xlu1 %7681  ;;  %7843 = vst.msk [vmem:[#allocation3 + $0xc0] sm:$0xff] %vm19_vm0, %v7676_v7  ;;  %v13674_v7 = vadd.f32 %v13328_v53, %v6533_v35  ;;  %v13689_v53 = vadd.f32 %v13340_v44, %v6531_v19 }
 0x4b4   :  { %7846 = vst.msk [vmem:[#allocation3 + $0xd8] sm:$0xff] %vm19_vm0, %v7682_v49  ;;  %7407 = vrot.lane.b32.xlu0 %v9846_v42, %s9881_s2 }
 0x4b5   :  { %7733 = vrot.lane.b32.xlu1 %v13657_v32, %s9880_s29  ;;  %15282 = vst [vmem:[#allocation80_spill] sm:$0xff] %v13674_v7  ;;  %15286 = vst [vmem:[#allocation89_spill] sm:$0xff] %v13689_v53  ;;  %9861 = vtanh.f32 %v13674_v7 }
 0x4b6   :  { %v13665_v14 = vpop.permute.xlu0 %7351  ;;  %9863 = vtanh.f32 %v13689_v53 }
 0x4b7   :  { %v7678_v6 = vpop.permute.xlu1 %7677 }
 0x4b8   :  { %7844 = vst.msk [vmem:[#allocation3 + $0xc8] sm:$0xff] %vm19_vm0, %v7678_v6  ;;  %7403 = vrot.lane.b32.xlu0 %v9848_v63, %s9881_s2  ;;  %v15284_v63 = vld [vmem:[#allocation123_spill] sm:$0xff] }
 0x4b9   :  { %7409 = vrot.lane.b32.xlu1 %v9850_v5, %s9881_s2  ;;  %v15285_v5 = vld [vmem:[#allocation16_spill] sm:$0xff] }
 0x4ba   :  { %v13676_v42 = vpop.permute.xlu0 %7347  ;;  %v6534_v6 = vmul.f32 %v15285_v5, %v15284_v63  ;;  %v6532_v5 = vmul.f32 %v15288_v0, %v15152_v51 }
 0x4bb   :  { %v13679_v49 = vpop.permute.xlu1 %7353 }
 0x4bc   :  { %7743 = vrot.lane.b32.xlu0 %v13674_v7, %s9880_s29  ;;  %v13693_v8 = vadd.f32 %v13343_v29, %v6534_v6  ;;  %v13705_v19 = vadd.f32 %v13359_v41, %v6532_v5  ;;  %v15290_v41 = vld [vmem:[#allocation41_spill] sm:$0xff] }
 0x4bd   :  { %7405 = vrot.lane.b32.xlu1 %v9852_v54, %s9881_s2  ;;  %v9854_v54 = vpop.eup %9853  ;;  %v6537_v5 = vmul.f32 %v15290_v41, %v12880_v11  ;;  %v15292_v41 = vld [vmem:[#allocation17_spill] sm:$0xff] }
 0x4be   :  { %v7688_v35 = vpop.permute.xlu0 %7687  ;;  %15287 = vst [vmem:[#allocation83_spill] sm:$0xff] %v13693_v8  ;;  %15289 = vst [vmem:[#allocation94_spill] sm:$0xff] %v13705_v19  ;;  %9865 = vtanh.f32 %v13693_v8  ;;  %v6535_v11 = vmul.f32 %v15292_v41, %v12888_v61  ;;  %v15296_v41 = vld [vmem:[#allocation126_spill] sm:$0xff] }
 0x4bf   :  { %v13695_v60 = vpop.permute.xlu1 %7349  ;;  %7849 = vst.msk [vmem:[#allocation3 + $0xf0] sm:$0xff] %vm19_vm0, %v7688_v35  ;;  %v9856_v35 = vpop.eup %9855  ;;  %9867 = vtanh.f32 %v13705_v19 }
 0x4c0   :  { %7739 = vrot.lane.b32.xlu0 %v13689_v53, %s9880_s29  ;;  %v9858_v32 = vpop.eup %9857 }
 0x4c1   :  { %7745 = vrot.lane.b32.xlu1 %v13693_v8, %s9880_s29  ;;  %v9860_v7 = vpop.eup %9859 }
 0x4c2   :  { %v7684_v44 = vpop.permute.xlu0 %7683 }
 0x4c3   :  { %v7690_v29 = vpop.permute.xlu1 %7689  ;;  %7847 = vst.msk [vmem:[#allocation3 + $0xe0] sm:$0xff] %vm19_vm0, %v7684_v44  ;;  %v13722_v44 = vadd.f32 %v13377_v24, %v6537_v5  ;;  %v13737_v24 = vadd.f32 %v13388_v15, %v6535_v11  ;;  %v9862_v15 = vpop.eup %9861 }
 0x4c4   :  { %7850 = vst.msk [vmem:[#allocation3 + $0xf8] sm:$0xff] %vm19_vm0, %v7690_v29  ;;  %7415 = vrot.lane.b32.xlu0 %v9854_v54, %s9881_s2 }
 0x4c5   :  { %7741 = vrot.lane.b32.xlu1 %v13705_v19, %s9880_s29  ;;  %15291 = vst [vmem:[#allocation90_spill] sm:$0xff] %v13722_v44  ;;  %15294 = vst [vmem:[#allocation99_spill] sm:$0xff] %v13737_v24  ;;  %9869 = vtanh.f32 %v13722_v44 }
 0x4c6   :  { %v13713_v6 = vpop.permute.xlu0 %7359  ;;  %9871 = vtanh.f32 %v13737_v24 }
 0x4c7   :  { %v7686_v0 = vpop.permute.xlu1 %7685 }
 0x4c8   :  { %7848 = vst.msk [vmem:[#allocation3 + $0xe8] sm:$0xff] %vm19_vm0, %v7686_v0  ;;  %7411 = vrot.lane.b32.xlu0 %v9856_v35, %s9881_s2 }
 0x4c9   :  { %7417 = vrot.lane.b32.xlu1 %v9858_v32, %s9881_s2  ;;  %v15293_v32 = vld [vmem:[#allocation116_spill] sm:$0xff] }
 0x4ca   :  { %v13724_v54 = vpop.permute.xlu0 %7355  ;;  %v6538_v35 = vmul.f32 %v15293_v32, %v12892_v1  ;;  %v15297_v32 = vld [vmem:[#allocation19_spill] sm:$0xff] }
 0x4cb   :  { %v13727_v29 = vpop.permute.xlu1 %7361  ;;  %v6536_v53 = vmul.f32 %v15297_v32, %v15296_v41 }
 0x4cc   :  { %7751 = vrot.lane.b32.xlu0 %v13722_v44, %s9880_s29  ;;  %v13741_v5 = vadd.f32 %v13391_v31, %v6538_v35  ;;  %v15301_v44 = vld [vmem:[#allocation49_spill] sm:$0xff] }
 0x4cd   :  { %7413 = vrot.lane.b32.xlu1 %v9860_v7, %s9881_s2  ;;  %v13753_v7 = vadd.f32 %v13407_v45, %v6536_v53  ;;  %v15299_v45 = vld [vmem:[#allocation47_spill] sm:$0xff] }
 0x4ce   :  { %v7696_v0 = vpop.permute.xlu0 %7695  ;;  %15295 = vst [vmem:[#allocation93_spill] sm:$0xff] %v13741_v5  ;;  %v7501_v53 = vmul.f32 %v13425_v59, %v15299_v45  ;;  %9873 = vtanh.f32 %v13741_v5  ;;  %v7502_v59 = vmul.f32 %v13439_v56, %v15301_v44 }
 0x4cf   :  { %v13743_v8 = vpop.permute.xlu1 %7357  ;;  %7853 = vst.msk [vmem:[#allocation3 + $0x110] sm:$0xff] %vm19_vm0, %v7696_v0  ;;  %15298 = vst [vmem:[#allocation4_spill] sm:$0xff] %v13753_v7  ;;  %v9864_v0 = vpop.eup %9863  ;;  %9875 = vtanh.f32 %v13753_v7 }
 0x4d0   :  { %7747 = vrot.lane.b32.xlu0 %v13737_v24, %s9880_s29  ;;  %v9866_v19 = vpop.eup %9865 }
 0x4d1   :  { %7753 = vrot.lane.b32.xlu1 %v13741_v5, %s9880_s29 }
 0x4d2   :  { %v7692_v11 = vpop.permute.xlu0 %7691 }
 0x4d3   :  { %v7698_v31 = vpop.permute.xlu1 %7697  ;;  %7851 = vst.msk [vmem:[#allocation3 + $0x100] sm:$0xff] %vm19_vm0, %v7692_v11 }
 0x4d4   :  { %7854 = vst.msk [vmem:[#allocation3 + $0x118] sm:$0xff] %vm19_vm0, %v7698_v31  ;;  %7423 = vrot.lane.b32.xlu0 %v9862_v15, %s9881_s2  ;;  %v9868_v31 = vpop.eup %9867 }
 0x4d5   :  { %7749 = vrot.lane.b32.xlu1 %v13753_v7, %s9880_s29  ;;  %s9882_s29 = smov 64   ;;  %v9870_v5 = vpop.eup %9869 }
 0x4d6   :  { %v13761_v35 = vpop.permute.xlu0 %7367  ;;  %v9872_v44 = vpop.eup %9871 }
 0x4d7   :  { %v7694_v32 = vpop.permute.xlu1 %7693 }
 0x4d8   :  { %7852 = vst.msk [vmem:[#allocation3 + $0x108] sm:$0xff] %vm19_vm0, %v7694_v32  ;;  %7419 = vrot.lane.b32.xlu0 %v9864_v0, %s9881_s2  ;;  %v15300_v0 = vld [vmem:[#allocation50_spill] sm:$0xff] }
 0x4d9   :  { %7425 = vrot.lane.b32.xlu1 %v9866_v19, %s9881_s2  ;;  %v7499_v19 = vmul.f32 %v13436_v58, %v15300_v0 }
 0x4da   :  { %v13769_v11 = vpop.permute.xlu0 %7363 }
 0x4db   :  { %v13772_v15 = vpop.permute.xlu1 %7369 }
 0x4dc   :  { %7951 = vrot.lane.b32.xlu0 %v7501_v53, %s9882_s29 }
 0x4dd   :  { %7421 = vrot.lane.b32.xlu1 %v9868_v31, %s9881_s2  ;;  %v15302_v31 = vld [vmem:[#allocation53_spill] sm:$0xff] }
 0x4de   :  { %v7704_v32 = vpop.permute.xlu0 %7703  ;;  %v7500_v24 = vmul.f32 %v13455_v48, %v15302_v31  ;;  %v15303_v48 = vld [vmem:[#allocation54_spill] sm:$0xff] }
 0x4df   :  { %v13781_v45 = vpop.permute.xlu1 %7365  ;;  %7857 = vst.msk [vmem:[#allocation3 + $0x130] sm:$0xff] %vm19_vm0, %v7704_v32  ;;  %v7505_v32 = vmul.f32 %v13473_v3, %v15303_v48  ;;  %v15306_v3 = vld [vmem:[#allocation60_spill] sm:$0xff] }
 0x4e0   :  { %7947 = vrot.lane.b32.xlu0 %v7499_v19, %s9882_s29  ;;  %v9874_v19 = vpop.eup %9873  ;;  %v7509_v48 = vmul.f32 %v13521_v26, %v15306_v3 }
 0x4e1   :  { %7953 = vrot.lane.b32.xlu1 %v7502_v59, %s9882_s29 }
 0x4e2   :  { %v7700_v53 = vpop.permute.xlu0 %7699 }
 0x4e3   :  { %v7706_v58 = vpop.permute.xlu1 %7705  ;;  %7855 = vst.msk [vmem:[#allocation3 + $0x120] sm:$0xff] %vm19_vm0, %v7700_v53 }
 0x4e4   :  { %7858 = vst.msk [vmem:[#allocation3 + $0x138] sm:$0xff] %vm19_vm0, %v7706_v58  ;;  %7431 = vrot.lane.b32.xlu0 %v9870_v5, %s9881_s2  ;;  %v9876_v5 = vpop.eup %9875 }
 0x4e5   :  { %7949 = vrot.lane.b32.xlu1 %v7500_v24, %s9882_s29  ;;  %v15304_v24 = vld [vmem:[#allocation58_spill] sm:$0xff] }
 0x4e6   :  { %v13792_v56 = vpop.permute.xlu0 %7375  ;;  %v7503_v31 = vmul.f32 %v13484_v17, %v15304_v24 }
 0x4e7   :  { %v7702_v0 = vpop.permute.xlu1 %7701 }
 0x4e8   :  { %7856 = vst.msk [vmem:[#allocation3 + $0x128] sm:$0xff] %vm19_vm0, %v7702_v0  ;;  %7427 = vrot.lane.b32.xlu0 %v9872_v44, %s9881_s2  ;;  %v15305_v0 = vld [vmem:[#allocation56_spill] sm:$0xff] }
 0x4e9   :  { %7433 = vrot.lane.b32.xlu1 %v9874_v19, %s9881_s2  ;;  %v7506_v44 = vmul.f32 %v13487_v34, %v15305_v0  ;;  %v15308_v34 = vld [vmem:[#allocation64_spill] sm:$0xff] }
 0x4ea   :  { %v13799_v59 = vpop.permute.xlu0 %7371  ;;  %v7507_v24 = vmul.f32 %v13532_v39, %v15308_v34 }
 0x4eb   :  { %v13801_v53 = vpop.permute.xlu1 %7377 }
 0x4ec   :  { %7959 = vrot.lane.b32.xlu0 %v7505_v32, %s9882_s29 }
 0x4ed   :  { %7429 = vrot.lane.b32.xlu1 %v9876_v5, %s9881_s2  ;;  %v15307_v5 = vld [vmem:[#allocation59_spill] sm:$0xff] }
 0x4ee   :  { %v7712_v58 = vpop.permute.xlu0 %7711  ;;  %v7504_v7 = vmul.f32 %v13503_v30, %v15307_v5  ;;  %v15310_v30 = vld [vmem:[#allocation68_spill] sm:$0xff] }
 0x4ef   :  { %v13809_v19 = vpop.permute.xlu1 %7373  ;;  %7861 = vst.msk [vmem:[#allocation3 + $0x150] sm:$0xff] %vm19_vm0, %v7712_v58  ;;  %v15309_v58 = vld [vmem:[#allocation63_spill] sm:$0xff] }
 0x4f0   :  { %7955 = vrot.lane.b32.xlu0 %v7503_v31, %s9882_s29  ;;  %v7510_v26 = vmul.f32 %v13535_v12, %v15309_v58  ;;  %v15312_v12 = vld [vmem:[#allocation69_spill] sm:$0xff] }
 0x4f1   :  { %7961 = vrot.lane.b32.xlu1 %v7506_v44, %s9882_s29  ;;  %v7513_v44 = vmul.f32 %v13569_v2, %v15310_v30 }
 0x4f2   :  { %v7708_v32 = vpop.permute.xlu0 %7707 }
 0x4f3   :  { %v7714_v17 = vpop.permute.xlu1 %7713  ;;  %7859 = vst.msk [vmem:[#allocation3 + $0x140] sm:$0xff] %vm19_vm0, %v7708_v32  ;;  %v7511_v32 = vmul.f32 %v13580_v4, %v15312_v12 }
 0x4f4   :  { %7862 = vst.msk [vmem:[#allocation3 + $0x158] sm:$0xff] %vm19_vm0, %v7714_v17  ;;  %7967 = vrot.lane.b32.xlu0 %v7509_v48, %s9882_s29  ;;  %v15313_v17 = vld [vmem:[#allocation71_spill] sm:$0xff] }
 0x4f5   :  { %7957 = vrot.lane.b32.xlu1 %v7504_v7, %s9882_s29  ;;  %v15311_v7 = vld [vmem:[#allocation65_spill] sm:$0xff]  ;;  %v7514_v34 = vmul.f32 %v13583_v18, %v15313_v17 }
 0x4f6   :  { %v13824_v31 = vpop.permute.xlu0 %7383  ;;  %v7508_v39 = vmul.f32 %v13551_v40, %v15311_v7  ;;  %v15314_v40 = vld [vmem:[#allocation74_spill] sm:$0xff]  ;;  %v15316_v18 = vld [vmem:[#allocation77_spill] sm:$0xff] }
 0x4f7   :  { %v7710_v0 = vpop.permute.xlu1 %7709  ;;  %v7517_v2 = vmul.f32 %v13617_v20, %v15314_v40  ;;  %v7515_v30 = vmul.f32 %v13628_v52, %v15316_v18  ;;  %v15317_v7 = vld [vmem:[#allocation78_spill] sm:$0xff] }
 0x4f8   :  { %7860 = vst.msk [vmem:[#allocation3 + $0x148] sm:$0xff] %vm19_vm0, %v7710_v0  ;;  %7963 = vrot.lane.b32.xlu0 %v7507_v24, %s9882_s29  ;;  %v7518_v20 = vmul.f32 %v13631_v33, %v15317_v7  ;;  %v15320_v33 = vld [vmem:[#allocation84_spill] sm:$0xff] }
 0x4f9   :  { %7969 = vrot.lane.b32.xlu1 %v7510_v26, %s9882_s29  ;;  %v15315_v26 = vld [vmem:[#allocation73_spill] sm:$0xff] }
 0x4fa   :  { %v13833_v3 = vpop.permute.xlu0 %7379  ;;  %v7512_v0 = vmul.f32 %v13599_v21, %v15315_v26  ;;  %v15318_v21 = vld [vmem:[#allocation82_spill] sm:$0xff] }
 0x4fb   :  { %v13837_v48 = vpop.permute.xlu1 %7385  ;;  %v7521_v12 = vmul.f32 %v13665_v14, %v15318_v21 }
 0x4fc   :  { %7975 = vrot.lane.b32.xlu0 %v7513_v44, %s9882_s29 }
 0x4fd   :  { %7965 = vrot.lane.b32.xlu1 %v7508_v39, %s9882_s29 }
 0x4fe   :  { %v7720_v5 = vpop.permute.xlu0 %7719 }
 0x4ff   :  { %v13845_v24 = vpop.permute.xlu1 %7381  ;;  %7865 = vst.msk [vmem:[#allocation3 + $0x170] sm:$0xff] %vm19_vm0, %v7720_v5  ;;  %v15319_v5 = vld [vmem:[#allocation81_spill] sm:$0xff] }
 0x500   :  { %7971 = vrot.lane.b32.xlu0 %v7511_v32, %s9882_s29  ;;  %v7516_v52 = vmul.f32 %v13647_v43, %v15319_v5  ;;  %v15322_v43 = vld [vmem:[#allocation88_spill] sm:$0xff] }
 0x501   :  { %7977 = vrot.lane.b32.xlu1 %v7514_v34, %s9882_s29  ;;  %v7519_v34 = vmul.f32 %v13676_v42, %v15320_v33  ;;  %v7525_v14 = vmul.f32 %v13713_v6, %v15322_v43  ;;  %v7530_v33 = vmul.f32 %v13772_v15, %v15134_v28  ;;  %v7531_v28 = vmul.f32 %v13799_v59, %v15137_v13 }
 0x502   :  { %v7716_v58 = vpop.permute.xlu0 %7715  ;;  %v7538_v59 = vmul.f32 %v13837_v48, %v15233_v16 }
 0x503   :  { %v7722_v4 = vpop.permute.xlu1 %7721  ;;  %7863 = vst.msk [vmem:[#allocation3 + $0x160] sm:$0xff] %vm19_vm0, %v7716_v58 }
 0x504   :  { %7866 = vst.msk [vmem:[#allocation3 + $0x178] sm:$0xff] %vm19_vm0, %v7722_v4  ;;  %7983 = vrot.lane.b32.xlu0 %v7517_v2, %s9882_s29  ;;  %v15321_v2 = vld [vmem:[#allocation85_spill] sm:$0xff]  ;;  %v15323_v4 = vld [vmem:[#allocation87_spill] sm:$0xff] }
 0x505   :  { %7973 = vrot.lane.b32.xlu1 %v7512_v0, %s9882_s29  ;;  %v7522_v58 = vmul.f32 %v13679_v49, %v15321_v2  ;;  %v7520_v18 = vmul.f32 %v13695_v60, %v15323_v4  ;;  %v15324_v49 = vld [vmem:[#allocation91_spill] sm:$0xff]  ;;  %v7529_v60 = vmul.f32 %v13761_v35, %v15211_v37  ;;  %v7533_v37 = vmul.f32 %v13792_v56, %v15135_v27 }
 0x506   :  { %v13860_v44 = vpop.permute.xlu0 %7391  ;;  %v7528_v35 = vmul.f32 %v13781_v45, %v15136_v25  ;;  %v7534_v27 = vmul.f32 %v13801_v53, %v15138_v57  ;;  %v7537_v25 = vmul.f32 %v13824_v31, %v12627_v23  ;;  %v15327_v45 = vld [vmem:[#allocation9_spill] sm:$0xff]  ;;  %v7535_v57 = vmul.f32 %v13833_v3, %v15231_v10  ;;  %v15328_v23 = vld [vmem:[#allocation15_spill] sm:$0xff] }
 0x507   :  { %v7718_v39 = vpop.permute.xlu1 %7717  ;;  %v7532_v56 = vmul.f32 %v13809_v19, %v15327_v45  ;;  %v7541_v19 = vmul.f32 %v13860_v44, %v15328_v23  ;;  %v15343_v23 = vld [vmem:[#allocation125_spill] sm:$0xff] }
 0x508   :  { %7864 = vst.msk [vmem:[#allocation3 + $0x168] sm:$0xff] %vm19_vm0, %v7718_v39  ;;  %7979 = vrot.lane.b32.xlu0 %v7515_v30, %s9882_s29  ;;  %v7523_v30 = vmul.f32 %v13724_v54, %v15324_v49  ;;  %v7527_v54 = vmul.f32 %v13769_v11, %v15214_v47 }
 0x509   :  { %7985 = vrot.lane.b32.xlu1 %v7518_v20, %s9882_s29  ;;  %v15325_v20 = vld [vmem:[#allocation92_spill] sm:$0xff] }
 0x50a   :  { %v13869_v32 = vpop.permute.xlu0 %7387  ;;  %v7526_v6 = vmul.f32 %v13727_v29, %v15325_v20 }
 0x50b   :  { %v13873_v17 = vpop.permute.xlu1 %7393  ;;  %v7539_v10 = vmul.f32 %v13869_v32, %v15140_v55 }
 0x50c   :  { %7991 = vrot.lane.b32.xlu0 %v7521_v12, %s9882_s29  ;;  %v15326_v12 = vld [vmem:[#allocation96_spill] sm:$0xff]  ;;  %v7542_v3 = vmul.f32 %v13873_v17, %v15141_v38 }
 0x50d   :  { %7981 = vrot.lane.b32.xlu1 %v7516_v52, %s9882_s29  ;;  %v7524_v5 = vmul.f32 %v13743_v8, %v15326_v12  ;;  %v15335_v12 = vld [vmem:[#allocation22_spill] sm:$0xff] }
 0x50e   :  { %v7728_v40 = vpop.permute.xlu0 %7727 }
 0x50f   :  { %v13881_v26 = vpop.permute.xlu1 %7389  ;;  %7869 = vst.msk [vmem:[#allocation3 + $0x190] sm:$0xff] %vm19_vm0, %v7728_v40 }
 0x510   :  { %7987 = vrot.lane.b32.xlu0 %v7519_v34, %s9882_s29 }
 0x511   :  { %7993 = vrot.lane.b32.xlu1 %v7522_v58, %s9882_s29  ;;  %v15329_v58 = vld [vmem:[#allocation109_spill] sm:$0xff] }
 0x512   :  { %v7724_v0 = vpop.permute.xlu0 %7723  ;;  %v7536_v43 = vmul.f32 %v13845_v24, %v15329_v58  ;;  %v15344_v58 = vld [vmem:[#allocation104_spill] sm:$0xff] }
 0x513   :  { %v7730_v42 = vpop.permute.xlu1 %7729  ;;  %7867 = vst.msk [vmem:[#allocation3 + $0x180] sm:$0xff] %vm19_vm0, %v7724_v0  ;;  %v7540_v0 = vmul.f32 %v13881_v26, %v15143_v46  ;;  %v15331_v26 = vld [vmem:[#allocation38_spill] sm:$0xff] }
 0x514   :  { %7870 = vst.msk [vmem:[#allocation3 + $0x198] sm:$0xff] %vm19_vm0, %v7730_v42  ;;  %7999 = vrot.lane.b32.xlu0 %v7525_v14, %s9882_s29 }
 0x515   :  { %7989 = vrot.lane.b32.xlu1 %v7520_v18, %s9882_s29 }
 0x516   :  { %v7400_v7 = vpop.permute.xlu0 %7399 }
 0x517   :  { %v7726_v39 = vpop.permute.xlu1 %7725  ;;  %v7545_v24 = vmul.f32 %v7400_v7, %v15142_v36  ;;  %v15330_v36 = vld [vmem:[#allocation20_spill] sm:$0xff]  ;;  %v15333_v7 = vld [vmem:[#allocation115_spill] sm:$0xff] }
 0x518   :  { %7868 = vst.msk [vmem:[#allocation3 + $0x188] sm:$0xff] %vm19_vm0, %v7726_v39  ;;  %7995 = vrot.lane.b32.xlu0 %v7523_v30, %s9882_s29  ;;  %v15334_v39 = vld [vmem:[#allocation117_spill] sm:$0xff] }
 0x519   :  { %8001 = vrot.lane.b32.xlu1 %v7526_v6, %s9882_s29 }
 0x51a   :  { %v7396_v21 = vpop.permute.xlu0 %7395 }
 0x51b   :  { %v7402_v52 = vpop.permute.xlu1 %7401  ;;  %v7543_v38 = vmul.f32 %v7396_v21, %v12741_v50 }
 0x51c   :  { %8007 = vrot.lane.b32.xlu0 %v7529_v60, %s9882_s29  ;;  %v7546_v32 = vmul.f32 %v7402_v52, %v12755_v9  ;;  %v15332_v9 = vld [vmem:[#allocation21_spill] sm:$0xff] }
 0x51d   :  { %7997 = vrot.lane.b32.xlu1 %v7524_v5, %s9882_s29 }
 0x51e   :  { %v7736_v29 = vpop.permute.xlu0 %7735 }
 0x51f   :  { %v7398_v34 = vpop.permute.xlu1 %7397  ;;  %7873 = vst.msk [vmem:[#allocation3 + $0x1b0] sm:$0xff] %vm19_vm0, %v7736_v29 }
 0x520   :  { %8003 = vrot.lane.b32.xlu0 %v7527_v54, %s9882_s29  ;;  %v7544_v42 = vmul.f32 %v7398_v34, %v15331_v26  ;;  %v15354_v26 = vld [vmem:[#allocation27_spill] sm:$0xff] }
 0x521   :  { %8009 = vrot.lane.b32.xlu1 %v7530_v33, %s9882_s29  ;;  %v15336_v33 = vld [vmem:[#allocation119_spill] sm:$0xff] }
 0x522   :  { %v7732_v8 = vpop.permute.xlu0 %7731 }
 0x523   :  { %v7738_v40 = vpop.permute.xlu1 %7737  ;;  %7871 = vst.msk [vmem:[#allocation3 + $0x1a0] sm:$0xff] %vm19_vm0, %v7732_v8  ;;  %v15337_v8 = vld [vmem:[#allocation98_spill] sm:$0xff] }
 0x524   :  { %7874 = vst.msk [vmem:[#allocation3 + $0x1b8] sm:$0xff] %vm19_vm0, %v7738_v40  ;;  %8015 = vrot.lane.b32.xlu0 %v7533_v37, %s9882_s29 }
 0x525   :  { %8005 = vrot.lane.b32.xlu1 %v7528_v35, %s9882_s29 }
 0x526   :  { %v7408_v47 = vpop.permute.xlu0 %7407 }
 0x527   :  { %v7734_v11 = vpop.permute.xlu1 %7733  ;;  %v7549_v18 = vmul.f32 %v7408_v47, %v15330_v36 }
 0x528   :  { %7872 = vst.msk [vmem:[#allocation3 + $0x1a8] sm:$0xff] %vm19_vm0, %v7734_v11  ;;  %8011 = vrot.lane.b32.xlu0 %v7531_v28, %s9882_s29  ;;  %v15339_v28 = vld [vmem:[#allocation121_spill] sm:$0xff]  ;;  %v15340_v11 = vld [vmem:[#allocation102_spill] sm:$0xff] }
 0x529   :  { %8017 = vrot.lane.b32.xlu1 %v7534_v27, %s9882_s29 }
 0x52a   :  { %v7404_v15 = vpop.permute.xlu0 %7403 }
 0x52b   :  { %v7410_v2 = vpop.permute.xlu1 %7409  ;;  %v7547_v50 = vmul.f32 %v7404_v15, %v15332_v9  ;;  %v15355_v9 = vld [vmem:[#allocation31_spill] sm:$0xff] }
 0x52c   :  { %8023 = vrot.lane.b32.xlu0 %v7537_v25, %s9882_s29  ;;  %v7550_v20 = vmul.f32 %v7410_v2, %v15333_v7  ;;  %v15341_v25 = vld [vmem:[#allocation101_spill] sm:$0xff] }
 0x52d   :  { %8013 = vrot.lane.b32.xlu1 %v7532_v56, %s9882_s29 }
 0x52e   :  { %v7744_v13 = vpop.permute.xlu0 %7743 }
 0x52f   :  { %v7406_v53 = vpop.permute.xlu1 %7405  ;;  %7877 = vst.msk [vmem:[#allocation3 + $0x1d0] sm:$0xff] %vm19_vm0, %v7744_v13 }
 0x530   :  { %8019 = vrot.lane.b32.xlu0 %v7535_v57, %s9882_s29  ;;  %v7548_v5 = vmul.f32 %v7406_v53, %v15335_v12  ;;  %v15342_v57 = vld [vmem:[#allocation5_spill] sm:$0xff]  ;;  %v15360_v12 = vld [vmem:[#allocation14_spill] sm:$0xff] }
 0x531   :  { %8025 = vrot.lane.b32.xlu1 %v7538_v59, %s9882_s29 }
 0x532   :  { %v7740_v31 = vpop.permute.xlu0 %7739 }
 0x533   :  { %v7746_v14 = vpop.permute.xlu1 %7745  ;;  %7875 = vst.msk [vmem:[#allocation3 + $0x1c0] sm:$0xff] %vm19_vm0, %v7740_v31 }
 0x534   :  { %7878 = vst.msk [vmem:[#allocation3 + $0x1d8] sm:$0xff] %vm19_vm0, %v7746_v14  ;;  %8031 = vrot.lane.b32.xlu0 %v7541_v19, %s9882_s29  ;;  %v15345_v14 = vld [vmem:[#allocation113_spill] sm:$0xff] }
 0x535   :  { %8021 = vrot.lane.b32.xlu1 %v7536_v43, %s9882_s29 }
 0x536   :  { %v7416_v16 = vpop.permute.xlu0 %7415 }
 0x537   :  { %v7742_v48 = vpop.permute.xlu1 %7741  ;;  %v7553_v60 = vmul.f32 %v7416_v16, %v15334_v39 }
 0x538   :  { %7876 = vst.msk [vmem:[#allocation3 + $0x1c8] sm:$0xff] %vm19_vm0, %v7742_v48  ;;  %8027 = vrot.lane.b32.xlu0 %v7539_v10, %s9882_s29  ;;  %v15346_v10 = vld [vmem:[#allocation112_spill] sm:$0xff]  ;;  %v15348_v48 = vld [vmem:[#allocation33_spill] sm:$0xff] }
 0x539   :  { %8033 = vrot.lane.b32.xlu1 %v7542_v3, %s9882_s29  ;;  %v15347_v3 = vld [vmem:[#allocation114_spill] sm:$0xff] }
 0x53a   :  { %v7412_v44 = vpop.permute.xlu0 %7411 }
 0x53b   :  { %v7418_v4 = vpop.permute.xlu1 %7417  ;;  %v7551_v54 = vmul.f32 %v7412_v44, %v15271_v62  ;;  %v15338_v62 = vld [vmem:[#allocation120_spill] sm:$0xff] }
 0x53c   :  { %8039 = vrot.lane.b32.xlu0 %v7545_v24, %s9882_s29  ;;  %v7554_v34 = vmul.f32 %v7418_v4, %v15336_v33  ;;  %v15350_v4 = vld [vmem:[#allocation29_spill] sm:$0xff] }
 0x53d   :  { %8029 = vrot.lane.b32.xlu1 %v7540_v0, %s9882_s29  ;;  %v15349_v0 = vld [vmem:[#allocation122_spill] sm:$0xff] }
 0x53e   :  { %v7752_v55 = vpop.permute.xlu0 %7751 }
 0x53f   :  { %v7414_v17 = vpop.permute.xlu1 %7413  ;;  %7881 = vst.msk [vmem:[#allocation3 + $0x1f0] sm:$0xff] %vm19_vm0, %v7752_v55 }
 0x540   :  { %8035 = vrot.lane.b32.xlu0 %v7543_v38, %s9882_s29  ;;  %v7552_v47 = vmul.f32 %v7414_v17, %v15339_v28  ;;  %v15352_v17 = vld [vmem:[#allocation124_spill] sm:$0xff]  ;;  %v15366_v28 = vld [vmem:[#allocation18_spill] sm:$0xff] }
 0x541   :  { %8041 = vrot.lane.b32.xlu1 %v7546_v32, %s9882_s29  ;;  %v15351_v32 = vld [vmem:[#allocation28_spill] sm:$0xff] }
 0x542   :  { %v7748_v46 = vpop.permute.xlu0 %7747 }
 0x543   :  { %v7754_v49 = vpop.permute.xlu1 %7753  ;;  %7879 = vst.msk [vmem:[#allocation3 + $0x1e0] sm:$0xff] %vm19_vm0, %v7748_v46  ;;  %v15353_v46 = vld [vmem:[#allocation30_spill] sm:$0xff] }
 0x544   :  { %7882 = vst.msk [vmem:[#allocation3 + $0x1f8] sm:$0xff] %vm19_vm0, %v7754_v49  ;;  %8047 = vrot.lane.b32.xlu0 %v7549_v18, %s9882_s29 }
 0x545   :  { %8037 = vrot.lane.b32.xlu1 %v7544_v42, %s9882_s29 }
 0x546   :  { %v7424_v30 = vpop.permute.xlu0 %7423 }
 0x547   :  { %v7750_v6 = vpop.permute.xlu1 %7749  ;;  %v7557_v35 = vmul.f32 %v7424_v30, %v15338_v62 }
 0x548   :  { %7880 = vst.msk [vmem:[#allocation3 + $0x1e8] sm:$0xff] %vm19_vm0, %v7750_v6  ;;  %8043 = vrot.lane.b32.xlu0 %v7547_v50, %s9882_s29  ;;  %v15356_v50 = vld [vmem:[#allocation7_spill] sm:$0xff]  ;;  %v15358_v6 = vld [vmem:[#allocation6_spill] sm:$0xff] }
 0x549   :  { %8049 = vrot.lane.b32.xlu1 %v7550_v20, %s9882_s29  ;;  %v15357_v20 = vld [vmem:[#allocation11_spill] sm:$0xff] }
 0x54a   :  { %v7420_v21 = vpop.permute.xlu0 %7419 }
 0x54b   :  { %v7426_v52 = vpop.permute.xlu1 %7425  ;;  %v7555_v15 = vmul.f32 %v7420_v21, %v15147_v22  ;;  %v15359_v21 = vld [vmem:[#allocation12_spill] sm:$0xff] }
 0x54c   :  { %8055 = vrot.lane.b32.xlu0 %v7553_v60, %s9882_s29  ;;  %v7558_v56 = vmul.f32 %v7426_v52, %v15284_v63 }
 0x54d   :  { %8045 = vrot.lane.b32.xlu1 %v7548_v5, %s9882_s29 }
 0x54e   :  { %v7952_v29 = vpop.permute.xlu0 %7951 }
 0x54f   :  { %v7422_v37 = vpop.permute.xlu1 %7421  ;;  %8141 = vst.msk [vmem:[#allocation2 + $0x31] sm:$0xff] %vm19_vm0, %v7952_v29  ;;  %8208 = vst.msk [vmem:[%s14647_s3 + $0x10] sm:$0xff] %vm19_vm0, %v7952_v29  ;;  %v15362_v29 = vld [vmem:[#allocation13_spill] sm:$0xff] }
 0x550   :  { %8273 = vst.msk [vmem:[%s14647_s3 + $0x10] sm:$0xff] %vm8270_vm3, %v15337_v8  ;;  %8051 = vrot.lane.b32.xlu0 %v7551_v54, %s9882_s29  ;;  %v7556_v63 = vmul.f32 %v7422_v37, %v15152_v51  ;;  %v15361_v54 = vld [vmem:[#allocation34_spill] sm:$0xff]  ;;  %v15363_v37 = vld [vmem:[#allocation35_spill] sm:$0xff]  ;;  %v15364_v8 = vld [vmem:[#allocation37_spill] sm:$0xff] }
 0x551   :  { %8057 = vrot.lane.b32.xlu1 %v7554_v34, %s9882_s29 }
 0x552   :  { %v7948_v40 = vpop.permute.xlu0 %7947 }
 0x553   :  { %v7954_v27 = vpop.permute.xlu1 %7953  ;;  %8139 = vst.msk [vmem:[#allocation2 + $0x19] sm:$0xff] %vm19_vm0, %v7948_v40  ;;  %8206 = vst.msk [vmem:[%s14647_s3] sm:$0xff] %vm19_vm0, %v7948_v40  ;;  %v15365_v40 = vld [vmem:[#allocation39_spill] sm:$0xff] }
 0x554   :  { %8142 = vst.msk [vmem:[#allocation2 + $0x39] sm:$0xff] %vm19_vm0, %v7954_v27  ;;  %8209 = vst.msk [vmem:[%s14647_s3 + $0x18] sm:$0xff] %vm19_vm0, %v7954_v27  ;;  %8063 = vrot.lane.b32.xlu0 %v7557_v35, %s9882_s29 }
 0x555   :  { %8271 = vst.msk [vmem:[%s14647_s3] sm:$0xff] %vm8270_vm3, %v15340_v11  ;;  %8274 = vst.msk [vmem:[%s14647_s3 + $0x18] sm:$0xff] %vm8270_vm3, %v15341_v25  ;;  %8053 = vrot.lane.b32.xlu1 %v7552_v47, %s9882_s29  ;;  %v15367_v11 = vld [vmem:[#allocation40_spill] sm:$0xff]  ;;  %v15368_v25 = vld [vmem:[#allocation42_spill] sm:$0xff] }
 0x556   :  { %v7432_v45 = vpop.permute.xlu0 %7431 }
 0x557   :  { %v7950_v2 = vpop.permute.xlu1 %7949  ;;  %v7561_v19 = vmul.f32 %v7432_v45, %v15343_v23  ;;  %v15373_v23 = vld [vmem:[#allocation26_spill] sm:$0xff] }
 0x558   :  { %8140 = vst.msk [vmem:[#allocation2 + $0x21] sm:$0xff] %vm19_vm0, %v7950_v2  ;;  %8207 = vst.msk [vmem:[%s14647_s3 + $0x8] sm:$0xff] %vm19_vm0, %v7950_v2  ;;  %8059 = vrot.lane.b32.xlu0 %v7555_v15, %s9882_s29  ;;  %v15370_v2 = vld [vmem:[#allocation23_spill] sm:$0xff] }
 0x559   :  { %8272 = vst.msk [vmem:[%s14647_s3 + $0x8] sm:$0xff] %vm8270_vm3, %v15342_v57  ;;  %8065 = vrot.lane.b32.xlu1 %v7558_v56, %s9882_s29  ;;  %v15369_v56 = vld [vmem:[#allocation24_spill] sm:$0xff] }
 0x55a   :  { %v7428_v22 = vpop.permute.xlu0 %7427 }
 0x55b   :  { %v7434_v13 = vpop.permute.xlu1 %7433  ;;  %v7559_v59 = vmul.f32 %v7428_v22, %v12888_v61 }
 0x55d   :  { %8061 = vrot.lane.b32.xlu1 %v7556_v63, %s9882_s29  ;;  %8067 = vrot.lane.b32.xlu0 %v7559_v59, %s9882_s29  ;;  %v15371_v63 = vld [vmem:[#allocation25_spill] sm:$0xff] }
 0x55e   :  { %v7960_v53 = vpop.permute.xlu0 %7959 }
 0x55f   :  { %v7430_v31 = vpop.permute.xlu1 %7429  ;;  %8145 = vst.msk [vmem:[#allocation2 + $0x61] sm:$0xff] %vm19_vm0, %v7960_v53  ;;  %8212 = vst.msk [vmem:[%s14647_s3 + $0x30] sm:$0xff] %vm19_vm0, %v7960_v53 }
 0x560   :  { %v7560_v51 = vmul.f32 %v7430_v31, %v15296_v41  ;;  %8277 = vst.msk [vmem:[%s14647_s3 + $0x30] sm:$0xff] %vm8270_vm3, %v15344_v58  ;;  %v7562_v41 = vmul.f32 %v7434_v13, %v12892_v1  ;;  %v15372_v13 = vld [vmem:[#allocation44_spill] sm:$0xff]  ;;  %v15375_v58 = vld [vmem:[#allocation45_spill] sm:$0xff] }
 0x561   :  { %8071 = vrot.lane.b32.xlu0 %v7561_v19, %s9882_s29  ;;  %v15374_v19 = vld [vmem:[#allocation43_spill] sm:$0xff] }
 0x562   :  { %8069 = vrot.lane.b32.xlu1 %v7560_v51, %s9882_s29  ;;  %v7956_v61 = vpop.permute.xlu0 %7955 }
 0x563   :  { %v7962_v43 = vpop.permute.xlu1 %7961  ;;  %8143 = vst.msk [vmem:[#allocation2 + $0x49] sm:$0xff] %vm19_vm0, %v7956_v61  ;;  %8210 = vst.msk [vmem:[%s14647_s3 + $0x20] sm:$0xff] %vm19_vm0, %v7956_v61  ;;  %v15376_v61 = vld [vmem:[#allocation48_spill] sm:$0xff] }
 0x564   :  { %8146 = vst.msk [vmem:[#allocation2 + $0x69] sm:$0xff] %vm19_vm0, %v7962_v43  ;;  %8213 = vst.msk [vmem:[%s14647_s3 + $0x38] sm:$0xff] %vm19_vm0, %v7962_v43 }
 0x565   :  { %8275 = vst.msk [vmem:[%s14647_s3 + $0x20] sm:$0xff] %vm8270_vm3, %v15345_v14  ;;  %8278 = vst.msk [vmem:[%s14647_s3 + $0x38] sm:$0xff] %vm8270_vm3, %v15346_v10  ;;  %v15377_v14 = vld [vmem:[#allocation51_spill] sm:$0xff]  ;;  %v15378_v10 = vld [vmem:[#allocation46_spill] sm:$0xff] }
 0x566   :  { %8073 = vrot.lane.b32.xlu1 %v7562_v41, %s9882_s29  ;;  %v7968_v1 = vpop.permute.xlu0 %7967 }
 0x567   :  { %v7958_v16 = vpop.permute.xlu1 %7957  ;;  %8149 = vst.msk [vmem:[#allocation2 + $0x91] sm:$0xff] %vm19_vm0, %v7968_v1  ;;  %8216 = vst.msk [vmem:[%s14647_s3 + $0x50] sm:$0xff] %vm19_vm0, %v7968_v1 }
 0x568   :  { %8144 = vst.msk [vmem:[#allocation2 + $0x51] sm:$0xff] %vm19_vm0, %v7958_v16  ;;  %8211 = vst.msk [vmem:[%s14647_s3 + $0x28] sm:$0xff] %vm19_vm0, %v7958_v16 }
 0x569   :  { %8281 = vst.msk [vmem:[%s14647_s3 + $0x50] sm:$0xff] %vm8270_vm3, %v15347_v3  ;;  %8276 = vst.msk [vmem:[%s14647_s3 + $0x28] sm:$0xff] %vm8270_vm3, %v15348_v48  ;;  %v15379_v3 = vld [vmem:[#allocation57_spill] sm:$0xff]  ;;  %v15380_v48 = vld [vmem:[#allocation95_spill] sm:$0xff] }
 0x56a   :  { %v7964_v24 = vpop.permute.xlu0 %7963 }
 0x56b   :  { %v7970_v44 = vpop.permute.xlu1 %7969  ;;  %8147 = vst.msk [vmem:[#allocation2 + $0x79] sm:$0xff] %vm19_vm0, %v7964_v24  ;;  %8214 = vst.msk [vmem:[%s14647_s3 + $0x40] sm:$0xff] %vm19_vm0, %v7964_v24 }
 0x56c   :  { %8150 = vst.msk [vmem:[#allocation2 + $0x99] sm:$0xff] %vm19_vm0, %v7970_v44  ;;  %8217 = vst.msk [vmem:[%s14647_s3 + $0x58] sm:$0xff] %vm19_vm0, %v7970_v44 }
 0x56d   :  { %8279 = vst.msk [vmem:[%s14647_s3 + $0x40] sm:$0xff] %vm8270_vm3, %v15349_v0  ;;  %8282 = vst.msk [vmem:[%s14647_s3 + $0x58] sm:$0xff] %vm8270_vm3, %v15350_v4  ;;  %v15381_v0 = vld [vmem:[#allocation97_spill] sm:$0xff]  ;;  %v15382_v4 = vld [vmem:[#allocation52_spill] sm:$0xff] }
 0x56e   :  { %v7976_v38 = vpop.permute.xlu0 %7975 }
 0x56f   :  { %v7966_v55 = vpop.permute.xlu1 %7965  ;;  %8153 = vst.msk [vmem:[#allocation2 + $0xc1] sm:$0xff] %vm19_vm0, %v7976_v38  ;;  %8220 = vst.msk [vmem:[%s14647_s3 + $0x70] sm:$0xff] %vm19_vm0, %v7976_v38 }
 0x570   :  { %8148 = vst.msk [vmem:[#allocation2 + $0x81] sm:$0xff] %vm19_vm0, %v7966_v55  ;;  %8215 = vst.msk [vmem:[%s14647_s3 + $0x48] sm:$0xff] %vm19_vm0, %v7966_v55 }
 0x571   :  { %8285 = vst.msk [vmem:[%s14647_s3 + $0x70] sm:$0xff] %vm8270_vm3, %v15351_v32  ;;  %8280 = vst.msk [vmem:[%s14647_s3 + $0x48] sm:$0xff] %vm8270_vm3, %v15352_v17  ;;  %v15383_v32 = vld [vmem:[#allocation55_spill] sm:$0xff]  ;;  %v15384_v17 = vld [vmem:[#allocation61_spill] sm:$0xff] }
 0x572   :  { %v7972_v36 = vpop.permute.xlu0 %7971 }
 0x573   :  { %v7978_v18 = vpop.permute.xlu1 %7977  ;;  %8151 = vst.msk [vmem:[#allocation2 + $0xa9] sm:$0xff] %vm19_vm0, %v7972_v36  ;;  %8218 = vst.msk [vmem:[%s14647_s3 + $0x60] sm:$0xff] %vm19_vm0, %v7972_v36 }
 0x574   :  { %8154 = vst.msk [vmem:[#allocation2 + $0xc9] sm:$0xff] %vm19_vm0, %v7978_v18  ;;  %8221 = vst.msk [vmem:[%s14647_s3 + $0x78] sm:$0xff] %vm19_vm0, %v7978_v18 }
 0x575   :  { %8283 = vst.msk [vmem:[%s14647_s3 + $0x60] sm:$0xff] %vm8270_vm3, %v15353_v46  ;;  %8286 = vst.msk [vmem:[%s14647_s3 + $0x78] sm:$0xff] %vm8270_vm3, %v15354_v26  ;;  %v15385_v46 = vld [vmem:[#allocation67_spill] sm:$0xff]  ;;  %v15386_v26 = vld [vmem:[#allocation62_spill] sm:$0xff] }
 0x576   :  { %v7984_v42 = vpop.permute.xlu0 %7983 }
 0x577   :  { %v7974_v49 = vpop.permute.xlu1 %7973  ;;  %8157 = vst.msk [vmem:[#allocation2 + $0xf1] sm:$0xff] %vm19_vm0, %v7984_v42  ;;  %8224 = vst.msk [vmem:[%s14647_s3 + $0x90] sm:$0xff] %vm19_vm0, %v7984_v42 }
 0x578   :  { %8152 = vst.msk [vmem:[#allocation2 + $0xb1] sm:$0xff] %vm19_vm0, %v7974_v49  ;;  %8219 = vst.msk [vmem:[%s14647_s3 + $0x68] sm:$0xff] %vm19_vm0, %v7974_v49 }
 0x579   :  { %8289 = vst.msk [vmem:[%s14647_s3 + $0x90] sm:$0xff] %vm8270_vm3, %v15355_v9  ;;  %8284 = vst.msk [vmem:[%s14647_s3 + $0x68] sm:$0xff] %vm8270_vm3, %v15356_v50  ;;  %v15387_v9 = vld [vmem:[#allocation66_spill] sm:$0xff] }
 0x57a   :  { %v7980_v30 = vpop.permute.xlu0 %7979  ;;  %v15388_v50 = vld [vmem:[#allocation70_spill] sm:$0xff] }
 0x57b   :  { %v7986_v7 = vpop.permute.xlu1 %7985  ;;  %8155 = vst.msk [vmem:[#allocation2 + $0xd9] sm:$0xff] %vm19_vm0, %v7980_v30  ;;  %8222 = vst.msk [vmem:[%s14647_s3 + $0x80] sm:$0xff] %vm19_vm0, %v7980_v30 }
 0x57c   :  { %8158 = vst.msk [vmem:[#allocation2 + $0xf9] sm:$0xff] %vm19_vm0, %v7986_v7  ;;  %8225 = vst.msk [vmem:[%s14647_s3 + $0x98] sm:$0xff] %vm19_vm0, %v7986_v7 }
 0x57d   :  { %8287 = vst.msk [vmem:[%s14647_s3 + $0x80] sm:$0xff] %vm8270_vm3, %v15357_v20  ;;  %8290 = vst.msk [vmem:[%s14647_s3 + $0x98] sm:$0xff] %vm8270_vm3, %v15358_v6  ;;  %v15389_v20 = vld [vmem:[#allocation76_spill] sm:$0xff]  ;;  %v15390_v6 = vld [vmem:[#allocation106_spill] sm:$0xff] }
 0x57e   :  { %v7992_v39 = vpop.permute.xlu0 %7991 }
 0x57f   :  { %v7982_v60 = vpop.permute.xlu1 %7981  ;;  %8161 = vst.msk [vmem:[#allocation2 + $0x121] sm:$0xff] %vm19_vm0, %v7992_v39  ;;  %8228 = vst.msk [vmem:[%s14647_s3 + $0xb0] sm:$0xff] %vm19_vm0, %v7992_v39 }
 0x580   :  { %8156 = vst.msk [vmem:[#allocation2 + $0xe1] sm:$0xff] %vm19_vm0, %v7982_v60  ;;  %8223 = vst.msk [vmem:[%s14647_s3 + $0x88] sm:$0xff] %vm19_vm0, %v7982_v60 }
 0x581   :  { %8293 = vst.msk [vmem:[%s14647_s3 + $0xb0] sm:$0xff] %vm8270_vm3, %v15359_v21  ;;  %8288 = vst.msk [vmem:[%s14647_s3 + $0x88] sm:$0xff] %vm8270_vm3, %v15360_v12  ;;  %v15391_v21 = vld [vmem:[#allocation108_spill] sm:$0xff] }
 0x582   :  { %v7988_v5 = vpop.permute.xlu0 %7987  ;;  %v15392_v12 = vld [vmem:[#allocation72_spill] sm:$0xff] }
 0x583   :  { %v7994_v52 = vpop.permute.xlu1 %7993  ;;  %8159 = vst.msk [vmem:[#allocation2 + $0x109] sm:$0xff] %vm19_vm0, %v7988_v5  ;;  %8226 = vst.msk [vmem:[%s14647_s3 + $0xa0] sm:$0xff] %vm19_vm0, %v7988_v5 }
 0x584   :  { %8162 = vst.msk [vmem:[#allocation2 + $0x129] sm:$0xff] %vm19_vm0, %v7994_v52  ;;  %8229 = vst.msk [vmem:[%s14647_s3 + $0xb8] sm:$0xff] %vm19_vm0, %v7994_v52 }
 0x585   :  { %8291 = vst.msk [vmem:[%s14647_s3 + $0xa0] sm:$0xff] %vm8270_vm3, %v15361_v54  ;;  %8294 = vst.msk [vmem:[%s14647_s3 + $0xb8] sm:$0xff] %vm8270_vm3, %v15362_v29  ;;  %v15393_v54 = vld [vmem:[#allocation79_spill] sm:$0xff] }
 0x586   :  { %v8000_v33 = vpop.permute.xlu0 %7999  ;;  %v15394_v29 = vld [vmem:[#allocation75_spill] sm:$0xff] }
 0x587   :  { %v7990_v34 = vpop.permute.xlu1 %7989  ;;  %8165 = vst.msk [vmem:[#allocation2 + $0x151] sm:$0xff] %vm19_vm0, %v8000_v33  ;;  %8232 = vst.msk [vmem:[%s14647_s3 + $0xd0] sm:$0xff] %vm19_vm0, %v8000_v33 }
 0x588   :  { %8160 = vst.msk [vmem:[#allocation2 + $0x111] sm:$0xff] %vm19_vm0, %v7990_v34  ;;  %8227 = vst.msk [vmem:[%s14647_s3 + $0xa8] sm:$0xff] %vm19_vm0, %v7990_v34 }
 0x589   :  { %8297 = vst.msk [vmem:[%s14647_s3 + $0xd0] sm:$0xff] %vm8270_vm3, %v15363_v37  ;;  %8292 = vst.msk [vmem:[%s14647_s3 + $0xa8] sm:$0xff] %vm8270_vm3, %v15364_v8  ;;  %v15395_v37 = vld [vmem:[#allocation80_spill] sm:$0xff]  ;;  %v15396_v8 = vld [vmem:[#allocation86_spill] sm:$0xff] }
 0x58a   :  { %v7996_v62 = vpop.permute.xlu0 %7995 }
 0x58b   :  { %v8002_v35 = vpop.permute.xlu1 %8001  ;;  %8163 = vst.msk [vmem:[#allocation2 + $0x139] sm:$0xff] %vm19_vm0, %v7996_v62  ;;  %8230 = vst.msk [vmem:[%s14647_s3 + $0xc0] sm:$0xff] %vm19_vm0, %v7996_v62 }
 0x58c   :  { %8166 = vst.msk [vmem:[#allocation2 + $0x159] sm:$0xff] %vm19_vm0, %v8002_v35  ;;  %8233 = vst.msk [vmem:[%s14647_s3 + $0xd8] sm:$0xff] %vm19_vm0, %v8002_v35 }
 0x58d   :  { %8295 = vst.msk [vmem:[%s14647_s3 + $0xc0] sm:$0xff] %vm8270_vm3, %v15365_v40  ;;  %8298 = vst.msk [vmem:[%s14647_s3 + $0xd8] sm:$0xff] %vm8270_vm3, %v15366_v28  ;;  %v15397_v40 = vld [vmem:[#allocation89_spill] sm:$0xff]  ;;  %v15398_v28 = vld [vmem:[#allocation83_spill] sm:$0xff] }
 0x58e   :  { %v8008_v47 = vpop.permute.xlu0 %8007 }
 0x58f   :  { %v7998_v27 = vpop.permute.xlu1 %7997  ;;  %8169 = vst.msk [vmem:[#allocation2 + $0x181] sm:$0xff] %vm19_vm0, %v8008_v47  ;;  %8236 = vst.msk [vmem:[%s14647_s3 + $0xf0] sm:$0xff] %vm19_vm0, %v8008_v47 }
 0x590   :  { %8164 = vst.msk [vmem:[#allocation2 + $0x141] sm:$0xff] %vm19_vm0, %v7998_v27  ;;  %8231 = vst.msk [vmem:[%s14647_s3 + $0xc8] sm:$0xff] %vm19_vm0, %v7998_v27 }
 0x591   :  { %8301 = vst.msk [vmem:[%s14647_s3 + $0xf0] sm:$0xff] %vm8270_vm3, %v15367_v11  ;;  %8296 = vst.msk [vmem:[%s14647_s3 + $0xc8] sm:$0xff] %vm8270_vm3, %v15368_v25  ;;  %v15399_v11 = vld [vmem:[#allocation94_spill] sm:$0xff]  ;;  %v15400_v25 = vld [vmem:[#allocation99_spill] sm:$0xff] }
 0x592   :  { %v8004_v15 = vpop.permute.xlu0 %8003 }
 0x593   :  { %v8010_v45 = vpop.permute.xlu1 %8009  ;;  %8167 = vst.msk [vmem:[#allocation2 + $0x169] sm:$0xff] %vm19_vm0, %v8004_v15  ;;  %8234 = vst.msk [vmem:[%s14647_s3 + $0xe0] sm:$0xff] %vm19_vm0, %v8004_v15 }
 0x594   :  { %8170 = vst.msk [vmem:[#allocation2 + $0x189] sm:$0xff] %vm19_vm0, %v8010_v45  ;;  %8237 = vst.msk [vmem:[%s14647_s3 + $0xf8] sm:$0xff] %vm19_vm0, %v8010_v45 }
 0x595   :  { %8299 = vst.msk [vmem:[%s14647_s3 + $0xe0] sm:$0xff] %vm8270_vm3, %v15369_v56  ;;  %8302 = vst.msk [vmem:[%s14647_s3 + $0xf8] sm:$0xff] %vm8270_vm3, %v15370_v2  ;;  %v15401_v56 = vld [vmem:[#allocation90_spill] sm:$0xff]  ;;  %v15402_v2 = vld [vmem:[#allocation4_spill] sm:$0xff] }
 0x596   :  { %v8016_v57 = vpop.permute.xlu0 %8015 }
 0x597   :  { %v8006_v22 = vpop.permute.xlu1 %8005  ;;  %8173 = vst.msk [vmem:[#allocation2 + $0x1e1] sm:$0xff] %vm19_vm0, %v8016_v57  ;;  %8240 = vst.msk [vmem:[%s14647_s3 + $0x110] sm:$0xff] %vm19_vm0, %v8016_v57 }
 0x598   :  { %8168 = vst.msk [vmem:[#allocation2 + $0x171] sm:$0xff] %vm19_vm0, %v8006_v22  ;;  %8235 = vst.msk [vmem:[%s14647_s3 + $0xe8] sm:$0xff] %vm19_vm0, %v8006_v22  ;;  %v15403_v22 = vld [vmem:[#allocation93_spill] sm:$0xff] }
 0x599   :  { %8305 = vst.msk [vmem:[%s14647_s3 + $0x110] sm:$0xff] %vm8270_vm3, %v15371_v63  ;;  %8300 = vst.msk [vmem:[%s14647_s3 + $0xe8] sm:$0xff] %vm8270_vm3, %v15372_v13 }
 0x59a   :  { %v8012_v59 = vpop.permute.xlu0 %8011 }
 0x59b   :  { %v8018_v53 = vpop.permute.xlu1 %8017  ;;  %8171 = vst.msk [vmem:[#allocation2 + $0x1c9] sm:$0xff] %vm19_vm0, %v8012_v59  ;;  %8238 = vst.msk [vmem:[%s14647_s3 + $0x100] sm:$0xff] %vm19_vm0, %v8012_v59 }
 0x59c   :  { %8174 = vst.msk [vmem:[#allocation2 + $0x1e9] sm:$0xff] %vm19_vm0, %v8018_v53  ;;  %8241 = vst.msk [vmem:[%s14647_s3 + $0x118] sm:$0xff] %vm19_vm0, %v8018_v53 }
 0x59d   :  { %8303 = vst.msk [vmem:[%s14647_s3 + $0x100] sm:$0xff] %vm8270_vm3, %v15373_v23  ;;  %8306 = vst.msk [vmem:[%s14647_s3 + $0x118] sm:$0xff] %vm8270_vm3, %v15374_v19 }
 0x59e   :  { %v8024_v31 = vpop.permute.xlu0 %8023 }
 0x59f   :  { %v8014_v51 = vpop.permute.xlu1 %8013  ;;  %8177 = vst.msk [vmem:[#allocation2 + $0x211] sm:$0xff] %vm19_vm0, %v8024_v31  ;;  %8244 = vst.msk [vmem:[%s14647_s3 + $0x130] sm:$0xff] %vm19_vm0, %v8024_v31 }
 0x5a0   :  { %8172 = vst.msk [vmem:[#allocation2 + $0x1d1] sm:$0xff] %vm19_vm0, %v8014_v51  ;;  %8239 = vst.msk [vmem:[%s14647_s3 + $0x108] sm:$0xff] %vm19_vm0, %v8014_v51 }
 0x5a1   :  { %8309 = vst.msk [vmem:[%s14647_s3 + $0x130] sm:$0xff] %vm8270_vm3, %v15375_v58  ;;  %8304 = vst.msk [vmem:[%s14647_s3 + $0x108] sm:$0xff] %vm8270_vm3, %v15376_v61 }
 0x5a2   :  { %v8020_v43 = vpop.permute.xlu0 %8019 }
 0x5a3   :  { %v8026_v41 = vpop.permute.xlu1 %8025  ;;  %8175 = vst.msk [vmem:[#allocation2 + $0x1f9] sm:$0xff] %vm19_vm0, %v8020_v43  ;;  %8242 = vst.msk [vmem:[%s14647_s3 + $0x120] sm:$0xff] %vm19_vm0, %v8020_v43 }
 0x5a4   :  { %8178 = vst.msk [vmem:[#allocation2 + $0x219] sm:$0xff] %vm19_vm0, %v8026_v41  ;;  %8245 = vst.msk [vmem:[%s14647_s3 + $0x138] sm:$0xff] %vm19_vm0, %v8026_v41 }
 0x5a5   :  { %8307 = vst.msk [vmem:[%s14647_s3 + $0x120] sm:$0xff] %vm8270_vm3, %v15377_v14  ;;  %8310 = vst.msk [vmem:[%s14647_s3 + $0x138] sm:$0xff] %vm8270_vm3, %v15378_v10 }
 0x5a6   :  { %v8032_v1 = vpop.permute.xlu0 %8031 }
 0x5a7   :  { %v8022_v16 = vpop.permute.xlu1 %8021  ;;  %8181 = vst.msk [vmem:[#allocation2 + $0x241] sm:$0xff] %vm19_vm0, %v8032_v1  ;;  %8248 = vst.msk [vmem:[%s14647_s3 + $0x150] sm:$0xff] %vm19_vm0, %v8032_v1 }
 0x5a8   :  { %8176 = vst.msk [vmem:[#allocation2 + $0x201] sm:$0xff] %vm19_vm0, %v8022_v16  ;;  %8243 = vst.msk [vmem:[%s14647_s3 + $0x128] sm:$0xff] %vm19_vm0, %v8022_v16 }
 0x5a9   :  { %8313 = vst.msk [vmem:[%s14647_s3 + $0x150] sm:$0xff] %vm8270_vm3, %v15379_v3  ;;  %8308 = vst.msk [vmem:[%s14647_s3 + $0x128] sm:$0xff] %vm8270_vm3, %v15380_v48 }
 0x5aa   :  { %v8028_v24 = vpop.permute.xlu0 %8027 }
 0x5ab   :  { %v8034_v44 = vpop.permute.xlu1 %8033  ;;  %8179 = vst.msk [vmem:[#allocation2 + $0x229] sm:$0xff] %vm19_vm0, %v8028_v24  ;;  %8246 = vst.msk [vmem:[%s14647_s3 + $0x140] sm:$0xff] %vm19_vm0, %v8028_v24 }
 0x5ac   :  { %8182 = vst.msk [vmem:[#allocation2 + $0x249] sm:$0xff] %vm19_vm0, %v8034_v44  ;;  %8249 = vst.msk [vmem:[%s14647_s3 + $0x158] sm:$0xff] %vm19_vm0, %v8034_v44 }
 0x5ad   :  { %8311 = vst.msk [vmem:[%s14647_s3 + $0x140] sm:$0xff] %vm8270_vm3, %v15381_v0  ;;  %8314 = vst.msk [vmem:[%s14647_s3 + $0x158] sm:$0xff] %vm8270_vm3, %v15382_v4 }
 0x5ae   :  { %v8040_v38 = vpop.permute.xlu0 %8039 }
 0x5af   :  { %v8030_v55 = vpop.permute.xlu1 %8029  ;;  %8185 = vst.msk [vmem:[#allocation2 + $0x271] sm:$0xff] %vm19_vm0, %v8040_v38  ;;  %8252 = vst.msk [vmem:[%s14647_s3 + $0x170] sm:$0xff] %vm19_vm0, %v8040_v38 }
 0x5b0   :  { %8180 = vst.msk [vmem:[#allocation2 + $0x231] sm:$0xff] %vm19_vm0, %v8030_v55  ;;  %8247 = vst.msk [vmem:[%s14647_s3 + $0x148] sm:$0xff] %vm19_vm0, %v8030_v55 }
 0x5b1   :  { %8317 = vst.msk [vmem:[%s14647_s3 + $0x170] sm:$0xff] %vm8270_vm3, %v15383_v32  ;;  %8312 = vst.msk [vmem:[%s14647_s3 + $0x148] sm:$0xff] %vm8270_vm3, %v15384_v17 }
 0x5b2   :  { %v8036_v36 = vpop.permute.xlu0 %8035 }
 0x5b3   :  { %v8042_v18 = vpop.permute.xlu1 %8041  ;;  %8183 = vst.msk [vmem:[#allocation2 + $0x259] sm:$0xff] %vm19_vm0, %v8036_v36  ;;  %8250 = vst.msk [vmem:[%s14647_s3 + $0x160] sm:$0xff] %vm19_vm0, %v8036_v36 }
 0x5b4   :  { %8186 = vst.msk [vmem:[#allocation2 + $0x279] sm:$0xff] %vm19_vm0, %v8042_v18  ;;  %8253 = vst.msk [vmem:[%s14647_s3 + $0x178] sm:$0xff] %vm19_vm0, %v8042_v18 }
 0x5b5   :  { %8315 = vst.msk [vmem:[%s14647_s3 + $0x160] sm:$0xff] %vm8270_vm3, %v15385_v46  ;;  %8318 = vst.msk [vmem:[%s14647_s3 + $0x178] sm:$0xff] %vm8270_vm3, %v15386_v26 }
 0x5b6   :  { %v8048_v42 = vpop.permute.xlu0 %8047 }
 0x5b7   :  { %v8038_v49 = vpop.permute.xlu1 %8037  ;;  %8189 = vst.msk [vmem:[#allocation2 + $0x2a1] sm:$0xff] %vm19_vm0, %v8048_v42  ;;  %8256 = vst.msk [vmem:[%s14647_s3 + $0x190] sm:$0xff] %vm19_vm0, %v8048_v42 }
 0x5b8   :  { %8184 = vst.msk [vmem:[#allocation2 + $0x261] sm:$0xff] %vm19_vm0, %v8038_v49  ;;  %8251 = vst.msk [vmem:[%s14647_s3 + $0x168] sm:$0xff] %vm19_vm0, %v8038_v49 }
 0x5b9   :  { %8321 = vst.msk [vmem:[%s14647_s3 + $0x190] sm:$0xff] %vm8270_vm3, %v15387_v9  ;;  %8316 = vst.msk [vmem:[%s14647_s3 + $0x168] sm:$0xff] %vm8270_vm3, %v15388_v50 }
 0x5ba   :  { %v8044_v30 = vpop.permute.xlu0 %8043 }
 0x5bb   :  { %v8050_v7 = vpop.permute.xlu1 %8049  ;;  %8187 = vst.msk [vmem:[#allocation2 + $0x289] sm:$0xff] %vm19_vm0, %v8044_v30  ;;  %8254 = vst.msk [vmem:[%s14647_s3 + $0x180] sm:$0xff] %vm19_vm0, %v8044_v30 }
 0x5bc   :  { %8190 = vst.msk [vmem:[#allocation2 + $0x2a9] sm:$0xff] %vm19_vm0, %v8050_v7  ;;  %8257 = vst.msk [vmem:[%s14647_s3 + $0x198] sm:$0xff] %vm19_vm0, %v8050_v7 }
 0x5bd   :  { %8319 = vst.msk [vmem:[%s14647_s3 + $0x180] sm:$0xff] %vm8270_vm3, %v15389_v20  ;;  %8322 = vst.msk [vmem:[%s14647_s3 + $0x198] sm:$0xff] %vm8270_vm3, %v15390_v6 }
 0x5be   :  { %v8056_v39 = vpop.permute.xlu0 %8055 }
 0x5bf   :  { %v8046_v60 = vpop.permute.xlu1 %8045  ;;  %8193 = vst.msk [vmem:[#allocation2 + $0x2d1] sm:$0xff] %vm19_vm0, %v8056_v39  ;;  %8260 = vst.msk [vmem:[%s14647_s3 + $0x1b0] sm:$0xff] %vm19_vm0, %v8056_v39 }
 0x5c0   :  { %8188 = vst.msk [vmem:[#allocation2 + $0x291] sm:$0xff] %vm19_vm0, %v8046_v60  ;;  %8255 = vst.msk [vmem:[%s14647_s3 + $0x188] sm:$0xff] %vm19_vm0, %v8046_v60 }
 0x5c1   :  { %8325 = vst.msk [vmem:[%s14647_s3 + $0x1b0] sm:$0xff] %vm8270_vm3, %v15391_v21  ;;  %8320 = vst.msk [vmem:[%s14647_s3 + $0x188] sm:$0xff] %vm8270_vm3, %v15392_v12 }
 0x5c2   :  { %v8052_v5 = vpop.permute.xlu0 %8051 }
 0x5c3   :  { %v8058_v52 = vpop.permute.xlu1 %8057  ;;  %8191 = vst.msk [vmem:[#allocation2 + $0x2b9] sm:$0xff] %vm19_vm0, %v8052_v5  ;;  %8258 = vst.msk [vmem:[%s14647_s3 + $0x1a0] sm:$0xff] %vm19_vm0, %v8052_v5 }
 0x5c4   :  { %8194 = vst.msk [vmem:[#allocation2 + $0x2d9] sm:$0xff] %vm19_vm0, %v8058_v52  ;;  %8261 = vst.msk [vmem:[%s14647_s3 + $0x1b8] sm:$0xff] %vm19_vm0, %v8058_v52 }
 0x5c5   :  { %8323 = vst.msk [vmem:[%s14647_s3 + $0x1a0] sm:$0xff] %vm8270_vm3, %v15393_v54  ;;  %8326 = vst.msk [vmem:[%s14647_s3 + $0x1b8] sm:$0xff] %vm8270_vm3, %v15394_v29 }
 0x5c6   :  { %v8064_v33 = vpop.permute.xlu0 %8063 }
 0x5c7   :  { %v8054_v34 = vpop.permute.xlu1 %8053  ;;  %8197 = vst.msk [vmem:[#allocation2 + $0x301] sm:$0xff] %vm19_vm0, %v8064_v33  ;;  %8264 = vst.msk [vmem:[%s14647_s3 + $0x1d0] sm:$0xff] %vm19_vm0, %v8064_v33 }
 0x5c8   :  { %8192 = vst.msk [vmem:[#allocation2 + $0x2c1] sm:$0xff] %vm19_vm0, %v8054_v34  ;;  %8259 = vst.msk [vmem:[%s14647_s3 + $0x1a8] sm:$0xff] %vm19_vm0, %v8054_v34 }
 0x5c9   :  { %8329 = vst.msk [vmem:[%s14647_s3 + $0x1d0] sm:$0xff] %vm8270_vm3, %v15395_v37  ;;  %8324 = vst.msk [vmem:[%s14647_s3 + $0x1a8] sm:$0xff] %vm8270_vm3, %v15396_v8 }
 0x5ca   :  { %v8060_v62 = vpop.permute.xlu0 %8059 }
 0x5cb   :  { %v8066_v35 = vpop.permute.xlu1 %8065  ;;  %8195 = vst.msk [vmem:[#allocation2 + $0x2e9] sm:$0xff] %vm19_vm0, %v8060_v62  ;;  %8262 = vst.msk [vmem:[%s14647_s3 + $0x1c0] sm:$0xff] %vm19_vm0, %v8060_v62 }
 0x5cc   :  { %8198 = vst.msk [vmem:[#allocation2 + $0x309] sm:$0xff] %vm19_vm0, %v8066_v35  ;;  %8265 = vst.msk [vmem:[%s14647_s3 + $0x1d8] sm:$0xff] %vm19_vm0, %v8066_v35 }
 0x5cd   :  { %8327 = vst.msk [vmem:[%s14647_s3 + $0x1c0] sm:$0xff] %vm8270_vm3, %v15397_v40  ;;  %8330 = vst.msk [vmem:[%s14647_s3 + $0x1d8] sm:$0xff] %vm8270_vm3, %v15398_v28 }
 0x5cf   :  { %v8062_v47 = vpop.permute.xlu1 %8061  ;;  %v8068_v27 = vpop.permute.xlu0 %8067 }
 0x5d0   :  { %8196 = vst.msk [vmem:[#allocation2 + $0x2f1] sm:$0xff] %vm19_vm0, %v8062_v47  ;;  %8263 = vst.msk [vmem:[%s14647_s3 + $0x1c8] sm:$0xff] %vm19_vm0, %v8062_v47 }
 0x5d1   :  { %8199 = vst.msk [vmem:[#allocation2 + $0x319] sm:$0xff] %vm19_vm0, %v8068_v27  ;;  %8266 = vst.msk [vmem:[%s14647_s3 + $0x1e0] sm:$0xff] %vm19_vm0, %v8068_v27 }
 0x5d2   :  { %8328 = vst.msk [vmem:[%s14647_s3 + $0x1c8] sm:$0xff] %vm8270_vm3, %v15399_v11  ;;  %8331 = vst.msk [vmem:[%s14647_s3 + $0x1e0] sm:$0xff] %vm8270_vm3, %v15400_v25 }
 0x5d3   :  { %v8072_v15 = vpop.permute.xlu0 %8071 }
 0x5d4   :  { %v8070_v45 = vpop.permute.xlu1 %8069  ;;  %8201 = vst.msk [vmem:[#allocation2 + $0x331] sm:$0xff] %vm19_vm0, %v8072_v15  ;;  %8268 = vst.msk [vmem:[%s14647_s3 + $0x1f0] sm:$0xff] %vm19_vm0, %v8072_v15 }
 0x5d5   :  { %8200 = vst.msk [vmem:[#allocation2 + $0x321] sm:$0xff] %vm19_vm0, %v8070_v45  ;;  %8267 = vst.msk [vmem:[%s14647_s3 + $0x1e8] sm:$0xff] %vm19_vm0, %v8070_v45 }
 0x5d6   :  { %8333 = vst.msk [vmem:[%s14647_s3 + $0x1f0] sm:$0xff] %vm8270_vm3, %v15401_v56  ;;  %8332 = vst.msk [vmem:[%s14647_s3 + $0x1e8] sm:$0xff] %vm8270_vm3, %v15402_v2 }
 0x5d8   :  { %v8074_v57 = vpop.permute.xlu1 %8073 }
 0x5d9   :  { %8202 = vst.msk [vmem:[#allocation2 + $0x339] sm:$0xff] %vm19_vm0, %v8074_v57  ;;  %8269 = vst.msk [vmem:[%s14647_s3 + $0x1f8] sm:$0xff] %vm19_vm0, %v8074_v57 }
 0x5da   :  { %8334 = vst.msk [vmem:[%s14647_s3 + $0x1f8] sm:$0xff] %vm8270_vm3, %v15403_v22 }

</bundles_post_ra>
